<compile_context>
chip_gen: v6e
topology: v6e:2x2x1
jax: 0.10.0
libtpu: 0.0.40
codegen_flags: <defaults>
</compile_context>

<pallas_src>
import functools
import numpy as np
import jax
import jax.numpy as jnp
from jax import lax
from jax.experimental import pallas as pl
from jax.experimental.pallas import tpu as pltpu

# ----------------------------- configuration ---------------------------------
NODE_FEAT_IN = 8        # raw node feature dim
EDGE_FEAT_IN = 4        # raw edge feature dim
D = 16                  # node_state_dim == av.filters_3
E_ENC = 8               # encoded edge feature dim
T_DIM = 16              # av.transform_dim
MSG_H = 2 * D           # message net hidden/output dim (GMN convention)
N_PROP = 3              # n_prop_layers
N_TIME = 2              # early_interaction n_time_updates
MAX_SET_SIZE = 16       # max(MAX_QUERY_SUBGRAPH_SIZE, MAX_CORPUS_SUBGRAPH_SIZE)
SINK_TEMP = 0.1
SINK_ITERS = 10
D_STORE = D * (N_PROP + 1)
# time_update_idx == 'k_t' is hardwired below (lo = D * (prop_idx - 1)).

N_OPERANDS = 11
WEIGHT_KEYS = (
    "enc_nw", "enc_nb", "enc_ew", "enc_eb",
    "comb_w1_n", "comb_w1_i", "comb_b1", "comb_w2", "comb_b2",
    "msg_w1_f", "msg_w1_t", "msg_w1_e", "msg_b1", "msg_w2", "msg_b2",
    "node_w1_a", "node_w1_c", "node_b1", "node_w2", "node_b2",
    "t1_w", "t1_b", "t2_w", "t2_b",
)

_HIGHEST = jax.lax.Precision.HIGHEST


def _logsumexp(x, axis):
    m = jnp.max(x, axis=axis, keepdims=True)
    return m + jnp.log(jnp.sum(jnp.exp(x - m), axis=axis, keepdims=True))


def _block_diag(a, b):
    za = jnp.zeros((a.shape[0], b.shape[1]), a.dtype)
    zb = jnp.zeros((b.shape[0], a.shape[1]), b.dtype)
    return jnp.concatenate([jnp.concatenate([a, za], axis=1),
                            jnp.concatenate([zb, b], axis=1)], axis=0)


# ----------------------------- host-side weight restructuring -----------------
def _prepare_mxu_weights(params, mm_dtype):
    """Split/fuse the nn.Linear weights on the host:
       * concat-consuming layers split per input block (no lane concats in-kernel),
       * forward+reverse message nets fused (permuted rows + block-diag layer 2),
       * matrices stored in the MXU operand dtype, biases kept f32 as (1, F)."""
    f32 = jnp.float32

    def w(x):
        return jnp.asarray(x).astype(mm_dtype)

    def b(x):
        return jnp.asarray(x, f32).reshape(1, -1)

    mw1, rw1 = params["msg_w1"], params["rmsg_w1"]
    return {
        "enc_nw": w(params["enc_nw"]), "enc_nb": b(params["enc_nb"]),
        "enc_ew": w(params["enc_ew"]), "enc_eb": b(params["enc_eb"]),
        # fc_combine_interaction: [node_enc, interaction] concat removed
        "comb_w1_n": w(params["comb_w1"][:D]),
        "comb_w1_i": w(params["comb_w1"][D:]),
        "comb_b1": b(params["comb_b1"]),
        "comb_w2": w(params["comb_w2"]), "comb_b2": b(params["comb_b2"]),
        # fused fwd+rev message nets: [from, to, edge] concat removed; reverse
        # net's from/to row blocks permuted so both nets consume the same operands
        "msg_w1_f": w(jnp.concatenate([mw1[:D], rw1[D:2 * D]], axis=1)),
        "msg_w1_t": w(jnp.concatenate([mw1[D:2 * D], rw1[:D]], axis=1)),
        "msg_w1_e": w(jnp.concatenate([mw1[2 * D:], rw1[2 * D:]], axis=1)),
        "msg_b1": b(jnp.concatenate([params["msg_b1"], params["rmsg_b1"]])),
        "msg_w2": w(_block_diag(params["msg_w2"], params["rmsg_w2"])),
        "msg_b2": b(jnp.concatenate([params["msg_b2"], params["rmsg_b2"]])),
        # node-update MLP: [agg, combined] concat removed
        "node_w1_a": w(params["node_w1"][:MSG_H]),
        "node_w1_c": w(params["node_w1"][MSG_H:]),
        "node_b1": b(params["node_b1"]),
        "node_w2": w(params["node_w2"]), "node_b2": b(params["node_b2"]),
        "t1_w": w(params["t1_w"]), "t1_b": b(params["t1_b"]),
        "t2_w": w(params["t2_w"]), "t2_b": b(params["t2_b"]),
    }


# ----------------------------- shared restructured math -----------------------
def _forward_math(operands, weights, *, batch_size, mm_dtype):
    """Restructured NodeEarlyInteraction forward.  Shared verbatim between the
    Pallas kernel body (Mosaic trace, bf16 MXU operands) and the plain-JAX
    mirror / f32 reference paths."""
    (node_feat, edge_feat, from_oh, to_oh, from_oh_t, to_oh_t,
     pq, pc, pq_t, pc_t, mask) = operands
    f32 = jnp.float32
    S = MAX_SET_SIZE
    BS = batch_size * S
    prec = _HIGHEST if mm_dtype == jnp.float32 else None

    def mm(a, b):
        return jnp.dot(a.astype(mm_dtype), b.astype(mm_dtype),
                       preferred_element_type=f32, precision=prec)

    def bmm(eq, a, b):
        return jnp.einsum(eq, a.astype(mm_dtype), b.astype(mm_dtype),
                          preferred_element_type=f32, precision=prec)

    num_nodes, num_edges = node_feat.shape[0], edge_feat.shape[0]

    # bias broadcasts hoisted out of the fully-unrolled loops (no CSE of
    # broadcast_in_dim in JAX)
    comb_b1 = jnp.broadcast_to(weights["comb_b1"], (num_nodes, 2 * D))
    comb_b2 = jnp.broadcast_to(weights["comb_b2"], (num_nodes, D))
    node_b1 = jnp.broadcast_to(weights["node_b1"], (num_nodes, D))
    node_b2 = jnp.broadcast_to(weights["node_b2"], (num_nodes, D))
    msg_b2 = jnp.broadcast_to(weights["msg_b2"], (num_edges, 2 * MSG_H))
    t1_b = jnp.broadcast_to(weights["t1_b"], (2 * BS, T_DIM))
    t2_b = jnp.broadcast_to(weights["t2_b"], (2 * BS, T_DIM))

    # encoder (once)
    nodes_enc = mm(node_feat, weights["enc_nw"]) + weights["enc_nb"]     # (N, D)
    edges_enc = mm(edge_feat, weights["enc_ew"]) + weights["enc_eb"]     # (E, E_ENC)

    # edge contribution (+ bias) to the fused message hidden layer is identical
    # in every one of the N_TIME * N_PROP prop iterations -> hoisted
    msg_hidden_edge = (mm(edges_enc, weights["msg_w1_e"])
                       + jnp.broadcast_to(weights["msg_b1"],
                                          (num_edges, 2 * MSG_H)))

    node_tail = None   # node_feature_store columns D:, None == all-zero (time 0)
    scores = None
    for time_idx in range(N_TIME):
        nfe = nodes_enc
        new_blocks = []
        for prop_idx in range(1, N_PROP + 1):
            lo = D * (prop_idx - 1)           # 'k_t' time-update indexing
            # fc_combine_interaction (lane concat removed via host weight split;
            # the interaction matmul is skipped whenever that block is known-zero)
            ch = mm(nfe, weights["comb_w1_n"]) + comb_b1
            if node_tail is not None and lo > 0:
                ch = ch + mm(node_tail[:, lo - D:lo], weights["comb_w1_i"])
            combined = mm(jnp.maximum(ch, 0.0), weights["comb_w2"]) + comb_b2

            # GraphPropLayer: gathers / segment-sums as one-hot matmuls,
            # fwd+rev message nets fused into one (E, 2*MSG_H) MLP
            from_states = mm(from_oh, combined)
            to_states = mm(to_oh, combined)
            mh = (msg_hidden_edge + mm(from_states, weights["msg_w1_f"])
                  + mm(to_states, weights["msg_w1_t"]))
            mo = mm(jnp.maximum(mh, 0.0), weights["msg_w2"]) + msg_b2
            agg = mm(to_oh_t, mo[:, :MSG_H]) + mm(from_oh_t, mo[:, MSG_H:])

            uh = (mm(agg, weights["node_w1_a"])
                  + mm(combined, weights["node_w1_c"]) + node_b1)
            upd = mm(jnp.maximum(uh, 0.0), weights["node_w2"]) + node_b2
            nfe = combined + upd              # residual node update
            new_blocks.append(nfe)

        tail_nodes = jnp.concatenate(new_blocks, axis=1)       # (N, N_PROP*D)

        # pad + stack into (pair, slot) layout via one-hot scatter matmuls (MXU)
        q_tail = mm(pq, tail_nodes)                            # (B*S, N_PROP*D)
        c_tail = mm(pc, tail_nodes)
        q_final = mm(pq, nfe)                                  # (B*S, D)
        c_final = mm(pc, nfe)

        # fc_transform1 -> ReLU -> fc_transform2 over query+corpus of all pairs
        finals = jnp.concatenate([q_final, c_final], axis=0)   # sublane concat
        tr = jnp.maximum(mm(finals, weights["t1_w"]) + t1_b, 0.0)
        tr = (mm(tr, weights["t2_w"]) + t2_b) * mask
        mq = tr[:BS].reshape(batch_size, S, T_DIM)
        mc = tr[BS:].reshape(batch_size, S, T_DIM)

        # batched similarity + log-domain Sinkhorn (f32 VPU/EUP math; temp scale
        # hoisted out of the iteration loop).  The 20 logsumexp chains are the
        # dominant serial segment; lane-packing pairs only pays off at larger B.
        sim = bmm("bqt,bkt->bqk", mq, mc)
        log_alpha = sim * (1.0 / SINK_TEMP)
        for _ in range(SINK_ITERS):           # serial dependency; unrolled
            log_alpha = log_alpha - _logsumexp(log_alpha, axis=-1)
            log_alpha = log_alpha - _logsumexp(log_alpha, axis=-2)
        transport = jnp.exp(log_alpha)                          # (B, S, S)

        if time_idx < N_TIME - 1:
            # interaction features for the next time step
            q_tail_r = q_tail.reshape(batch_size, S, N_PROP * D)
            c_tail_r = c_tail.reshape(batch_size, S, N_PROP * D)
            qfc = bmm("bqk,bkd->bqd", transport, c_tail_r)      # query <- corpus
            cfq_rows = []
            for b in range(batch_size):
                # transport^T @ q_tail with the transpose folded into MXU staging
                cfq_rows.append(lax.dot_general(
                    transport[b].astype(mm_dtype), q_tail_r[b].astype(mm_dtype),
                    (((0,), (0,)), ((), ())),
                    preferred_element_type=f32, precision=prec))
            node_tail = (mm(pq_t, qfc.reshape(BS, N_PROP * D))
                         + mm(pc_t, jnp.concatenate(cfq_rows, axis=0)))
        else:
            # score term, reduced to per-pair scalars in-kernel (no masked
            # (B,S,16) stores, no trailing XLA reduce)
            q_final_r = q_final.reshape(batch_size, S, D)
            c_final_r = c_final.reshape(batch_size, S, D)
            tc = bmm("bqk,bkd->bqd", transport, c_final_r)
            relu_diff = jnp.maximum(q_final_r - tc, 0.0)
            scores = -jnp.sum(jnp.sum(relu_diff, axis=2), axis=1, keepdims=True)
    return scores                                               # (B, 1)


# ----------------------------- fused Pallas kernel ----------------------------
def _fused_forward_kernel(*refs, batch_size):
    """Entire NodeEarlyInteraction forward for one batch, resident in VMEM."""
    scores_ref = refs[-1]
    operands = tuple(r[...] for r in refs[:N_OPERANDS])
    weights = {k: refs[N_OPERANDS + i][...] for i, k in enumerate(WEIGHT_KEYS)}
    scores_ref[...] = _forward_math(operands, weights, batch_size=batch_size,
                                    mm_dtype=jnp.bfloat16)


@functools.lru_cache(maxsize=None)
def _build_device_fn(batch_size):
    n_inputs = N_OPERANDS + len(WEIGHT_KEYS)
    kernel = functools.partial(_fused_forward_kernel, batch_size=batch_size)

    @jax.jit
    def run(params, *operands):
        weights = _prepare_mxu_weights(params, jnp.bfloat16)
        vmem = pl.BlockSpec(memory_space=pltpu.MemorySpace.VMEM)
        scores = pl.pallas_call(
            kernel,
            out_shape=jax.ShapeDtypeStruct((batch_size, 1), jnp.float32),
            in_specs=[vmem] * n_inputs,
            out_specs=vmem,
        )(*operands, *(weights[k] for k in WEIGHT_KEYS))
        return scores[:, 0]

    return run


# ----------------------------- host-side layout helpers -----------------------
def _row_one_hot(idx, n):
    idx = np.asarray(idx, dtype=np.int64)
    oh = np.zeros((idx.shape[0], n), dtype=np.float32)
    oh[np.arange(idx.shape[0]), idx] = 1.0
    return oh


@functools.lru_cache(maxsize=None)
def _cached_pair_layout(sizes_key, num_nodes):
    """One-hot pad/stack matrices + transform mask, cached per batch signature.
    One-hots are exact in bf16 (MXU operand dtype, half the VMEM/DMA)."""
    sizes_flat = [s for pair in sizes_key for s in pair]
    B, S = len(sizes_key), MAX_SET_SIZE
    pq = np.zeros((B * S, num_nodes), np.float32)
    pc = np.zeros((B * S, num_nodes), np.float32)
    offset = 0
    for g, sz in enumerate(sizes_flat):
        pair, is_corpus = divmod(g, 2)
        tgt = pc if is_corpus else pq
        tgt[pair * S + np.arange(sz), offset + np.arange(sz)] = 1.0
        offset += sz
    mask = np.zeros((2 * B * S, T_DIM), np.float32)
    for pair, (qs, cs) in enumerate(sizes_key):
        mask[pair * S: pair * S + qs, :] = 1.0
        mask[B * S + pair * S: B * S + pair * S + cs, :] = 1.0
    bf = jnp.bfloat16
    return (jnp.asarray(pq, bf), jnp.asarray(pc, bf),
            jnp.asarray(np.ascontiguousarray(pq.T), bf),
            jnp.asarray(np.ascontiguousarray(pc.T), bf),
            jnp.asarray(mask))


@functools.lru_cache(maxsize=None)
def _cached_edge_onehots(from_key, to_key, num_nodes):
    from_oh = _row_one_hot(from_key, num_nodes)
    to_oh = _row_one_hot(to_key, num_nodes)
    bf = jnp.bfloat16
    return (jnp.asarray(from_oh, bf), jnp.asarray(to_oh, bf),
            jnp.asarray(np.ascontiguousarray(from_oh.T), bf),
            jnp.asarray(np.ascontiguousarray(to_oh.T), bf))


def _prepare_operands(node_features, edge_features, from_idx, to_idx,
                      batch_data_sizes):
    num_nodes = int(node_features.shape[0])
    sizes_key = tuple((int(q), int(c)) for q, c in batch_data_sizes)
    pq, pc, pq_t, pc_t, mask = _cached_pair_layout(sizes_key, num_nodes)
    from_oh, to_oh, from_oh_t, to_oh_t = _cached_edge_onehots(
        tuple(int(i) for i in from_idx), tuple(int(i) for i in to_idx), num_nodes)
    return (node_features, edge_features, from_oh, to_oh, from_oh_t, to_oh_t,
            pq, pc, pq_t, pc_t, mask)


# ----------------------------- forward pass -----------------------------------
def node_early_interaction_forward(params, node_features, edge_features,
                                   from_idx, to_idx, batch_data_sizes):
    batch_size = len(batch_data_sizes)
    operands = _prepare_operands(node_features, edge_features, from_idx, to_idx,
                                 batch_data_sizes)
    # Single fused launch: grid=(), every operand is a whole-array VMEM block.
    return _build_device_fn(batch_size)(params, *operands)


# ----------------------------- parameters ------------------------------------
def init_linear(key, fan_in, fan_out):
    k1, k2 = jax.random.split(key)
    bound = 1.0 / np.sqrt(fan_in)
    w = jax.random.uniform(k1, (fan_in, fan_out), minval=-bound, maxval=bound,
                           dtype=jnp.float32)
    b = jax.random.uniform(k2, (fan_out,), minval=-bound, maxval=bound,
                           dtype=jnp.float32)
    return w, b


def init_params(key):
    keys = jax.random.split(key, 16)
    p = {}
    p["enc_nw"], p["enc_nb"] = init_linear(keys[0], NODE_FEAT_IN, D)
    p["enc_ew"], p["enc_eb"] = init_linear(keys[1], EDGE_FEAT_IN, E_ENC)
    p["comb_w1"], p["comb_b1"] = init_linear(keys[2], 2 * D, 2 * D)
    p["comb_w2"], p["comb_b2"] = init_linear(keys[3], 2 * D, D)
    p["msg_w1"], p["msg_b1"] = init_linear(keys[4], 2 * D + E_ENC, MSG_H)
    p["msg_w2"], p["msg_b2"] = init_linear(keys[5], MSG_H, MSG_H)
    p["rmsg_w1"], p["rmsg_b1"] = init_linear(keys[6], 2 * D + E_ENC, MSG_H)
    p["rmsg_w2"], p["rmsg_b2"] = init_linear(keys[7], MSG_H, MSG_H)
    p["node_w1"], p["node_b1"] = init_linear(keys[8], MSG_H + D, D)
    p["node_w2"], p["node_b2"] = init_linear(keys[9], D, D)
    p["t1_w"], p["t1_b"] = init_linear(keys[10], D, T_DIM)
    p["t2_w"], p["t2_b"] = init_linear(keys[11], T_DIM, T_DIM)
    return p


# ----------------------------- original-semantics f32 reference ---------------
def reference_forward(params, node_features, edge_features, from_idx, to_idx,
                      batch_data_sizes):
    """Direct f32 port of the PyTorch forward (index gathers, segment sums,
    concat-based MLP inputs).  HIGHEST matmul precision so it is a true f32
    ground truth."""
    sizes_flat = [int(s) for pair in batch_data_sizes for s in pair]
    B, S = len(batch_data_sizes), MAX_SET_SIZE
    N = sum(sizes_flat)

    def linear(x, w, b, relu=False):
        y = jnp.dot(x, w, precision=_HIGHEST) + b
        return jnp.maximum(y, 0.0) if relu else y

    enc_nodes = linear(node_features, params["enc_nw"], params["enc_nb"])
    enc_edges = linear(edge_features, params["enc_ew"], params["enc_eb"])

    offsets = np.concatenate([[0], np.cumsum(sizes_flat)])
    node_slot = np.zeros(N, np.int32)
    for g, sz in enumerate(sizes_flat):
        node_slot[offsets[g]:offsets[g] + sz] = g * S + np.arange(sz)
    node_slot = jnp.asarray(node_slot)

    q_sizes = np.array([p[0] for p in batch_data_sizes])
    c_sizes = np.array([p[1] for p in batch_data_sizes])
    q_mask = jnp.asarray((np.arange(S)[None, :, None]
                          < q_sizes[:, None, None]).astype(np.float32))
    c_mask = jnp.asarray((np.arange(S)[None, :, None]
                          < c_sizes[:, None, None]).astype(np.float32))

    store = jnp.zeros((N, D_STORE), jnp.float32)
    q_final = c_final = tp = None
    for _t in range(N_TIME):
        nfe = enc_nodes
        new_store = jnp.zeros_like(store)
        for p in range(1, N_PROP + 1):
            lo = D * p
            inter = store[:, lo - D:lo]                       # k_t
            comb = linear(linear(jnp.concatenate([nfe, inter], 1),
                                 params["comb_w1"], params["comb_b1"], True),
                          params["comb_w2"], params["comb_b2"])
            fs = comb[from_idx]
            ts = comb[to_idx]
            msg = linear(linear(jnp.concatenate([fs, ts, enc_edges], 1),
                                params["msg_w1"], params["msg_b1"], True),
                         params["msg_w2"], params["msg_b2"])
            rmsg = linear(linear(jnp.concatenate([ts, fs, enc_edges], 1),
                                 params["rmsg_w1"], params["rmsg_b1"], True),
                          params["rmsg_w2"], params["rmsg_b2"])
            agg = (jax.ops.segment_sum(msg, to_idx, num_segments=N)
                   + jax.ops.segment_sum(rmsg, from_idx, num_segments=N))
            upd = linear(linear(jnp.concatenate([agg, comb], 1),
                                params["node_w1"], params["node_b1"], True),
                         params["node_w2"], params["node_b2"])
            nfe = comb + upd
            new_store = new_store.at[:, lo:lo + D].set(nfe)
        store = new_store

        padded = jnp.zeros((2 * B * S, D_STORE), jnp.float32).at[node_slot].set(store)
        padded = padded.reshape(2 * B, S, D_STORE)
        q_store = padded[0::2]
        c_store = padded[1::2]
        q_final = q_store[:, :, -D:]
        c_final = c_store[:, :, -D:]

        def transf(x):
            return linear(linear(x, params["t1_w"], params["t1_b"], True),
                          params["t2_w"], params["t2_b"])

        mq = transf(q_final) * q_mask
        mc = transf(c_final) * c_mask
        sim = jnp.einsum("bqt,bkt->bqk", mq, mc, precision=_HIGHEST)
        la = sim / SINK_TEMP
        for _ in range(SINK_ITERS):
            la = la - _logsumexp(la, axis=-1)
            la = la - _logsumexp(la, axis=-2)
        tp = jnp.exp(la)

        qfc = jnp.einsum("bqk,bkd->bqd", tp, c_store, precision=_HIGHEST)
        cfq = jnp.einsum("bqk,bqd->bkd", tp, q_store, precision=_HIGHEST)
        interleaved = jnp.stack([qfc, cfq], axis=1)[:, :, :, D:].reshape(
            -1, N_PROP * D)
        store = store.at[:, D:].set(interleaved[node_slot])

    scores = -jnp.sum(
        jnp.maximum(q_final - jnp.einsum("bqk,bkd->bqd", tp, c_final,
                                         precision=_HIGHEST), 0.0),
        axis=(1, 2))
    return scores


# ----------------------------- main -------------------------------------------
if __name__ == "__main__":
    key = jax.random.PRNGKey(0)
    pkey, nkey, ekey = jax.random.split(key, 3)
    params = init_params(pkey)

    # two (query, corpus) pairs, interleaved node layout: q0, c0, q1, c1
    batch_data_sizes = [(5, 7), (6, 8)]
    sizes_flat = [s for pair in batch_data_sizes for s in pair]
    num_nodes = sum(sizes_flat)
    node_features = jax.random.normal(nkey, (num_nodes, NODE_FEAT_IN), jnp.float32)

    # ring edges within each graph (deterministic structure)
    from_list, to_list = [], []
    offset = 0
    for sz in sizes_flat:
        for i in range(sz):
            from_list.append(offset + i)
            to_list.append(offset + (i + 1) % sz)
        offset += sz
    from_idx = np.array(from_list, dtype=np.int32)
    to_idx = np.array(to_list, dtype=np.int32)
    edge_features = jax.random.normal(ekey, (from_idx.shape[0], EDGE_FEAT_IN),
                                      jnp.float32)

    B = len(batch_data_sizes)
    scores = node_early_interaction_forward(
        params, node_features, edge_features, from_idx, to_idx, batch_data_sizes)
    scores = np.asarray(jax.block_until_ready(scores))
    assert scores.shape == (B,)
    assert np.all(np.isfinite(scores))

    # -------------------------- verification ---------------------------------
    operands = _prepare_operands(node_features, edge_features, from_idx, to_idx,
                                 batch_data_sizes)

    # (1) TIGHT: Pallas/Mosaic lowering vs the identical restructured math
    #     traced by XLA (same bf16 MXU casts, same host-restructured weights).
    mirror = np.asarray(jax.jit(functools.partial(
        _forward_math, batch_size=B, mm_dtype=jnp.bfloat16))(
            operands, _prepare_mxu_weights(params, jnp.bfloat16))[:, 0])
    err_lowering = float(np.max(np.abs(scores - mirror)))
    tol_lowering = 2e-2 * (float(np.max(np.abs(mirror))) + 1.0)
    assert err_lowering <= tol_lowering, (err_lowering, tol_lowering)

    # (2) TIGHT: restructured math in pure f32 vs a direct f32 port of the
    #     PyTorch forward -> validates the weight splitting, fwd/rev message-net
    #     fusion and one-hot gather/scatter rewrites against original semantics.
    restruct32 = np.asarray(jax.jit(functools.partial(
        _forward_math, batch_size=B, mm_dtype=jnp.float32))(
            operands, _prepare_mxu_weights(params, jnp.float32))[:, 0])
    origin = np.asarray(jax.block_until_ready(reference_forward(
        params, node_features, edge_features, from_idx, to_idx,
        batch_data_sizes)))
    err_math = float(np.max(np.abs(restruct32 - origin)))
    tol_math = 5e-3 * (float(np.max(np.abs(origin))) + 1.0)
    assert err_math <= tol_math, (err_math, tol_math)

    # (3) Coarse bound on the intentional bf16-MXU rounding drift (Sinkhorn's
    #     exp(x/0.1) amplifies it, so it is not held to the tight tolerances).
    err_drift = float(np.max(np.abs(scores - origin)))
    assert np.all(np.isfinite(origin))
    assert err_drift <= 0.5 * (float(np.max(np.abs(origin))) + 1.0), err_drift

    print("KERNEL_OK")
</pallas_src>

<mosaic_0001>
module attributes {stable_mosaic.version = 11 : i64} {
  func.func @_fused_forward_kernel(%arg0: memref<26x8xf32, #tpu.memory_space<vmem>>, %arg1: memref<26x4xf32, #tpu.memory_space<vmem>>, %arg2: memref<26x26xbf16, #tpu.memory_space<vmem>>, %arg3: memref<26x26xbf16, #tpu.memory_space<vmem>>, %arg4: memref<26x26xbf16, #tpu.memory_space<vmem>>, %arg5: memref<26x26xbf16, #tpu.memory_space<vmem>>, %arg6: memref<32x26xbf16, #tpu.memory_space<vmem>>, %arg7: memref<32x26xbf16, #tpu.memory_space<vmem>>, %arg8: memref<26x32xbf16, #tpu.memory_space<vmem>>, %arg9: memref<26x32xbf16, #tpu.memory_space<vmem>>, %arg10: memref<64x16xf32, #tpu.memory_space<vmem>>, %arg11: memref<8x16xbf16, #tpu.memory_space<vmem>>, %arg12: memref<1x16xf32, #tpu.memory_space<vmem>>, %arg13: memref<4x8xbf16, #tpu.memory_space<vmem>>, %arg14: memref<1x8xf32, #tpu.memory_space<vmem>>, %arg15: memref<16x32xbf16, #tpu.memory_space<vmem>>, %arg16: memref<16x32xbf16, #tpu.memory_space<vmem>>, %arg17: memref<1x32xf32, #tpu.memory_space<vmem>>, %arg18: memref<32x16xbf16, #tpu.memory_space<vmem>>, %arg19: memref<1x16xf32, #tpu.memory_space<vmem>>, %arg20: memref<16x64xbf16, #tpu.memory_space<vmem>>, %arg21: memref<16x64xbf16, #tpu.memory_space<vmem>>, %arg22: memref<8x64xbf16, #tpu.memory_space<vmem>>, %arg23: memref<1x64xf32, #tpu.memory_space<vmem>>, %arg24: memref<64x64xbf16, #tpu.memory_space<vmem>>, %arg25: memref<1x64xf32, #tpu.memory_space<vmem>>, %arg26: memref<32x16xbf16, #tpu.memory_space<vmem>>, %arg27: memref<16x16xbf16, #tpu.memory_space<vmem>>, %arg28: memref<1x16xf32, #tpu.memory_space<vmem>>, %arg29: memref<16x16xbf16, #tpu.memory_space<vmem>>, %arg30: memref<1x16xf32, #tpu.memory_space<vmem>>, %arg31: memref<16x16xbf16, #tpu.memory_space<vmem>>, %arg32: memref<1x16xf32, #tpu.memory_space<vmem>>, %arg33: memref<16x16xbf16, #tpu.memory_space<vmem>>, %arg34: memref<1x16xf32, #tpu.memory_space<vmem>>, %arg35: memref<2x1xf32, #tpu.memory_space<vmem>>) attributes {dimension_semantics = [], scalar_prefetch = 0 : i64, scratch_operands = 0 : i64, tpu.core_type = #tpu.core_type<tc>} {
    %c0 = arith.constant 0 : index
    %c0_0 = arith.constant 0 : index
    %0 = vector.load %arg0[%c0, %c0_0] : memref<26x8xf32, #tpu.memory_space<vmem>>, vector<26x8xf32>
    %c0_1 = arith.constant 0 : index
    %c0_2 = arith.constant 0 : index
    %1 = vector.load %arg1[%c0_1, %c0_2] : memref<26x4xf32, #tpu.memory_space<vmem>>, vector<26x4xf32>
    %c0_3 = arith.constant 0 : index
    %c0_4 = arith.constant 0 : index
    %2 = vector.load %arg2[%c0_3, %c0_4] : memref<26x26xbf16, #tpu.memory_space<vmem>>, vector<26x26xbf16>
    %c0_5 = arith.constant 0 : index
    %c0_6 = arith.constant 0 : index
    %3 = vector.load %arg3[%c0_5, %c0_6] : memref<26x26xbf16, #tpu.memory_space<vmem>>, vector<26x26xbf16>
    %c0_7 = arith.constant 0 : index
    %c0_8 = arith.constant 0 : index
    %4 = vector.load %arg4[%c0_7, %c0_8] : memref<26x26xbf16, #tpu.memory_space<vmem>>, vector<26x26xbf16>
    %c0_9 = arith.constant 0 : index
    %c0_10 = arith.constant 0 : index
    %5 = vector.load %arg5[%c0_9, %c0_10] : memref<26x26xbf16, #tpu.memory_space<vmem>>, vector<26x26xbf16>
    %c0_11 = arith.constant 0 : index
    %c0_12 = arith.constant 0 : index
    %6 = vector.load %arg6[%c0_11, %c0_12] : memref<32x26xbf16, #tpu.memory_space<vmem>>, vector<32x26xbf16>
    %c0_13 = arith.constant 0 : index
    %c0_14 = arith.constant 0 : index
    %7 = vector.load %arg7[%c0_13, %c0_14] : memref<32x26xbf16, #tpu.memory_space<vmem>>, vector<32x26xbf16>
    %c0_15 = arith.constant 0 : index
    %c0_16 = arith.constant 0 : index
    %8 = vector.load %arg8[%c0_15, %c0_16] : memref<26x32xbf16, #tpu.memory_space<vmem>>, vector<26x32xbf16>
    %c0_17 = arith.constant 0 : index
    %c0_18 = arith.constant 0 : index
    %9 = vector.load %arg9[%c0_17, %c0_18] : memref<26x32xbf16, #tpu.memory_space<vmem>>, vector<26x32xbf16>
    %c0_19 = arith.constant 0 : index
    %c0_20 = arith.constant 0 : index
    %10 = vector.load %arg10[%c0_19, %c0_20] : memref<64x16xf32, #tpu.memory_space<vmem>>, vector<64x16xf32>
    %c0_21 = arith.constant 0 : index
    %c0_22 = arith.constant 0 : index
    %11 = vector.load %arg11[%c0_21, %c0_22] : memref<8x16xbf16, #tpu.memory_space<vmem>>, vector<8x16xbf16>
    %c0_23 = arith.constant 0 : index
    %c0_24 = arith.constant 0 : index
    %12 = vector.load %arg12[%c0_23, %c0_24] : memref<1x16xf32, #tpu.memory_space<vmem>>, vector<1x16xf32>
    %c0_25 = arith.constant 0 : index
    %c0_26 = arith.constant 0 : index
    %13 = vector.load %arg13[%c0_25, %c0_26] : memref<4x8xbf16, #tpu.memory_space<vmem>>, vector<4x8xbf16>
    %c0_27 = arith.constant 0 : index
    %c0_28 = arith.constant 0 : index
    %14 = vector.load %arg14[%c0_27, %c0_28] : memref<1x8xf32, #tpu.memory_space<vmem>>, vector<1x8xf32>
    %c0_29 = arith.constant 0 : index
    %c0_30 = arith.constant 0 : index
    %15 = vector.load %arg15[%c0_29, %c0_30] : memref<16x32xbf16, #tpu.memory_space<vmem>>, vector<16x32xbf16>
    %c0_31 = arith.constant 0 : index
    %c0_32 = arith.constant 0 : index
    %16 = vector.load %arg16[%c0_31, %c0_32] : memref<16x32xbf16, #tpu.memory_space<vmem>>, vector<16x32xbf16>
    %c0_33 = arith.constant 0 : index
    %c0_34 = arith.constant 0 : index
    %17 = vector.load %arg17[%c0_33, %c0_34] : memref<1x32xf32, #tpu.memory_space<vmem>>, vector<1x32xf32>
    %c0_35 = arith.constant 0 : index
    %c0_36 = arith.constant 0 : index
    %18 = vector.load %arg18[%c0_35, %c0_36] : memref<32x16xbf16, #tpu.memory_space<vmem>>, vector<32x16xbf16>
    %c0_37 = arith.constant 0 : index
    %c0_38 = arith.constant 0 : index
    %19 = vector.load %arg19[%c0_37, %c0_38] : memref<1x16xf32, #tpu.memory_space<vmem>>, vector<1x16xf32>
    %c0_39 = arith.constant 0 : index
    %c0_40 = arith.constant 0 : index
    %20 = vector.load %arg20[%c0_39, %c0_40] : memref<16x64xbf16, #tpu.memory_space<vmem>>, vector<16x64xbf16>
    %c0_41 = arith.constant 0 : index
    %c0_42 = arith.constant 0 : index
    %21 = vector.load %arg21[%c0_41, %c0_42] : memref<16x64xbf16, #tpu.memory_space<vmem>>, vector<16x64xbf16>
    %c0_43 = arith.constant 0 : index
    %c0_44 = arith.constant 0 : index
    %22 = vector.load %arg22[%c0_43, %c0_44] : memref<8x64xbf16, #tpu.memory_space<vmem>>, vector<8x64xbf16>
    %c0_45 = arith.constant 0 : index
    %c0_46 = arith.constant 0 : index
    %23 = vector.load %arg23[%c0_45, %c0_46] : memref<1x64xf32, #tpu.memory_space<vmem>>, vector<1x64xf32>
    %c0_47 = arith.constant 0 : index
    %c0_48 = arith.constant 0 : index
    %24 = vector.load %arg24[%c0_47, %c0_48] : memref<64x64xbf16, #tpu.memory_space<vmem>>, vector<64x64xbf16>
    %c0_49 = arith.constant 0 : index
    %c0_50 = arith.constant 0 : index
    %25 = vector.load %arg25[%c0_49, %c0_50] : memref<1x64xf32, #tpu.memory_space<vmem>>, vector<1x64xf32>
    %c0_51 = arith.constant 0 : index
    %c0_52 = arith.constant 0 : index
    %26 = vector.load %arg26[%c0_51, %c0_52] : memref<32x16xbf16, #tpu.memory_space<vmem>>, vector<32x16xbf16>
    %c0_53 = arith.constant 0 : index
    %c0_54 = arith.constant 0 : index
    %27 = vector.load %arg27[%c0_53, %c0_54] : memref<16x16xbf16, #tpu.memory_space<vmem>>, vector<16x16xbf16>
    %c0_55 = arith.constant 0 : index
    %c0_56 = arith.constant 0 : index
    %28 = vector.load %arg28[%c0_55, %c0_56] : memref<1x16xf32, #tpu.memory_space<vmem>>, vector<1x16xf32>
    %c0_57 = arith.constant 0 : index
    %c0_58 = arith.constant 0 : index
    %29 = vector.load %arg29[%c0_57, %c0_58] : memref<16x16xbf16, #tpu.memory_space<vmem>>, vector<16x16xbf16>
    %c0_59 = arith.constant 0 : index
    %c0_60 = arith.constant 0 : index
    %30 = vector.load %arg30[%c0_59, %c0_60] : memref<1x16xf32, #tpu.memory_space<vmem>>, vector<1x16xf32>
    %c0_61 = arith.constant 0 : index
    %c0_62 = arith.constant 0 : index
    %31 = vector.load %arg31[%c0_61, %c0_62] : memref<16x16xbf16, #tpu.memory_space<vmem>>, vector<16x16xbf16>
    %c0_63 = arith.constant 0 : index
    %c0_64 = arith.constant 0 : index
    %32 = vector.load %arg32[%c0_63, %c0_64] : memref<1x16xf32, #tpu.memory_space<vmem>>, vector<1x16xf32>
    %c0_65 = arith.constant 0 : index
    %c0_66 = arith.constant 0 : index
    %33 = vector.load %arg33[%c0_65, %c0_66] : memref<16x16xbf16, #tpu.memory_space<vmem>>, vector<16x16xbf16>
    %c0_67 = arith.constant 0 : index
    %c0_68 = arith.constant 0 : index
    %34 = vector.load %arg34[%c0_67, %c0_68] : memref<1x16xf32, #tpu.memory_space<vmem>>, vector<1x16xf32>
    %35 = vector.shape_cast %17 : vector<1x32xf32> to vector<1x32xf32>
    %36 = vector.broadcast %35 : vector<1x32xf32> to vector<26x32xf32>
    %37 = vector.shape_cast %19 : vector<1x16xf32> to vector<1x16xf32>
    %38 = vector.broadcast %37 : vector<1x16xf32> to vector<26x16xf32>
    %39 = vector.shape_cast %28 : vector<1x16xf32> to vector<1x16xf32>
    %40 = vector.broadcast %39 : vector<1x16xf32> to vector<26x16xf32>
    %41 = vector.shape_cast %30 : vector<1x16xf32> to vector<1x16xf32>
    %42 = vector.broadcast %41 : vector<1x16xf32> to vector<26x16xf32>
    %43 = vector.shape_cast %25 : vector<1x64xf32> to vector<1x64xf32>
    %44 = vector.broadcast %43 : vector<1x64xf32> to vector<26x64xf32>
    %45 = vector.shape_cast %32 : vector<1x16xf32> to vector<1x16xf32>
    %46 = vector.broadcast %45 : vector<1x16xf32> to vector<64x16xf32>
    %47 = vector.shape_cast %34 : vector<1x16xf32> to vector<1x16xf32>
    %48 = vector.broadcast %47 : vector<1x16xf32> to vector<64x16xf32>
    %49 = arith.truncf %0 : vector<26x8xf32> to vector<26x8xbf16>
    %cst = arith.constant dense<0.000000e+00> : vector<26x16xf32>
    %50 = tpu.matmul %49, %11, %cst {dimension_numbers = #tpu.dot_dimension_numbers<[1], [0], [0], [1], [0, 0, 1, 1], [], []>} : vector<26x8xbf16>, vector<8x16xbf16>, vector<26x16xf32> -> vector<26x16xf32>
    %51 = vector.broadcast %12 : vector<1x16xf32> to vector<26x16xf32>
    %52 = arith.addf %50, %51 : vector<26x16xf32>
    %53 = arith.truncf %1 : vector<26x4xf32> to vector<26x4xbf16>
    %cst_69 = arith.constant dense<0.000000e+00> : vector<26x8xf32>
    %54 = tpu.matmul %53, %13, %cst_69 {dimension_numbers = #tpu.dot_dimension_numbers<[1], [0], [0], [1], [0, 0, 1, 1], [], []>} : vector<26x4xbf16>, vector<4x8xbf16>, vector<26x8xf32> -> vector<26x8xf32>
    %55 = vector.broadcast %14 : vector<1x8xf32> to vector<26x8xf32>
    %56 = arith.addf %54, %55 : vector<26x8xf32>
    %57 = arith.truncf %56 : vector<26x8xf32> to vector<26x8xbf16>
    %cst_70 = arith.constant dense<0.000000e+00> : vector<26x64xf32>
    %58 = tpu.matmul %57, %22, %cst_70 {dimension_numbers = #tpu.dot_dimension_numbers<[1], [0], [0], [1], [0, 0, 1, 1], [], []>} : vector<26x8xbf16>, vector<8x64xbf16>, vector<26x64xf32> -> vector<26x64xf32>
    %59 = vector.shape_cast %23 : vector<1x64xf32> to vector<1x64xf32>
    %60 = vector.broadcast %59 : vector<1x64xf32> to vector<26x64xf32>
    %61 = arith.addf %58, %60 : vector<26x64xf32>
    %62 = arith.truncf %52 : vector<26x16xf32> to vector<26x16xbf16>
    %cst_71 = arith.constant dense<0.000000e+00> : vector<26x32xf32>
    %63 = tpu.matmul %62, %15, %cst_71 {dimension_numbers = #tpu.dot_dimension_numbers<[1], [0], [0], [1], [0, 0, 1, 1], [], []>} : vector<26x16xbf16>, vector<16x32xbf16>, vector<26x32xf32> -> vector<26x32xf32>
    %64 = arith.addf %63, %36 : vector<26x32xf32>
    %cst_72 = arith.constant 0.000000e+00 : f32
    %65 = vector.broadcast %cst_72 : f32 to vector<26x32xf32>
    %66 = arith.maximumf %64, %65 : vector<26x32xf32>
    %67 = arith.truncf %66 : vector<26x32xf32> to vector<26x32xbf16>
    %cst_73 = arith.constant dense<0.000000e+00> : vector<26x16xf32>
    %68 = tpu.matmul %67, %18, %cst_73 {dimension_numbers = #tpu.dot_dimension_numbers<[1], [0], [0], [1], [0, 0, 1, 1], [], []>} : vector<26x32xbf16>, vector<32x16xbf16>, vector<26x16xf32> -> vector<26x16xf32>
    %69 = arith.addf %68, %38 : vector<26x16xf32>
    %70 = arith.truncf %69 : vector<26x16xf32> to vector<26x16xbf16>
    %cst_74 = arith.constant dense<0.000000e+00> : vector<26x16xf32>
    %71 = tpu.matmul %2, %70, %cst_74 {dimension_numbers = #tpu.dot_dimension_numbers<[1], [0], [0], [1], [0, 0, 1, 1], [], []>} : vector<26x26xbf16>, vector<26x16xbf16>, vector<26x16xf32> -> vector<26x16xf32>
    %72 = arith.truncf %69 : vector<26x16xf32> to vector<26x16xbf16>
    %cst_75 = arith.constant dense<0.000000e+00> : vector<26x16xf32>
    %73 = tpu.matmul %3, %72, %cst_75 {dimension_numbers = #tpu.dot_dimension_numbers<[1], [0], [0], [1], [0, 0, 1, 1], [], []>} : vector<26x26xbf16>, vector<26x16xbf16>, vector<26x16xf32> -> vector<26x16xf32>
    %74 = arith.truncf %71 : vector<26x16xf32> to vector<26x16xbf16>
    %cst_76 = arith.constant dense<0.000000e+00> : vector<26x64xf32>
    %75 = tpu.matmul %74, %20, %cst_76 {dimension_numbers = #tpu.dot_dimension_numbers<[1], [0], [0], [1], [0, 0, 1, 1], [], []>} : vector<26x16xbf16>, vector<16x64xbf16>, vector<26x64xf32> -> vector<26x64xf32>
    %76 = arith.addf %61, %75 : vector<26x64xf32>
    %77 = arith.truncf %73 : vector<26x16xf32> to vector<26x16xbf16>
    %cst_77 = arith.constant dense<0.000000e+00> : vector<26x64xf32>
    %78 = tpu.matmul %77, %21, %cst_77 {dimension_numbers = #tpu.dot_dimension_numbers<[1], [0], [0], [1], [0, 0, 1, 1], [], []>} : vector<26x16xbf16>, vector<16x64xbf16>, vector<26x64xf32> -> vector<26x64xf32>
    %79 = arith.addf %76, %78 : vector<26x64xf32>
    %cst_78 = arith.constant 0.000000e+00 : f32
    %80 = vector.broadcast %cst_78 : f32 to vector<26x64xf32>
    %81 = arith.maximumf %79, %80 : vector<26x64xf32>
    %82 = arith.truncf %81 : vector<26x64xf32> to vector<26x64xbf16>
    %cst_79 = arith.constant dense<0.000000e+00> : vector<26x64xf32>
    %83 = tpu.matmul %82, %24, %cst_79 {dimension_numbers = #tpu.dot_dimension_numbers<[1], [0], [0], [1], [0, 0, 1, 1], [], []>} : vector<26x64xbf16>, vector<64x64xbf16>, vector<26x64xf32> -> vector<26x64xf32>
    %84 = arith.addf %83, %44 : vector<26x64xf32>
    %85 = vector.extract_strided_slice %84 {offsets = [0, 0], sizes = [26, 32], strides = [1, 1]} : vector<26x64xf32> to vector<26x32xf32>
    %86 = arith.truncf %85 : vector<26x32xf32> to vector<26x32xbf16>
    %cst_80 = arith.constant dense<0.000000e+00> : vector<26x32xf32>
    %87 = tpu.matmul %5, %86, %cst_80 {dimension_numbers = #tpu.dot_dimension_numbers<[1], [0], [0], [1], [0, 0, 1, 1], [], []>} : vector<26x26xbf16>, vector<26x32xbf16>, vector<26x32xf32> -> vector<26x32xf32>
    %88 = vector.extract_strided_slice %84 {offsets = [0, 32], sizes = [26, 32], strides = [1, 1]} : vector<26x64xf32> to vector<26x32xf32>
    %89 = arith.truncf %88 : vector<26x32xf32> to vector<26x32xbf16>
    %cst_81 = arith.constant dense<0.000000e+00> : vector<26x32xf32>
    %90 = tpu.matmul %4, %89, %cst_81 {dimension_numbers = #tpu.dot_dimension_numbers<[1], [0], [0], [1], [0, 0, 1, 1], [], []>} : vector<26x26xbf16>, vector<26x32xbf16>, vector<26x32xf32> -> vector<26x32xf32>
    %91 = arith.addf %87, %90 : vector<26x32xf32>
    %92 = arith.truncf %91 : vector<26x32xf32> to vector<26x32xbf16>
    %cst_82 = arith.constant dense<0.000000e+00> : vector<26x16xf32>
    %93 = tpu.matmul %92, %26, %cst_82 {dimension_numbers = #tpu.dot_dimension_numbers<[1], [0], [0], [1], [0, 0, 1, 1], [], []>} : vector<26x32xbf16>, vector<32x16xbf16>, vector<26x16xf32> -> vector<26x16xf32>
    %94 = arith.truncf %69 : vector<26x16xf32> to vector<26x16xbf16>
    %cst_83 = arith.constant dense<0.000000e+00> : vector<26x16xf32>
    %95 = tpu.matmul %94, %27, %cst_83 {dimension_numbers = #tpu.dot_dimension_numbers<[1], [0], [0], [1], [0, 0, 1, 1], [], []>} : vector<26x16xbf16>, vector<16x16xbf16>, vector<26x16xf32> -> vector<26x16xf32>
    %96 = arith.addf %93, %95 : vector<26x16xf32>
    %97 = arith.addf %96, %40 : vector<26x16xf32>
    %cst_84 = arith.constant 0.000000e+00 : f32
    %98 = vector.broadcast %cst_84 : f32 to vector<26x16xf32>
    %99 = arith.maximumf %97, %98 : vector<26x16xf32>
    %100 = arith.truncf %99 : vector<26x16xf32> to vector<26x16xbf16>
    %cst_85 = arith.constant dense<0.000000e+00> : vector<26x16xf32>
    %101 = tpu.matmul %100, %29, %cst_85 {dimension_numbers = #tpu.dot_dimension_numbers<[1], [0], [0], [1], [0, 0, 1, 1], [], []>} : vector<26x16xbf16>, vector<16x16xbf16>, vector<26x16xf32> -> vector<26x16xf32>
    %102 = arith.addf %101, %42 : vector<26x16xf32>
    %103 = arith.addf %69, %102 : vector<26x16xf32>
    %104 = arith.truncf %103 : vector<26x16xf32> to vector<26x16xbf16>
    %cst_86 = arith.constant dense<0.000000e+00> : vector<26x32xf32>
    %105 = tpu.matmul %104, %15, %cst_86 {dimension_numbers = #tpu.dot_dimension_numbers<[1], [0], [0], [1], [0, 0, 1, 1], [], []>} : vector<26x16xbf16>, vector<16x32xbf16>, vector<26x32xf32> -> vector<26x32xf32>
    %106 = arith.addf %105, %36 : vector<26x32xf32>
    %cst_87 = arith.constant 0.000000e+00 : f32
    %107 = vector.broadcast %cst_87 : f32 to vector<26x32xf32>
    %108 = arith.maximumf %106, %107 : vector<26x32xf32>
    %109 = arith.truncf %108 : vector<26x32xf32> to vector<26x32xbf16>
    %cst_88 = arith.constant dense<0.000000e+00> : vector<26x16xf32>
    %110 = tpu.matmul %109, %18, %cst_88 {dimension_numbers = #tpu.dot_dimension_numbers<[1], [0], [0], [1], [0, 0, 1, 1], [], []>} : vector<26x32xbf16>, vector<32x16xbf16>, vector<26x16xf32> -> vector<26x16xf32>
    %111 = arith.addf %110, %38 : vector<26x16xf32>
    %112 = arith.truncf %111 : vector<26x16xf32> to vector<26x16xbf16>
    %cst_89 = arith.constant dense<0.000000e+00> : vector<26x16xf32>
    %113 = tpu.matmul %2, %112, %cst_89 {dimension_numbers = #tpu.dot_dimension_numbers<[1], [0], [0], [1], [0, 0, 1, 1], [], []>} : vector<26x26xbf16>, vector<26x16xbf16>, vector<26x16xf32> -> vector<26x16xf32>
    %114 = arith.truncf %111 : vector<26x16xf32> to vector<26x16xbf16>
    %cst_90 = arith.constant dense<0.000000e+00> : vector<26x16xf32>
    %115 = tpu.matmul %3, %114, %cst_90 {dimension_numbers = #tpu.dot_dimension_numbers<[1], [0], [0], [1], [0, 0, 1, 1], [], []>} : vector<26x26xbf16>, vector<26x16xbf16>, vector<26x16xf32> -> vector<26x16xf32>
    %116 = arith.truncf %113 : vector<26x16xf32> to vector<26x16xbf16>
    %cst_91 = arith.constant dense<0.000000e+00> : vector<26x64xf32>
    %117 = tpu.matmul %116, %20, %cst_91 {dimension_numbers = #tpu.dot_dimension_numbers<[1], [0], [0], [1], [0, 0, 1, 1], [], []>} : vector<26x16xbf16>, vector<16x64xbf16>, vector<26x64xf32> -> vector<26x64xf32>
    %118 = arith.addf %61, %117 : vector<26x64xf32>
    %119 = arith.truncf %115 : vector<26x16xf32> to vector<26x16xbf16>
    %cst_92 = arith.constant dense<0.000000e+00> : vector<26x64xf32>
    %120 = tpu.matmul %119, %21, %cst_92 {dimension_numbers = #tpu.dot_dimension_numbers<[1], [0], [0], [1], [0, 0, 1, 1], [], []>} : vector<26x16xbf16>, vector<16x64xbf16>, vector<26x64xf32> -> vector<26x64xf32>
    %121 = arith.addf %118, %120 : vector<26x64xf32>
    %cst_93 = arith.constant 0.000000e+00 : f32
    %122 = vector.broadcast %cst_93 : f32 to vector<26x64xf32>
    %123 = arith.maximumf %121, %122 : vector<26x64xf32>
    %124 = arith.truncf %123 : vector<26x64xf32> to vector<26x64xbf16>
    %cst_94 = arith.constant dense<0.000000e+00> : vector<26x64xf32>
    %125 = tpu.matmul %124, %24, %cst_94 {dimension_numbers = #tpu.dot_dimension_numbers<[1], [0], [0], [1], [0, 0, 1, 1], [], []>} : vector<26x64xbf16>, vector<64x64xbf16>, vector<26x64xf32> -> vector<26x64xf32>
    %126 = arith.addf %125, %44 : vector<26x64xf32>
    %127 = vector.extract_strided_slice %126 {offsets = [0, 0], sizes = [26, 32], strides = [1, 1]} : vector<26x64xf32> to vector<26x32xf32>
    %128 = arith.truncf %127 : vector<26x32xf32> to vector<26x32xbf16>
    %cst_95 = arith.constant dense<0.000000e+00> : vector<26x32xf32>
    %129 = tpu.matmul %5, %128, %cst_95 {dimension_numbers = #tpu.dot_dimension_numbers<[1], [0], [0], [1], [0, 0, 1, 1], [], []>} : vector<26x26xbf16>, vector<26x32xbf16>, vector<26x32xf32> -> vector<26x32xf32>
    %130 = vector.extract_strided_slice %126 {offsets = [0, 32], sizes = [26, 32], strides = [1, 1]} : vector<26x64xf32> to vector<26x32xf32>
    %131 = arith.truncf %130 : vector<26x32xf32> to vector<26x32xbf16>
    %cst_96 = arith.constant dense<0.000000e+00> : vector<26x32xf32>
    %132 = tpu.matmul %4, %131, %cst_96 {dimension_numbers = #tpu.dot_dimension_numbers<[1], [0], [0], [1], [0, 0, 1, 1], [], []>} : vector<26x26xbf16>, vector<26x32xbf16>, vector<26x32xf32> -> vector<26x32xf32>
    %133 = arith.addf %129, %132 : vector<26x32xf32>
    %134 = arith.truncf %133 : vector<26x32xf32> to vector<26x32xbf16>
    %cst_97 = arith.constant dense<0.000000e+00> : vector<26x16xf32>
    %135 = tpu.matmul %134, %26, %cst_97 {dimension_numbers = #tpu.dot_dimension_numbers<[1], [0], [0], [1], [0, 0, 1, 1], [], []>} : vector<26x32xbf16>, vector<32x16xbf16>, vector<26x16xf32> -> vector<26x16xf32>
    %136 = arith.truncf %111 : vector<26x16xf32> to vector<26x16xbf16>
    %cst_98 = arith.constant dense<0.000000e+00> : vector<26x16xf32>
    %137 = tpu.matmul %136, %27, %cst_98 {dimension_numbers = #tpu.dot_dimension_numbers<[1], [0], [0], [1], [0, 0, 1, 1], [], []>} : vector<26x16xbf16>, vector<16x16xbf16>, vector<26x16xf32> -> vector<26x16xf32>
    %138 = arith.addf %135, %137 : vector<26x16xf32>
    %139 = arith.addf %138, %40 : vector<26x16xf32>
    %cst_99 = arith.constant 0.000000e+00 : f32
    %140 = vector.broadcast %cst_99 : f32 to vector<26x16xf32>
    %141 = arith.maximumf %139, %140 : vector<26x16xf32>
    %142 = arith.truncf %141 : vector<26x16xf32> to vector<26x16xbf16>
    %cst_100 = arith.constant dense<0.000000e+00> : vector<26x16xf32>
    %143 = tpu.matmul %142, %29, %cst_100 {dimension_numbers = #tpu.dot_dimension_numbers<[1], [0], [0], [1], [0, 0, 1, 1], [], []>} : vector<26x16xbf16>, vector<16x16xbf16>, vector<26x16xf32> -> vector<26x16xf32>
    %144 = arith.addf %143, %42 : vector<26x16xf32>
    %145 = arith.addf %111, %144 : vector<26x16xf32>
    %146 = arith.truncf %145 : vector<26x16xf32> to vector<26x16xbf16>
    %cst_101 = arith.constant dense<0.000000e+00> : vector<26x32xf32>
    %147 = tpu.matmul %146, %15, %cst_101 {dimension_numbers = #tpu.dot_dimension_numbers<[1], [0], [0], [1], [0, 0, 1, 1], [], []>} : vector<26x16xbf16>, vector<16x32xbf16>, vector<26x32xf32> -> vector<26x32xf32>
    %148 = arith.addf %147, %36 : vector<26x32xf32>
    %cst_102 = arith.constant 0.000000e+00 : f32
    %149 = vector.broadcast %cst_102 : f32 to vector<26x32xf32>
    %150 = arith.maximumf %148, %149 : vector<26x32xf32>
    %151 = arith.truncf %150 : vector<26x32xf32> to vector<26x32xbf16>
    %cst_103 = arith.constant dense<0.000000e+00> : vector<26x16xf32>
    %152 = tpu.matmul %151, %18, %cst_103 {dimension_numbers = #tpu.dot_dimension_numbers<[1], [0], [0], [1], [0, 0, 1, 1], [], []>} : vector<26x32xbf16>, vector<32x16xbf16>, vector<26x16xf32> -> vector<26x16xf32>
    %153 = arith.addf %152, %38 : vector<26x16xf32>
    %154 = arith.truncf %153 : vector<26x16xf32> to vector<26x16xbf16>
    %cst_104 = arith.constant dense<0.000000e+00> : vector<26x16xf32>
    %155 = tpu.matmul %2, %154, %cst_104 {dimension_numbers = #tpu.dot_dimension_numbers<[1], [0], [0], [1], [0, 0, 1, 1], [], []>} : vector<26x26xbf16>, vector<26x16xbf16>, vector<26x16xf32> -> vector<26x16xf32>
    %156 = arith.truncf %153 : vector<26x16xf32> to vector<26x16xbf16>
    %cst_105 = arith.constant dense<0.000000e+00> : vector<26x16xf32>
    %157 = tpu.matmul %3, %156, %cst_105 {dimension_numbers = #tpu.dot_dimension_numbers<[1], [0], [0], [1], [0, 0, 1, 1], [], []>} : vector<26x26xbf16>, vector<26x16xbf16>, vector<26x16xf32> -> vector<26x16xf32>
    %158 = arith.truncf %155 : vector<26x16xf32> to vector<26x16xbf16>
    %cst_106 = arith.constant dense<0.000000e+00> : vector<26x64xf32>
    %159 = tpu.matmul %158, %20, %cst_106 {dimension_numbers = #tpu.dot_dimension_numbers<[1], [0], [0], [1], [0, 0, 1, 1], [], []>} : vector<26x16xbf16>, vector<16x64xbf16>, vector<26x64xf32> -> vector<26x64xf32>
    %160 = arith.addf %61, %159 : vector<26x64xf32>
    %161 = arith.truncf %157 : vector<26x16xf32> to vector<26x16xbf16>
    %cst_107 = arith.constant dense<0.000000e+00> : vector<26x64xf32>
    %162 = tpu.matmul %161, %21, %cst_107 {dimension_numbers = #tpu.dot_dimension_numbers<[1], [0], [0], [1], [0, 0, 1, 1], [], []>} : vector<26x16xbf16>, vector<16x64xbf16>, vector<26x64xf32> -> vector<26x64xf32>
    %163 = arith.addf %160, %162 : vector<26x64xf32>
    %cst_108 = arith.constant 0.000000e+00 : f32
    %164 = vector.broadcast %cst_108 : f32 to vector<26x64xf32>
    %165 = arith.maximumf %163, %164 : vector<26x64xf32>
    %166 = arith.truncf %165 : vector<26x64xf32> to vector<26x64xbf16>
    %cst_109 = arith.constant dense<0.000000e+00> : vector<26x64xf32>
    %167 = tpu.matmul %166, %24, %cst_109 {dimension_numbers = #tpu.dot_dimension_numbers<[1], [0], [0], [1], [0, 0, 1, 1], [], []>} : vector<26x64xbf16>, vector<64x64xbf16>, vector<26x64xf32> -> vector<26x64xf32>
    %168 = arith.addf %167, %44 : vector<26x64xf32>
    %169 = vector.extract_strided_slice %168 {offsets = [0, 0], sizes = [26, 32], strides = [1, 1]} : vector<26x64xf32> to vector<26x32xf32>
    %170 = arith.truncf %169 : vector<26x32xf32> to vector<26x32xbf16>
    %cst_110 = arith.constant dense<0.000000e+00> : vector<26x32xf32>
    %171 = tpu.matmul %5, %170, %cst_110 {dimension_numbers = #tpu.dot_dimension_numbers<[1], [0], [0], [1], [0, 0, 1, 1], [], []>} : vector<26x26xbf16>, vector<26x32xbf16>, vector<26x32xf32> -> vector<26x32xf32>
    %172 = vector.extract_strided_slice %168 {offsets = [0, 32], sizes = [26, 32], strides = [1, 1]} : vector<26x64xf32> to vector<26x32xf32>
    %173 = arith.truncf %172 : vector<26x32xf32> to vector<26x32xbf16>
    %cst_111 = arith.constant dense<0.000000e+00> : vector<26x32xf32>
    %174 = tpu.matmul %4, %173, %cst_111 {dimension_numbers = #tpu.dot_dimension_numbers<[1], [0], [0], [1], [0, 0, 1, 1], [], []>} : vector<26x26xbf16>, vector<26x32xbf16>, vector<26x32xf32> -> vector<26x32xf32>
    %175 = arith.addf %171, %174 : vector<26x32xf32>
    %176 = arith.truncf %175 : vector<26x32xf32> to vector<26x32xbf16>
    %cst_112 = arith.constant dense<0.000000e+00> : vector<26x16xf32>
    %177 = tpu.matmul %176, %26, %cst_112 {dimension_numbers = #tpu.dot_dimension_numbers<[1], [0], [0], [1], [0, 0, 1, 1], [], []>} : vector<26x32xbf16>, vector<32x16xbf16>, vector<26x16xf32> -> vector<26x16xf32>
    %178 = arith.truncf %153 : vector<26x16xf32> to vector<26x16xbf16>
    %cst_113 = arith.constant dense<0.000000e+00> : vector<26x16xf32>
    %179 = tpu.matmul %178, %27, %cst_113 {dimension_numbers = #tpu.dot_dimension_numbers<[1], [0], [0], [1], [0, 0, 1, 1], [], []>} : vector<26x16xbf16>, vector<16x16xbf16>, vector<26x16xf32> -> vector<26x16xf32>
    %180 = arith.addf %177, %179 : vector<26x16xf32>
    %181 = arith.addf %180, %40 : vector<26x16xf32>
    %cst_114 = arith.constant 0.000000e+00 : f32
    %182 = vector.broadcast %cst_114 : f32 to vector<26x16xf32>
    %183 = arith.maximumf %181, %182 : vector<26x16xf32>
    %184 = arith.truncf %183 : vector<26x16xf32> to vector<26x16xbf16>
    %cst_115 = arith.constant dense<0.000000e+00> : vector<26x16xf32>
    %185 = tpu.matmul %184, %29, %cst_115 {dimension_numbers = #tpu.dot_dimension_numbers<[1], [0], [0], [1], [0, 0, 1, 1], [], []>} : vector<26x16xbf16>, vector<16x16xbf16>, vector<26x16xf32> -> vector<26x16xf32>
    %186 = arith.addf %185, %42 : vector<26x16xf32>
    %187 = arith.addf %153, %186 : vector<26x16xf32>
    %188 = tpu.concatenate %103, %145, %187 in 1 : vector<26x16xf32>, vector<26x16xf32>, vector<26x16xf32> -> vector<26x48xf32>
    %189 = arith.truncf %188 : vector<26x48xf32> to vector<26x48xbf16>
    %cst_116 = arith.constant dense<0.000000e+00> : vector<32x48xf32>
    %190 = tpu.matmul %6, %189, %cst_116 {dimension_numbers = #tpu.dot_dimension_numbers<[1], [0], [0], [1], [0, 0, 1, 1], [], []>} : vector<32x26xbf16>, vector<26x48xbf16>, vector<32x48xf32> -> vector<32x48xf32>
    %191 = arith.truncf %188 : vector<26x48xf32> to vector<26x48xbf16>
    %cst_117 = arith.constant dense<0.000000e+00> : vector<32x48xf32>
    %192 = tpu.matmul %7, %191, %cst_117 {dimension_numbers = #tpu.dot_dimension_numbers<[1], [0], [0], [1], [0, 0, 1, 1], [], []>} : vector<32x26xbf16>, vector<26x48xbf16>, vector<32x48xf32> -> vector<32x48xf32>
    %193 = arith.truncf %187 : vector<26x16xf32> to vector<26x16xbf16>
    %cst_118 = arith.constant dense<0.000000e+00> : vector<32x16xf32>
    %194 = tpu.matmul %6, %193, %cst_118 {dimension_numbers = #tpu.dot_dimension_numbers<[1], [0], [0], [1], [0, 0, 1, 1], [], []>} : vector<32x26xbf16>, vector<26x16xbf16>, vector<32x16xf32> -> vector<32x16xf32>
    %195 = arith.truncf %187 : vector<26x16xf32> to vector<26x16xbf16>
    %cst_119 = arith.constant dense<0.000000e+00> : vector<32x16xf32>
    %196 = tpu.matmul %7, %195, %cst_119 {dimension_numbers = #tpu.dot_dimension_numbers<[1], [0], [0], [1], [0, 0, 1, 1], [], []>} : vector<32x26xbf16>, vector<26x16xbf16>, vector<32x16xf32> -> vector<32x16xf32>
    %197 = tpu.concatenate %194, %196 in 0 : vector<32x16xf32>, vector<32x16xf32> -> vector<64x16xf32>
    %198 = arith.truncf %197 : vector<64x16xf32> to vector<64x16xbf16>
    %cst_120 = arith.constant dense<0.000000e+00> : vector<64x16xf32>
    %199 = tpu.matmul %198, %31, %cst_120 {dimension_numbers = #tpu.dot_dimension_numbers<[1], [0], [0], [1], [0, 0, 1, 1], [], []>} : vector<64x16xbf16>, vector<16x16xbf16>, vector<64x16xf32> -> vector<64x16xf32>
    %200 = arith.addf %199, %46 : vector<64x16xf32>
    %cst_121 = arith.constant 0.000000e+00 : f32
    %201 = vector.broadcast %cst_121 : f32 to vector<64x16xf32>
    %202 = arith.maximumf %200, %201 : vector<64x16xf32>
    %203 = arith.truncf %202 : vector<64x16xf32> to vector<64x16xbf16>
    %cst_122 = arith.constant dense<0.000000e+00> : vector<64x16xf32>
    %204 = tpu.matmul %203, %33, %cst_122 {dimension_numbers = #tpu.dot_dimension_numbers<[1], [0], [0], [1], [0, 0, 1, 1], [], []>} : vector<64x16xbf16>, vector<16x16xbf16>, vector<64x16xf32> -> vector<64x16xf32>
    %205 = arith.addf %204, %48 : vector<64x16xf32>
    %206 = arith.mulf %205, %10 : vector<64x16xf32>
    %207 = vector.extract_strided_slice %206 {offsets = [0, 0], sizes = [32, 16], strides = [1, 1]} : vector<64x16xf32> to vector<32x16xf32>
    %208 = vector.shape_cast %207 : vector<32x16xf32> to vector<2x16x16xf32>
    %209 = vector.extract_strided_slice %206 {offsets = [32, 0], sizes = [32, 16], strides = [1, 1]} : vector<64x16xf32> to vector<32x16xf32>
    %210 = vector.shape_cast %209 : vector<32x16xf32> to vector<2x16x16xf32>
    %211 = arith.truncf %208 : vector<2x16x16xf32> to vector<2x16x16xbf16>
    %212 = arith.truncf %210 : vector<2x16x16xf32> to vector<2x16x16xbf16>
    "tpu.trace_start"() <{level = 10 : i32, message = "bqt,bkt->bqk"}> : () -> ()
    %cst_123 = arith.constant dense<0.000000e+00> : vector<2x16x16xf32>
    %213 = tpu.matmul %211, %212, %cst_123 {dimension_numbers = #tpu.dot_dimension_numbers<[2], [2], [1], [1], [0, 0, 0, 1, 1, 1], [0], [0]>} : vector<2x16x16xbf16>, vector<2x16x16xbf16>, vector<2x16x16xf32> -> vector<2x16x16xf32>
    "tpu.trace_stop"() : () -> ()
    %cst_124 = arith.constant 1.000000e+01 : f32
    %214 = vector.broadcast %cst_124 : f32 to vector<2x16x16xf32>
    %215 = arith.mulf %213, %214 : vector<2x16x16xf32>
    %cst_125 = arith.constant dense<0xFF800000> : vector<2x16xf32>
    %216 = vector.multi_reduction <maximumf>, %215, %cst_125 [2] : vector<2x16x16xf32> to vector<2x16xf32>
    %217 = vector.shape_cast %216 : vector<2x16xf32> to vector<2x16x1xf32>
    %218 = vector.broadcast %217 : vector<2x16x1xf32> to vector<2x16x16xf32>
    %219 = arith.subf %215, %218 : vector<2x16x16xf32>
    %220 = math.exp %219 : vector<2x16x16xf32>
    %cst_126 = arith.constant dense<0.000000e+00> : vector<2x16xf32>
    %221 = vector.multi_reduction <add>, %220, %cst_126 [2] : vector<2x16x16xf32> to vector<2x16xf32>
    %222 = vector.shape_cast %221 : vector<2x16xf32> to vector<2x16x1xf32>
    %223 = math.log %222 : vector<2x16x1xf32>
    %224 = arith.addf %217, %223 : vector<2x16x1xf32>
    %225 = vector.broadcast %224 : vector<2x16x1xf32> to vector<2x16x16xf32>
    %226 = arith.subf %215, %225 : vector<2x16x16xf32>
    %cst_127 = arith.constant dense<0xFF800000> : vector<2x16xf32>
    %227 = vector.multi_reduction <maximumf>, %226, %cst_127 [1] : vector<2x16x16xf32> to vector<2x16xf32>
    %228 = vector.shape_cast %227 : vector<2x16xf32> to vector<2x1x16xf32>
    %229 = vector.broadcast %228 : vector<2x1x16xf32> to vector<2x16x16xf32>
    %230 = arith.subf %226, %229 : vector<2x16x16xf32>
    %231 = math.exp %230 : vector<2x16x16xf32>
    %cst_128 = arith.constant dense<0.000000e+00> : vector<2x16xf32>
    %232 = vector.multi_reduction <add>, %231, %cst_128 [1] : vector<2x16x16xf32> to vector<2x16xf32>
    %233 = vector.shape_cast %232 : vector<2x16xf32> to vector<2x1x16xf32>
    %234 = math.log %233 : vector<2x1x16xf32>
    %235 = arith.addf %228, %234 : vector<2x1x16xf32>
    %236 = vector.broadcast %235 : vector<2x1x16xf32> to vector<2x16x16xf32>
    %237 = arith.subf %226, %236 : vector<2x16x16xf32>
    %cst_129 = arith.constant dense<0xFF800000> : vector<2x16xf32>
    %238 = vector.multi_reduction <maximumf>, %237, %cst_129 [2] : vector<2x16x16xf32> to vector<2x16xf32>
    %239 = vector.shape_cast %238 : vector<2x16xf32> to vector<2x16x1xf32>
    %240 = vector.broadcast %239 : vector<2x16x1xf32> to vector<2x16x16xf32>
    %241 = arith.subf %237, %240 : vector<2x16x16xf32>
    %242 = math.exp %241 : vector<2x16x16xf32>
    %cst_130 = arith.constant dense<0.000000e+00> : vector<2x16xf32>
    %243 = vector.multi_reduction <add>, %242, %cst_130 [2] : vector<2x16x16xf32> to vector<2x16xf32>
    %244 = vector.shape_cast %243 : vector<2x16xf32> to vector<2x16x1xf32>
    %245 = math.log %244 : vector<2x16x1xf32>
    %246 = arith.addf %239, %245 : vector<2x16x1xf32>
    %247 = vector.broadcast %246 : vector<2x16x1xf32> to vector<2x16x16xf32>
    %248 = arith.subf %237, %247 : vector<2x16x16xf32>
    %cst_131 = arith.constant dense<0xFF800000> : vector<2x16xf32>
    %249 = vector.multi_reduction <maximumf>, %248, %cst_131 [1] : vector<2x16x16xf32> to vector<2x16xf32>
    %250 = vector.shape_cast %249 : vector<2x16xf32> to vector<2x1x16xf32>
    %251 = vector.broadcast %250 : vector<2x1x16xf32> to vector<2x16x16xf32>
    %252 = arith.subf %248, %251 : vector<2x16x16xf32>
    %253 = math.exp %252 : vector<2x16x16xf32>
    %cst_132 = arith.constant dense<0.000000e+00> : vector<2x16xf32>
    %254 = vector.multi_reduction <add>, %253, %cst_132 [1] : vector<2x16x16xf32> to vector<2x16xf32>
    %255 = vector.shape_cast %254 : vector<2x16xf32> to vector<2x1x16xf32>
    %256 = math.log %255 : vector<2x1x16xf32>
    %257 = arith.addf %250, %256 : vector<2x1x16xf32>
    %258 = vector.broadcast %257 : vector<2x1x16xf32> to vector<2x16x16xf32>
    %259 = arith.subf %248, %258 : vector<2x16x16xf32>
    %cst_133 = arith.constant dense<0xFF800000> : vector<2x16xf32>
    %260 = vector.multi_reduction <maximumf>, %259, %cst_133 [2] : vector<2x16x16xf32> to vector<2x16xf32>
    %261 = vector.shape_cast %260 : vector<2x16xf32> to vector<2x16x1xf32>
    %262 = vector.broadcast %261 : vector<2x16x1xf32> to vector<2x16x16xf32>
    %263 = arith.subf %259, %262 : vector<2x16x16xf32>
    %264 = math.exp %263 : vector<2x16x16xf32>
    %cst_134 = arith.constant dense<0.000000e+00> : vector<2x16xf32>
    %265 = vector.multi_reduction <add>, %264, %cst_134 [2] : vector<2x16x16xf32> to vector<2x16xf32>
    %266 = vector.shape_cast %265 : vector<2x16xf32> to vector<2x16x1xf32>
    %267 = math.log %266 : vector<2x16x1xf32>
    %268 = arith.addf %261, %267 : vector<2x16x1xf32>
    %269 = vector.broadcast %268 : vector<2x16x1xf32> to vector<2x16x16xf32>
    %270 = arith.subf %259, %269 : vector<2x16x16xf32>
    %cst_135 = arith.constant dense<0xFF800000> : vector<2x16xf32>
    %271 = vector.multi_reduction <maximumf>, %270, %cst_135 [1] : vector<2x16x16xf32> to vector<2x16xf32>
    %272 = vector.shape_cast %271 : vector<2x16xf32> to vector<2x1x16xf32>
    %273 = vector.broadcast %272 : vector<2x1x16xf32> to vector<2x16x16xf32>
    %274 = arith.subf %270, %273 : vector<2x16x16xf32>
    %275 = math.exp %274 : vector<2x16x16xf32>
    %cst_136 = arith.constant dense<0.000000e+00> : vector<2x16xf32>
    %276 = vector.multi_reduction <add>, %275, %cst_136 [1] : vector<2x16x16xf32> to vector<2x16xf32>
    %277 = vector.shape_cast %276 : vector<2x16xf32> to vector<2x1x16xf32>
    %278 = math.log %277 : vector<2x1x16xf32>
    %279 = arith.addf %272, %278 : vector<2x1x16xf32>
    %280 = vector.broadcast %279 : vector<2x1x16xf32> to vector<2x16x16xf32>
    %281 = arith.subf %270, %280 : vector<2x16x16xf32>
    %cst_137 = arith.constant dense<0xFF800000> : vector<2x16xf32>
    %282 = vector.multi_reduction <maximumf>, %281, %cst_137 [2] : vector<2x16x16xf32> to vector<2x16xf32>
    %283 = vector.shape_cast %282 : vector<2x16xf32> to vector<2x16x1xf32>
    %284 = vector.broadcast %283 : vector<2x16x1xf32> to vector<2x16x16xf32>
    %285 = arith.subf %281, %284 : vector<2x16x16xf32>
    %286 = math.exp %285 : vector<2x16x16xf32>
    %cst_138 = arith.constant dense<0.000000e+00> : vector<2x16xf32>
    %287 = vector.multi_reduction <add>, %286, %cst_138 [2] : vector<2x16x16xf32> to vector<2x16xf32>
    %288 = vector.shape_cast %287 : vector<2x16xf32> to vector<2x16x1xf32>
    %289 = math.log %288 : vector<2x16x1xf32>
    %290 = arith.addf %283, %289 : vector<2x16x1xf32>
    %291 = vector.broadcast %290 : vector<2x16x1xf32> to vector<2x16x16xf32>
    %292 = arith.subf %281, %291 : vector<2x16x16xf32>
    %cst_139 = arith.constant dense<0xFF800000> : vector<2x16xf32>
    %293 = vector.multi_reduction <maximumf>, %292, %cst_139 [1] : vector<2x16x16xf32> to vector<2x16xf32>
    %294 = vector.shape_cast %293 : vector<2x16xf32> to vector<2x1x16xf32>
    %295 = vector.broadcast %294 : vector<2x1x16xf32> to vector<2x16x16xf32>
    %296 = arith.subf %292, %295 : vector<2x16x16xf32>
    %297 = math.exp %296 : vector<2x16x16xf32>
    %cst_140 = arith.constant dense<0.000000e+00> : vector<2x16xf32>
    %298 = vector.multi_reduction <add>, %297, %cst_140 [1] : vector<2x16x16xf32> to vector<2x16xf32>
    %299 = vector.shape_cast %298 : vector<2x16xf32> to vector<2x1x16xf32>
    %300 = math.log %299 : vector<2x1x16xf32>
    %301 = arith.addf %294, %300 : vector<2x1x16xf32>
    %302 = vector.broadcast %301 : vector<2x1x16xf32> to vector<2x16x16xf32>
    %303 = arith.subf %292, %302 : vector<2x16x16xf32>
    %cst_141 = arith.constant dense<0xFF800000> : vector<2x16xf32>
    %304 = vector.multi_reduction <maximumf>, %303, %cst_141 [2] : vector<2x16x16xf32> to vector<2x16xf32>
    %305 = vector.shape_cast %304 : vector<2x16xf32> to vector<2x16x1xf32>
    %306 = vector.broadcast %305 : vector<2x16x1xf32> to vector<2x16x16xf32>
    %307 = arith.subf %303, %306 : vector<2x16x16xf32>
    %308 = math.exp %307 : vector<2x16x16xf32>
    %cst_142 = arith.constant dense<0.000000e+00> : vector<2x16xf32>
    %309 = vector.multi_reduction <add>, %308, %cst_142 [2] : vector<2x16x16xf32> to vector<2x16xf32>
    %310 = vector.shape_cast %309 : vector<2x16xf32> to vector<2x16x1xf32>
    %311 = math.log %310 : vector<2x16x1xf32>
    %312 = arith.addf %305, %311 : vector<2x16x1xf32>
    %313 = vector.broadcast %312 : vector<2x16x1xf32> to vector<2x16x16xf32>
    %314 = arith.subf %303, %313 : vector<2x16x16xf32>
    %cst_143 = arith.constant dense<0xFF800000> : vector<2x16xf32>
    %315 = vector.multi_reduction <maximumf>, %314, %cst_143 [1] : vector<2x16x16xf32> to vector<2x16xf32>
    %316 = vector.shape_cast %315 : vector<2x16xf32> to vector<2x1x16xf32>
    %317 = vector.broadcast %316 : vector<2x1x16xf32> to vector<2x16x16xf32>
    %318 = arith.subf %314, %317 : vector<2x16x16xf32>
    %319 = math.exp %318 : vector<2x16x16xf32>
    %cst_144 = arith.constant dense<0.000000e+00> : vector<2x16xf32>
    %320 = vector.multi_reduction <add>, %319, %cst_144 [1] : vector<2x16x16xf32> to vector<2x16xf32>
    %321 = vector.shape_cast %320 : vector<2x16xf32> to vector<2x1x16xf32>
    %322 = math.log %321 : vector<2x1x16xf32>
    %323 = arith.addf %316, %322 : vector<2x1x16xf32>
    %324 = vector.broadcast %323 : vector<2x1x16xf32> to vector<2x16x16xf32>
    %325 = arith.subf %314, %324 : vector<2x16x16xf32>
    %cst_145 = arith.constant dense<0xFF800000> : vector<2x16xf32>
    %326 = vector.multi_reduction <maximumf>, %325, %cst_145 [2] : vector<2x16x16xf32> to vector<2x16xf32>
    %327 = vector.shape_cast %326 : vector<2x16xf32> to vector<2x16x1xf32>
    %328 = vector.broadcast %327 : vector<2x16x1xf32> to vector<2x16x16xf32>
    %329 = arith.subf %325, %328 : vector<2x16x16xf32>
    %330 = math.exp %329 : vector<2x16x16xf32>
    %cst_146 = arith.constant dense<0.000000e+00> : vector<2x16xf32>
    %331 = vector.multi_reduction <add>, %330, %cst_146 [2] : vector<2x16x16xf32> to vector<2x16xf32>
    %332 = vector.shape_cast %331 : vector<2x16xf32> to vector<2x16x1xf32>
    %333 = math.log %332 : vector<2x16x1xf32>
    %334 = arith.addf %327, %333 : vector<2x16x1xf32>
    %335 = vector.broadcast %334 : vector<2x16x1xf32> to vector<2x16x16xf32>
    %336 = arith.subf %325, %335 : vector<2x16x16xf32>
    %cst_147 = arith.constant dense<0xFF800000> : vector<2x16xf32>
    %337 = vector.multi_reduction <maximumf>, %336, %cst_147 [1] : vector<2x16x16xf32> to vector<2x16xf32>
    %338 = vector.shape_cast %337 : vector<2x16xf32> to vector<2x1x16xf32>
    %339 = vector.broadcast %338 : vector<2x1x16xf32> to vector<2x16x16xf32>
    %340 = arith.subf %336, %339 : vector<2x16x16xf32>
    %341 = math.exp %340 : vector<2x16x16xf32>
    %cst_148 = arith.constant dense<0.000000e+00> : vector<2x16xf32>
    %342 = vector.multi_reduction <add>, %341, %cst_148 [1] : vector<2x16x16xf32> to vector<2x16xf32>
    %343 = vector.shape_cast %342 : vector<2x16xf32> to vector<2x1x16xf32>
    %344 = math.log %343 : vector<2x1x16xf32>
    %345 = arith.addf %338, %344 : vector<2x1x16xf32>
    %346 = vector.broadcast %345 : vector<2x1x16xf32> to vector<2x16x16xf32>
    %347 = arith.subf %336, %346 : vector<2x16x16xf32>
    %cst_149 = arith.constant dense<0xFF800000> : vector<2x16xf32>
    %348 = vector.multi_reduction <maximumf>, %347, %cst_149 [2] : vector<2x16x16xf32> to vector<2x16xf32>
    %349 = vector.shape_cast %348 : vector<2x16xf32> to vector<2x16x1xf32>
    %350 = vector.broadcast %349 : vector<2x16x1xf32> to vector<2x16x16xf32>
    %351 = arith.subf %347, %350 : vector<2x16x16xf32>
    %352 = math.exp %351 : vector<2x16x16xf32>
    %cst_150 = arith.constant dense<0.000000e+00> : vector<2x16xf32>
    %353 = vector.multi_reduction <add>, %352, %cst_150 [2] : vector<2x16x16xf32> to vector<2x16xf32>
    %354 = vector.shape_cast %353 : vector<2x16xf32> to vector<2x16x1xf32>
    %355 = math.log %354 : vector<2x16x1xf32>
    %356 = arith.addf %349, %355 : vector<2x16x1xf32>
    %357 = vector.broadcast %356 : vector<2x16x1xf32> to vector<2x16x16xf32>
    %358 = arith.subf %347, %357 : vector<2x16x16xf32>
    %cst_151 = arith.constant dense<0xFF800000> : vector<2x16xf32>
    %359 = vector.multi_reduction <maximumf>, %358, %cst_151 [1] : vector<2x16x16xf32> to vector<2x16xf32>
    %360 = vector.shape_cast %359 : vector<2x16xf32> to vector<2x1x16xf32>
    %361 = vector.broadcast %360 : vector<2x1x16xf32> to vector<2x16x16xf32>
    %362 = arith.subf %358, %361 : vector<2x16x16xf32>
    %363 = math.exp %362 : vector<2x16x16xf32>
    %cst_152 = arith.constant dense<0.000000e+00> : vector<2x16xf32>
    %364 = vector.multi_reduction <add>, %363, %cst_152 [1] : vector<2x16x16xf32> to vector<2x16xf32>
    %365 = vector.shape_cast %364 : vector<2x16xf32> to vector<2x1x16xf32>
    %366 = math.log %365 : vector<2x1x16xf32>
    %367 = arith.addf %360, %366 : vector<2x1x16xf32>
    %368 = vector.broadcast %367 : vector<2x1x16xf32> to vector<2x16x16xf32>
    %369 = arith.subf %358, %368 : vector<2x16x16xf32>
    %cst_153 = arith.constant dense<0xFF800000> : vector<2x16xf32>
    %370 = vector.multi_reduction <maximumf>, %369, %cst_153 [2] : vector<2x16x16xf32> to vector<2x16xf32>
    %371 = vector.shape_cast %370 : vector<2x16xf32> to vector<2x16x1xf32>
    %372 = vector.broadcast %371 : vector<2x16x1xf32> to vector<2x16x16xf32>
    %373 = arith.subf %369, %372 : vector<2x16x16xf32>
    %374 = math.exp %373 : vector<2x16x16xf32>
    %cst_154 = arith.constant dense<0.000000e+00> : vector<2x16xf32>
    %375 = vector.multi_reduction <add>, %374, %cst_154 [2] : vector<2x16x16xf32> to vector<2x16xf32>
    %376 = vector.shape_cast %375 : vector<2x16xf32> to vector<2x16x1xf32>
    %377 = math.log %376 : vector<2x16x1xf32>
    %378 = arith.addf %371, %377 : vector<2x16x1xf32>
    %379 = vector.broadcast %378 : vector<2x16x1xf32> to vector<2x16x16xf32>
    %380 = arith.subf %369, %379 : vector<2x16x16xf32>
    %cst_155 = arith.constant dense<0xFF800000> : vector<2x16xf32>
    %381 = vector.multi_reduction <maximumf>, %380, %cst_155 [1] : vector<2x16x16xf32> to vector<2x16xf32>
    %382 = vector.shape_cast %381 : vector<2x16xf32> to vector<2x1x16xf32>
    %383 = vector.broadcast %382 : vector<2x1x16xf32> to vector<2x16x16xf32>
    %384 = arith.subf %380, %383 : vector<2x16x16xf32>
    %385 = math.exp %384 : vector<2x16x16xf32>
    %cst_156 = arith.constant dense<0.000000e+00> : vector<2x16xf32>
    %386 = vector.multi_reduction <add>, %385, %cst_156 [1] : vector<2x16x16xf32> to vector<2x16xf32>
    %387 = vector.shape_cast %386 : vector<2x16xf32> to vector<2x1x16xf32>
    %388 = math.log %387 : vector<2x1x16xf32>
    %389 = arith.addf %382, %388 : vector<2x1x16xf32>
    %390 = vector.broadcast %389 : vector<2x1x16xf32> to vector<2x16x16xf32>
    %391 = arith.subf %380, %390 : vector<2x16x16xf32>
    %cst_157 = arith.constant dense<0xFF800000> : vector<2x16xf32>
    %392 = vector.multi_reduction <maximumf>, %391, %cst_157 [2] : vector<2x16x16xf32> to vector<2x16xf32>
    %393 = vector.shape_cast %392 : vector<2x16xf32> to vector<2x16x1xf32>
    %394 = vector.broadcast %393 : vector<2x16x1xf32> to vector<2x16x16xf32>
    %395 = arith.subf %391, %394 : vector<2x16x16xf32>
    %396 = math.exp %395 : vector<2x16x16xf32>
    %cst_158 = arith.constant dense<0.000000e+00> : vector<2x16xf32>
    %397 = vector.multi_reduction <add>, %396, %cst_158 [2] : vector<2x16x16xf32> to vector<2x16xf32>
    %398 = vector.shape_cast %397 : vector<2x16xf32> to vector<2x16x1xf32>
    %399 = math.log %398 : vector<2x16x1xf32>
    %400 = arith.addf %393, %399 : vector<2x16x1xf32>
    %401 = vector.broadcast %400 : vector<2x16x1xf32> to vector<2x16x16xf32>
    %402 = arith.subf %391, %401 : vector<2x16x16xf32>
    %cst_159 = arith.constant dense<0xFF800000> : vector<2x16xf32>
    %403 = vector.multi_reduction <maximumf>, %402, %cst_159 [1] : vector<2x16x16xf32> to vector<2x16xf32>
    %404 = vector.shape_cast %403 : vector<2x16xf32> to vector<2x1x16xf32>
    %405 = vector.broadcast %404 : vector<2x1x16xf32> to vector<2x16x16xf32>
    %406 = arith.subf %402, %405 : vector<2x16x16xf32>
    %407 = math.exp %406 : vector<2x16x16xf32>
    %cst_160 = arith.constant dense<0.000000e+00> : vector<2x16xf32>
    %408 = vector.multi_reduction <add>, %407, %cst_160 [1] : vector<2x16x16xf32> to vector<2x16xf32>
    %409 = vector.shape_cast %408 : vector<2x16xf32> to vector<2x1x16xf32>
    %410 = math.log %409 : vector<2x1x16xf32>
    %411 = arith.addf %404, %410 : vector<2x1x16xf32>
    %412 = vector.broadcast %411 : vector<2x1x16xf32> to vector<2x16x16xf32>
    %413 = arith.subf %402, %412 : vector<2x16x16xf32>
    %cst_161 = arith.constant dense<0xFF800000> : vector<2x16xf32>
    %414 = vector.multi_reduction <maximumf>, %413, %cst_161 [2] : vector<2x16x16xf32> to vector<2x16xf32>
    %415 = vector.shape_cast %414 : vector<2x16xf32> to vector<2x16x1xf32>
    %416 = vector.broadcast %415 : vector<2x16x1xf32> to vector<2x16x16xf32>
    %417 = arith.subf %413, %416 : vector<2x16x16xf32>
    %418 = math.exp %417 : vector<2x16x16xf32>
    %cst_162 = arith.constant dense<0.000000e+00> : vector<2x16xf32>
    %419 = vector.multi_reduction <add>, %418, %cst_162 [2] : vector<2x16x16xf32> to vector<2x16xf32>
    %420 = vector.shape_cast %419 : vector<2x16xf32> to vector<2x16x1xf32>
    %421 = math.log %420 : vector<2x16x1xf32>
    %422 = arith.addf %415, %421 : vector<2x16x1xf32>
    %423 = vector.broadcast %422 : vector<2x16x1xf32> to vector<2x16x16xf32>
    %424 = arith.subf %413, %423 : vector<2x16x16xf32>
    %cst_163 = arith.constant dense<0xFF800000> : vector<2x16xf32>
    %425 = vector.multi_reduction <maximumf>, %424, %cst_163 [1] : vector<2x16x16xf32> to vector<2x16xf32>
    %426 = vector.shape_cast %425 : vector<2x16xf32> to vector<2x1x16xf32>
    %427 = vector.broadcast %426 : vector<2x1x16xf32> to vector<2x16x16xf32>
    %428 = arith.subf %424, %427 : vector<2x16x16xf32>
    %429 = math.exp %428 : vector<2x16x16xf32>
    %cst_164 = arith.constant dense<0.000000e+00> : vector<2x16xf32>
    %430 = vector.multi_reduction <add>, %429, %cst_164 [1] : vector<2x16x16xf32> to vector<2x16xf32>
    %431 = vector.shape_cast %430 : vector<2x16xf32> to vector<2x1x16xf32>
    %432 = math.log %431 : vector<2x1x16xf32>
    %433 = arith.addf %426, %432 : vector<2x1x16xf32>
    %434 = vector.broadcast %433 : vector<2x1x16xf32> to vector<2x16x16xf32>
    %435 = arith.subf %424, %434 : vector<2x16x16xf32>
    %436 = math.exp %435 : vector<2x16x16xf32>
    %437 = vector.shape_cast %190 : vector<32x48xf32> to vector<2x16x48xf32>
    %438 = vector.shape_cast %192 : vector<32x48xf32> to vector<2x16x48xf32>
    %439 = arith.truncf %436 : vector<2x16x16xf32> to vector<2x16x16xbf16>
    %440 = arith.truncf %438 : vector<2x16x48xf32> to vector<2x16x48xbf16>
    "tpu.trace_start"() <{level = 10 : i32, message = "bqk,bkd->bqd"}> : () -> ()
    %cst_165 = arith.constant dense<0.000000e+00> : vector<2x16x48xf32>
    %441 = tpu.matmul %439, %440, %cst_165 {dimension_numbers = #tpu.dot_dimension_numbers<[2], [1], [1], [2], [0, 0, 0, 1, 1, 2], [0], [0]>} : vector<2x16x16xbf16>, vector<2x16x48xbf16>, vector<2x16x48xf32> -> vector<2x16x48xf32>
    "tpu.trace_stop"() : () -> ()
    %442 = vector.extract_strided_slice %436 {offsets = [0, 0, 0], sizes = [1, 16, 16], strides = [1, 1, 1]} : vector<2x16x16xf32> to vector<1x16x16xf32>
    %443 = vector.shape_cast %442 : vector<1x16x16xf32> to vector<16x16xf32>
    %444 = arith.truncf %443 : vector<16x16xf32> to vector<16x16xbf16>
    %445 = vector.extract_strided_slice %437 {offsets = [0, 0, 0], sizes = [1, 16, 48], strides = [1, 1, 1]} : vector<2x16x48xf32> to vector<1x16x48xf32>
    %446 = vector.shape_cast %445 : vector<1x16x48xf32> to vector<16x48xf32>
    %447 = arith.truncf %446 : vector<16x48xf32> to vector<16x48xbf16>
    %cst_166 = arith.constant dense<0.000000e+00> : vector<16x48xf32>
    %448 = tpu.matmul %444, %447, %cst_166 {dimension_numbers = #tpu.dot_dimension_numbers<[0], [0], [1], [1], [0, 1, 1, 1], [], []>} : vector<16x16xbf16>, vector<16x48xbf16>, vector<16x48xf32> -> vector<16x48xf32>
    %449 = vector.extract_strided_slice %436 {offsets = [1, 0, 0], sizes = [1, 16, 16], strides = [1, 1, 1]} : vector<2x16x16xf32> to vector<1x16x16xf32>
    %450 = vector.shape_cast %449 : vector<1x16x16xf32> to vector<16x16xf32>
    %451 = arith.truncf %450 : vector<16x16xf32> to vector<16x16xbf16>
    %452 = vector.extract_strided_slice %437 {offsets = [1, 0, 0], sizes = [1, 16, 48], strides = [1, 1, 1]} : vector<2x16x48xf32> to vector<1x16x48xf32>
    %453 = vector.shape_cast %452 : vector<1x16x48xf32> to vector<16x48xf32>
    %454 = arith.truncf %453 : vector<16x48xf32> to vector<16x48xbf16>
    %cst_167 = arith.constant dense<0.000000e+00> : vector<16x48xf32>
    %455 = tpu.matmul %451, %454, %cst_167 {dimension_numbers = #tpu.dot_dimension_numbers<[0], [0], [1], [1], [0, 1, 1, 1], [], []>} : vector<16x16xbf16>, vector<16x48xbf16>, vector<16x48xf32> -> vector<16x48xf32>
    %456 = vector.shape_cast %441 : vector<2x16x48xf32> to vector<32x48xf32>
    %457 = arith.truncf %456 : vector<32x48xf32> to vector<32x48xbf16>
    %cst_168 = arith.constant dense<0.000000e+00> : vector<26x48xf32>
    %458 = tpu.matmul %8, %457, %cst_168 {dimension_numbers = #tpu.dot_dimension_numbers<[1], [0], [0], [1], [0, 0, 1, 1], [], []>} : vector<26x32xbf16>, vector<32x48xbf16>, vector<26x48xf32> -> vector<26x48xf32>
    %459 = tpu.concatenate %448, %455 in 0 : vector<16x48xf32>, vector<16x48xf32> -> vector<32x48xf32>
    %460 = arith.truncf %459 : vector<32x48xf32> to vector<32x48xbf16>
    %cst_169 = arith.constant dense<0.000000e+00> : vector<26x48xf32>
    %461 = tpu.matmul %9, %460, %cst_169 {dimension_numbers = #tpu.dot_dimension_numbers<[1], [0], [0], [1], [0, 0, 1, 1], [], []>} : vector<26x32xbf16>, vector<32x48xbf16>, vector<26x48xf32> -> vector<26x48xf32>
    %462 = arith.addf %458, %461 : vector<26x48xf32>
    %463 = arith.truncf %52 : vector<26x16xf32> to vector<26x16xbf16>
    %cst_170 = arith.constant dense<0.000000e+00> : vector<26x32xf32>
    %464 = tpu.matmul %463, %15, %cst_170 {dimension_numbers = #tpu.dot_dimension_numbers<[1], [0], [0], [1], [0, 0, 1, 1], [], []>} : vector<26x16xbf16>, vector<16x32xbf16>, vector<26x32xf32> -> vector<26x32xf32>
    %465 = arith.addf %464, %36 : vector<26x32xf32>
    %cst_171 = arith.constant 0.000000e+00 : f32
    %466 = vector.broadcast %cst_171 : f32 to vector<26x32xf32>
    %467 = arith.maximumf %465, %466 : vector<26x32xf32>
    %468 = arith.truncf %467 : vector<26x32xf32> to vector<26x32xbf16>
    %cst_172 = arith.constant dense<0.000000e+00> : vector<26x16xf32>
    %469 = tpu.matmul %468, %18, %cst_172 {dimension_numbers = #tpu.dot_dimension_numbers<[1], [0], [0], [1], [0, 0, 1, 1], [], []>} : vector<26x32xbf16>, vector<32x16xbf16>, vector<26x16xf32> -> vector<26x16xf32>
    %470 = arith.addf %469, %38 : vector<26x16xf32>
    %471 = arith.truncf %470 : vector<26x16xf32> to vector<26x16xbf16>
    %cst_173 = arith.constant dense<0.000000e+00> : vector<26x16xf32>
    %472 = tpu.matmul %2, %471, %cst_173 {dimension_numbers = #tpu.dot_dimension_numbers<[1], [0], [0], [1], [0, 0, 1, 1], [], []>} : vector<26x26xbf16>, vector<26x16xbf16>, vector<26x16xf32> -> vector<26x16xf32>
    %473 = arith.truncf %470 : vector<26x16xf32> to vector<26x16xbf16>
    %cst_174 = arith.constant dense<0.000000e+00> : vector<26x16xf32>
    %474 = tpu.matmul %3, %473, %cst_174 {dimension_numbers = #tpu.dot_dimension_numbers<[1], [0], [0], [1], [0, 0, 1, 1], [], []>} : vector<26x26xbf16>, vector<26x16xbf16>, vector<26x16xf32> -> vector<26x16xf32>
    %475 = arith.truncf %472 : vector<26x16xf32> to vector<26x16xbf16>
    %cst_175 = arith.constant dense<0.000000e+00> : vector<26x64xf32>
    %476 = tpu.matmul %475, %20, %cst_175 {dimension_numbers = #tpu.dot_dimension_numbers<[1], [0], [0], [1], [0, 0, 1, 1], [], []>} : vector<26x16xbf16>, vector<16x64xbf16>, vector<26x64xf32> -> vector<26x64xf32>
    %477 = arith.addf %61, %476 : vector<26x64xf32>
    %478 = arith.truncf %474 : vector<26x16xf32> to vector<26x16xbf16>
    %cst_176 = arith.constant dense<0.000000e+00> : vector<26x64xf32>
    %479 = tpu.matmul %478, %21, %cst_176 {dimension_numbers = #tpu.dot_dimension_numbers<[1], [0], [0], [1], [0, 0, 1, 1], [], []>} : vector<26x16xbf16>, vector<16x64xbf16>, vector<26x64xf32> -> vector<26x64xf32>
    %480 = arith.addf %477, %479 : vector<26x64xf32>
    %cst_177 = arith.constant 0.000000e+00 : f32
    %481 = vector.broadcast %cst_177 : f32 to vector<26x64xf32>
    %482 = arith.maximumf %480, %481 : vector<26x64xf32>
    %483 = arith.truncf %482 : vector<26x64xf32> to vector<26x64xbf16>
    %cst_178 = arith.constant dense<0.000000e+00> : vector<26x64xf32>
    %484 = tpu.matmul %483, %24, %cst_178 {dimension_numbers = #tpu.dot_dimension_numbers<[1], [0], [0], [1], [0, 0, 1, 1], [], []>} : vector<26x64xbf16>, vector<64x64xbf16>, vector<26x64xf32> -> vector<26x64xf32>
    %485 = arith.addf %484, %44 : vector<26x64xf32>
    %486 = vector.extract_strided_slice %485 {offsets = [0, 0], sizes = [26, 32], strides = [1, 1]} : vector<26x64xf32> to vector<26x32xf32>
    %487 = arith.truncf %486 : vector<26x32xf32> to vector<26x32xbf16>
    %cst_179 = arith.constant dense<0.000000e+00> : vector<26x32xf32>
    %488 = tpu.matmul %5, %487, %cst_179 {dimension_numbers = #tpu.dot_dimension_numbers<[1], [0], [0], [1], [0, 0, 1, 1], [], []>} : vector<26x26xbf16>, vector<26x32xbf16>, vector<26x32xf32> -> vector<26x32xf32>
    %489 = vector.extract_strided_slice %485 {offsets = [0, 32], sizes = [26, 32], strides = [1, 1]} : vector<26x64xf32> to vector<26x32xf32>
    %490 = arith.truncf %489 : vector<26x32xf32> to vector<26x32xbf16>
    %cst_180 = arith.constant dense<0.000000e+00> : vector<26x32xf32>
    %491 = tpu.matmul %4, %490, %cst_180 {dimension_numbers = #tpu.dot_dimension_numbers<[1], [0], [0], [1], [0, 0, 1, 1], [], []>} : vector<26x26xbf16>, vector<26x32xbf16>, vector<26x32xf32> -> vector<26x32xf32>
    %492 = arith.addf %488, %491 : vector<26x32xf32>
    %493 = arith.truncf %492 : vector<26x32xf32> to vector<26x32xbf16>
    %cst_181 = arith.constant dense<0.000000e+00> : vector<26x16xf32>
    %494 = tpu.matmul %493, %26, %cst_181 {dimension_numbers = #tpu.dot_dimension_numbers<[1], [0], [0], [1], [0, 0, 1, 1], [], []>} : vector<26x32xbf16>, vector<32x16xbf16>, vector<26x16xf32> -> vector<26x16xf32>
    %495 = arith.truncf %470 : vector<26x16xf32> to vector<26x16xbf16>
    %cst_182 = arith.constant dense<0.000000e+00> : vector<26x16xf32>
    %496 = tpu.matmul %495, %27, %cst_182 {dimension_numbers = #tpu.dot_dimension_numbers<[1], [0], [0], [1], [0, 0, 1, 1], [], []>} : vector<26x16xbf16>, vector<16x16xbf16>, vector<26x16xf32> -> vector<26x16xf32>
    %497 = arith.addf %494, %496 : vector<26x16xf32>
    %498 = arith.addf %497, %40 : vector<26x16xf32>
    %cst_183 = arith.constant 0.000000e+00 : f32
    %499 = vector.broadcast %cst_183 : f32 to vector<26x16xf32>
    %500 = arith.maximumf %498, %499 : vector<26x16xf32>
    %501 = arith.truncf %500 : vector<26x16xf32> to vector<26x16xbf16>
    %cst_184 = arith.constant dense<0.000000e+00> : vector<26x16xf32>
    %502 = tpu.matmul %501, %29, %cst_184 {dimension_numbers = #tpu.dot_dimension_numbers<[1], [0], [0], [1], [0, 0, 1, 1], [], []>} : vector<26x16xbf16>, vector<16x16xbf16>, vector<26x16xf32> -> vector<26x16xf32>
    %503 = arith.addf %502, %42 : vector<26x16xf32>
    %504 = arith.addf %470, %503 : vector<26x16xf32>
    %505 = arith.truncf %504 : vector<26x16xf32> to vector<26x16xbf16>
    %cst_185 = arith.constant dense<0.000000e+00> : vector<26x32xf32>
    %506 = tpu.matmul %505, %15, %cst_185 {dimension_numbers = #tpu.dot_dimension_numbers<[1], [0], [0], [1], [0, 0, 1, 1], [], []>} : vector<26x16xbf16>, vector<16x32xbf16>, vector<26x32xf32> -> vector<26x32xf32>
    %507 = arith.addf %506, %36 : vector<26x32xf32>
    %508 = vector.extract_strided_slice %462 {offsets = [0, 0], sizes = [26, 16], strides = [1, 1]} : vector<26x48xf32> to vector<26x16xf32>
    %509 = arith.truncf %508 : vector<26x16xf32> to vector<26x16xbf16>
    %cst_186 = arith.constant dense<0.000000e+00> : vector<26x32xf32>
    %510 = tpu.matmul %509, %16, %cst_186 {dimension_numbers = #tpu.dot_dimension_numbers<[1], [0], [0], [1], [0, 0, 1, 1], [], []>} : vector<26x16xbf16>, vector<16x32xbf16>, vector<26x32xf32> -> vector<26x32xf32>
    %511 = arith.addf %507, %510 : vector<26x32xf32>
    %cst_187 = arith.constant 0.000000e+00 : f32
    %512 = vector.broadcast %cst_187 : f32 to vector<26x32xf32>
    %513 = arith.maximumf %511, %512 : vector<26x32xf32>
    %514 = arith.truncf %513 : vector<26x32xf32> to vector<26x32xbf16>
    %cst_188 = arith.constant dense<0.000000e+00> : vector<26x16xf32>
    %515 = tpu.matmul %514, %18, %cst_188 {dimension_numbers = #tpu.dot_dimension_numbers<[1], [0], [0], [1], [0, 0, 1, 1], [], []>} : vector<26x32xbf16>, vector<32x16xbf16>, vector<26x16xf32> -> vector<26x16xf32>
    %516 = arith.addf %515, %38 : vector<26x16xf32>
    %517 = arith.truncf %516 : vector<26x16xf32> to vector<26x16xbf16>
    %cst_189 = arith.constant dense<0.000000e+00> : vector<26x16xf32>
    %518 = tpu.matmul %2, %517, %cst_189 {dimension_numbers = #tpu.dot_dimension_numbers<[1], [0], [0], [1], [0, 0, 1, 1], [], []>} : vector<26x26xbf16>, vector<26x16xbf16>, vector<26x16xf32> -> vector<26x16xf32>
    %519 = arith.truncf %516 : vector<26x16xf32> to vector<26x16xbf16>
    %cst_190 = arith.constant dense<0.000000e+00> : vector<26x16xf32>
    %520 = tpu.matmul %3, %519, %cst_190 {dimension_numbers = #tpu.dot_dimension_numbers<[1], [0], [0], [1], [0, 0, 1, 1], [], []>} : vector<26x26xbf16>, vector<26x16xbf16>, vector<26x16xf32> -> vector<26x16xf32>
    %521 = arith.truncf %518 : vector<26x16xf32> to vector<26x16xbf16>
    %cst_191 = arith.constant dense<0.000000e+00> : vector<26x64xf32>
    %522 = tpu.matmul %521, %20, %cst_191 {dimension_numbers = #tpu.dot_dimension_numbers<[1], [0], [0], [1], [0, 0, 1, 1], [], []>} : vector<26x16xbf16>, vector<16x64xbf16>, vector<26x64xf32> -> vector<26x64xf32>
    %523 = arith.addf %61, %522 : vector<26x64xf32>
    %524 = arith.truncf %520 : vector<26x16xf32> to vector<26x16xbf16>
    %cst_192 = arith.constant dense<0.000000e+00> : vector<26x64xf32>
    %525 = tpu.matmul %524, %21, %cst_192 {dimension_numbers = #tpu.dot_dimension_numbers<[1], [0], [0], [1], [0, 0, 1, 1], [], []>} : vector<26x16xbf16>, vector<16x64xbf16>, vector<26x64xf32> -> vector<26x64xf32>
    %526 = arith.addf %523, %525 : vector<26x64xf32>
    %cst_193 = arith.constant 0.000000e+00 : f32
    %527 = vector.broadcast %cst_193 : f32 to vector<26x64xf32>
    %528 = arith.maximumf %526, %527 : vector<26x64xf32>
    %529 = arith.truncf %528 : vector<26x64xf32> to vector<26x64xbf16>
    %cst_194 = arith.constant dense<0.000000e+00> : vector<26x64xf32>
    %530 = tpu.matmul %529, %24, %cst_194 {dimension_numbers = #tpu.dot_dimension_numbers<[1], [0], [0], [1], [0, 0, 1, 1], [], []>} : vector<26x64xbf16>, vector<64x64xbf16>, vector<26x64xf32> -> vector<26x64xf32>
    %531 = arith.addf %530, %44 : vector<26x64xf32>
    %532 = vector.extract_strided_slice %531 {offsets = [0, 0], sizes = [26, 32], strides = [1, 1]} : vector<26x64xf32> to vector<26x32xf32>
    %533 = arith.truncf %532 : vector<26x32xf32> to vector<26x32xbf16>
    %cst_195 = arith.constant dense<0.000000e+00> : vector<26x32xf32>
    %534 = tpu.matmul %5, %533, %cst_195 {dimension_numbers = #tpu.dot_dimension_numbers<[1], [0], [0], [1], [0, 0, 1, 1], [], []>} : vector<26x26xbf16>, vector<26x32xbf16>, vector<26x32xf32> -> vector<26x32xf32>
    %535 = vector.extract_strided_slice %531 {offsets = [0, 32], sizes = [26, 32], strides = [1, 1]} : vector<26x64xf32> to vector<26x32xf32>
    %536 = arith.truncf %535 : vector<26x32xf32> to vector<26x32xbf16>
    %cst_196 = arith.constant dense<0.000000e+00> : vector<26x32xf32>
    %537 = tpu.matmul %4, %536, %cst_196 {dimension_numbers = #tpu.dot_dimension_numbers<[1], [0], [0], [1], [0, 0, 1, 1], [], []>} : vector<26x26xbf16>, vector<26x32xbf16>, vector<26x32xf32> -> vector<26x32xf32>
    %538 = arith.addf %534, %537 : vector<26x32xf32>
    %539 = arith.truncf %538 : vector<26x32xf32> to vector<26x32xbf16>
    %cst_197 = arith.constant dense<0.000000e+00> : vector<26x16xf32>
    %540 = tpu.matmul %539, %26, %cst_197 {dimension_numbers = #tpu.dot_dimension_numbers<[1], [0], [0], [1], [0, 0, 1, 1], [], []>} : vector<26x32xbf16>, vector<32x16xbf16>, vector<26x16xf32> -> vector<26x16xf32>
    %541 = arith.truncf %516 : vector<26x16xf32> to vector<26x16xbf16>
    %cst_198 = arith.constant dense<0.000000e+00> : vector<26x16xf32>
    %542 = tpu.matmul %541, %27, %cst_198 {dimension_numbers = #tpu.dot_dimension_numbers<[1], [0], [0], [1], [0, 0, 1, 1], [], []>} : vector<26x16xbf16>, vector<16x16xbf16>, vector<26x16xf32> -> vector<26x16xf32>
    %543 = arith.addf %540, %542 : vector<26x16xf32>
    %544 = arith.addf %543, %40 : vector<26x16xf32>
    %cst_199 = arith.constant 0.000000e+00 : f32
    %545 = vector.broadcast %cst_199 : f32 to vector<26x16xf32>
    %546 = arith.maximumf %544, %545 : vector<26x16xf32>
    %547 = arith.truncf %546 : vector<26x16xf32> to vector<26x16xbf16>
    %cst_200 = arith.constant dense<0.000000e+00> : vector<26x16xf32>
    %548 = tpu.matmul %547, %29, %cst_200 {dimension_numbers = #tpu.dot_dimension_numbers<[1], [0], [0], [1], [0, 0, 1, 1], [], []>} : vector<26x16xbf16>, vector<16x16xbf16>, vector<26x16xf32> -> vector<26x16xf32>
    %549 = arith.addf %548, %42 : vector<26x16xf32>
    %550 = arith.addf %516, %549 : vector<26x16xf32>
    %551 = arith.truncf %550 : vector<26x16xf32> to vector<26x16xbf16>
    %cst_201 = arith.constant dense<0.000000e+00> : vector<26x32xf32>
    %552 = tpu.matmul %551, %15, %cst_201 {dimension_numbers = #tpu.dot_dimension_numbers<[1], [0], [0], [1], [0, 0, 1, 1], [], []>} : vector<26x16xbf16>, vector<16x32xbf16>, vector<26x32xf32> -> vector<26x32xf32>
    %553 = arith.addf %552, %36 : vector<26x32xf32>
    %554 = vector.extract_strided_slice %462 {offsets = [0, 16], sizes = [26, 16], strides = [1, 1]} : vector<26x48xf32> to vector<26x16xf32>
    %555 = arith.truncf %554 : vector<26x16xf32> to vector<26x16xbf16>
    %cst_202 = arith.constant dense<0.000000e+00> : vector<26x32xf32>
    %556 = tpu.matmul %555, %16, %cst_202 {dimension_numbers = #tpu.dot_dimension_numbers<[1], [0], [0], [1], [0, 0, 1, 1], [], []>} : vector<26x16xbf16>, vector<16x32xbf16>, vector<26x32xf32> -> vector<26x32xf32>
    %557 = arith.addf %553, %556 : vector<26x32xf32>
    %cst_203 = arith.constant 0.000000e+00 : f32
    %558 = vector.broadcast %cst_203 : f32 to vector<26x32xf32>
    %559 = arith.maximumf %557, %558 : vector<26x32xf32>
    %560 = arith.truncf %559 : vector<26x32xf32> to vector<26x32xbf16>
    %cst_204 = arith.constant dense<0.000000e+00> : vector<26x16xf32>
    %561 = tpu.matmul %560, %18, %cst_204 {dimension_numbers = #tpu.dot_dimension_numbers<[1], [0], [0], [1], [0, 0, 1, 1], [], []>} : vector<26x32xbf16>, vector<32x16xbf16>, vector<26x16xf32> -> vector<26x16xf32>
    %562 = arith.addf %561, %38 : vector<26x16xf32>
    %563 = arith.truncf %562 : vector<26x16xf32> to vector<26x16xbf16>
    %cst_205 = arith.constant dense<0.000000e+00> : vector<26x16xf32>
    %564 = tpu.matmul %2, %563, %cst_205 {dimension_numbers = #tpu.dot_dimension_numbers<[1], [0], [0], [1], [0, 0, 1, 1], [], []>} : vector<26x26xbf16>, vector<26x16xbf16>, vector<26x16xf32> -> vector<26x16xf32>
    %565 = arith.truncf %562 : vector<26x16xf32> to vector<26x16xbf16>
    %cst_206 = arith.constant dense<0.000000e+00> : vector<26x16xf32>
    %566 = tpu.matmul %3, %565, %cst_206 {dimension_numbers = #tpu.dot_dimension_numbers<[1], [0], [0], [1], [0, 0, 1, 1], [], []>} : vector<26x26xbf16>, vector<26x16xbf16>, vector<26x16xf32> -> vector<26x16xf32>
    %567 = arith.truncf %564 : vector<26x16xf32> to vector<26x16xbf16>
    %cst_207 = arith.constant dense<0.000000e+00> : vector<26x64xf32>
    %568 = tpu.matmul %567, %20, %cst_207 {dimension_numbers = #tpu.dot_dimension_numbers<[1], [0], [0], [1], [0, 0, 1, 1], [], []>} : vector<26x16xbf16>, vector<16x64xbf16>, vector<26x64xf32> -> vector<26x64xf32>
    %569 = arith.addf %61, %568 : vector<26x64xf32>
    %570 = arith.truncf %566 : vector<26x16xf32> to vector<26x16xbf16>
    %cst_208 = arith.constant dense<0.000000e+00> : vector<26x64xf32>
    %571 = tpu.matmul %570, %21, %cst_208 {dimension_numbers = #tpu.dot_dimension_numbers<[1], [0], [0], [1], [0, 0, 1, 1], [], []>} : vector<26x16xbf16>, vector<16x64xbf16>, vector<26x64xf32> -> vector<26x64xf32>
    %572 = arith.addf %569, %571 : vector<26x64xf32>
    %cst_209 = arith.constant 0.000000e+00 : f32
    %573 = vector.broadcast %cst_209 : f32 to vector<26x64xf32>
    %574 = arith.maximumf %572, %573 : vector<26x64xf32>
    %575 = arith.truncf %574 : vector<26x64xf32> to vector<26x64xbf16>
    %cst_210 = arith.constant dense<0.000000e+00> : vector<26x64xf32>
    %576 = tpu.matmul %575, %24, %cst_210 {dimension_numbers = #tpu.dot_dimension_numbers<[1], [0], [0], [1], [0, 0, 1, 1], [], []>} : vector<26x64xbf16>, vector<64x64xbf16>, vector<26x64xf32> -> vector<26x64xf32>
    %577 = arith.addf %576, %44 : vector<26x64xf32>
    %578 = vector.extract_strided_slice %577 {offsets = [0, 0], sizes = [26, 32], strides = [1, 1]} : vector<26x64xf32> to vector<26x32xf32>
    %579 = arith.truncf %578 : vector<26x32xf32> to vector<26x32xbf16>
    %cst_211 = arith.constant dense<0.000000e+00> : vector<26x32xf32>
    %580 = tpu.matmul %5, %579, %cst_211 {dimension_numbers = #tpu.dot_dimension_numbers<[1], [0], [0], [1], [0, 0, 1, 1], [], []>} : vector<26x26xbf16>, vector<26x32xbf16>, vector<26x32xf32> -> vector<26x32xf32>
    %581 = vector.extract_strided_slice %577 {offsets = [0, 32], sizes = [26, 32], strides = [1, 1]} : vector<26x64xf32> to vector<26x32xf32>
    %582 = arith.truncf %581 : vector<26x32xf32> to vector<26x32xbf16>
    %cst_212 = arith.constant dense<0.000000e+00> : vector<26x32xf32>
    %583 = tpu.matmul %4, %582, %cst_212 {dimension_numbers = #tpu.dot_dimension_numbers<[1], [0], [0], [1], [0, 0, 1, 1], [], []>} : vector<26x26xbf16>, vector<26x32xbf16>, vector<26x32xf32> -> vector<26x32xf32>
    %584 = arith.addf %580, %583 : vector<26x32xf32>
    %585 = arith.truncf %584 : vector<26x32xf32> to vector<26x32xbf16>
    %cst_213 = arith.constant dense<0.000000e+00> : vector<26x16xf32>
    %586 = tpu.matmul %585, %26, %cst_213 {dimension_numbers = #tpu.dot_dimension_numbers<[1], [0], [0], [1], [0, 0, 1, 1], [], []>} : vector<26x32xbf16>, vector<32x16xbf16>, vector<26x16xf32> -> vector<26x16xf32>
    %587 = arith.truncf %562 : vector<26x16xf32> to vector<26x16xbf16>
    %cst_214 = arith.constant dense<0.000000e+00> : vector<26x16xf32>
    %588 = tpu.matmul %587, %27, %cst_214 {dimension_numbers = #tpu.dot_dimension_numbers<[1], [0], [0], [1], [0, 0, 1, 1], [], []>} : vector<26x16xbf16>, vector<16x16xbf16>, vector<26x16xf32> -> vector<26x16xf32>
    %589 = arith.addf %586, %588 : vector<26x16xf32>
    %590 = arith.addf %589, %40 : vector<26x16xf32>
    %cst_215 = arith.constant 0.000000e+00 : f32
    %591 = vector.broadcast %cst_215 : f32 to vector<26x16xf32>
    %592 = arith.maximumf %590, %591 : vector<26x16xf32>
    %593 = arith.truncf %592 : vector<26x16xf32> to vector<26x16xbf16>
    %cst_216 = arith.constant dense<0.000000e+00> : vector<26x16xf32>
    %594 = tpu.matmul %593, %29, %cst_216 {dimension_numbers = #tpu.dot_dimension_numbers<[1], [0], [0], [1], [0, 0, 1, 1], [], []>} : vector<26x16xbf16>, vector<16x16xbf16>, vector<26x16xf32> -> vector<26x16xf32>
    %595 = arith.addf %594, %42 : vector<26x16xf32>
    %596 = arith.addf %562, %595 : vector<26x16xf32>
    %597 = arith.truncf %596 : vector<26x16xf32> to vector<26x16xbf16>
    %cst_217 = arith.constant dense<0.000000e+00> : vector<32x16xf32>
    %598 = tpu.matmul %6, %597, %cst_217 {dimension_numbers = #tpu.dot_dimension_numbers<[1], [0], [0], [1], [0, 0, 1, 1], [], []>} : vector<32x26xbf16>, vector<26x16xbf16>, vector<32x16xf32> -> vector<32x16xf32>
    %599 = arith.truncf %596 : vector<26x16xf32> to vector<26x16xbf16>
    %cst_218 = arith.constant dense<0.000000e+00> : vector<32x16xf32>
    %600 = tpu.matmul %7, %599, %cst_218 {dimension_numbers = #tpu.dot_dimension_numbers<[1], [0], [0], [1], [0, 0, 1, 1], [], []>} : vector<32x26xbf16>, vector<26x16xbf16>, vector<32x16xf32> -> vector<32x16xf32>
    %601 = tpu.concatenate %598, %600 in 0 : vector<32x16xf32>, vector<32x16xf32> -> vector<64x16xf32>
    %602 = arith.truncf %601 : vector<64x16xf32> to vector<64x16xbf16>
    %cst_219 = arith.constant dense<0.000000e+00> : vector<64x16xf32>
    %603 = tpu.matmul %602, %31, %cst_219 {dimension_numbers = #tpu.dot_dimension_numbers<[1], [0], [0], [1], [0, 0, 1, 1], [], []>} : vector<64x16xbf16>, vector<16x16xbf16>, vector<64x16xf32> -> vector<64x16xf32>
    %604 = arith.addf %603, %46 : vector<64x16xf32>
    %cst_220 = arith.constant 0.000000e+00 : f32
    %605 = vector.broadcast %cst_220 : f32 to vector<64x16xf32>
    %606 = arith.maximumf %604, %605 : vector<64x16xf32>
    %607 = arith.truncf %606 : vector<64x16xf32> to vector<64x16xbf16>
    %cst_221 = arith.constant dense<0.000000e+00> : vector<64x16xf32>
    %608 = tpu.matmul %607, %33, %cst_221 {dimension_numbers = #tpu.dot_dimension_numbers<[1], [0], [0], [1], [0, 0, 1, 1], [], []>} : vector<64x16xbf16>, vector<16x16xbf16>, vector<64x16xf32> -> vector<64x16xf32>
    %609 = arith.addf %608, %48 : vector<64x16xf32>
    %610 = arith.mulf %609, %10 : vector<64x16xf32>
    %611 = vector.extract_strided_slice %610 {offsets = [0, 0], sizes = [32, 16], strides = [1, 1]} : vector<64x16xf32> to vector<32x16xf32>
    %612 = vector.shape_cast %611 : vector<32x16xf32> to vector<2x16x16xf32>
    %613 = vector.extract_strided_slice %610 {offsets = [32, 0], sizes = [32, 16], strides = [1, 1]} : vector<64x16xf32> to vector<32x16xf32>
    %614 = vector.shape_cast %613 : vector<32x16xf32> to vector<2x16x16xf32>
    %615 = arith.truncf %612 : vector<2x16x16xf32> to vector<2x16x16xbf16>
    %616 = arith.truncf %614 : vector<2x16x16xf32> to vector<2x16x16xbf16>
    "tpu.trace_start"() <{level = 10 : i32, message = "bqt,bkt->bqk"}> : () -> ()
    %cst_222 = arith.constant dense<0.000000e+00> : vector<2x16x16xf32>
    %617 = tpu.matmul %615, %616, %cst_222 {dimension_numbers = #tpu.dot_dimension_numbers<[2], [2], [1], [1], [0, 0, 0, 1, 1, 1], [0], [0]>} : vector<2x16x16xbf16>, vector<2x16x16xbf16>, vector<2x16x16xf32> -> vector<2x16x16xf32>
    "tpu.trace_stop"() : () -> ()
    %cst_223 = arith.constant 1.000000e+01 : f32
    %618 = vector.broadcast %cst_223 : f32 to vector<2x16x16xf32>
    %619 = arith.mulf %617, %618 : vector<2x16x16xf32>
    %cst_224 = arith.constant dense<0xFF800000> : vector<2x16xf32>
    %620 = vector.multi_reduction <maximumf>, %619, %cst_224 [2] : vector<2x16x16xf32> to vector<2x16xf32>
    %621 = vector.shape_cast %620 : vector<2x16xf32> to vector<2x16x1xf32>
    %622 = vector.broadcast %621 : vector<2x16x1xf32> to vector<2x16x16xf32>
    %623 = arith.subf %619, %622 : vector<2x16x16xf32>
    %624 = math.exp %623 : vector<2x16x16xf32>
    %cst_225 = arith.constant dense<0.000000e+00> : vector<2x16xf32>
    %625 = vector.multi_reduction <add>, %624, %cst_225 [2] : vector<2x16x16xf32> to vector<2x16xf32>
    %626 = vector.shape_cast %625 : vector<2x16xf32> to vector<2x16x1xf32>
    %627 = math.log %626 : vector<2x16x1xf32>
    %628 = arith.addf %621, %627 : vector<2x16x1xf32>
    %629 = vector.broadcast %628 : vector<2x16x1xf32> to vector<2x16x16xf32>
    %630 = arith.subf %619, %629 : vector<2x16x16xf32>
    %cst_226 = arith.constant dense<0xFF800000> : vector<2x16xf32>
    %631 = vector.multi_reduction <maximumf>, %630, %cst_226 [1] : vector<2x16x16xf32> to vector<2x16xf32>
    %632 = vector.shape_cast %631 : vector<2x16xf32> to vector<2x1x16xf32>
    %633 = vector.broadcast %632 : vector<2x1x16xf32> to vector<2x16x16xf32>
    %634 = arith.subf %630, %633 : vector<2x16x16xf32>
    %635 = math.exp %634 : vector<2x16x16xf32>
    %cst_227 = arith.constant dense<0.000000e+00> : vector<2x16xf32>
    %636 = vector.multi_reduction <add>, %635, %cst_227 [1] : vector<2x16x16xf32> to vector<2x16xf32>
    %637 = vector.shape_cast %636 : vector<2x16xf32> to vector<2x1x16xf32>
    %638 = math.log %637 : vector<2x1x16xf32>
    %639 = arith.addf %632, %638 : vector<2x1x16xf32>
    %640 = vector.broadcast %639 : vector<2x1x16xf32> to vector<2x16x16xf32>
    %641 = arith.subf %630, %640 : vector<2x16x16xf32>
    %cst_228 = arith.constant dense<0xFF800000> : vector<2x16xf32>
    %642 = vector.multi_reduction <maximumf>, %641, %cst_228 [2] : vector<2x16x16xf32> to vector<2x16xf32>
    %643 = vector.shape_cast %642 : vector<2x16xf32> to vector<2x16x1xf32>
    %644 = vector.broadcast %643 : vector<2x16x1xf32> to vector<2x16x16xf32>
    %645 = arith.subf %641, %644 : vector<2x16x16xf32>
    %646 = math.exp %645 : vector<2x16x16xf32>
    %cst_229 = arith.constant dense<0.000000e+00> : vector<2x16xf32>
    %647 = vector.multi_reduction <add>, %646, %cst_229 [2] : vector<2x16x16xf32> to vector<2x16xf32>
    %648 = vector.shape_cast %647 : vector<2x16xf32> to vector<2x16x1xf32>
    %649 = math.log %648 : vector<2x16x1xf32>
    %650 = arith.addf %643, %649 : vector<2x16x1xf32>
    %651 = vector.broadcast %650 : vector<2x16x1xf32> to vector<2x16x16xf32>
    %652 = arith.subf %641, %651 : vector<2x16x16xf32>
    %cst_230 = arith.constant dense<0xFF800000> : vector<2x16xf32>
    %653 = vector.multi_reduction <maximumf>, %652, %cst_230 [1] : vector<2x16x16xf32> to vector<2x16xf32>
    %654 = vector.shape_cast %653 : vector<2x16xf32> to vector<2x1x16xf32>
    %655 = vector.broadcast %654 : vector<2x1x16xf32> to vector<2x16x16xf32>
    %656 = arith.subf %652, %655 : vector<2x16x16xf32>
    %657 = math.exp %656 : vector<2x16x16xf32>
    %cst_231 = arith.constant dense<0.000000e+00> : vector<2x16xf32>
    %658 = vector.multi_reduction <add>, %657, %cst_231 [1] : vector<2x16x16xf32> to vector<2x16xf32>
    %659 = vector.shape_cast %658 : vector<2x16xf32> to vector<2x1x16xf32>
    %660 = math.log %659 : vector<2x1x16xf32>
    %661 = arith.addf %654, %660 : vector<2x1x16xf32>
    %662 = vector.broadcast %661 : vector<2x1x16xf32> to vector<2x16x16xf32>
    %663 = arith.subf %652, %662 : vector<2x16x16xf32>
    %cst_232 = arith.constant dense<0xFF800000> : vector<2x16xf32>
    %664 = vector.multi_reduction <maximumf>, %663, %cst_232 [2] : vector<2x16x16xf32> to vector<2x16xf32>
    %665 = vector.shape_cast %664 : vector<2x16xf32> to vector<2x16x1xf32>
    %666 = vector.broadcast %665 : vector<2x16x1xf32> to vector<2x16x16xf32>
    %667 = arith.subf %663, %666 : vector<2x16x16xf32>
    %668 = math.exp %667 : vector<2x16x16xf32>
    %cst_233 = arith.constant dense<0.000000e+00> : vector<2x16xf32>
    %669 = vector.multi_reduction <add>, %668, %cst_233 [2] : vector<2x16x16xf32> to vector<2x16xf32>
    %670 = vector.shape_cast %669 : vector<2x16xf32> to vector<2x16x1xf32>
    %671 = math.log %670 : vector<2x16x1xf32>
    %672 = arith.addf %665, %671 : vector<2x16x1xf32>
    %673 = vector.broadcast %672 : vector<2x16x1xf32> to vector<2x16x16xf32>
    %674 = arith.subf %663, %673 : vector<2x16x16xf32>
    %cst_234 = arith.constant dense<0xFF800000> : vector<2x16xf32>
    %675 = vector.multi_reduction <maximumf>, %674, %cst_234 [1] : vector<2x16x16xf32> to vector<2x16xf32>
    %676 = vector.shape_cast %675 : vector<2x16xf32> to vector<2x1x16xf32>
    %677 = vector.broadcast %676 : vector<2x1x16xf32> to vector<2x16x16xf32>
    %678 = arith.subf %674, %677 : vector<2x16x16xf32>
    %679 = math.exp %678 : vector<2x16x16xf32>
    %cst_235 = arith.constant dense<0.000000e+00> : vector<2x16xf32>
    %680 = vector.multi_reduction <add>, %679, %cst_235 [1] : vector<2x16x16xf32> to vector<2x16xf32>
    %681 = vector.shape_cast %680 : vector<2x16xf32> to vector<2x1x16xf32>
    %682 = math.log %681 : vector<2x1x16xf32>
    %683 = arith.addf %676, %682 : vector<2x1x16xf32>
    %684 = vector.broadcast %683 : vector<2x1x16xf32> to vector<2x16x16xf32>
    %685 = arith.subf %674, %684 : vector<2x16x16xf32>
    %cst_236 = arith.constant dense<0xFF800000> : vector<2x16xf32>
    %686 = vector.multi_reduction <maximumf>, %685, %cst_236 [2] : vector<2x16x16xf32> to vector<2x16xf32>
    %687 = vector.shape_cast %686 : vector<2x16xf32> to vector<2x16x1xf32>
    %688 = vector.broadcast %687 : vector<2x16x1xf32> to vector<2x16x16xf32>
    %689 = arith.subf %685, %688 : vector<2x16x16xf32>
    %690 = math.exp %689 : vector<2x16x16xf32>
    %cst_237 = arith.constant dense<0.000000e+00> : vector<2x16xf32>
    %691 = vector.multi_reduction <add>, %690, %cst_237 [2] : vector<2x16x16xf32> to vector<2x16xf32>
    %692 = vector.shape_cast %691 : vector<2x16xf32> to vector<2x16x1xf32>
    %693 = math.log %692 : vector<2x16x1xf32>
    %694 = arith.addf %687, %693 : vector<2x16x1xf32>
    %695 = vector.broadcast %694 : vector<2x16x1xf32> to vector<2x16x16xf32>
    %696 = arith.subf %685, %695 : vector<2x16x16xf32>
    %cst_238 = arith.constant dense<0xFF800000> : vector<2x16xf32>
    %697 = vector.multi_reduction <maximumf>, %696, %cst_238 [1] : vector<2x16x16xf32> to vector<2x16xf32>
    %698 = vector.shape_cast %697 : vector<2x16xf32> to vector<2x1x16xf32>
    %699 = vector.broadcast %698 : vector<2x1x16xf32> to vector<2x16x16xf32>
    %700 = arith.subf %696, %699 : vector<2x16x16xf32>
    %701 = math.exp %700 : vector<2x16x16xf32>
    %cst_239 = arith.constant dense<0.000000e+00> : vector<2x16xf32>
    %702 = vector.multi_reduction <add>, %701, %cst_239 [1] : vector<2x16x16xf32> to vector<2x16xf32>
    %703 = vector.shape_cast %702 : vector<2x16xf32> to vector<2x1x16xf32>
    %704 = math.log %703 : vector<2x1x16xf32>
    %705 = arith.addf %698, %704 : vector<2x1x16xf32>
    %706 = vector.broadcast %705 : vector<2x1x16xf32> to vector<2x16x16xf32>
    %707 = arith.subf %696, %706 : vector<2x16x16xf32>
    %cst_240 = arith.constant dense<0xFF800000> : vector<2x16xf32>
    %708 = vector.multi_reduction <maximumf>, %707, %cst_240 [2] : vector<2x16x16xf32> to vector<2x16xf32>
    %709 = vector.shape_cast %708 : vector<2x16xf32> to vector<2x16x1xf32>
    %710 = vector.broadcast %709 : vector<2x16x1xf32> to vector<2x16x16xf32>
    %711 = arith.subf %707, %710 : vector<2x16x16xf32>
    %712 = math.exp %711 : vector<2x16x16xf32>
    %cst_241 = arith.constant dense<0.000000e+00> : vector<2x16xf32>
    %713 = vector.multi_reduction <add>, %712, %cst_241 [2] : vector<2x16x16xf32> to vector<2x16xf32>
    %714 = vector.shape_cast %713 : vector<2x16xf32> to vector<2x16x1xf32>
    %715 = math.log %714 : vector<2x16x1xf32>
    %716 = arith.addf %709, %715 : vector<2x16x1xf32>
    %717 = vector.broadcast %716 : vector<2x16x1xf32> to vector<2x16x16xf32>
    %718 = arith.subf %707, %717 : vector<2x16x16xf32>
    %cst_242 = arith.constant dense<0xFF800000> : vector<2x16xf32>
    %719 = vector.multi_reduction <maximumf>, %718, %cst_242 [1] : vector<2x16x16xf32> to vector<2x16xf32>
    %720 = vector.shape_cast %719 : vector<2x16xf32> to vector<2x1x16xf32>
    %721 = vector.broadcast %720 : vector<2x1x16xf32> to vector<2x16x16xf32>
    %722 = arith.subf %718, %721 : vector<2x16x16xf32>
    %723 = math.exp %722 : vector<2x16x16xf32>
    %cst_243 = arith.constant dense<0.000000e+00> : vector<2x16xf32>
    %724 = vector.multi_reduction <add>, %723, %cst_243 [1] : vector<2x16x16xf32> to vector<2x16xf32>
    %725 = vector.shape_cast %724 : vector<2x16xf32> to vector<2x1x16xf32>
    %726 = math.log %725 : vector<2x1x16xf32>
    %727 = arith.addf %720, %726 : vector<2x1x16xf32>
    %728 = vector.broadcast %727 : vector<2x1x16xf32> to vector<2x16x16xf32>
    %729 = arith.subf %718, %728 : vector<2x16x16xf32>
    %cst_244 = arith.constant dense<0xFF800000> : vector<2x16xf32>
    %730 = vector.multi_reduction <maximumf>, %729, %cst_244 [2] : vector<2x16x16xf32> to vector<2x16xf32>
    %731 = vector.shape_cast %730 : vector<2x16xf32> to vector<2x16x1xf32>
    %732 = vector.broadcast %731 : vector<2x16x1xf32> to vector<2x16x16xf32>
    %733 = arith.subf %729, %732 : vector<2x16x16xf32>
    %734 = math.exp %733 : vector<2x16x16xf32>
    %cst_245 = arith.constant dense<0.000000e+00> : vector<2x16xf32>
    %735 = vector.multi_reduction <add>, %734, %cst_245 [2] : vector<2x16x16xf32> to vector<2x16xf32>
    %736 = vector.shape_cast %735 : vector<2x16xf32> to vector<2x16x1xf32>
    %737 = math.log %736 : vector<2x16x1xf32>
    %738 = arith.addf %731, %737 : vector<2x16x1xf32>
    %739 = vector.broadcast %738 : vector<2x16x1xf32> to vector<2x16x16xf32>
    %740 = arith.subf %729, %739 : vector<2x16x16xf32>
    %cst_246 = arith.constant dense<0xFF800000> : vector<2x16xf32>
    %741 = vector.multi_reduction <maximumf>, %740, %cst_246 [1] : vector<2x16x16xf32> to vector<2x16xf32>
    %742 = vector.shape_cast %741 : vector<2x16xf32> to vector<2x1x16xf32>
    %743 = vector.broadcast %742 : vector<2x1x16xf32> to vector<2x16x16xf32>
    %744 = arith.subf %740, %743 : vector<2x16x16xf32>
    %745 = math.exp %744 : vector<2x16x16xf32>
    %cst_247 = arith.constant dense<0.000000e+00> : vector<2x16xf32>
    %746 = vector.multi_reduction <add>, %745, %cst_247 [1] : vector<2x16x16xf32> to vector<2x16xf32>
    %747 = vector.shape_cast %746 : vector<2x16xf32> to vector<2x1x16xf32>
    %748 = math.log %747 : vector<2x1x16xf32>
    %749 = arith.addf %742, %748 : vector<2x1x16xf32>
    %750 = vector.broadcast %749 : vector<2x1x16xf32> to vector<2x16x16xf32>
    %751 = arith.subf %740, %750 : vector<2x16x16xf32>
    %cst_248 = arith.constant dense<0xFF800000> : vector<2x16xf32>
    %752 = vector.multi_reduction <maximumf>, %751, %cst_248 [2] : vector<2x16x16xf32> to vector<2x16xf32>
    %753 = vector.shape_cast %752 : vector<2x16xf32> to vector<2x16x1xf32>
    %754 = vector.broadcast %753 : vector<2x16x1xf32> to vector<2x16x16xf32>
    %755 = arith.subf %751, %754 : vector<2x16x16xf32>
    %756 = math.exp %755 : vector<2x16x16xf32>
    %cst_249 = arith.constant dense<0.000000e+00> : vector<2x16xf32>
    %757 = vector.multi_reduction <add>, %756, %cst_249 [2] : vector<2x16x16xf32> to vector<2x16xf32>
    %758 = vector.shape_cast %757 : vector<2x16xf32> to vector<2x16x1xf32>
    %759 = math.log %758 : vector<2x16x1xf32>
    %760 = arith.addf %753, %759 : vector<2x16x1xf32>
    %761 = vector.broadcast %760 : vector<2x16x1xf32> to vector<2x16x16xf32>
    %762 = arith.subf %751, %761 : vector<2x16x16xf32>
    %cst_250 = arith.constant dense<0xFF800000> : vector<2x16xf32>
    %763 = vector.multi_reduction <maximumf>, %762, %cst_250 [1] : vector<2x16x16xf32> to vector<2x16xf32>
    %764 = vector.shape_cast %763 : vector<2x16xf32> to vector<2x1x16xf32>
    %765 = vector.broadcast %764 : vector<2x1x16xf32> to vector<2x16x16xf32>
    %766 = arith.subf %762, %765 : vector<2x16x16xf32>
    %767 = math.exp %766 : vector<2x16x16xf32>
    %cst_251 = arith.constant dense<0.000000e+00> : vector<2x16xf32>
    %768 = vector.multi_reduction <add>, %767, %cst_251 [1] : vector<2x16x16xf32> to vector<2x16xf32>
    %769 = vector.shape_cast %768 : vector<2x16xf32> to vector<2x1x16xf32>
    %770 = math.log %769 : vector<2x1x16xf32>
    %771 = arith.addf %764, %770 : vector<2x1x16xf32>
    %772 = vector.broadcast %771 : vector<2x1x16xf32> to vector<2x16x16xf32>
    %773 = arith.subf %762, %772 : vector<2x16x16xf32>
    %cst_252 = arith.constant dense<0xFF800000> : vector<2x16xf32>
    %774 = vector.multi_reduction <maximumf>, %773, %cst_252 [2] : vector<2x16x16xf32> to vector<2x16xf32>
    %775 = vector.shape_cast %774 : vector<2x16xf32> to vector<2x16x1xf32>
    %776 = vector.broadcast %775 : vector<2x16x1xf32> to vector<2x16x16xf32>
    %777 = arith.subf %773, %776 : vector<2x16x16xf32>
    %778 = math.exp %777 : vector<2x16x16xf32>
    %cst_253 = arith.constant dense<0.000000e+00> : vector<2x16xf32>
    %779 = vector.multi_reduction <add>, %778, %cst_253 [2] : vector<2x16x16xf32> to vector<2x16xf32>
    %780 = vector.shape_cast %779 : vector<2x16xf32> to vector<2x16x1xf32>
    %781 = math.log %780 : vector<2x16x1xf32>
    %782 = arith.addf %775, %781 : vector<2x16x1xf32>
    %783 = vector.broadcast %782 : vector<2x16x1xf32> to vector<2x16x16xf32>
    %784 = arith.subf %773, %783 : vector<2x16x16xf32>
    %cst_254 = arith.constant dense<0xFF800000> : vector<2x16xf32>
    %785 = vector.multi_reduction <maximumf>, %784, %cst_254 [1] : vector<2x16x16xf32> to vector<2x16xf32>
    %786 = vector.shape_cast %785 : vector<2x16xf32> to vector<2x1x16xf32>
    %787 = vector.broadcast %786 : vector<2x1x16xf32> to vector<2x16x16xf32>
    %788 = arith.subf %784, %787 : vector<2x16x16xf32>
    %789 = math.exp %788 : vector<2x16x16xf32>
    %cst_255 = arith.constant dense<0.000000e+00> : vector<2x16xf32>
    %790 = vector.multi_reduction <add>, %789, %cst_255 [1] : vector<2x16x16xf32> to vector<2x16xf32>
    %791 = vector.shape_cast %790 : vector<2x16xf32> to vector<2x1x16xf32>
    %792 = math.log %791 : vector<2x1x16xf32>
    %793 = arith.addf %786, %792 : vector<2x1x16xf32>
    %794 = vector.broadcast %793 : vector<2x1x16xf32> to vector<2x16x16xf32>
    %795 = arith.subf %784, %794 : vector<2x16x16xf32>
    %cst_256 = arith.constant dense<0xFF800000> : vector<2x16xf32>
    %796 = vector.multi_reduction <maximumf>, %795, %cst_256 [2] : vector<2x16x16xf32> to vector<2x16xf32>
    %797 = vector.shape_cast %796 : vector<2x16xf32> to vector<2x16x1xf32>
    %798 = vector.broadcast %797 : vector<2x16x1xf32> to vector<2x16x16xf32>
    %799 = arith.subf %795, %798 : vector<2x16x16xf32>
    %800 = math.exp %799 : vector<2x16x16xf32>
    %cst_257 = arith.constant dense<0.000000e+00> : vector<2x16xf32>
    %801 = vector.multi_reduction <add>, %800, %cst_257 [2] : vector<2x16x16xf32> to vector<2x16xf32>
    %802 = vector.shape_cast %801 : vector<2x16xf32> to vector<2x16x1xf32>
    %803 = math.log %802 : vector<2x16x1xf32>
    %804 = arith.addf %797, %803 : vector<2x16x1xf32>
    %805 = vector.broadcast %804 : vector<2x16x1xf32> to vector<2x16x16xf32>
    %806 = arith.subf %795, %805 : vector<2x16x16xf32>
    %cst_258 = arith.constant dense<0xFF800000> : vector<2x16xf32>
    %807 = vector.multi_reduction <maximumf>, %806, %cst_258 [1] : vector<2x16x16xf32> to vector<2x16xf32>
    %808 = vector.shape_cast %807 : vector<2x16xf32> to vector<2x1x16xf32>
    %809 = vector.broadcast %808 : vector<2x1x16xf32> to vector<2x16x16xf32>
    %810 = arith.subf %806, %809 : vector<2x16x16xf32>
    %811 = math.exp %810 : vector<2x16x16xf32>
    %cst_259 = arith.constant dense<0.000000e+00> : vector<2x16xf32>
    %812 = vector.multi_reduction <add>, %811, %cst_259 [1] : vector<2x16x16xf32> to vector<2x16xf32>
    %813 = vector.shape_cast %812 : vector<2x16xf32> to vector<2x1x16xf32>
    %814 = math.log %813 : vector<2x1x16xf32>
    %815 = arith.addf %808, %814 : vector<2x1x16xf32>
    %816 = vector.broadcast %815 : vector<2x1x16xf32> to vector<2x16x16xf32>
    %817 = arith.subf %806, %816 : vector<2x16x16xf32>
    %cst_260 = arith.constant dense<0xFF800000> : vector<2x16xf32>
    %818 = vector.multi_reduction <maximumf>, %817, %cst_260 [2] : vector<2x16x16xf32> to vector<2x16xf32>
    %819 = vector.shape_cast %818 : vector<2x16xf32> to vector<2x16x1xf32>
    %820 = vector.broadcast %819 : vector<2x16x1xf32> to vector<2x16x16xf32>
    %821 = arith.subf %817, %820 : vector<2x16x16xf32>
    %822 = math.exp %821 : vector<2x16x16xf32>
    %cst_261 = arith.constant dense<0.000000e+00> : vector<2x16xf32>
    %823 = vector.multi_reduction <add>, %822, %cst_261 [2] : vector<2x16x16xf32> to vector<2x16xf32>
    %824 = vector.shape_cast %823 : vector<2x16xf32> to vector<2x16x1xf32>
    %825 = math.log %824 : vector<2x16x1xf32>
    %826 = arith.addf %819, %825 : vector<2x16x1xf32>
    %827 = vector.broadcast %826 : vector<2x16x1xf32> to vector<2x16x16xf32>
    %828 = arith.subf %817, %827 : vector<2x16x16xf32>
    %cst_262 = arith.constant dense<0xFF800000> : vector<2x16xf32>
    %829 = vector.multi_reduction <maximumf>, %828, %cst_262 [1] : vector<2x16x16xf32> to vector<2x16xf32>
    %830 = vector.shape_cast %829 : vector<2x16xf32> to vector<2x1x16xf32>
    %831 = vector.broadcast %830 : vector<2x1x16xf32> to vector<2x16x16xf32>
    %832 = arith.subf %828, %831 : vector<2x16x16xf32>
    %833 = math.exp %832 : vector<2x16x16xf32>
    %cst_263 = arith.constant dense<0.000000e+00> : vector<2x16xf32>
    %834 = vector.multi_reduction <add>, %833, %cst_263 [1] : vector<2x16x16xf32> to vector<2x16xf32>
    %835 = vector.shape_cast %834 : vector<2x16xf32> to vector<2x1x16xf32>
    %836 = math.log %835 : vector<2x1x16xf32>
    %837 = arith.addf %830, %836 : vector<2x1x16xf32>
    %838 = vector.broadcast %837 : vector<2x1x16xf32> to vector<2x16x16xf32>
    %839 = arith.subf %828, %838 : vector<2x16x16xf32>
    %840 = math.exp %839 : vector<2x16x16xf32>
    %841 = vector.shape_cast %598 : vector<32x16xf32> to vector<2x16x16xf32>
    %842 = vector.shape_cast %600 : vector<32x16xf32> to vector<2x16x16xf32>
    %843 = arith.truncf %840 : vector<2x16x16xf32> to vector<2x16x16xbf16>
    %844 = arith.truncf %842 : vector<2x16x16xf32> to vector<2x16x16xbf16>
    "tpu.trace_start"() <{level = 10 : i32, message = "bqk,bkd->bqd"}> : () -> ()
    %cst_264 = arith.constant dense<0.000000e+00> : vector<2x16x16xf32>
    %845 = tpu.matmul %843, %844, %cst_264 {dimension_numbers = #tpu.dot_dimension_numbers<[2], [1], [1], [2], [0, 0, 0, 1, 1, 2], [0], [0]>} : vector<2x16x16xbf16>, vector<2x16x16xbf16>, vector<2x16x16xf32> -> vector<2x16x16xf32>
    "tpu.trace_stop"() : () -> ()
    %846 = arith.subf %841, %845 : vector<2x16x16xf32>
    %cst_265 = arith.constant 0.000000e+00 : f32
    %847 = vector.broadcast %cst_265 : f32 to vector<2x16x16xf32>
    %848 = arith.maximumf %846, %847 : vector<2x16x16xf32>
    %cst_266 = arith.constant dense<0.000000e+00> : vector<2x16xf32>
    %849 = vector.multi_reduction <add>, %848, %cst_266 [2] : vector<2x16x16xf32> to vector<2x16xf32>
    %cst_267 = arith.constant dense<0.000000e+00> : vector<2xf32>
    %850 = vector.multi_reduction <add>, %849, %cst_267 [1] : vector<2x16xf32> to vector<2xf32>
    %851 = vector.shape_cast %850 : vector<2xf32> to vector<2x1xf32>
    %cst_268 = arith.constant 0.000000e+00 : f32
    %852 = vector.broadcast %cst_268 : f32 to vector<2x1xf32>
    %853 = arith.subf %852, %851 : vector<2x1xf32>
    %c0_269 = arith.constant 0 : index
    %c0_270 = arith.constant 0 : index
    %854 = vector.load %arg35[%c0_269, %c0_270] : memref<2x1xf32, #tpu.memory_space<vmem>>, vector<2x1xf32>
    tpu.vector_store %arg35[%c0_269, %c0_270], %853 {strides = array<i32>} : memref<2x1xf32, #tpu.memory_space<vmem>>, vector<2x1xf32>,
    return
  }
}

</mosaic_0001>

<bundles_post_ra>
// kernel: run.1
= control target key start
LH: loop header
LB: loop body
LE: loop exit
PB: predicated region body
PF: predicated region fallthrough
CT: control target
= control target key end

     0   :  { %s9791_s3 = smov 11   ;;  %s9792_s10 = smov 13   ;;  %vm297_vm0 = vcmask 1043456   ;;  %vm365_vm1 = vcmask 1041408   ;;  %vm290_vm2 = vcmask 64512   ;;  %vm358_vm3 = vcmask 31744   ;;  %s11758_s0 = inlined_call_operand.smem [shape: u32[36], index: -1, kind: input, shape index: {}] }
   0x1   :  { %s7868_s6 = sld [smem:[%s11758_s0 + %s9791_s3]]   ;;  %s9793_s14 = smov 1   ;;  %vm492_vm4 = vcmask 130048   ;;  %vm566_vm5 = vcmask 261120   ;;  %vm634_vm6 = vcmask 211968   ;;  %vm641_vm7 = vcmask 1044480  }
   0x2   :  { %s1_s9 = sld [smem:[%s11758_s0]]   ;;  %s9794_s18 = smov 15   ;;  %vm923_vm8 = vcmask 523264   ;;  %vm9823_vm9 = vmmov 0   ;;  %vm7833_vm10 = vcmask 130112   ;;  %vm7844_vm11 = vcmask 1041409  }
   0x3   :  { %s7870_s13 = sld [smem:[%s11758_s0 + %s9792_s10]]   ;;  %s9795_s22 = smov 22   ;;  %vm7847_vm12 = vcmask 123904   ;;  %vm7852_vm13 = vcmask 1024  }
   0x4   :  { %s7858_s17 = sld [smem:[%s11758_s0 + %s9793_s14]]   ;;  %s9796_s26 = smov 14  }
   0x5   :  { %s9854_s21 = sld [smem:[%s11758_s0 + %s9794_s18]]   ;;  %s9797_s30 = smov 12  }
   0x6   :  { %s7879_s25 = sld [smem:[%s11758_s0 + %s9795_s22]]   ;;  %s9798_s4 = smov 18  }
   0x7   :  { %v195_v0 = vld [vmem:[%s7868_s6] sm:$0xf]  ;;  %s7871_s29 = sld [smem:[%s11758_s0 + %s9796_s26]]   ;;  %s9799_s8 = smov 17  }
   0x8   :  { %9052 = vmatprep.subr.msk.bf16.mxu0 %vm297_vm0, %v195_v0  ;;  %v299_v1 = vsel %vm297_vm0, %v195_v0, 0  ;;  %v147_v2 = vld [vmem:[%s1_s9] sm:$0xff]  ;;  %v148_v3 = vld [vmem:[%s1_s9 + $0x8] sm:$0xff]  ;;  %v149_v4 = vld [vmem:[%s1_s9 + $0x10] sm:$0xff]  ;;  %s7869_s3 = sld [smem:[%s11758_s0 + %s9797_s30]]   ;;  %s9800_s12 = smov 2  }
   0x9   :  { %8415 = vmatpush3.bf16.msra.mxu0 %v299_v1  ;;  %v282_v5 = vpack.c.bf16 %v148_v3, %v147_v2  ;;  %v150_v6 = vld [vmem:[%s1_s9 + $0x18] sm:$0x3]  ;;  %v197_v7 = vld [vmem:[%s7870_s13] sm:$0x3]  ;;  %s9879_s7 = sld [smem:[%s11758_s0 + %s9798_s4]]   ;;  %s9801_s16 = smov 3  }
   0xa   :  { %v283_v8 = vpack.c.bf16 %v150_v6, %v149_v4  ;;  %9053 = vmatprep.subr.msk.bf16.mxu1 %vm365_vm1, %v197_v7  ;;  %v367_v9 = vsel %vm365_vm1, %v197_v7, 0  ;;  %v151_v10 = vld [vmem:[%s7858_s17] sm:$0xff]  ;;  %v152_v11 = vld [vmem:[%s7858_s17 + $0x8] sm:$0xff]  ;;  %v153_v12 = vld [vmem:[%s7858_s17 + $0x10] sm:$0xff]  ;;  %s9894_s11 = sld [smem:[%s11758_s0 + %s9799_s8]]   ;;  %s9802_s20 = smov 19  }
   0xb   :  { %8416 = vmatprep.mubr.msk.bf16.mxu0 %vm290_vm2, %v282_v5  ;;  %8421 = vmatpush3.bf16.msra.mxu1 %v367_v9  ;;  %v350_v13 = vpack.c.bf16 %v152_v11, %v151_v10  ;;  %v154_v14 = vld [vmem:[%s7858_s17 + $0x18] sm:$0x3]  ;;  %v9857_v16 = vld [vmem:[%s9854_s21] sm:$0xff]   ;;  %s9908_s15 = sld [smem:[%s11758_s0 + %s9800_s12]]   ;;  %s9806_s8 = smov 27  }
   0xc   :  { %8417 = vmatmul.mubr.msk.bf16.vlgmr.msra.gmra.mxu0 %vm290_vm2, %v283_v8  ;;  %v351_v15 = vpack.c.bf16 %v154_v14, %v153_v12  ;;  %8432 = vmatprep.subr.bf16.mxu1 %v9857_v16  ;;  %v213_v17 = vld [vmem:[%s7879_s25] sm:$0xf]  ;;  %s9913_s19 = sld [smem:[%s11758_s0 + %s9801_s16]]   ;;  %s9803_s25 = smov 20  }
   0xd   :  { %8422 = vmatprep.mubr.msk.bf16.mxu1 %vm358_vm3, %v350_v13  ;;  %9054 = vmatprep.subr.msk.bf16.mxu0 %vm297_vm0, %v213_v17  ;;  %v433_v18 = vsel %vm297_vm0, %v213_v17, 0  ;;  %v7903_v22 = vld [vmem:[%s7871_s29] ss:$0 sm:$0xff]  ;;  %s9934_s24 = sld [smem:[%s11758_s0 + %s9802_s20]]   ;;  %s9804_s29 = smov 21  }
   0xe   :  { %8423 = vmatmul.mubr.msk.bf16.vlgmr.msra.gmra.mxu1 %vm358_vm3, %v351_v15  ;;  %8427 = vmatpush3.bf16.msra.mxu0 %v433_v18  ;;  %v7900_v25 = vld [vmem:[%s7869_s3] ss:$0 sm:$0xff]  ;;  %s9984_s28 = sld [smem:[%s11758_s0 + %s9803_s25]]   ;;  %s9805_s3 = smov 24  }
   0xf   :  { %8433 = vmatpush3.bf16.msra.mxu1 %v9857_v16  ;;  %v9882_v41 = vld [vmem:[%s9879_s7 + $0x8] sm:$0xff]   ;;  %v9887_v42 = vld [vmem:[%s9879_s7] sm:$0xff]   ;;  %s9989_s2 = sld [smem:[%s11758_s0 + %s9804_s29]]   ;;  %s9807_s13 = smov 23  }
  0x10   :  { %8438 = vmatprep.subr.bf16.mxu0 %v9882_v41  ;;  %v9897_v45 = vld [vmem:[%s9894_s11] ss:$0 sm:$0xff]  ;;  %s10008_s6 = sld [smem:[%s11758_s0 + %s9805_s3]]   ;;  %s9808_s18 = smov 25  }
  0x11   :  { %v9916_v58 = vld [vmem:[%s9908_s15] sm:$0xff]   ;;  %v9970_v12 = vld [vmem:[%s9908_s15 + $0x8] sm:$0x1f]   ;;  %s10032_s12 = sld [smem:[%s11758_s0 + %s9806_s8]]   ;;  %s9809_s25 = smov 4  }
  0x12   :  { %v9919_v59 = vld [vmem:[%s9913_s19] sm:$0xff]   ;;  %v9973_v13 = vld [vmem:[%s9913_s19 + $0x8] sm:$0x1f]   ;;  %s7880_s17 = sld [smem:[%s11758_s0 + %s9807_s13]]   ;;  %s9810_s30 = smov 5  }
  0x13   :  { %v9939_v1 = vld [vmem:[%s9934_s24] ss:$0 sm:$0xff]  ;;  %s10068_s23 = sld [smem:[%s11758_s0 + %s9808_s18]]   ;;  %s11760_s5 = smov 96  }
  0x14   :  { %v9992_v14 = vld [vmem:[%s9984_s28] sm:$0xff]   ;;  %s10073_s29 = sld [smem:[%s11758_s0 + %s9809_s25]]   ;;  %s9812_s8 = smov 26  }
  0x15   :  { %v9995_v15 = vld [vmem:[%s9989_s2] sm:$0xff]   ;;  %s10086_s4 = sld [smem:[%s11758_s0 + %s9810_s30]]   ;;  %s9813_s14 = smov 29  }
  0x16   :  { %s10116_s13 = sld [smem:[%s11758_s0 + %s9812_s8]]   ;;  %s9814_s20 = smov 28  }
  0x17   :  { %s10135_s18 = sld [smem:[%s11758_s0 + %s9813_s14]]   ;;  %s9815_s27 = smov 30  }
  0x18   :  { %s10146_s26 = sld [smem:[%s11758_s0 + %s9814_s20]]   ;;  %s9816_s8 = smov 16  }
  0x19   :  { %s10163_s3 = sld [smem:[%s11758_s0 + %s9815_s27]]   ;;  %s9817_s16 = smov 6  }
  0x1a   :  { %s10417_s14 = sld [smem:[%s11758_s0 + %s9816_s8]]   ;;  %s9818_s25 = smov 7  }
  0x1b   :  { %s10456_s22 = sld [smem:[%s11758_s0 + %s9817_s16]]   ;;  %s9820_s9 = smov 31  }
  0x1c   :  { %s10462_s1 = sld [smem:[%s11758_s0 + %s9818_s25]]   ;;  %s9821_s20 = smov 33  }
  0x1d   :  { %s10540_s30 = sld [smem:[%s11758_s0 + %s9821_s20]]  }
  0xcc   :  { %v8418_v19 = vpop.f32.mrf.mxu0 }
  0xcd   :  { %v344_v34 = vadd.f32 %v8418_v19, %v7900_v25 }
  0xce   :  { %v335_v20 = vpop.f32.mrf.mxu0  ;;  %v8424_v21 = vpop.f32.mrf.mxu1 }
  0xcf   :  { %v412_v28 = vadd.f32 %v8424_v21, %v7903_v22  ;;  %v336_v30 = vadd.f32 %v7900_v25, %v335_v20 }
  0xd0   :  { %v8419_v23 = vpop.f32.mrf.mxu0  ;;  %v403_v24 = vpop.f32.mrf.mxu1 }
  0xd1   :  { %v347_v26 = vadd.f32 %v8419_v23, %v7900_v25  ;;  %v404_v32 = vadd.f32 %v7903_v22, %v403_v24 }
  0xd2   :  { %v338_v27 = vpop.f32.mrf.mxu0  ;;  %v8425_v29 = vpop.f32.mrf.mxu1 }
  0xd3   :  { %v339_v31 = vadd.f32 %v7900_v25, %v338_v27  ;;  %v415_v33 = vadd.f32 %v8425_v29, %v7903_v22  ;;  %v485_v38 = vpack.c.bf16 %v347_v26, %v344_v34  ;;  %v10011_v29 = vld [vmem:[%s10008_s6 + $0x18] sm:$0xff]   ;;  %v7906_v34 = vld [vmem:[%s7880_s17] ss:$0 sm:$0xff]  ;;  %s10506_s17 = sld [smem:[%s11758_s0 + %s9820_s9]]   ;;  %s9825_s9 = smov 10  }
  0xd4   :  { %v406_v35 = vpop.f32.mrf.mxu1 }
  0xd5   :  { %v484_v36 = vpack.c.bf16 %v339_v31, %v336_v30  ;;  %v407_v37 = vadd.f32 %v7903_v22, %v406_v35  ;;  %v419_v39 = vpack.c.bf16 %v415_v33, %v412_v28  ;;  %v10016_v30 = vld [vmem:[%s10008_s6 + $0x10] sm:$0xff]   ;;  %v10021_v31 = vld [vmem:[%s10008_s6 + $0x8] sm:$0xff]   ;;  %v10036_v33 = vld [vmem:[%s10032_s12] sm:$0xff]  }
  0xd7   :  { %8434 = vmatprep.mubr.msk.bf16.mxu1 %vm492_vm4, %v484_v36  ;;  %v418_v40 = vpack.c.bf16 %v407_v37, %v404_v32  ;;  %v10026_v32 = vld [vmem:[%s10008_s6] sm:$0xff]  }
  0xd8   :  { %8435 = vmatmul.mubr.msk.bf16.vlgmr.msra.gmra.mxu1 %vm492_vm4, %v485_v38 }
  0xd9   :  { %8428 = vmatprep.mubr.msk.bf16.mxu0 %vm290_vm2, %v418_v40  ;;  %8450 = vmatprep.mubr.msk.bf16.mxu1 %vm634_vm6, %v9916_v58 }
  0xda   :  { %8429 = vmatmul.mubr.msk.bf16.vlgmr.msra.gmra.mxu0 %vm290_vm2, %v419_v39 }
  0xdb   :  { %8439 = vmatpush3.bf16.msra.mxu0 %v9882_v41 }
  0xdc   :  { %8440 = vmatprep.subr.bf16.mxu0 %v9887_v42 }
  0xdf   :  { %8441 = vmatpush3.bf16.msra.mxu0 %v9887_v42 }
 0x198   :  { %v8436_v43 = vpop.f32.mrf.mxu1 }
 0x199   :  { %v542_v49 = vadd.f32 %v8436_v43, %v9897_v45 }
 0x19a   :  { %v533_v44 = vpop.f32.mrf.mxu1  ;;  %v9925_v60 = vpop.f32.mrf.mxu0 }
 0x19b   :  { %v534_v47 = vadd.f32 %v9897_v45, %v533_v44  ;;  %v550_v55 = vmax.f32 %v542_v49, 0.0  ;;  %v10046_v38 = vadd.f32 %v9925_v60, %v7906_v34 }
 0x19c   :  { %v8437_v46 = vpop.f32.mrf.mxu1  ;;  %v9927_v61 = vpop.f32.mrf.mxu0 }
 0x19d   :  { %v545_v48 = vadd.f32 %v8437_v46, %v9897_v45  ;;  %v548_v53 = vmax.f32 %v534_v47, 0.0  ;;  %v10043_v37 = vadd.f32 %v7906_v34, %v9927_v61 }
 0x19e   :  { %v536_v50 = vpop.f32.mrf.mxu1  ;;  %v9929_v62 = vpop.f32.mrf.mxu0 }
 0x19f   :  { %v537_v51 = vadd.f32 %v9897_v45, %v536_v50  ;;  %v551_v52 = vmax.f32 %v545_v48, 0.0  ;;  %v10049_v43 = vadd.f32 %v9929_v62, %v7906_v34 }
 0x1a0   :  { %v9936_v63 = vpop.f32.mrf.mxu0 }
 0x1a1   :  { %v549_v54 = vmax.f32 %v537_v51, 0.0  ;;  %v553_v57 = vpack.c.bf16 %v551_v52, %v550_v55  ;;  %v10054_v49 = vadd.f32 %v7906_v34, %v9936_v63 }
 0x1a3   :  { %v552_v56 = vpack.c.bf16 %v549_v54, %v548_v53 }
 0x1a5   :  { %8442 = vmatprep.mubr.msk.bf16.mxu0 %vm566_vm5, %v552_v56 }
 0x1a6   :  { %8443 = vmatmul.mubr.msk.bf16.vlgmr.msra.gmra.mxu0 %vm566_vm5, %v553_v57 }
 0x1a7   :  { %8458 = vmatprep.mubr.msk.bf16.mxu0 %vm634_vm6, %v9919_v59 }
 0x266   :  { %v8444_v0 = vpop.f32.mrf.mxu0 }
 0x267   :  { %v9942_v4 = vadd.f32 %v8444_v0, %v9939_v1 }
 0x268   :  { %v607_v2 = vpop.f32.mrf.mxu0 }
 0x269   :  { %v9948_v7 = vadd.f32 %v9939_v1, %v607_v2 }
 0x26a   :  { %v8445_v3 = vpop.f32.mrf.mxu0 }
 0x26b   :  { %v9945_v5 = vadd.f32 %v8445_v3, %v9939_v1 }
 0x26c   :  { %v610_v6 = vpop.f32.mrf.mxu0 }
 0x26d   :  { %v9952_v8 = vpack.c.bf16 %v9945_v5, %v9942_v4  ;;  %v9955_v9 = vadd.f32 %v9939_v1, %v610_v6  ;;  %v10076_v6 = vld [vmem:[%s10073_s29] sm:$0xff]  }
 0x26f   :  { %v9959_v10 = vpack.c.bf16 %v9955_v9, %v9948_v7  ;;  %9055 = vmatprep.subr.msk.bf16.mxu1 %vm641_vm7, %v9952_v8  ;;  %9056 = vmatprep.subr.msk.bf16.mxu0 %vm641_vm7, %v9952_v8  ;;  %v643_v11 = vsel %vm641_vm7, %v9952_v8, 0 }
 0x270   :  { %8447 = vmatpush3.bf16.msra.mxu1 %v643_v11  ;;  %8455 = vmatpush3.bf16.msra.mxu0 %v643_v11 }
 0x271   :  { %8448 = vmatprep.subr.bf16.mxu1 %v9959_v10  ;;  %8456 = vmatprep.subr.bf16.mxu0 %v9959_v10 }
 0x274   :  { %8449 = vmatpush3.bf16.msra.mxu1 %v9959_v10  ;;  %8457 = vmatpush3.bf16.msra.mxu0 %v9959_v10 }
 0x275   :  { %8462 = vmatprep.subr.bf16.mxu1 %v9992_v14  ;;  %8468 = vmatprep.subr.bf16.mxu0 %v9995_v15 }
 0x277   :  { %8451 = vmatmul.mubr.msk.bf16.vlgmr.msra.gmra.mxu1 %vm634_vm6, %v9970_v12  ;;  %8459 = vmatmul.mubr.msk.bf16.vlgmr.msra.gmra.mxu0 %vm634_vm6, %v9973_v13 }
 0x278   :  { %8463 = vmatpush3.bf16.msra.mxu1 %v9992_v14  ;;  %8469 = vmatpush3.bf16.msra.mxu0 %v9995_v15 }
 0x279   :  { %8474 = vmatprep.subr.bf16.mxu1 %v10011_v29 }
 0x337   :  { %v8452_v17 = vpop.f32.mrf.mxu1  ;;  %v8460_v18 = vpop.f32.mrf.mxu0 }
 0x339   :  { %v679_v19 = vpop.f32.mrf.mxu1  ;;  %v744_v20 = vpop.f32.mrf.mxu0 }
 0x33b   :  { %v8453_v21 = vpop.f32.mrf.mxu1  ;;  %v8461_v22 = vpop.f32.mrf.mxu0 }
 0x33c   :  { %v760_v27 = vpack.c.bf16 %v8453_v21, %v8452_v17  ;;  %v827_v28 = vpack.c.bf16 %v8461_v22, %v8460_v18 }
 0x33d   :  { %v682_v23 = vpop.f32.mrf.mxu1  ;;  %v747_v24 = vpop.f32.mrf.mxu0 }
 0x33e   :  { %v759_v25 = vpack.c.bf16 %v682_v23, %v679_v19  ;;  %v826_v26 = vpack.c.bf16 %v747_v24, %v744_v20 }
 0x340   :  { %8464 = vmatprep.mubr.msk.bf16.mxu1 %vm492_vm4, %v759_v25  ;;  %8470 = vmatprep.mubr.msk.bf16.mxu0 %vm492_vm4, %v826_v26 }
 0x341   :  { %8465 = vmatmul.mubr.msk.bf16.vlgmr.msra.gmra.mxu1 %vm492_vm4, %v760_v27  ;;  %8471 = vmatmul.mubr.msk.bf16.vlgmr.msra.gmra.mxu0 %vm492_vm4, %v827_v28  ;;  %v10097_v27 = vld [vmem:[%s10073_s29 + $0x8] sm:$0x1f]   ;;  %v10100_v28 = vld [vmem:[%s10086_s4] sm:$0xff]  }
 0x342   :  { %8475 = vmatpush3.bf16.msra.mxu1 %v10011_v29  ;;  %8490 = vmatprep.mubr.msk.bf16.mxu0 %vm634_vm6, %v10076_v6 }
 0x343   :  { %8476 = vmatprep.subr.bf16.mxu1 %v10016_v30 }
 0x346   :  { %8477 = vmatpush3.bf16.msra.mxu1 %v10016_v30 }
 0x347   :  { %8478 = vmatprep.subr.bf16.mxu1 %v10021_v31 }
 0x34a   :  { %8479 = vmatpush3.bf16.msra.mxu1 %v10021_v31 }
 0x34b   :  { %8480 = vmatprep.subr.bf16.mxu1 %v10026_v32 }
 0x34e   :  { %8481 = vmatpush3.bf16.msra.mxu1 %v10026_v32 }
 0x34f   :  { %8502 = vmatprep.subr.bf16.mxu1 %v10036_v33 }
 0x401   :  { %v8466_v35 = vpop.f32.mrf.mxu1  ;;  %v8472_v36 = vpop.f32.mrf.mxu0 }
 0x402   :  { %v824_v46 = vadd.f32 %v8466_v35, %v10046_v38  ;;  %v10109_v35 = vld [vmem:[%s10086_s4 + $0x8] sm:$0x1f]  }
 0x403   :  { %v807_v39 = vpop.f32.mrf.mxu1  ;;  %v874_v40 = vpop.f32.mrf.mxu0 }
 0x404   :  { %v822_v44 = vadd.f32 %v807_v39, %v10043_v37  ;;  %v891_v55 = vadd.f32 %v8472_v36, %v824_v46  ;;  %v10119_v36 = vld [vmem:[%s10116_s13 + $0x8] sm:$0xff]   ;;  %v10124_v39 = vld [vmem:[%s10116_s13] sm:$0xff]  }
 0x405   :  { %v8467_v47 = vpop.f32.mrf.mxu1  ;;  %v8473_v48 = vpop.f32.mrf.mxu0 }
 0x406   :  { %v825_v50 = vadd.f32 %v8467_v47, %v10049_v43  ;;  %v889_v52 = vadd.f32 %v874_v40, %v822_v44  ;;  %v895_v0 = vmax.f32 %v891_v55, 0.0 }
 0x407   :  { %v810_v51 = vpop.f32.mrf.mxu1  ;;  %v877_v56 = vpop.f32.mrf.mxu0 }
 0x408   :  { %v892_v53 = vadd.f32 %v8473_v48, %v825_v50  ;;  %v823_v54 = vadd.f32 %v810_v51, %v10054_v49  ;;  %v893_v61 = vmax.f32 %v889_v52, 0.0 }
 0x40a   :  { %v890_v57 = vadd.f32 %v877_v56, %v823_v54  ;;  %v896_v60 = vmax.f32 %v892_v53, 0.0 }
 0x40c   :  { %v894_v62 = vmax.f32 %v890_v57, 0.0  ;;  %v898_v3 = vpack.c.bf16 %v896_v60, %v895_v0 }
 0x40e   :  { %v897_v2 = vpack.c.bf16 %v894_v62, %v893_v61  ;;  %v10138_v61 = vld [vmem:[%s10135_s18] sm:$0xff]  }
 0x410   :  { %8482 = vmatprep.mubr.msk.bf16.mxu1 %vm923_vm8, %v897_v2 }
 0x411   :  { %8483 = vmatmul.mubr.msk.bf16.vlgmr.msra.gmra.mxu1 %vm923_vm8, %v898_v3 }
 0x412   :  { %8504 = vmatprep.mubr.msk.bf16.mxu1 %vm492_vm4, %v9959_v10  ;;  %8503 = vmatpush3.bf16.msra.mxu1 %v10036_v33  ;;  %v10079_v10 = vld [vmem:[%s10068_s23] ss:$0 sm:$0xff] }
 0x413   :  { %8516 = vmatprep.subr.bf16.mxu1 %v10138_v61 }
 0x419   :  { %8505 = vmatmul.mubr.msk.bf16.vlgmr.msra.gmra.mxu1 %vm492_vm4, %v9952_v8 }
 0x41a   :  { %8517 = vmatpush3.bf16.msra.mxu1 %v10138_v61 }
 0x41b   :  { %8528 = vmatprep.subr.bf16.mxu1 %v9882_v41 }
 0x4d1   :  { %v8484_v63 = vpop.f32.mrf.mxu1 }
 0x4d2   :  { %v973_v17 = vadd.f32 %v8484_v63, %v10079_v10 }
 0x4d3   :  { %v964_v8 = vpop.f32.mrf.mxu1 }
 0x4d4   :  { %v965_v22 = vadd.f32 %v10079_v10, %v964_v8 }
 0x4d5   :  { %v8485_v11 = vpop.f32.mrf.mxu1 }
 0x4d6   :  { %v976_v18 = vadd.f32 %v8485_v11, %v10079_v10 }
 0x4d7   :  { %v967_v19 = vpop.f32.mrf.mxu1 }
 0x4d8   :  { %v980_v20 = vpack.c.bf16 %v976_v18, %v973_v17  ;;  %v968_v21 = vadd.f32 %v10079_v10, %v967_v19  ;;  %v10149_v18 = vld [vmem:[%s10146_s26] ss:$0 sm:$0xff] }
 0x4d9   :  { %v8506_v62 = vpop.f32.mrf.mxu1 }
 0x4da   :  { %995 = vrot.lane.b32.xlu0 %v980_v20, %s11760_s5  ;;  %v979_v23 = vpack.c.bf16 %v968_v21, %v965_v22  ;;  %v1073_v34 = vsel %vm641_vm7, %v980_v20, 0 }
 0x4db   :  { %v1171_v0 = vpop.f32.mrf.mxu1 }
 0x4dd   :  { %v8507_v3 = vpop.f32.mrf.mxu1 }
 0x4de   :  { %993 = vrot.lane.b32.xlu0 %v979_v23, %s11760_s5 }
 0x54c   :  { %v996_v24 = vpop.permute.xlu0 %995 }
 0x54d   :  { %9057 = vmatprep.subr.msk.bf16.mxu0 %vm641_vm7, %v996_v24  ;;  %v1005_v25 = vsel %vm641_vm7, %v996_v24, 0 }
 0x54e   :  { %8487 = vmatpush3.bf16.msra.mxu0 %v1005_v25 }
 0x550   :  { %v994_v26 = vpop.permute.xlu0 %993 }
 0x551   :  { %8488 = vmatprep.subr.bf16.mxu0 %v994_v26 }
 0x552   :  { %8489 = vmatpush3.bf16.msra.mxu0 %v994_v26 }
 0x553   :  { %9058 = vmatprep.subr.msk.bf16.mxu0 %vm641_vm7, %v980_v20  ;;  %v1174_v20 = vpop.f32.mrf.mxu1 }
 0x555   :  { %8491 = vmatmul.mubr.msk.bf16.vlgmr.msra.gmra.mxu0 %vm634_vm6, %v10097_v27 }
 0x556   :  { %8495 = vmatpush3.bf16.msra.mxu0 %v1073_v34  ;;  %8498 = vmatprep.mubr.msk.bf16.mxu0 %vm634_vm6, %v10100_v28 }
 0x557   :  { %8496 = vmatprep.subr.bf16.mxu0 %v979_v23 }
 0x55a   :  { %8497 = vmatpush3.bf16.msra.mxu0 %v979_v23 }
 0x55b   :  { %8508 = vmatprep.subr.bf16.mxu0 %v10119_v36 }
 0x55d   :  { %8499 = vmatmul.mubr.msk.bf16.vlgmr.msra.gmra.mxu0 %vm634_vm6, %v10109_v35 }
 0x55e   :  { %8509 = vmatpush3.bf16.msra.mxu0 %v10119_v36 }
 0x55f   :  { %8510 = vmatprep.subr.bf16.mxu0 %v10124_v39 }
 0x562   :  { %8511 = vmatpush3.bf16.msra.mxu0 %v10124_v39 }
 0x563   :  { %8522 = vmatprep.subr.bf16.mxu0 %v9857_v16 }
 0x615   :  { %v8492_v40 = vpop.f32.mrf.mxu0 }
 0x617   :  { %v1041_v44 = vpop.f32.mrf.mxu0 }
 0x619   :  { %v8493_v46 = vpop.f32.mrf.mxu0 }
 0x61b   :  { %v1044_v47 = vpop.f32.mrf.mxu0 }
 0x61d   :  { %v8500_v48 = vpop.f32.mrf.mxu0 }
 0x61e   :  { %v1118_v56 = vadd.f32 %v8500_v48, %v8492_v40 }
 0x61f   :  { %v1109_v50 = vpop.f32.mrf.mxu0 }
 0x620   :  { %v1110_v54 = vadd.f32 %v1109_v50, %v1041_v44 }
 0x621   :  { %v8501_v51 = vpop.f32.mrf.mxu0 }
 0x622   :  { %v1121_v52 = vadd.f32 %v8501_v51, %v8493_v46 }
 0x623   :  { %v1112_v53 = vpop.f32.mrf.mxu0 }
 0x624   :  { %v1113_v55 = vadd.f32 %v1112_v53, %v1044_v47  ;;  %v1125_v60 = vpack.c.bf16 %v1121_v52, %v1118_v56  ;;  %v10166_v52 = vld [vmem:[%s10163_s3] ss:$0 sm:$0xff] }
 0x626   :  { %v1124_v57 = vpack.c.bf16 %v1113_v55, %v1110_v54 }
 0x628   :  { %8512 = vmatprep.mubr.msk.bf16.mxu0 %vm566_vm5, %v1124_v57 }
 0x629   :  { %8513 = vmatmul.mubr.msk.bf16.vlgmr.msra.gmra.mxu0 %vm566_vm5, %v1125_v60 }
 0x62a   :  { %8523 = vmatpush3.bf16.msra.mxu0 %v9857_v16 }
 0x6e9   :  { %v8514_v2 = vpop.f32.mrf.mxu0 }
 0x6ea   :  { %v1247_v11 = vadd.f32 %v8514_v2, %v8506_v62 }
 0x6eb   :  { %v1238_v63 = vpop.f32.mrf.mxu0 }
 0x6ec   :  { %v1239_v8 = vadd.f32 %v1238_v63, %v1171_v0  ;;  %v1255_v25 = vadd.f32 %v10149_v18, %v1247_v11 }
 0x6ed   :  { %v8515_v17 = vpop.f32.mrf.mxu0 }
 0x6ee   :  { %v1250_v19 = vadd.f32 %v8515_v17, %v8507_v3  ;;  %v1253_v22 = vadd.f32 %v10149_v18, %v1239_v8  ;;  %v1259_v46 = vmax.f32 %v1255_v25, 0.0 }
 0x6ef   :  { %v1241_v21 = vpop.f32.mrf.mxu0 }
 0x6f0   :  { %v1256_v23 = vadd.f32 %v10149_v18, %v1250_v19  ;;  %v1242_v24 = vadd.f32 %v1241_v21, %v1174_v20  ;;  %v1257_v40 = vmax.f32 %v1253_v22, 0.0 }
 0x6f2   :  { %v1254_v26 = vadd.f32 %v10149_v18, %v1242_v24  ;;  %v1260_v34 = vmax.f32 %v1256_v23, 0.0 }
 0x6f4   :  { %v1258_v44 = vmax.f32 %v1254_v26, 0.0  ;;  %v1262_v48 = vpack.c.bf16 %v1260_v34, %v1259_v46 }
 0x6f6   :  { %v1261_v47 = vpack.c.bf16 %v1258_v44, %v1257_v40 }
 0x6f8   :  { %8518 = vmatprep.mubr.msk.bf16.mxu1 %vm492_vm4, %v1261_v47 }
 0x6f9   :  { %8519 = vmatmul.mubr.msk.bf16.vlgmr.msra.gmra.mxu1 %vm492_vm4, %v1262_v48 }
 0x6fa   :  { %8529 = vmatpush3.bf16.msra.mxu1 %v9882_v41 }
 0x6fb   :  { %8530 = vmatprep.subr.bf16.mxu1 %v9887_v42 }
 0x6fe   :  { %8531 = vmatpush3.bf16.msra.mxu1 %v9887_v42 }
 0x7b9   :  { %v8520_v50 = vpop.f32.mrf.mxu1 }
 0x7ba   :  { %v1318_v56 = vadd.f32 %v8520_v50, %v10166_v52 }
 0x7bb   :  { %v1309_v51 = vpop.f32.mrf.mxu1 }
 0x7bc   :  { %v1310_v54 = vadd.f32 %v10166_v52, %v1309_v51  ;;  %v10182_v3 = vadd.f32 %v1318_v56, %v9942_v4 }
 0x7bd   :  { %v8521_v53 = vpop.f32.mrf.mxu1 }
 0x7be   :  { %v1321_v55 = vadd.f32 %v8521_v53, %v10166_v52  ;;  %v10176_v0 = vadd.f32 %v1310_v54, %v9948_v7 }
 0x7bf   :  { %v1312_v57 = vpop.f32.mrf.mxu1 }
 0x7c0   :  { %v1313_v60 = vadd.f32 %v10166_v52, %v1312_v57  ;;  %v10173_v62 = vadd.f32 %v1321_v55, %v9945_v5 }
 0x7c2   :  { %v10179_v2 = vadd.f32 %v1313_v60, %v9955_v9  ;;  %v1329_v8 = vpack.c.bf16 %v10173_v62, %v10182_v3 }
 0x7c4   :  { %v1328_v63 = vpack.c.bf16 %v10179_v2, %v10176_v0 }
 0x7c6   :  { %8524 = vmatprep.mubr.msk.bf16.mxu0 %vm492_vm4, %v1328_v63 }
 0x7c7   :  { %8525 = vmatmul.mubr.msk.bf16.vlgmr.msra.gmra.mxu0 %vm492_vm4, %v1329_v8 }
 0x7c8   :  { %8540 = vmatprep.mubr.msk.bf16.mxu0 %vm634_vm6, %v9916_v58 }
 0x887   :  { %v8526_v5 = vpop.f32.mrf.mxu0 }
 0x888   :  { %v10199_v17 = vadd.f32 %v8526_v5, %v9897_v45 }
 0x889   :  { %v1370_v7 = vpop.f32.mrf.mxu0 }
 0x88a   :  { %v10193_v11 = vadd.f32 %v9897_v45, %v1370_v7  ;;  %v1387_v24 = vmax.f32 %v10199_v17, 0.0 }
 0x88b   :  { %v8527_v9 = vpop.f32.mrf.mxu0 }
 0x88c   :  { %v10196_v4 = vadd.f32 %v8527_v9, %v9897_v45  ;;  %v1385_v22 = vmax.f32 %v10193_v11, 0.0 }
 0x88d   :  { %v1373_v19 = vpop.f32.mrf.mxu0 }
 0x88e   :  { %v10202_v20 = vadd.f32 %v9897_v45, %v1373_v19  ;;  %v1388_v21 = vmax.f32 %v10196_v4, 0.0 }
 0x890   :  { %11766 = vst [vmem:[#allocation2_spill] sm:$0xff] %v10202_v20  ;;  %v1386_v23 = vmax.f32 %v10202_v20, 0.0  ;;  %v1390_v26 = vpack.c.bf16 %v1388_v21, %v1387_v24 }
 0x892   :  { %v1389_v25 = vpack.c.bf16 %v1386_v23, %v1385_v22 }
 0x894   :  { %8532 = vmatprep.mubr.msk.bf16.mxu1 %vm566_vm5, %v1389_v25 }
 0x895   :  { %8533 = vmatmul.mubr.msk.bf16.vlgmr.msra.gmra.mxu1 %vm566_vm5, %v1390_v26 }
 0x896   :  { %8548 = vmatprep.mubr.msk.bf16.mxu1 %vm634_vm6, %v9919_v59 }
 0x955   :  { %v8534_v34 = vpop.f32.mrf.mxu1 }
 0x956   :  { %v10213_v46 = vadd.f32 %v8534_v34, %v9939_v1 }
 0x957   :  { %v1431_v40 = vpop.f32.mrf.mxu1 }
 0x958   :  { %v10219_v50 = vadd.f32 %v9939_v1, %v1431_v40 }
 0x959   :  { %v8535_v44 = vpop.f32.mrf.mxu1 }
 0x95a   :  { %v10216_v47 = vadd.f32 %v8535_v44, %v9939_v1 }
 0x95b   :  { %v1434_v48 = vpop.f32.mrf.mxu1 }
 0x95c   :  { %v10223_v51 = vpack.c.bf16 %v10216_v47, %v10213_v46  ;;  %v10226_v53 = vadd.f32 %v9939_v1, %v1434_v48 }
 0x95e   :  { %v10230_v54 = vpack.c.bf16 %v10226_v53, %v10219_v50  ;;  %9059 = vmatprep.subr.msk.bf16.mxu0 %vm641_vm7, %v10223_v51  ;;  %9060 = vmatprep.subr.msk.bf16.mxu1 %vm641_vm7, %v10223_v51  ;;  %v1449_v55 = vsel %vm641_vm7, %v10223_v51, 0 }
 0x95f   :  { %8537 = vmatpush3.bf16.msra.mxu0 %v1449_v55  ;;  %8545 = vmatpush3.bf16.msra.mxu1 %v1449_v55 }
 0x960   :  { %8538 = vmatprep.subr.bf16.mxu0 %v10230_v54  ;;  %8546 = vmatprep.subr.bf16.mxu1 %v10230_v54 }
 0x963   :  { %8539 = vmatpush3.bf16.msra.mxu0 %v10230_v54  ;;  %8547 = vmatpush3.bf16.msra.mxu1 %v10230_v54 }
 0x964   :  { %8552 = vmatprep.subr.bf16.mxu0 %v9992_v14  ;;  %8558 = vmatprep.subr.bf16.mxu1 %v9995_v15 }
 0x966   :  { %8541 = vmatmul.mubr.msk.bf16.vlgmr.msra.gmra.mxu0 %vm634_vm6, %v9970_v12  ;;  %8549 = vmatmul.mubr.msk.bf16.vlgmr.msra.gmra.mxu1 %vm634_vm6, %v9973_v13 }
 0x967   :  { %8553 = vmatpush3.bf16.msra.mxu0 %v9992_v14  ;;  %8559 = vmatpush3.bf16.msra.mxu1 %v9995_v15 }
 0x968   :  { %8564 = vmatprep.subr.bf16.mxu0 %v10011_v29 }
 0xa26   :  { %v8542_v56 = vpop.f32.mrf.mxu0  ;;  %v8550_v57 = vpop.f32.mrf.mxu1 }
 0xa28   :  { %v1485_v60 = vpop.f32.mrf.mxu0  ;;  %v1534_v63 = vpop.f32.mrf.mxu1 }
 0xa2a   :  { %v8543_v8 = vpop.f32.mrf.mxu0  ;;  %v8551_v5 = vpop.f32.mrf.mxu1 }
 0xa2b   :  { %v1550_v22 = vpack.c.bf16 %v8543_v8, %v8542_v56  ;;  %v1611_v23 = vpack.c.bf16 %v8551_v5, %v8550_v57 }
 0xa2c   :  { %v1488_v7 = vpop.f32.mrf.mxu0  ;;  %v1537_v9 = vpop.f32.mrf.mxu1 }
 0xa2d   :  { %v1549_v19 = vpack.c.bf16 %v1488_v7, %v1485_v60  ;;  %v1610_v21 = vpack.c.bf16 %v1537_v9, %v1534_v63 }
 0xa2f   :  { %8554 = vmatprep.mubr.msk.bf16.mxu0 %vm492_vm4, %v1549_v19  ;;  %8560 = vmatprep.mubr.msk.bf16.mxu1 %vm492_vm4, %v1610_v21 }
 0xa30   :  { %8555 = vmatmul.mubr.msk.bf16.vlgmr.msra.gmra.mxu0 %vm492_vm4, %v1550_v22  ;;  %8561 = vmatmul.mubr.msk.bf16.vlgmr.msra.gmra.mxu1 %vm492_vm4, %v1611_v23 }
 0xa31   :  { %8565 = vmatpush3.bf16.msra.mxu0 %v10011_v29  ;;  %8580 = vmatprep.mubr.msk.bf16.mxu1 %vm634_vm6, %v10076_v6 }
 0xa32   :  { %8566 = vmatprep.subr.bf16.mxu0 %v10016_v30 }
 0xa35   :  { %8567 = vmatpush3.bf16.msra.mxu0 %v10016_v30 }
 0xa36   :  { %8568 = vmatprep.subr.bf16.mxu0 %v10021_v31 }
 0xa39   :  { %8569 = vmatpush3.bf16.msra.mxu0 %v10021_v31 }
 0xa3a   :  { %8570 = vmatprep.subr.bf16.mxu0 %v10026_v32 }
 0xa3d   :  { %8571 = vmatpush3.bf16.msra.mxu0 %v10026_v32 }
 0xa3e   :  { %8592 = vmatprep.subr.bf16.mxu0 %v10036_v33 }
 0xaf0   :  { %v8556_v24 = vpop.f32.mrf.mxu0  ;;  %v8562_v25 = vpop.f32.mrf.mxu1 }
 0xaf1   :  { %v1608_v44 = vadd.f32 %v8556_v24, %v10046_v38 }
 0xaf2   :  { %v1591_v26 = vpop.f32.mrf.mxu0  ;;  %v1652_v34 = vpop.f32.mrf.mxu1 }
 0xaf3   :  { %v1606_v40 = vadd.f32 %v1591_v26, %v10043_v37  ;;  %v1669_v5 = vadd.f32 %v8562_v25, %v1608_v44 }
 0xaf4   :  { %v8557_v48 = vpop.f32.mrf.mxu0  ;;  %v8563_v55 = vpop.f32.mrf.mxu1 }
 0xaf5   :  { %v1609_v56 = vadd.f32 %v8557_v48, %v10049_v43  ;;  %v1667_v60 = vadd.f32 %v1652_v34, %v1606_v40  ;;  %v1673_v23 = vmax.f32 %v1669_v5, 0.0 }
 0xaf6   :  { %v1594_v57 = vpop.f32.mrf.mxu0  ;;  %v1655_v7 = vpop.f32.mrf.mxu1 }
 0xaf7   :  { %v1670_v63 = vadd.f32 %v8563_v55, %v1609_v56  ;;  %v1607_v8 = vadd.f32 %v1594_v57, %v10054_v49  ;;  %v1671_v21 = vmax.f32 %v1667_v60, 0.0 }
 0xaf9   :  { %v1668_v9 = vadd.f32 %v1655_v7, %v1607_v8  ;;  %v1674_v19 = vmax.f32 %v1670_v63, 0.0 }
 0xafb   :  { %v1672_v22 = vmax.f32 %v1668_v9, 0.0  ;;  %v1676_v26 = vpack.c.bf16 %v1674_v19, %v1673_v23 }
 0xafd   :  { %v1675_v20 = vpack.c.bf16 %v1672_v22, %v1671_v21 }
 0xaff   :  { %8572 = vmatprep.mubr.msk.bf16.mxu0 %vm923_vm8, %v1675_v20 }
 0xb00   :  { %8573 = vmatmul.mubr.msk.bf16.vlgmr.msra.gmra.mxu0 %vm923_vm8, %v1676_v26 }
 0xb01   :  { %8594 = vmatprep.mubr.msk.bf16.mxu0 %vm492_vm4, %v10230_v54  ;;  %8593 = vmatpush3.bf16.msra.mxu0 %v10036_v33 }
 0xb02   :  { %8606 = vmatprep.subr.bf16.mxu0 %v10138_v61 }
 0xb08   :  { %8595 = vmatmul.mubr.msk.bf16.vlgmr.msra.gmra.mxu0 %vm492_vm4, %v10223_v51 }
 0xb09   :  { %8607 = vmatpush3.bf16.msra.mxu0 %v10138_v61 }
 0xb0a   :  { %8618 = vmatprep.subr.bf16.mxu0 %v9882_v41 }
 0xbc0   :  { %v8574_v24 = vpop.f32.mrf.mxu0 }
 0xbc1   :  { %v1726_v20 = vadd.f32 %v8574_v24, %v10079_v10 }
 0xbc2   :  { %v1717_v25 = vpop.f32.mrf.mxu0 }
 0xbc3   :  { %v1718_v55 = vadd.f32 %v10079_v10, %v1717_v25 }
 0xbc4   :  { %v8575_v34 = vpop.f32.mrf.mxu0 }
 0xbc5   :  { %v1729_v40 = vadd.f32 %v8575_v34, %v10079_v10 }
 0xbc6   :  { %v1720_v44 = vpop.f32.mrf.mxu0 }
 0xbc7   :  { %v1733_v54 = vpack.c.bf16 %v1729_v40, %v1726_v20  ;;  %v1721_v48 = vadd.f32 %v10079_v10, %v1720_v44 }
 0xbc8   :  { %v8596_v44 = vpop.f32.mrf.mxu0 }
 0xbc9   :  { %1738 = vrot.lane.b32.xlu1 %v1733_v54, %s11760_s5  ;;  %v1732_v51 = vpack.c.bf16 %v1721_v48, %v1718_v55  ;;  %v1794_v63 = vsel %vm641_vm7, %v1733_v54, 0 }
 0xbcd   :  { %1736 = vrot.lane.b32.xlu1 %v1732_v51, %s11760_s5 }
 0xc3b   :  { %v1739_v56 = vpop.permute.xlu1 %1738 }
 0xc3c   :  { %9061 = vmatprep.subr.msk.bf16.mxu1 %vm641_vm7, %v1739_v56  ;;  %v1742_v57 = vsel %vm641_vm7, %v1739_v56, 0 }
 0xc3d   :  { %8577 = vmatpush3.bf16.msra.mxu1 %v1742_v57 }
 0xc3f   :  { %v1737_v60 = vpop.permute.xlu1 %1736 }
 0xc40   :  { %8578 = vmatprep.subr.bf16.mxu1 %v1737_v60 }
 0xc41   :  { %8579 = vmatpush3.bf16.msra.mxu1 %v1737_v60 }
 0xc42   :  { %9062 = vmatprep.subr.msk.bf16.mxu1 %vm641_vm7, %v1733_v54  ;;  %v1886_v54 = vpop.f32.mrf.mxu0 }
 0xc44   :  { %8581 = vmatmul.mubr.msk.bf16.vlgmr.msra.gmra.mxu1 %vm634_vm6, %v10097_v27  ;;  %v8597_v55 = vpop.f32.mrf.mxu0 }
 0xc45   :  { %8585 = vmatpush3.bf16.msra.mxu1 %v1794_v63  ;;  %8588 = vmatprep.mubr.msk.bf16.mxu1 %vm634_vm6, %v10100_v28 }
 0xc46   :  { %8586 = vmatprep.subr.bf16.mxu1 %v1732_v51 }
 0xc49   :  { %8587 = vmatpush3.bf16.msra.mxu1 %v1732_v51 }
 0xc4a   :  { %8598 = vmatprep.subr.bf16.mxu1 %v10119_v36 }
 0xc4c   :  { %8589 = vmatmul.mubr.msk.bf16.vlgmr.msra.gmra.mxu1 %vm634_vm6, %v10109_v35 }
 0xc4d   :  { %8599 = vmatpush3.bf16.msra.mxu1 %v10119_v36 }
 0xc4e   :  { %8600 = vmatprep.subr.bf16.mxu1 %v10124_v39 }
 0xc51   :  { %8601 = vmatpush3.bf16.msra.mxu1 %v10124_v39 }
 0xc52   :  { %8612 = vmatprep.subr.bf16.mxu1 %v9857_v16 }
 0xd04   :  { %v8582_v8 = vpop.f32.mrf.mxu1 }
 0xd06   :  { %v1778_v5 = vpop.f32.mrf.mxu1 }
 0xd08   :  { %v8583_v7 = vpop.f32.mrf.mxu1 }
 0xd0a   :  { %v1781_v9 = vpop.f32.mrf.mxu1 }
 0xd0c   :  { %v8590_v19 = vpop.f32.mrf.mxu1 }
 0xd0d   :  { %v1839_v34 = vadd.f32 %v8590_v19, %v8582_v8 }
 0xd0e   :  { %v1830_v21 = vpop.f32.mrf.mxu1 }
 0xd0f   :  { %v1831_v24 = vadd.f32 %v1830_v21, %v1778_v5  ;;  %v1889_v5 = vpop.f32.mrf.mxu0 }
 0xd10   :  { %v8591_v22 = vpop.f32.mrf.mxu1 }
 0xd11   :  { %v1842_v23 = vadd.f32 %v8591_v22, %v8583_v7 }
 0xd12   :  { %v1833_v26 = vpop.f32.mrf.mxu1 }
 0xd13   :  { %v1834_v25 = vadd.f32 %v1833_v26, %v1781_v9  ;;  %v1846_v40 = vpack.c.bf16 %v1842_v23, %v1839_v34 }
 0xd15   :  { %v1845_v20 = vpack.c.bf16 %v1834_v25, %v1831_v24 }
 0xd17   :  { %8602 = vmatprep.mubr.msk.bf16.mxu1 %vm566_vm5, %v1845_v20 }
 0xd18   :  { %8603 = vmatmul.mubr.msk.bf16.vlgmr.msra.gmra.mxu1 %vm566_vm5, %v1846_v40 }
 0xd19   :  { %8613 = vmatpush3.bf16.msra.mxu1 %v9857_v16 }
 0xdd8   :  { %v8604_v48 = vpop.f32.mrf.mxu1 }
 0xdd9   :  { %v1950_v57 = vadd.f32 %v8604_v48, %v8596_v44 }
 0xdda   :  { %v1941_v51 = vpop.f32.mrf.mxu1 }
 0xddb   :  { %v1942_v56 = vadd.f32 %v1941_v51, %v1886_v54  ;;  %v1958_v21 = vadd.f32 %v10149_v18, %v1950_v57 }
 0xddc   :  { %v8605_v60 = vpop.f32.mrf.mxu1 }
 0xddd   :  { %v1953_v63 = vadd.f32 %v8605_v60, %v8597_v55  ;;  %v1956_v8 = vadd.f32 %v10149_v18, %v1942_v56  ;;  %v1962_v24 = vmax.f32 %v1958_v21, 0.0 }
 0xdde   :  { %v1944_v7 = vpop.f32.mrf.mxu1 }
 0xddf   :  { %v1959_v9 = vadd.f32 %v10149_v18, %v1953_v63  ;;  %v1945_v19 = vadd.f32 %v1944_v7, %v1889_v5  ;;  %v1960_v23 = vmax.f32 %v1956_v8, 0.0 }
 0xde1   :  { %v1957_v16 = vadd.f32 %v10149_v18, %v1945_v19  ;;  %v1963_v22 = vmax.f32 %v1959_v9, 0.0 }
 0xde3   :  { %v1961_v26 = vmax.f32 %v1957_v16, 0.0  ;;  %v1965_v34 = vpack.c.bf16 %v1963_v22, %v1962_v24 }
 0xde5   :  { %v1964_v25 = vpack.c.bf16 %v1961_v26, %v1960_v23 }
 0xde7   :  { %8608 = vmatprep.mubr.msk.bf16.mxu0 %vm492_vm4, %v1964_v25 }
 0xde8   :  { %8609 = vmatmul.mubr.msk.bf16.vlgmr.msra.gmra.mxu0 %vm492_vm4, %v1965_v34 }
 0xde9   :  { %8619 = vmatpush3.bf16.msra.mxu0 %v9882_v41 }
 0xdea   :  { %8620 = vmatprep.subr.bf16.mxu0 %v9887_v42 }
 0xded   :  { %8621 = vmatpush3.bf16.msra.mxu0 %v9887_v42 }
 0xea8   :  { %v8610_v20 = vpop.f32.mrf.mxu0 }
 0xea9   :  { %v2015_v44 = vadd.f32 %v8610_v20, %v10166_v52 }
 0xeaa   :  { %v2006_v40 = vpop.f32.mrf.mxu0 }
 0xeab   :  { %v2007_v48 = vadd.f32 %v10166_v52, %v2006_v40  ;;  %v10316_v56 = vadd.f32 %v2015_v44, %v10213_v46 }
 0xeac   :  { %v8611_v54 = vpop.f32.mrf.mxu0 }
 0xead   :  { %v2018_v55 = vadd.f32 %v8611_v54, %v10166_v52  ;;  %v10323_v42 = vadd.f32 %v2007_v48, %v10219_v50 }
 0xeae   :  { %v2009_v51 = vpop.f32.mrf.mxu0 }
 0xeaf   :  { %v10319_v57 = vadd.f32 %v2018_v55, %v10216_v47  ;;  %v2010_v41 = vadd.f32 %v10166_v52, %v2009_v51 }
 0xeb1   :  { %v10326_v60 = vadd.f32 %v2010_v41, %v10226_v53  ;;  %v9121_v63 = vpack.i.bf16 %v10319_v57, %v10316_v56  ;;  %v2026_v47 = vpack.c.bf16 %v10319_v57, %v10316_v56 }
 0xeb3   :  { %v2025_v5 = vpack.c.bf16 %v10326_v60, %v10323_v42  ;;  %v9126_v46 = vpack.i.bf16 %v10326_v60, %v10323_v42 }
 0xeb5   :  { %8614 = vmatprep.mubr.msk.bf16.mxu1 %vm492_vm4, %v2025_v5 }
 0xeb6   :  { %8615 = vmatmul.mubr.msk.bf16.vlgmr.msra.gmra.mxu1 %vm492_vm4, %v2026_v47 }
 0xeb7   :  { %8630 = vmatprep.mubr.msk.bf16.mxu1 %vm634_vm6, %v9916_v58 }
 0xf76   :  { %v8616_v50 = vpop.f32.mrf.mxu1 }
 0xf77   :  { %v2076_v19 = vadd.f32 %v8616_v50, %v9897_v45 }
 0xf78   :  { %v2067_v53 = vpop.f32.mrf.mxu1 }
 0xf79   :  { %v2068_v8 = vadd.f32 %v9897_v45, %v2067_v53  ;;  %v2084_v24 = vmax.f32 %v2076_v19, 0.0 }
 0xf7a   :  { %v8617_v7 = vpop.f32.mrf.mxu1 }
 0xf7b   :  { %v2079_v9 = vadd.f32 %v8617_v7, %v9897_v45  ;;  %v2082_v23 = vmax.f32 %v2068_v8, 0.0 }
 0xf7c   :  { %v2070_v21 = vpop.f32.mrf.mxu1 }
 0xf7d   :  { %v2071_v16 = vadd.f32 %v9897_v45, %v2070_v21  ;;  %v2085_v22 = vmax.f32 %v2079_v9, 0.0 }
 0xf7f   :  { %v2083_v26 = vmax.f32 %v2071_v16, 0.0  ;;  %v2087_v34 = vpack.c.bf16 %v2085_v22, %v2084_v24 }
 0xf81   :  { %v2086_v25 = vpack.c.bf16 %v2083_v26, %v2082_v23 }
 0xf83   :  { %8622 = vmatprep.mubr.msk.bf16.mxu0 %vm566_vm5, %v2086_v25 }
 0xf84   :  { %8623 = vmatmul.mubr.msk.bf16.vlgmr.msra.gmra.mxu0 %vm566_vm5, %v2087_v34 }
 0xf85   :  { %8638 = vmatprep.mubr.msk.bf16.mxu0 %vm634_vm6, %v9919_v59 }
0x1044   :  { %v8624_v58 = vpop.f32.mrf.mxu0 }
0x1045   :  { %v10349_v44 = vadd.f32 %v8624_v58, %v9939_v1 }
0x1046   :  { %v2128_v20 = vpop.f32.mrf.mxu0 }
0x1047   :  { %v10355_v48 = vadd.f32 %v9939_v1, %v2128_v20 }
0x1048   :  { %v8625_v40 = vpop.f32.mrf.mxu0 }
0x1049   :  { %v10352_v45 = vadd.f32 %v8625_v40, %v9939_v1 }
0x104a   :  { %v2131_v54 = vpop.f32.mrf.mxu0 }
0x104b   :  { %v10359_v55 = vpack.c.bf16 %v10352_v45, %v10349_v44  ;;  %v10362_v51 = vadd.f32 %v9939_v1, %v2131_v54 }
0x104d   :  { %v10366_v59 = vpack.c.bf16 %v10362_v51, %v10355_v48  ;;  %9063 = vmatprep.subr.msk.bf16.mxu1 %vm641_vm7, %v10359_v55  ;;  %9064 = vmatprep.subr.msk.bf16.mxu0 %vm641_vm7, %v10359_v55  ;;  %v2146_v41 = vsel %vm641_vm7, %v10359_v55, 0 }
0x104e   :  { %8627 = vmatpush3.bf16.msra.mxu1 %v2146_v41  ;;  %8635 = vmatpush3.bf16.msra.mxu0 %v2146_v41 }
0x104f   :  { %8628 = vmatprep.subr.bf16.mxu1 %v10366_v59  ;;  %8636 = vmatprep.subr.bf16.mxu0 %v10366_v59 }
0x1052   :  { %8629 = vmatpush3.bf16.msra.mxu1 %v10366_v59  ;;  %8637 = vmatpush3.bf16.msra.mxu0 %v10366_v59 }
0x1053   :  { %8642 = vmatprep.subr.bf16.mxu1 %v9992_v14  ;;  %8648 = vmatprep.subr.bf16.mxu0 %v9995_v15 }
0x1055   :  { %8631 = vmatmul.mubr.msk.bf16.vlgmr.msra.gmra.mxu1 %vm634_vm6, %v9970_v12  ;;  %8639 = vmatmul.mubr.msk.bf16.vlgmr.msra.gmra.mxu0 %vm634_vm6, %v9973_v13 }
0x1056   :  { %8643 = vmatpush3.bf16.msra.mxu1 %v9992_v14  ;;  %8649 = vmatpush3.bf16.msra.mxu0 %v9995_v15 }
0x1057   :  { %8654 = vmatprep.subr.bf16.mxu1 %v10011_v29 }
0x1115   :  { %v8632_v1 = vpop.f32.mrf.mxu1  ;;  %v8640_v5 = vpop.f32.mrf.mxu0 }
0x1117   :  { %v2182_v47 = vpop.f32.mrf.mxu1  ;;  %v2231_v50 = vpop.f32.mrf.mxu0 }
0x1119   :  { %v8633_v53 = vpop.f32.mrf.mxu1  ;;  %v8641_v7 = vpop.f32.mrf.mxu0 }
0x111a   :  { %v2247_v12 = vpack.c.bf16 %v8633_v53, %v8632_v1  ;;  %v2308_v16 = vpack.c.bf16 %v8641_v7, %v8640_v5 }
0x111b   :  { %v2185_v8 = vpop.f32.mrf.mxu1  ;;  %v2234_v9 = vpop.f32.mrf.mxu0 }
0x111c   :  { %v2246_v19 = vpack.c.bf16 %v2185_v8, %v2182_v47  ;;  %v2307_v21 = vpack.c.bf16 %v2234_v9, %v2231_v50 }
0x111e   :  { %8644 = vmatprep.mubr.msk.bf16.mxu1 %vm492_vm4, %v2246_v19  ;;  %8650 = vmatprep.mubr.msk.bf16.mxu0 %vm492_vm4, %v2307_v21 }
0x111f   :  { %8645 = vmatmul.mubr.msk.bf16.vlgmr.msra.gmra.mxu1 %vm492_vm4, %v2247_v12  ;;  %8651 = vmatmul.mubr.msk.bf16.vlgmr.msra.gmra.mxu0 %vm492_vm4, %v2308_v16 }
0x1120   :  { %8655 = vmatpush3.bf16.msra.mxu1 %v10011_v29  ;;  %8670 = vmatprep.mubr.msk.bf16.mxu0 %vm634_vm6, %v10076_v6 }
0x1121   :  { %8656 = vmatprep.subr.bf16.mxu1 %v10016_v30 }
0x1124   :  { %8657 = vmatpush3.bf16.msra.mxu1 %v10016_v30 }
0x1125   :  { %8658 = vmatprep.subr.bf16.mxu1 %v10021_v31 }
0x1128   :  { %8659 = vmatpush3.bf16.msra.mxu1 %v10021_v31 }
0x1129   :  { %8660 = vmatprep.subr.bf16.mxu1 %v10026_v32 }
0x112c   :  { %8661 = vmatpush3.bf16.msra.mxu1 %v10026_v32 }
0x112d   :  { %8682 = vmatprep.subr.bf16.mxu1 %v10036_v33 }
0x11df   :  { %v8646_v13 = vpop.f32.mrf.mxu1  ;;  %v8652_v14 = vpop.f32.mrf.mxu0 }
0x11e0   :  { %v2305_v22 = vadd.f32 %v8646_v13, %v10046_v38 }
0x11e1   :  { %v2288_v15 = vpop.f32.mrf.mxu1  ;;  %v2349_v29 = vpop.f32.mrf.mxu0 }
0x11e2   :  { %v2303_v6 = vadd.f32 %v2288_v15, %v10043_v37  ;;  %v2366_v32 = vadd.f32 %v8652_v14, %v2305_v22 }
0x11e3   :  { %v8647_v23 = vpop.f32.mrf.mxu1  ;;  %v8653_v30 = vpop.f32.mrf.mxu0 }
0x11e4   :  { %v2306_v26 = vadd.f32 %v8647_v23, %v10049_v43  ;;  %v2364_v31 = vadd.f32 %v2349_v29, %v2303_v6  ;;  %v2370_v1 = vmax.f32 %v2366_v32, 0.0 }
0x11e5   :  { %v2291_v24 = vpop.f32.mrf.mxu1  ;;  %v2352_v58 = vpop.f32.mrf.mxu0 }
0x11e6   :  { %v2367_v25 = vadd.f32 %v8653_v30, %v2306_v26  ;;  %v2304_v34 = vadd.f32 %v2291_v24, %v10054_v49  ;;  %v2368_v54 = vmax.f32 %v2364_v31, 0.0 }
0x11e8   :  { %v2365_v20 = vadd.f32 %v2352_v58, %v2304_v34  ;;  %v2371_v40 = vmax.f32 %v2367_v25, 0.0 }
0x11ea   :  { %v2369_v41 = vmax.f32 %v2365_v20, 0.0  ;;  %v2373_v47 = vpack.c.bf16 %v2371_v40, %v2370_v1 }
0x11ec   :  { %v2372_v5 = vpack.c.bf16 %v2369_v41, %v2368_v54 }
0x11ee   :  { %8662 = vmatprep.mubr.msk.bf16.mxu1 %vm923_vm8, %v2372_v5 }
0x11ef   :  { %8663 = vmatmul.mubr.msk.bf16.vlgmr.msra.gmra.mxu1 %vm923_vm8, %v2373_v47 }
0x11f0   :  { %8684 = vmatprep.mubr.msk.bf16.mxu1 %vm492_vm4, %v10366_v59  ;;  %8683 = vmatpush3.bf16.msra.mxu1 %v10036_v33 }
0x11f1   :  { %8696 = vmatprep.subr.bf16.mxu1 %v10138_v61 }
0x11f7   :  { %8685 = vmatmul.mubr.msk.bf16.vlgmr.msra.gmra.mxu1 %vm492_vm4, %v10359_v55 }
0x11f8   :  { %8697 = vmatpush3.bf16.msra.mxu1 %v10138_v61 }
0x12af   :  { %v8664_v50 = vpop.f32.mrf.mxu1 }
0x12b0   :  { %v2423_v59 = vadd.f32 %v8664_v50, %v10079_v10 }
0x12b1   :  { %v2414_v53 = vpop.f32.mrf.mxu1 }
0x12b2   :  { %v2415_v9 = vadd.f32 %v10079_v10, %v2414_v53 }
0x12b3   :  { %v8665_v7 = vpop.f32.mrf.mxu1 }
0x12b4   :  { %v2426_v33 = vadd.f32 %v8665_v7, %v10079_v10 }
0x12b5   :  { %v2417_v8 = vpop.f32.mrf.mxu1 }
0x12b6   :  { %v2430_v19 = vpack.c.bf16 %v2426_v33, %v2423_v59  ;;  %v2418_v55 = vadd.f32 %v10079_v10, %v2417_v8 }
0x12b8   :  { %v2429_v61 = vpack.c.bf16 %v2418_v55, %v2415_v9  ;;  %2435 = vrot.lane.b32.xlu0 %v2430_v19, %s11760_s5  ;;  %v2491_v56 = vsel %vm641_vm7, %v2430_v19, 0 }
0x12ba   :  { %2433 = vrot.lane.b32.xlu1 %v2429_v61, %s11760_s5  ;;  %s9826_s5 = smov 8  }
0x12bb   :  { %s7865_s25 = sld [smem:[%s11758_s0 + %s9826_s5]]  }
0x12bc   :  { %9122 = vrot.lane.b32.xlu0 %v9121_v63, %s9816_s8 }
0x12c0   :  { %9127 = vrot.lane.b32.xlu0 %v9126_v46, %s9816_s8  ;;  %s9819_s8 = smov 32  }
0x12c1   :  { %s10547_s16 = sld [smem:[%s11758_s0 + %s9819_s8]]  }
0x12c7   :  { %11767 = sst [smem:[#allocation3_spill]] %s10547_s16 }
0x132a   :  { %v2436_v21 = vpop.permute.xlu0 %2435 }
0x132b   :  { %9065 = vmatprep.subr.msk.bf16.mxu0 %vm641_vm7, %v2436_v21  ;;  %v2439_v12 = vsel %vm641_vm7, %v2436_v21, 0 }
0x132c   :  { %8667 = vmatpush3.bf16.msra.mxu0 %v2439_v12  ;;  %v2434_v10 = vpop.permute.xlu1 %2433 }
0x132d   :  { %8668 = vmatprep.subr.bf16.mxu0 %v2434_v10 }
0x1330   :  { %8669 = vmatpush3.bf16.msra.mxu0 %v2434_v10  ;;  %v9162_v10 = vld [vmem:[%s10456_s22] sm:$0xff]  }
0x1331   :  { %9066 = vmatprep.subr.msk.bf16.mxu0 %vm641_vm7, %v2430_v19 }
0x1333   :  { %8671 = vmatmul.mubr.msk.bf16.vlgmr.msra.gmra.mxu0 %vm634_vm6, %v10097_v27 }
0x1334   :  { %8675 = vmatpush3.bf16.msra.mxu0 %v2491_v56  ;;  %8678 = vmatprep.mubr.msk.bf16.mxu0 %vm634_vm6, %v10100_v28 }
0x1335   :  { %8676 = vmatprep.subr.bf16.mxu0 %v2429_v61 }
0x1338   :  { %8677 = vmatpush3.bf16.msra.mxu0 %v2429_v61 }
0x1339   :  { %8688 = vmatprep.subr.bf16.mxu0 %v10119_v36 }
0x133b   :  { %8679 = vmatmul.mubr.msk.bf16.vlgmr.msra.gmra.mxu0 %vm634_vm6, %v10109_v35 }
0x133c   :  { %8689 = vmatpush3.bf16.msra.mxu0 %v10119_v36  ;;  %v8686_v36 = vpop.f32.mrf.mxu1 }
0x133d   :  { %8690 = vmatprep.subr.bf16.mxu0 %v10124_v39 }
0x1340   :  { %8691 = vmatpush3.bf16.msra.mxu0 %v10124_v39  ;;  %v2583_v39 = vpop.f32.mrf.mxu1 }
0x1342   :  { %v8687_v23 = vpop.f32.mrf.mxu1 }
0x1344   :  { %v2586_v34 = vpop.f32.mrf.mxu1 }
0x13f3   :  { %v8672_v27 = vpop.f32.mrf.mxu0 }
0x13f5   :  { %v2475_v57 = vpop.f32.mrf.mxu0 }
0x13f7   :  { %v8673_v42 = vpop.f32.mrf.mxu0 }
0x13f9   :  { %v2478_v60 = vpop.f32.mrf.mxu0 }
0x13fb   :  { %v8680_v63 = vpop.f32.mrf.mxu0 }
0x13fc   :  { %v2536_v29 = vadd.f32 %v8680_v63, %v8672_v27 }
0x13fd   :  { %v2527_v46 = vpop.f32.mrf.mxu0 }
0x13fe   :  { %v2528_v14 = vadd.f32 %v2527_v46, %v2475_v57 }
0x13ff   :  { %v8681_v28 = vpop.f32.mrf.mxu0 }
0x1400   :  { %v2539_v16 = vadd.f32 %v8681_v28, %v8673_v42 }
0x1401   :  { %v2530_v13 = vpop.f32.mrf.mxu0 }
0x1402   :  { %v2531_v15 = vadd.f32 %v2530_v13, %v2478_v60  ;;  %v2543_v35 = vpack.c.bf16 %v2539_v16, %v2536_v29  ;;  %v9164_v60 = vld [vmem:[%s10462_s1] sm:$0xff]  }
0x1404   :  { %v2542_v6 = vpack.c.bf16 %v2531_v15, %v2528_v14 }
0x1406   :  { %8692 = vmatprep.mubr.msk.bf16.mxu0 %vm566_vm5, %v2542_v6 }
0x1407   :  { %8693 = vmatmul.mubr.msk.bf16.vlgmr.msra.gmra.mxu0 %vm566_vm5, %v2543_v35 }
0x1408   :  { %8706 = vmatprep.mubr.msk.bf16.mxu0 %vm634_vm6, %v9162_v10 }
0x14c7   :  { %v8694_v22 = vpop.f32.mrf.mxu0 }
0x14c8   :  { %v2647_v24 = vadd.f32 %v8694_v22, %v8686_v36 }
0x14c9   :  { %v2638_v30 = vpop.f32.mrf.mxu0 }
0x14ca   :  { %v2639_v26 = vadd.f32 %v2638_v30, %v2583_v39  ;;  %v2655_v54 = vadd.f32 %v10149_v18, %v2647_v24 }
0x14cb   :  { %v8695_v31 = vpop.f32.mrf.mxu0 }
0x14cc   :  { %v2650_v25 = vadd.f32 %v8695_v31, %v8687_v23  ;;  %v2653_v58 = vadd.f32 %v10149_v18, %v2639_v26  ;;  %v2659_v50 = vmax.f32 %v2655_v54, 0.0 }
0x14cd   :  { %v2641_v32 = vpop.f32.mrf.mxu0 }
0x14ce   :  { %v2656_v20 = vadd.f32 %v10149_v18, %v2650_v25  ;;  %v2642_v40 = vadd.f32 %v2641_v32, %v2586_v34  ;;  %v2657_v5 = vmax.f32 %v2653_v58, 0.0  ;;  %v9163_v25 = vld [vmem:[%s10456_s22 + $0x8] sm:$0xff]   ;;  %v9166_v34 = vld [vmem:[%s10506_s17] sm:$0xff]  }
0x14d0   :  { %v2654_v41 = vadd.f32 %v10149_v18, %v2642_v40  ;;  %v2660_v1 = vmax.f32 %v2656_v20, 0.0 }
0x14d2   :  { %v2658_v47 = vmax.f32 %v2654_v41, 0.0  ;;  %v2662_v7 = vpack.c.bf16 %v2660_v1, %v2659_v50 }
0x14d4   :  { %v2661_v53 = vpack.c.bf16 %v2658_v47, %v2657_v5 }
0x14d6   :  { %8698 = vmatprep.mubr.msk.bf16.mxu1 %vm492_vm4, %v2661_v53 }
0x14d7   :  { %8699 = vmatmul.mubr.msk.bf16.vlgmr.msra.gmra.mxu1 %vm492_vm4, %v2662_v7 }
0x14d8   :  { %8714 = vmatprep.mubr.msk.bf16.mxu1 %vm634_vm6, %v9164_v60 }
0x1597   :  { %v8700_v59 = vpop.f32.mrf.mxu1 }
0x1598   :  { %v2712_v18 = vadd.f32 %v8700_v59, %v10166_v52 }
0x1599   :  { %v2703_v33 = vpop.f32.mrf.mxu1 }
0x159a   :  { %v2704_v9 = vadd.f32 %v10166_v52, %v2703_v33  ;;  %v2720_v61 = vadd.f32 %v2712_v18, %v10349_v44 }
0x159b   :  { %v8701_v8 = vpop.f32.mrf.mxu1 }
0x159c   :  { %v2715_v19 = vadd.f32 %v8701_v8, %v10166_v52  ;;  %v2718_v56 = vadd.f32 %v2704_v9, %v10355_v48 }
0x159d   :  { %v2706_v55 = vpop.f32.mrf.mxu1 }
0x159e   :  { %v2721_v21 = vadd.f32 %v2715_v19, %v10352_v45  ;;  %v2707_v12 = vadd.f32 %v10166_v52, %v2706_v55  ;;  %v9123_v52 = vpop.permute.xlu0 %9122 }
0x159f   :  { %v9125_v45 = vunpack.i.h.bf16 %v9123_v52  ;;  %v9124_v46 = vunpack.i.l.bf16 %v9123_v52 }
0x15a0   :  { %v2898_v27 = vpack.c.bf16 %v2721_v21, %v2720_v61  ;;  %v2719_v57 = vadd.f32 %v2707_v12, %v10362_v51  ;;  %v9131_v42 = vpack.i.bf16 %v2721_v21, %v2720_v61 }
0x15a1   :  { %v2757_v13 = vsel %vm492_vm4, %v10173_v62, %v9125_v45  ;;  %v2756_v14 = vsel %vm492_vm4, %v10182_v3, %v9124_v46 }
0x15a2   :  { %v2897_v63 = vpack.c.bf16 %v2719_v57, %v2718_v56  ;;  %9132 = vrot.lane.b32.xlu1 %v9131_v42, %s9819_s8  ;;  %v9136_v44 = vpack.i.bf16 %v2719_v57, %v2718_v56  ;;  %v9128_v48 = vpop.permute.xlu0 %9127 }
0x15a3   :  { %v9130_v15 = vunpack.i.h.bf16 %v9128_v48  ;;  %v9129_v29 = vunpack.i.l.bf16 %v9128_v48 }
0x15a5   :  { %v2755_v30 = vsel %vm492_vm4, %v10179_v2, %v9130_v15  ;;  %v2754_v62 = vsel %vm492_vm4, %v10176_v0, %v9129_v29  ;;  %v9165_v2 = vld [vmem:[%s10462_s1 + $0x8] sm:$0xff]   ;;  %v2900_v0 = vsel %vm641_vm7, %v2898_v27, 0 }
0x15a6   :  { %9137 = vrot.lane.b32.xlu1 %v9136_v44, %s9819_s8  ;;  %s9824_s8 = smov 34  }
0x15a7   :  { %s10563_s27 = sld [smem:[%s11758_s0 + %s9824_s8]]  }
0x15ad   :  { %11768 = sst [smem:[#allocation4_spill]] %s10563_s27 }
0x1614   :  { %v9133_v28 = vpop.permute.xlu1 %9132 }
0x1615   :  { %v9135_v16 = vunpack.i.h.bf16 %v9133_v28  ;;  %v9134_v51 = vunpack.i.l.bf16 %v9133_v28 }
0x1617   :  { %v2761_v6 = vsel %vm566_vm5, %v2757_v13, %v9135_v16  ;;  %v2760_v35 = vsel %vm566_vm5, %v2756_v14, %v9134_v51 }
0x1618   :  { %v9138_v36 = vpop.permute.xlu1 %9137  ;;  %v2763_v39 = vpack.c.bf16 %v2761_v6, %v2760_v35 }
0x1619   :  { %v9140_v22 = vunpack.i.h.bf16 %v9138_v36  ;;  %v9139_v23 = vunpack.i.l.bf16 %v9138_v36 }
0x161a   :  { %9067 = vmatprep.subr.msk.bf16.mxu0 %vm641_vm7, %v2763_v39  ;;  %9068 = vmatprep.subr.msk.bf16.mxu1 %vm641_vm7, %v2763_v39  ;;  %v2781_v3 = vsel %vm641_vm7, %v2763_v39, 0 }
0x161b   :  { %v2759_v26 = vsel %vm566_vm5, %v2755_v30, %v9140_v22  ;;  %v2758_v24 = vsel %vm566_vm5, %v2754_v62, %v9139_v23  ;;  %8703 = vmatpush3.bf16.msra.mxu0 %v2781_v3  ;;  %8711 = vmatpush3.bf16.msra.mxu1 %v2781_v3 }
0x161c   :  { %v2762_v31 = vpack.c.bf16 %v2759_v26, %v2758_v24 }
0x161e   :  { %8704 = vmatprep.subr.bf16.mxu0 %v2762_v31  ;;  %8712 = vmatprep.subr.bf16.mxu1 %v2762_v31 }
0x161f   :  { %8705 = vmatpush3.bf16.msra.mxu0 %v2762_v31  ;;  %8713 = vmatpush3.bf16.msra.mxu1 %v2762_v31 }
0x1620   :  { %9069 = vmatprep.subr.msk.bf16.mxu0 %vm641_vm7, %v2898_v27  ;;  %9070 = vmatprep.subr.msk.bf16.mxu1 %vm641_vm7, %v2898_v27  ;;  %v9167_v27 = vld [vmem:[%s10540_s30] sm:$0xff]  }
0x1622   :  { %8707 = vmatmul.mubr.msk.bf16.vlgmr.msra.gmra.mxu0 %vm634_vm6, %v9163_v25  ;;  %8715 = vmatmul.mubr.msk.bf16.vlgmr.msra.gmra.mxu1 %vm634_vm6, %v9165_v2 }
0x1623   :  { %8719 = vmatpush3.bf16.msra.mxu0 %v2900_v0  ;;  %8727 = vmatpush3.bf16.msra.mxu1 %v2900_v0 }
0x1624   :  { %8720 = vmatprep.subr.bf16.mxu0 %v2897_v63  ;;  %8728 = vmatprep.subr.bf16.mxu1 %v2897_v63 }
0x1625   :  { %8722 = vmatprep.mubr.msk.bf16.mxu0 %vm634_vm6, %v9162_v10  ;;  %8730 = vmatprep.mubr.msk.bf16.mxu1 %vm634_vm6, %v9164_v60  ;;  %v7898_v60 = vld [vmem:[%s10547_s16] ss:$0 sm:$0xff]  ;;  %s10568_s16 = sld [smem:[%s11758_s0 + %s9825_s9]]   ;;  %s9827_s9 = smov 9  }
0x1627   :  { %8721 = vmatpush3.bf16.msra.mxu0 %v2897_v63  ;;  %8729 = vmatpush3.bf16.msra.mxu1 %v2897_v63 }
0x1628   :  { %8734 = vmatprep.subr.bf16.mxu0 %v9166_v34  ;;  %8744 = vmatprep.subr.bf16.mxu1 %v9167_v27 }
0x162a   :  { %8723 = vmatmul.mubr.msk.bf16.vlgmr.msra.gmra.mxu0 %vm634_vm6, %v9163_v25  ;;  %8731 = vmatmul.mubr.msk.bf16.vlgmr.msra.gmra.mxu1 %vm634_vm6, %v9165_v2  ;;  %v9822_v2 = vmov 0.0  }
0x162b   :  { %8735 = vmatpush3.bf16.msra.mxu0 %v9166_v34  ;;  %8745 = vmatpush3.bf16.msra.mxu1 %v9167_v27  ;;  %11769 = sst [smem:[#allocation5_spill]] %s10568_s16  ;;  %v192_v27 = vld [vmem:[%s10568_s16 + $0x28] sm:$0xff] }
0x162c   :  { %8760 = vmatprep.subr.bf16.mxu1 %v9822_v2  ;;  %8754 = vmatprep.subr.bf16.mxu0 %v9822_v2 }
0x16e2   :  { %v10509_v32 = vpop.f32.mrf.mxu0  ;;  %v10511_v58 = vpop.f32.mrf.mxu1 }
0x16e4   :  { %v10513_v20 = vpop.f32.mrf.mxu0  ;;  %v10515_v40 = vpop.f32.mrf.mxu1 }
0x16e6   :  { %v10517_v54 = vpop.f32.mrf.mxu0  ;;  %v10519_v41 = vpop.f32.mrf.mxu1 }
0x16e7   :  { %v4553_v1 = vpack.c.bf16 %v10517_v54, %v10509_v32  ;;  %v4403_v5 = vpack.c.bf16 %v10519_v41, %v10511_v58  ;;  %v9168_v32 = vld [vmem:[%s7865_s25] sm:$0xff]  }
0x16e8   :  { %v10525_v47 = vpop.f32.mrf.mxu0  ;;  %v10527_v50 = vpop.f32.mrf.mxu1 }
0x16e9   :  { %v4492_v53 = vpack.c.bf16 %v10525_v47, %v10513_v20  ;;  %v4402_v7 = vpack.c.bf16 %v10527_v50, %v10515_v40 }
0x16ea   :  { %v8724_v59 = vpop.f32.mrf.mxu0  ;;  %v8732_v33 = vpop.f32.mrf.mxu1 }
0x16ec   :  { %v2936_v18 = vpop.f32.mrf.mxu0  ;;  %v2985_v8 = vpop.f32.mrf.mxu1 }
0x16ee   :  { %v8725_v9 = vpop.f32.mrf.mxu0  ;;  %v8733_v19 = vpop.f32.mrf.mxu1 }
0x16ef   :  { %v3001_v10 = vpack.c.bf16 %v8725_v9, %v8724_v59  ;;  %v3003_v56 = vpack.c.bf16 %v8733_v19, %v8732_v33 }
0x16f0   :  { %v2939_v55 = vpop.f32.mrf.mxu0  ;;  %v2988_v61 = vpop.f32.mrf.mxu1 }
0x16f1   :  { %v3000_v21 = vpack.c.bf16 %v2939_v55, %v2936_v18  ;;  %v3002_v12 = vpack.c.bf16 %v2988_v61, %v2985_v8  ;;  %v7899_v8 = vld [vmem:[%s10563_s27] ss:$0 sm:$0xff]  ;;  %v193_v55 = vld [vmem:[%s10568_s16 + $0x30] sm:$0xff]  ;;  %v194_v61 = vld [vmem:[%s10568_s16 + $0x38] sm:$0xff]  ;;  %s10982_s27 = sld [smem:[%s11758_s0 + %s9827_s9]]  }
0x16f3   :  { %8736 = vmatprep.mubr.msk.bf16.mxu0 %vm492_vm4, %v3000_v21 }
0x16f4   :  { %8737 = vmatmul.mubr.msk.bf16.vlgmr.msra.gmra.mxu0 %vm492_vm4, %v3001_v10 }
0x16f5   :  { %8740 = vmatprep.mubr.msk.bf16.mxu0 %vm492_vm4, %v3002_v12 }
0x16f7   :  { %v9170_v20 = vld [vmem:[%s10982_s27] sm:$0xff]  }
0x16fc   :  { %8741 = vmatmul.mubr.msk.bf16.gmra.mxu0 %vm492_vm4, %v3003_v56  ;;  %v191_v56 = vld [vmem:[%s10568_s16 + $0x20] sm:$0xff] }
0x16fd   :  { %8756 = vmatprep.mubr.msk.bf16.mxu0 %vm9823_vm9, %v9822_v2 }
0x17b4   :  { %v8738_v57 = vpop.f32.mrf.mxu0 }
0x17b5   :  { %v3065_v45 = vadd.f32 %v8738_v57, %v7898_v60 }
0x17b6   :  { %v3056_v42 = vpop.f32.mrf.mxu0 }
0x17b7   :  { %v3057_v44 = vadd.f32 %v7898_v60, %v3056_v42  ;;  %v3089_v14 = vmax.f32 %v3065_v45, 0.0 }
0x17b8   :  { %v8739_v63 = vpop.f32.mrf.mxu0 }
0x17b9   :  { %v3068_v52 = vadd.f32 %v8739_v63, %v7898_v60  ;;  %v3087_v51 = vmax.f32 %v3057_v44, 0.0 }
0x17ba   :  { %v3059_v46 = vpop.f32.mrf.mxu0 }
0x17bb   :  { %v3060_v48 = vadd.f32 %v7898_v60, %v3059_v46  ;;  %v3090_v28 = vmax.f32 %v3068_v52, 0.0 }
0x17bc   :  { %v8742_v16 = vpop.f32.mrf.mxu0 }
0x17bd   :  { %v3088_v13 = vmax.f32 %v3060_v48, 0.0  ;;  %v3096_v6 = vpack.c.bf16 %v3090_v28, %v3089_v14  ;;  %v3081_v22 = vadd.f32 %v8742_v16, %v7898_v60  ;;  %v190_v48 = vld [vmem:[%s10568_s16 + $0x18] sm:$0xff]  ;;  %v189_v14 = vld [vmem:[%s10568_s16 + $0x10] sm:$0xff] }
0x17be   :  { %v3072_v15 = vpop.f32.mrf.mxu0 }
0x17bf   :  { %v3095_v29 = vpack.c.bf16 %v3088_v13, %v3087_v51  ;;  %v3073_v36 = vadd.f32 %v7898_v60, %v3072_v15  ;;  %v3093_v24 = vmax.f32 %v3081_v22, 0.0  ;;  %v188_v15 = vld [vmem:[%s10568_s16 + $0x8] sm:$0xff] }
0x17c0   :  { %v8743_v35 = vpop.f32.mrf.mxu0 }
0x17c1   :  { %v3084_v39 = vadd.f32 %v8743_v35, %v7898_v60  ;;  %8746 = vmatprep.mubr.msk.bf16.mxu1 %vm492_vm4, %v3095_v29  ;;  %v3091_v3 = vmax.f32 %v3073_v36, 0.0  ;;  %v187_v36 = vld [vmem:[%s10568_s16] sm:$0xff] }
0x17c2   :  { %v3075_v23 = vpop.f32.mrf.mxu0  ;;  %8747 = vmatmul.mubr.msk.bf16.vlgmr.msra.gmra.mxu1 %vm492_vm4, %v3096_v6 }
0x17c3   :  { %v3076_v30 = vadd.f32 %v7898_v60, %v3075_v23  ;;  %v3094_v62 = vmax.f32 %v3084_v39, 0.0 }
0x17c5   :  { %v3092_v26 = vmax.f32 %v3076_v30, 0.0  ;;  %v3098_v25 = vpack.c.bf16 %v3094_v62, %v3093_v24 }
0x17c7   :  { %v3097_v31 = vpack.c.bf16 %v3092_v26, %v3091_v3 }
0x17c9   :  { %8750 = vmatprep.mubr.msk.bf16.mxu1 %vm492_vm4, %v3097_v31 }
0x17ca   :  { %8751 = vmatmul.mubr.msk.bf16.gmra.mxu1 %vm492_vm4, %v3098_v25 }
0x17cb   :  { %8762 = vmatprep.mubr.msk.bf16.mxu1 %vm9823_vm9, %v9822_v2 }
0x1882   :  { %v8748_v0 = vpop.f32.mrf.mxu1 }
0x1883   :  { %v3160_v28 = vadd.f32 %v8748_v0, %v7899_v8 }
0x1884   :  { %v3151_v34 = vpop.f32.mrf.mxu1 }
0x1885   :  { %v3152_v29 = vadd.f32 %v7899_v8, %v3151_v34  ;;  %v3184_v39 = vmul.f32 %v3160_v28, %v189_v14 }
0x1886   :  { %v8749_v59 = vpop.f32.mrf.mxu1 }
0x1887   :  { %v3163_v44 = vadd.f32 %v8749_v59, %v7899_v8  ;;  %v3182_v23 = vmul.f32 %v3152_v29, %v187_v36 }
0x1888   :  { %v3154_v33 = vpop.f32.mrf.mxu1 }
0x1889   :  { %v3155_v16 = vadd.f32 %v7899_v8, %v3154_v33  ;;  %v3185_v6 = vmul.f32 %v3163_v44, %v190_v48 }
0x188a   :  { %v8752_v18 = vpop.f32.mrf.mxu1 }
0x188b   :  { %v3176_v19 = vadd.f32 %v8752_v18, %v7899_v8  ;;  %v3183_v22 = vmul.f32 %v3155_v16, %v188_v15  ;;  %v3191_v30 = vpack.c.bf16 %v3185_v6, %v3184_v39 }
0x188c   :  { %v3167_v9 = vpop.f32.mrf.mxu1 }
0x188d   :  { %v3168_v12 = vadd.f32 %v7899_v8, %v3167_v9  ;;  %v3188_v42 = vmul.f32 %v3176_v19, %v193_v55  ;;  %v3190_v62 = vpack.c.bf16 %v3183_v22, %v3182_v23 }
0x188e   :  { %v8753_v21 = vpop.f32.mrf.mxu1 }
0x188f   :  { %v3179_v10 = vadd.f32 %v8753_v21, %v7899_v8  ;;  %v3186_v52 = vmul.f32 %v3168_v12, %v191_v56 }
0x1890   :  { %v3170_v57 = vpop.f32.mrf.mxu1 }
0x1891   :  { %v3189_v60 = vmul.f32 %v3179_v10, %v194_v61  ;;  %v3171_v63 = vadd.f32 %v7899_v8, %v3170_v57 }
0x1893   :  { %v3193_v45 = vpack.c.bf16 %v3189_v60, %v3188_v42  ;;  %v3187_v46 = vmul.f32 %v3171_v63, %v192_v27 }
0x1895   :  { %v3192_v51 = vpack.c.bf16 %v3187_v46, %v3186_v52  ;;  %v3245_v13 = vsel %vm492_vm4, %v3193_v45, 0 }
0x1896   :  { %8761 = vmatpush3.bf16.xpose.msra.mxu1 %v3245_v13 }
0x1897   :  { %v3198_v35 = vsel %vm492_vm4, %v3192_v51, 0  ;;  %8772 = vmatprep.subr.bf16.mxu1 %v9822_v2 }
0x1898   :  { %8755 = vmatpush3.bf16.xpose.msra.mxu0 %v3198_v35 }
0x1899   :  { %8766 = vmatprep.subr.bf16.mxu0 %v9822_v2 }
0x189d   :  { %8763 = vmatmul.mubr.msk.bf16.vlgmr.msra.gmra.mxu1 %vm492_vm4, %v3191_v30 }
0x189e   :  { %8773 = vmatpush3.bf16.msra.mxu1 %v4403_v5  ;;  %8774 = vmatprep.mubr.msk.bf16.mxu1 %vm9823_vm9, %v9822_v2 }
0x189f   :  { %8757 = vmatmul.mubr.msk.bf16.vlgmr.msra.gmra.mxu0 %vm492_vm4, %v3190_v62  ;;  %8784 = vmatprep.subr.bf16.mxu1 %v9822_v2 }
0x18a0   :  { %8767 = vmatpush3.bf16.msra.mxu0 %v4402_v7  ;;  %8768 = vmatprep.mubr.msk.bf16.mxu0 %vm9823_vm9, %v9822_v2 }
0x18a1   :  { %8778 = vmatprep.subr.bf16.mxu0 %v9822_v2 }
0x195d   :  { %v3281_v3 = vpop.f32.mrf.mxu1 }
0x195e   :  { %v3290_v26 = vmul.f32 10.0, %v3281_v3 }
0x195f   :  { %v3234_v58 = vpop.f32.mrf.mxu0  ;;  %v8764_v41 = vpop.f32.mrf.mxu1 }
0x1960   :  { %v10597_v5 = vmul.f32 10.0, %v3234_v58  ;;  %v3298_v24 = vsel %vm492_vm4, %v3290_v26, -inf }
0x1961   :  { %3299 = vmax.xlane.f32.xlu0 %v3298_v24  ;;  %v8758_v31 = vpop.f32.mrf.mxu0  ;;  %v3284_v25 = vpop.f32.mrf.mxu1 }
0x1962   :  { %v3291_v0 = vmul.f32 10.0, %v3284_v25  ;;  %v3292_v59 = vsel %vm492_vm4, %v10597_v5, -inf }
0x1963   :  { %v3237_v34 = vpop.f32.mrf.mxu0  ;;  %v8765_v40 = vpop.f32.mrf.mxu1 }
0x1964   :  { %v3289_v50 = vmul.f32 10.0, %v3237_v34  ;;  %v3301_v7 = vsel %vm492_vm4, %v3291_v0, -inf }
0x1965   :  { %3302 = vmax.xlane.f32.xlu1 %v3301_v7  ;;  %3293 = vmax.xlane.f32.xlu0 %v3292_v59  ;;  %v8759_v33 = vpop.f32.mrf.mxu0 }
0x1966   :  { %v3295_v18 = vsel %vm492_vm4, %v3289_v50, -inf }
0x1969   :  { %3296 = vmax.xlane.f32.xlu0 %v3295_v18 }
0x19ea   :  { %v3300_v8 = vpop.xlane.xlu0 %3299 }
0x19eb   :  { %v3306_v9 = vsub.f32 %v3290_v26, %v3300_v8 }
0x19ed   :  { %v3312_v19 = vmul.f32 1.442695, %v3306_v9 }
0x19ee   :  { %v3303_v55 = vpop.xlane.xlu1 %3302  ;;  %v3294_v61 = vpop.xlane.xlu0 %3293 }
0x19ef   :  { %9173 = vpow2.f32 %v3312_v19  ;;  %v3307_v21 = vsub.f32 %v3291_v0, %v3303_v55  ;;  %v3304_v12 = vsub.f32 %v10597_v5, %v3294_v61 }
0x19f1   :  { %v3314_v10 = vmul.f32 1.442695, %v3307_v21  ;;  %v3308_v56 = vmul.f32 1.442695, %v3304_v12 }
0x19f2   :  { %v3297_v27 = vpop.xlane.xlu0 %3296 }
0x19f3   :  { %9175 = vpow2.f32 %v3314_v10  ;;  %v3305_v57 = vsub.f32 %v3289_v50, %v3297_v27 }
0x19f4   :  { %9177 = vpow2.f32 %v3308_v56 }
0x19f5   :  { %v3310_v42 = vmul.f32 1.442695, %v3305_v57 }
0x19f7   :  { %9179 = vpow2.f32 %v3310_v42 }
0x19fc   :  { %v9174_v60 = vpop.eup %9173 }
0x19fd   :  { %v3322_v63 = vsel %vm492_vm4, %v9174_v60, 0.0 }
0x19fe   :  { %3323 = vadd.xlane.f32.xlu1 %v3322_v63 }
0x1a00   :  { %v9176_v44 = vpop.eup %9175 }
0x1a01   :  { %v9178_v52 = vpop.eup %9177  ;;  %v3325_v45 = vsel %vm492_vm4, %v9176_v44, 0.0 }
0x1a02   :  { %v3316_v46 = vsel %vm492_vm4, %v9178_v52, 0.0  ;;  %3326 = vadd.xlane.f32.xlu0 %v3325_v45 }
0x1a03   :  { %3317 = vadd.xlane.f32.xlu1 %v3316_v46 }
0x1a04   :  { %v9180_v48 = vpop.eup %9179 }
0x1a05   :  { %v3319_v28 = vsel %vm492_vm4, %v9180_v48, 0.0 }
0x1a06   :  { %3320 = vadd.xlane.f32.xlu0 %v3319_v28 }
0x1a87   :  { %v3324_v16 = vpop.xlane.xlu1 %3323 }
0x1a88   :  { %9181 = vlog2.f32 %v3324_v16 }
0x1a8b   :  { %v3327_v51 = vpop.xlane.xlu0 %3326 }
0x1a8c   :  { %v3318_v13 = vpop.xlane.xlu1 %3317  ;;  %9183 = vlog2.f32 %v3327_v51 }
0x1a8d   :  { %9185 = vlog2.f32 %v3318_v13 }
0x1a8f   :  { %v3321_v14 = vpop.xlane.xlu0 %3320 }
0x1a90   :  { %9187 = vlog2.f32 %v3321_v14 }
0x1a95   :  { %v9182_v15 = vpop.eup %9181 }
0x1a96   :  { %v3333_v29 = vmul.f32 0.6931472, %v9182_v15 }
0x1a98   :  { %v3338_v6 = vadd.f32 %v3333_v29, %v3300_v8 }
0x1a99   :  { %v9184_v35 = vpop.eup %9183 }
0x1a9a   :  { %v9186_v36 = vpop.eup %9185  ;;  %v3335_v39 = vmul.f32 0.6931472, %v9184_v35  ;;  %v10609_v23 = vsub.f32 %v3290_v26, %v3338_v6 }
0x1a9b   :  { %v3329_v22 = vmul.f32 0.6931472, %v9186_v36 }
0x1a9c   :  { %v3339_v30 = vadd.f32 %v3335_v39, %v3303_v55  ;;  %v3353_v24 = vsel %vm492_vm4, %v10609_v23, -inf }
0x1a9d   :  { %v9188_v62 = vpop.eup %9187  ;;  %v3336_v3 = vadd.f32 %v3329_v22, %v3294_v61 }
0x1a9e   :  { %v10611_v58 = vsub.f32 %v3291_v0, %v3339_v30  ;;  %v3331_v41 = vmul.f32 0.6931472, %v9188_v62 }
0x1a9f   :  { %v10616_v31 = vsub.f32 %v10597_v5, %v3336_v3 }
0x1aa0   :  { %v3354_v25 = vsel %vm492_vm4, %v10611_v58, -inf  ;;  %v3337_v34 = vadd.f32 %v3331_v41, %v3297_v27 }
0x1aa1   :  { %v3355_v40 = vmax.f32 %v3353_v24, %v3354_v25  ;;  %v3344_v59 = vsel %vm492_vm4, %v10616_v31, -inf }
0x1aa2   :  { %v10620_v7 = vsub.f32 %v3289_v50, %v3337_v34 }
0x1aa3   :  { %v3356_v26 = vrot.slane %v3355_v40, 4 }
0x1aa4   :  { %v3345_v0 = vsel %vm492_vm4, %v10620_v7, -inf }
0x1aa5   :  { %v3346_v33 = vmax.f32 %v3344_v59, %v3345_v0  ;;  %v3357_v18 = vmax.f32 %v3355_v40, %v3356_v26 }
0x1aa7   :  { %v3347_v8 = vrot.slane %v3346_v33, 4  ;;  %v3358_v9 = vrot.slane %v3357_v18, 2 }
0x1aa9   :  { %v3359_v5 = vmax.f32 %v3357_v18, %v3358_v9  ;;  %v3348_v19 = vmax.f32 %v3346_v33, %v3347_v8 }
0x1aab   :  { %v3360_v55 = vrot.slane %v3359_v5, 1  ;;  %v3349_v61 = vrot.slane %v3348_v19, 2 }
0x1aad   :  { %v3361_v21 = vmax.f32 %v3359_v5, %v3360_v55  ;;  %v3350_v12 = vmax.f32 %v3348_v19, %v3349_v61 }
0x1aaf   :  { %v3364_v50 = vsub.f32 %v10609_v23, %v3361_v21  ;;  %v3365_v10 = vsub.f32 %v10611_v58, %v3361_v21  ;;  %v3351_v56 = vrot.slane %v3350_v12, 1 }
0x1ab1   :  { %v3370_v27 = vmul.f32 1.442695, %v3364_v50  ;;  %v3372_v57 = vmul.f32 1.442695, %v3365_v10  ;;  %v3352_v42 = vmax.f32 %v3350_v12, %v3351_v56 }
0x1ab3   :  { %9189 = vpow2.f32 %v3370_v27  ;;  %v3362_v60 = vsub.f32 %v10616_v31, %v3352_v42  ;;  %v3363_v63 = vsub.f32 %v10620_v7, %v3352_v42 }
0x1ab4   :  { %9191 = vpow2.f32 %v3372_v57 }
0x1ab5   :  { %v3366_v44 = vmul.f32 1.442695, %v3362_v60  ;;  %v3368_v52 = vmul.f32 1.442695, %v3363_v63 }
0x1ab7   :  { %9193 = vpow2.f32 %v3366_v44 }
0x1ab8   :  { %9195 = vpow2.f32 %v3368_v52 }
0x1ac0   :  { %v9190_v45 = vpop.eup %9189 }
0x1ac1   :  { %v9192_v46 = vpop.eup %9191  ;;  %v3383_v48 = vsel %vm492_vm4, %v9190_v45, 0.0 }
0x1ac2   :  { %v3384_v28 = vsel %vm492_vm4, %v9192_v46, 0.0 }
0x1ac3   :  { %v3385_v16 = vadd.f32 %v3384_v28, %v3383_v48 }
0x1ac4   :  { %v9194_v51 = vpop.eup %9193 }
0x1ac5   :  { %v9196_v13 = vpop.eup %9195  ;;  %v3386_v14 = vrot.slane %v3385_v16, 4  ;;  %v3374_v15 = vsel %vm492_vm4, %v9194_v51, 0.0 }
0x1ac6   :  { %v3375_v29 = vsel %vm492_vm4, %v9196_v13, 0.0 }
0x1ac7   :  { %v3387_v6 = vadd.f32 %v3386_v14, %v3385_v16  ;;  %v3376_v35 = vadd.f32 %v3375_v29, %v3374_v15 }
0x1ac9   :  { %v3388_v36 = vrot.slane %v3387_v6, 2  ;;  %v3377_v39 = vrot.slane %v3376_v35, 4 }
0x1acb   :  { %v3389_v22 = vadd.f32 %v3388_v36, %v3387_v6  ;;  %v3378_v30 = vadd.f32 %v3377_v39, %v3376_v35 }
0x1acd   :  { %v3390_v62 = vrot.slane %v3389_v22, 1  ;;  %v3379_v3 = vrot.slane %v3378_v30, 2 }
0x1acf   :  { %v3391_v41 = vadd.f32 %v3390_v62, %v3389_v22  ;;  %v3380_v24 = vadd.f32 %v3379_v3, %v3378_v30 }
0x1ad1   :  { %9197 = vlog2.f32 %v3391_v41  ;;  %v3381_v25 = vrot.slane %v3380_v24, 1 }
0x1ad3   :  { %v3382_v34 = vadd.f32 %v3381_v25, %v3380_v24 }
0x1ad5   :  { %9199 = vlog2.f32 %v3382_v34 }
0x1ade   :  { %v9198_v40 = vpop.eup %9197 }
0x1adf   :  { %v3395_v26 = vmul.f32 0.6931472, %v9198_v40 }
0x1ae1   :  { %v3397_v59 = vadd.f32 %v3395_v26, %v3361_v21 }
0x1ae2   :  { %v9200_v0 = vpop.eup %9199 }
0x1ae3   :  { %v3401_v33 = vsub.f32 %v10611_v58, %v3397_v59  ;;  %v3400_v18 = vsub.f32 %v10609_v23, %v3397_v59  ;;  %v3393_v8 = vmul.f32 0.6931472, %v9200_v0 }
0x1ae5   :  { %v3411_v9 = vsel %vm492_vm4, %v3401_v33, -inf  ;;  %v3408_v5 = vsel %vm492_vm4, %v3400_v18, -inf  ;;  %v3396_v19 = vadd.f32 %v3393_v8, %v3352_v42 }
0x1ae6   :  { %3412 = vmax.xlane.f32.xlu0 %v3411_v9  ;;  %3409 = vmax.xlane.f32.xlu1 %v3408_v5 }
0x1ae7   :  { %v3399_v55 = vsub.f32 %v10620_v7, %v3396_v19  ;;  %v3398_v61 = vsub.f32 %v10616_v31, %v3396_v19 }
0x1ae9   :  { %v3405_v12 = vsel %vm492_vm4, %v3399_v55, -inf  ;;  %v3402_v21 = vsel %vm492_vm4, %v3398_v61, -inf }
0x1aea   :  { %3406 = vmax.xlane.f32.xlu0 %v3405_v12  ;;  %3403 = vmax.xlane.f32.xlu1 %v3402_v21 }
0x1b6f   :  { %v3410_v58 = vpop.xlane.xlu1 %3409  ;;  %v3413_v23 = vpop.xlane.xlu0 %3412 }
0x1b70   :  { %v3416_v50 = vsub.f32 %v3400_v18, %v3410_v58  ;;  %v3417_v10 = vsub.f32 %v3401_v33, %v3413_v23 }
0x1b72   :  { %v3422_v56 = vmul.f32 1.442695, %v3416_v50  ;;  %v3424_v27 = vmul.f32 1.442695, %v3417_v10 }
0x1b73   :  { %v3404_v57 = vpop.xlane.xlu1 %3403  ;;  %v3407_v42 = vpop.xlane.xlu0 %3406 }
0x1b74   :  { %9201 = vpow2.f32 %v3422_v56  ;;  %v3414_v60 = vsub.f32 %v3398_v61, %v3404_v57  ;;  %v3415_v63 = vsub.f32 %v3399_v55, %v3407_v42 }
0x1b75   :  { %9203 = vpow2.f32 %v3424_v27 }
0x1b76   :  { %v3418_v7 = vmul.f32 1.442695, %v3414_v60  ;;  %v3420_v31 = vmul.f32 1.442695, %v3415_v63 }
0x1b78   :  { %9205 = vpow2.f32 %v3418_v7 }
0x1b79   :  { %9207 = vpow2.f32 %v3420_v31 }
0x1b81   :  { %v9202_v44 = vpop.eup %9201 }
0x1b82   :  { %v9204_v52 = vpop.eup %9203  ;;  %v3432_v45 = vsel %vm492_vm4, %v9202_v44, 0.0 }
0x1b83   :  { %3433 = vadd.xlane.f32.xlu1 %v3432_v45  ;;  %v3435_v46 = vsel %vm492_vm4, %v9204_v52, 0.0 }
0x1b84   :  { %3436 = vadd.xlane.f32.xlu0 %v3435_v46 }
0x1b85   :  { %v9206_v48 = vpop.eup %9205 }
0x1b86   :  { %v9208_v28 = vpop.eup %9207  ;;  %v3426_v16 = vsel %vm492_vm4, %v9206_v48, 0.0 }
0x1b87   :  { %3427 = vadd.xlane.f32.xlu1 %v3426_v16  ;;  %v3429_v51 = vsel %vm492_vm4, %v9208_v28, 0.0 }
0x1b88   :  { %3430 = vadd.xlane.f32.xlu0 %v3429_v51 }
0x1c0c   :  { %v3434_v13 = vpop.xlane.xlu1 %3433 }
0x1c0d   :  { %9209 = vlog2.f32 %v3434_v13  ;;  %v3437_v14 = vpop.xlane.xlu0 %3436 }
0x1c0e   :  { %9211 = vlog2.f32 %v3437_v14 }
0x1c10   :  { %v3428_v15 = vpop.xlane.xlu1 %3427 }
0x1c11   :  { %9213 = vlog2.f32 %v3428_v15  ;;  %v3431_v29 = vpop.xlane.xlu0 %3430 }
0x1c12   :  { %9215 = vlog2.f32 %v3431_v29 }
0x1c1a   :  { %v9210_v6 = vpop.eup %9209 }
0x1c1b   :  { %v9212_v35 = vpop.eup %9211  ;;  %v3443_v36 = vmul.f32 0.6931472, %v9210_v6 }
0x1c1c   :  { %v3445_v39 = vmul.f32 0.6931472, %v9212_v35 }
0x1c1d   :  { %v3448_v22 = vadd.f32 %v3443_v36, %v3410_v58 }
0x1c1e   :  { %v9214_v30 = vpop.eup %9213  ;;  %v3449_v62 = vadd.f32 %v3445_v39, %v3413_v23 }
0x1c1f   :  { %v9216_v3 = vpop.eup %9215  ;;  %v10646_v41 = vsub.f32 %v3400_v18, %v3448_v22  ;;  %v3439_v24 = vmul.f32 0.6931472, %v9214_v30 }
0x1c20   :  { %v10648_v25 = vsub.f32 %v3401_v33, %v3449_v62  ;;  %v3441_v34 = vmul.f32 0.6931472, %v9216_v3 }
0x1c21   :  { %v3463_v40 = vsel %vm492_vm4, %v10646_v41, -inf  ;;  %v3446_v26 = vadd.f32 %v3439_v24, %v3404_v57 }
0x1c22   :  { %v3464_v59 = vsel %vm492_vm4, %v10648_v25, -inf  ;;  %v3447_v0 = vadd.f32 %v3441_v34, %v3407_v42 }
0x1c23   :  { %v3465_v8 = vmax.f32 %v3463_v40, %v3464_v59  ;;  %v10654_v9 = vsub.f32 %v3398_v61, %v3446_v26 }
0x1c24   :  { %v10656_v5 = vsub.f32 %v3399_v55, %v3447_v0 }
0x1c25   :  { %v3466_v19 = vrot.slane %v3465_v8, 4  ;;  %v3454_v18 = vsel %vm492_vm4, %v10654_v9, -inf }
0x1c26   :  { %v3455_v33 = vsel %vm492_vm4, %v10656_v5, -inf }
0x1c27   :  { %v3456_v12 = vmax.f32 %v3454_v18, %v3455_v33  ;;  %v3467_v21 = vmax.f32 %v3465_v8, %v3466_v19 }
0x1c29   :  { %v3457_v58 = vrot.slane %v3456_v12, 4  ;;  %v3468_v23 = vrot.slane %v3467_v21, 2 }
0x1c2b   :  { %v3469_v50 = vmax.f32 %v3467_v21, %v3468_v23  ;;  %v3458_v10 = vmax.f32 %v3456_v12, %v3457_v58 }
0x1c2d   :  { %v3470_v56 = vrot.slane %v3469_v50, 1  ;;  %v3459_v27 = vrot.slane %v3458_v10, 2 }
0x1c2f   :  { %v3471_v57 = vmax.f32 %v3469_v50, %v3470_v56  ;;  %v3460_v61 = vmax.f32 %v3458_v10, %v3459_v27 }
0x1c31   :  { %v3474_v55 = vsub.f32 %v10646_v41, %v3471_v57  ;;  %v3475_v42 = vsub.f32 %v10648_v25, %v3471_v57  ;;  %v3461_v60 = vrot.slane %v3460_v61, 1 }
0x1c33   :  { %v3480_v63 = vmul.f32 1.442695, %v3474_v55  ;;  %v3482_v7 = vmul.f32 1.442695, %v3475_v42  ;;  %v3462_v31 = vmax.f32 %v3460_v61, %v3461_v60 }
0x1c35   :  { %9217 = vpow2.f32 %v3480_v63  ;;  %v3472_v44 = vsub.f32 %v10654_v9, %v3462_v31  ;;  %v3473_v52 = vsub.f32 %v10656_v5, %v3462_v31 }
0x1c36   :  { %9219 = vpow2.f32 %v3482_v7 }
0x1c37   :  { %v3476_v45 = vmul.f32 1.442695, %v3472_v44  ;;  %v3478_v46 = vmul.f32 1.442695, %v3473_v52 }
0x1c39   :  { %9221 = vpow2.f32 %v3476_v45 }
0x1c3a   :  { %9223 = vpow2.f32 %v3478_v46 }
0x1c42   :  { %v9218_v48 = vpop.eup %9217 }
0x1c43   :  { %v9220_v28 = vpop.eup %9219  ;;  %v3493_v16 = vsel %vm492_vm4, %v9218_v48, 0.0 }
0x1c44   :  { %v3494_v51 = vsel %vm492_vm4, %v9220_v28, 0.0 }
0x1c45   :  { %v3495_v13 = vadd.f32 %v3494_v51, %v3493_v16 }
0x1c46   :  { %v9222_v14 = vpop.eup %9221 }
0x1c47   :  { %v9224_v15 = vpop.eup %9223  ;;  %v3496_v29 = vrot.slane %v3495_v13, 4  ;;  %v3484_v6 = vsel %vm492_vm4, %v9222_v14, 0.0 }
0x1c48   :  { %v3485_v35 = vsel %vm492_vm4, %v9224_v15, 0.0 }
0x1c49   :  { %v3497_v36 = vadd.f32 %v3496_v29, %v3495_v13  ;;  %v3486_v39 = vadd.f32 %v3485_v35, %v3484_v6 }
0x1c4b   :  { %v3498_v22 = vrot.slane %v3497_v36, 2  ;;  %v3487_v30 = vrot.slane %v3486_v39, 4 }
0x1c4d   :  { %v3499_v62 = vadd.f32 %v3498_v22, %v3497_v36  ;;  %v3488_v3 = vadd.f32 %v3487_v30, %v3486_v39 }
0x1c4f   :  { %v3500_v24 = vrot.slane %v3499_v62, 1  ;;  %v3489_v34 = vrot.slane %v3488_v3, 2 }
0x1c51   :  { %v3501_v40 = vadd.f32 %v3500_v24, %v3499_v62  ;;  %v3490_v26 = vadd.f32 %v3489_v34, %v3488_v3 }
0x1c53   :  { %9225 = vlog2.f32 %v3501_v40  ;;  %v3491_v59 = vrot.slane %v3490_v26, 1 }
0x1c55   :  { %v3492_v0 = vadd.f32 %v3491_v59, %v3490_v26 }
0x1c57   :  { %9227 = vlog2.f32 %v3492_v0 }
0x1c60   :  { %v9226_v8 = vpop.eup %9225 }
0x1c61   :  { %v3505_v19 = vmul.f32 0.6931472, %v9226_v8 }
0x1c63   :  { %v3507_v18 = vadd.f32 %v3505_v19, %v3471_v57 }
0x1c64   :  { %v9228_v33 = vpop.eup %9227 }
0x1c65   :  { %v3511_v12 = vsub.f32 %v10648_v25, %v3507_v18  ;;  %v3510_v21 = vsub.f32 %v10646_v41, %v3507_v18  ;;  %v3503_v58 = vmul.f32 0.6931472, %v9228_v33 }
0x1c67   :  { %v3521_v23 = vsel %vm492_vm4, %v3511_v12, -inf  ;;  %v3518_v50 = vsel %vm492_vm4, %v3510_v21, -inf  ;;  %v3506_v10 = vadd.f32 %v3503_v58, %v3462_v31 }
0x1c68   :  { %3522 = vmax.xlane.f32.xlu0 %v3521_v23  ;;  %3519 = vmax.xlane.f32.xlu1 %v3518_v50 }
0x1c69   :  { %v3509_v56 = vsub.f32 %v10656_v5, %v3506_v10  ;;  %v3508_v27 = vsub.f32 %v10654_v9, %v3506_v10 }
0x1c6b   :  { %v3515_v61 = vsel %vm492_vm4, %v3509_v56, -inf  ;;  %v3512_v57 = vsel %vm492_vm4, %v3508_v27, -inf }
0x1c6c   :  { %3516 = vmax.xlane.f32.xlu0 %v3515_v61  ;;  %3513 = vmax.xlane.f32.xlu1 %v3512_v57 }
0x1cf1   :  { %v3520_v25 = vpop.xlane.xlu1 %3519  ;;  %v3523_v41 = vpop.xlane.xlu0 %3522 }
0x1cf2   :  { %v3526_v55 = vsub.f32 %v3510_v21, %v3520_v25  ;;  %v3527_v42 = vsub.f32 %v3511_v12, %v3523_v41 }
0x1cf4   :  { %v3532_v60 = vmul.f32 1.442695, %v3526_v55  ;;  %v3534_v63 = vmul.f32 1.442695, %v3527_v42 }
0x1cf5   :  { %v3514_v7 = vpop.xlane.xlu1 %3513  ;;  %v3517_v31 = vpop.xlane.xlu0 %3516 }
0x1cf6   :  { %9229 = vpow2.f32 %v3532_v60  ;;  %v3524_v44 = vsub.f32 %v3508_v27, %v3514_v7  ;;  %v3525_v52 = vsub.f32 %v3509_v56, %v3517_v31 }
0x1cf7   :  { %9231 = vpow2.f32 %v3534_v63 }
0x1cf8   :  { %v3528_v5 = vmul.f32 1.442695, %v3524_v44  ;;  %v3530_v9 = vmul.f32 1.442695, %v3525_v52 }
0x1cfa   :  { %9233 = vpow2.f32 %v3528_v5 }
0x1cfb   :  { %9235 = vpow2.f32 %v3530_v9 }
0x1d03   :  { %v9230_v45 = vpop.eup %9229 }
0x1d04   :  { %v9232_v46 = vpop.eup %9231  ;;  %v3542_v48 = vsel %vm492_vm4, %v9230_v45, 0.0 }
0x1d05   :  { %3543 = vadd.xlane.f32.xlu1 %v3542_v48  ;;  %v3545_v28 = vsel %vm492_vm4, %v9232_v46, 0.0 }
0x1d06   :  { %3546 = vadd.xlane.f32.xlu0 %v3545_v28 }
0x1d07   :  { %v9234_v16 = vpop.eup %9233 }
0x1d08   :  { %v9236_v51 = vpop.eup %9235  ;;  %v3536_v13 = vsel %vm492_vm4, %v9234_v16, 0.0 }
0x1d09   :  { %3537 = vadd.xlane.f32.xlu1 %v3536_v13  ;;  %v3539_v14 = vsel %vm492_vm4, %v9236_v51, 0.0 }
0x1d0a   :  { %3540 = vadd.xlane.f32.xlu0 %v3539_v14 }
0x1d8e   :  { %v3544_v15 = vpop.xlane.xlu1 %3543 }
0x1d8f   :  { %9237 = vlog2.f32 %v3544_v15  ;;  %v3547_v29 = vpop.xlane.xlu0 %3546 }
0x1d90   :  { %9239 = vlog2.f32 %v3547_v29 }
0x1d92   :  { %v3538_v6 = vpop.xlane.xlu1 %3537 }
0x1d93   :  { %9241 = vlog2.f32 %v3538_v6  ;;  %v3541_v35 = vpop.xlane.xlu0 %3540 }
0x1d94   :  { %9243 = vlog2.f32 %v3541_v35 }
0x1d9c   :  { %v9238_v36 = vpop.eup %9237 }
0x1d9d   :  { %v9240_v39 = vpop.eup %9239  ;;  %v3553_v22 = vmul.f32 0.6931472, %v9238_v36 }
0x1d9e   :  { %v3555_v30 = vmul.f32 0.6931472, %v9240_v39 }
0x1d9f   :  { %v3558_v62 = vadd.f32 %v3553_v22, %v3520_v25 }
0x1da0   :  { %v9242_v3 = vpop.eup %9241  ;;  %v3559_v24 = vadd.f32 %v3555_v30, %v3523_v41 }
0x1da1   :  { %v9244_v34 = vpop.eup %9243  ;;  %v10682_v40 = vsub.f32 %v3510_v21, %v3558_v62  ;;  %v3549_v26 = vmul.f32 0.6931472, %v9242_v3 }
0x1da2   :  { %v10684_v59 = vsub.f32 %v3511_v12, %v3559_v24  ;;  %v3551_v0 = vmul.f32 0.6931472, %v9244_v34 }
0x1da3   :  { %v3573_v8 = vsel %vm492_vm4, %v10682_v40, -inf  ;;  %v3556_v19 = vadd.f32 %v3549_v26, %v3514_v7 }
0x1da4   :  { %v3574_v18 = vsel %vm492_vm4, %v10684_v59, -inf  ;;  %v3557_v33 = vadd.f32 %v3551_v0, %v3517_v31 }
0x1da5   :  { %v3575_v58 = vmax.f32 %v3573_v8, %v3574_v18  ;;  %v10690_v23 = vsub.f32 %v3508_v27, %v3556_v19 }
0x1da6   :  { %v10692_v50 = vsub.f32 %v3509_v56, %v3557_v33 }
0x1da7   :  { %v3576_v10 = vrot.slane %v3575_v58, 4  ;;  %v3564_v21 = vsel %vm492_vm4, %v10690_v23, -inf }
0x1da8   :  { %v3565_v12 = vsel %vm492_vm4, %v10692_v50, -inf }
0x1da9   :  { %v3566_v61 = vmax.f32 %v3564_v21, %v3565_v12  ;;  %v3577_v57 = vmax.f32 %v3575_v58, %v3576_v10 }
0x1dab   :  { %v3567_v25 = vrot.slane %v3566_v61, 4  ;;  %v3578_v41 = vrot.slane %v3577_v57, 2 }
0x1dad   :  { %v3579_v55 = vmax.f32 %v3577_v57, %v3578_v41  ;;  %v3568_v42 = vmax.f32 %v3566_v61, %v3567_v25 }
0x1daf   :  { %v3580_v60 = vrot.slane %v3579_v55, 1  ;;  %v3569_v63 = vrot.slane %v3568_v42, 2 }
0x1db1   :  { %v3581_v7 = vmax.f32 %v3579_v55, %v3580_v60  ;;  %v3570_v27 = vmax.f32 %v3568_v42, %v3569_v63 }
0x1db3   :  { %v3584_v56 = vsub.f32 %v10682_v40, %v3581_v7  ;;  %v3585_v31 = vsub.f32 %v10684_v59, %v3581_v7  ;;  %v3571_v44 = vrot.slane %v3570_v27, 1 }
0x1db5   :  { %v3590_v52 = vmul.f32 1.442695, %v3584_v56  ;;  %v3592_v5 = vmul.f32 1.442695, %v3585_v31  ;;  %v3572_v9 = vmax.f32 %v3570_v27, %v3571_v44 }
0x1db7   :  { %9245 = vpow2.f32 %v3590_v52  ;;  %v3582_v45 = vsub.f32 %v10690_v23, %v3572_v9  ;;  %v3583_v46 = vsub.f32 %v10692_v50, %v3572_v9 }
0x1db8   :  { %9247 = vpow2.f32 %v3592_v5 }
0x1db9   :  { %v3586_v48 = vmul.f32 1.442695, %v3582_v45  ;;  %v3588_v28 = vmul.f32 1.442695, %v3583_v46 }
0x1dbb   :  { %9249 = vpow2.f32 %v3586_v48 }
0x1dbc   :  { %9251 = vpow2.f32 %v3588_v28 }
0x1dc4   :  { %v9246_v16 = vpop.eup %9245 }
0x1dc5   :  { %v9248_v51 = vpop.eup %9247  ;;  %v3603_v13 = vsel %vm492_vm4, %v9246_v16, 0.0 }
0x1dc6   :  { %v3604_v14 = vsel %vm492_vm4, %v9248_v51, 0.0 }
0x1dc7   :  { %v3605_v15 = vadd.f32 %v3604_v14, %v3603_v13 }
0x1dc8   :  { %v9250_v29 = vpop.eup %9249 }
0x1dc9   :  { %v9252_v6 = vpop.eup %9251  ;;  %v3606_v35 = vrot.slane %v3605_v15, 4  ;;  %v3594_v36 = vsel %vm492_vm4, %v9250_v29, 0.0 }
0x1dca   :  { %v3595_v39 = vsel %vm492_vm4, %v9252_v6, 0.0 }
0x1dcb   :  { %v3607_v22 = vadd.f32 %v3606_v35, %v3605_v15  ;;  %v3596_v30 = vadd.f32 %v3595_v39, %v3594_v36 }
0x1dcd   :  { %v3608_v62 = vrot.slane %v3607_v22, 2  ;;  %v3597_v3 = vrot.slane %v3596_v30, 4 }
0x1dcf   :  { %v3609_v24 = vadd.f32 %v3608_v62, %v3607_v22  ;;  %v3598_v34 = vadd.f32 %v3597_v3, %v3596_v30 }
0x1dd1   :  { %v3610_v26 = vrot.slane %v3609_v24, 1  ;;  %v3599_v0 = vrot.slane %v3598_v34, 2 }
0x1dd3   :  { %v3611_v8 = vadd.f32 %v3610_v26, %v3609_v24  ;;  %v3600_v19 = vadd.f32 %v3599_v0, %v3598_v34 }
0x1dd5   :  { %9253 = vlog2.f32 %v3611_v8  ;;  %v3601_v18 = vrot.slane %v3600_v19, 1 }
0x1dd7   :  { %v3602_v33 = vadd.f32 %v3601_v18, %v3600_v19 }
0x1dd9   :  { %9255 = vlog2.f32 %v3602_v33 }
0x1de2   :  { %v9254_v58 = vpop.eup %9253 }
0x1de3   :  { %v3615_v10 = vmul.f32 0.6931472, %v9254_v58 }
0x1de5   :  { %v3617_v21 = vadd.f32 %v3615_v10, %v3581_v7 }
0x1de6   :  { %v9256_v12 = vpop.eup %9255 }
0x1de7   :  { %v3621_v61 = vsub.f32 %v10684_v59, %v3617_v21  ;;  %v3620_v57 = vsub.f32 %v10682_v40, %v3617_v21  ;;  %v3613_v25 = vmul.f32 0.6931472, %v9256_v12 }
0x1de9   :  { %v3631_v41 = vsel %vm492_vm4, %v3621_v61, -inf  ;;  %v3628_v55 = vsel %vm492_vm4, %v3620_v57, -inf  ;;  %v3616_v42 = vadd.f32 %v3613_v25, %v3572_v9 }
0x1dea   :  { %3632 = vmax.xlane.f32.xlu0 %v3631_v41  ;;  %3629 = vmax.xlane.f32.xlu1 %v3628_v55 }
0x1deb   :  { %v3619_v60 = vsub.f32 %v10692_v50, %v3616_v42  ;;  %v3618_v63 = vsub.f32 %v10690_v23, %v3616_v42 }
0x1ded   :  { %v3625_v27 = vsel %vm492_vm4, %v3619_v60, -inf  ;;  %v3622_v7 = vsel %vm492_vm4, %v3618_v63, -inf }
0x1dee   :  { %3626 = vmax.xlane.f32.xlu0 %v3625_v27  ;;  %3623 = vmax.xlane.f32.xlu1 %v3622_v7 }
0x1e73   :  { %v3630_v59 = vpop.xlane.xlu1 %3629  ;;  %v3633_v40 = vpop.xlane.xlu0 %3632 }
0x1e74   :  { %v3636_v56 = vsub.f32 %v3620_v57, %v3630_v59  ;;  %v3637_v31 = vsub.f32 %v3621_v61, %v3633_v40 }
0x1e76   :  { %v3642_v44 = vmul.f32 1.442695, %v3636_v56  ;;  %v3644_v52 = vmul.f32 1.442695, %v3637_v31 }
0x1e77   :  { %v3624_v5 = vpop.xlane.xlu1 %3623  ;;  %v3627_v9 = vpop.xlane.xlu0 %3626 }
0x1e78   :  { %9257 = vpow2.f32 %v3642_v44  ;;  %v3634_v45 = vsub.f32 %v3618_v63, %v3624_v5  ;;  %v3635_v46 = vsub.f32 %v3619_v60, %v3627_v9 }
0x1e79   :  { %9259 = vpow2.f32 %v3644_v52 }
0x1e7a   :  { %v3638_v50 = vmul.f32 1.442695, %v3634_v45  ;;  %v3640_v23 = vmul.f32 1.442695, %v3635_v46 }
0x1e7c   :  { %9261 = vpow2.f32 %v3638_v50 }
0x1e7d   :  { %9263 = vpow2.f32 %v3640_v23 }
0x1e85   :  { %v9258_v48 = vpop.eup %9257 }
0x1e86   :  { %v9260_v28 = vpop.eup %9259  ;;  %v3652_v16 = vsel %vm492_vm4, %v9258_v48, 0.0 }
0x1e87   :  { %3653 = vadd.xlane.f32.xlu1 %v3652_v16  ;;  %v3655_v51 = vsel %vm492_vm4, %v9260_v28, 0.0 }
0x1e88   :  { %3656 = vadd.xlane.f32.xlu0 %v3655_v51 }
0x1e89   :  { %v9262_v13 = vpop.eup %9261 }
0x1e8a   :  { %v9264_v14 = vpop.eup %9263  ;;  %v3646_v15 = vsel %vm492_vm4, %v9262_v13, 0.0 }
0x1e8b   :  { %3647 = vadd.xlane.f32.xlu1 %v3646_v15  ;;  %v3649_v29 = vsel %vm492_vm4, %v9264_v14, 0.0 }
0x1e8c   :  { %3650 = vadd.xlane.f32.xlu0 %v3649_v29 }
0x1f10   :  { %v3654_v6 = vpop.xlane.xlu1 %3653 }
0x1f11   :  { %9265 = vlog2.f32 %v3654_v6  ;;  %v3657_v35 = vpop.xlane.xlu0 %3656 }
0x1f12   :  { %9267 = vlog2.f32 %v3657_v35 }
0x1f14   :  { %v3648_v36 = vpop.xlane.xlu1 %3647 }
0x1f15   :  { %9269 = vlog2.f32 %v3648_v36  ;;  %v3651_v39 = vpop.xlane.xlu0 %3650 }
0x1f16   :  { %9271 = vlog2.f32 %v3651_v39 }
0x1f1e   :  { %v9266_v22 = vpop.eup %9265 }
0x1f1f   :  { %v9268_v30 = vpop.eup %9267  ;;  %v3663_v62 = vmul.f32 0.6931472, %v9266_v22 }
0x1f20   :  { %v3665_v3 = vmul.f32 0.6931472, %v9268_v30 }
0x1f21   :  { %v3668_v24 = vadd.f32 %v3663_v62, %v3630_v59 }
0x1f22   :  { %v9270_v34 = vpop.eup %9269  ;;  %v3669_v26 = vadd.f32 %v3665_v3, %v3633_v40 }
0x1f23   :  { %v9272_v0 = vpop.eup %9271  ;;  %v10718_v8 = vsub.f32 %v3620_v57, %v3668_v24  ;;  %v3659_v19 = vmul.f32 0.6931472, %v9270_v34 }
0x1f24   :  { %v10720_v18 = vsub.f32 %v3621_v61, %v3669_v26  ;;  %v3661_v33 = vmul.f32 0.6931472, %v9272_v0 }
0x1f25   :  { %v3683_v58 = vsel %vm492_vm4, %v10718_v8, -inf  ;;  %v3666_v10 = vadd.f32 %v3659_v19, %v3624_v5 }
0x1f26   :  { %v3684_v21 = vsel %vm492_vm4, %v10720_v18, -inf  ;;  %v3667_v12 = vadd.f32 %v3661_v33, %v3627_v9 }
0x1f27   :  { %v3685_v25 = vmax.f32 %v3683_v58, %v3684_v21  ;;  %v10726_v41 = vsub.f32 %v3618_v63, %v3666_v10 }
0x1f28   :  { %v10728_v55 = vsub.f32 %v3619_v60, %v3667_v12 }
0x1f29   :  { %v3686_v42 = vrot.slane %v3685_v25, 4  ;;  %v3674_v57 = vsel %vm492_vm4, %v10726_v41, -inf }
0x1f2a   :  { %v3675_v61 = vsel %vm492_vm4, %v10728_v55, -inf }
0x1f2b   :  { %v3676_v27 = vmax.f32 %v3674_v57, %v3675_v61  ;;  %v3687_v7 = vmax.f32 %v3685_v25, %v3686_v42 }
0x1f2d   :  { %v3677_v59 = vrot.slane %v3676_v27, 4  ;;  %v3688_v40 = vrot.slane %v3687_v7, 2 }
0x1f2f   :  { %v3689_v56 = vmax.f32 %v3687_v7, %v3688_v40  ;;  %v3678_v31 = vmax.f32 %v3676_v27, %v3677_v59 }
0x1f31   :  { %v3690_v44 = vrot.slane %v3689_v56, 1  ;;  %v3679_v52 = vrot.slane %v3678_v31, 2 }
0x1f33   :  { %v3691_v5 = vmax.f32 %v3689_v56, %v3690_v44  ;;  %v3680_v63 = vmax.f32 %v3678_v31, %v3679_v52 }
0x1f35   :  { %v3694_v60 = vsub.f32 %v10718_v8, %v3691_v5  ;;  %v3695_v9 = vsub.f32 %v10720_v18, %v3691_v5  ;;  %v3681_v45 = vrot.slane %v3680_v63, 1 }
0x1f37   :  { %v3700_v46 = vmul.f32 1.442695, %v3694_v60  ;;  %v3702_v50 = vmul.f32 1.442695, %v3695_v9  ;;  %v3682_v23 = vmax.f32 %v3680_v63, %v3681_v45 }
0x1f39   :  { %9273 = vpow2.f32 %v3700_v46  ;;  %v3692_v48 = vsub.f32 %v10726_v41, %v3682_v23  ;;  %v3693_v28 = vsub.f32 %v10728_v55, %v3682_v23 }
0x1f3a   :  { %9275 = vpow2.f32 %v3702_v50 }
0x1f3b   :  { %v3696_v16 = vmul.f32 1.442695, %v3692_v48  ;;  %v3698_v51 = vmul.f32 1.442695, %v3693_v28 }
0x1f3d   :  { %9277 = vpow2.f32 %v3696_v16 }
0x1f3e   :  { %9279 = vpow2.f32 %v3698_v51 }
0x1f46   :  { %v9274_v13 = vpop.eup %9273 }
0x1f47   :  { %v9276_v14 = vpop.eup %9275  ;;  %v3713_v15 = vsel %vm492_vm4, %v9274_v13, 0.0 }
0x1f48   :  { %v3714_v29 = vsel %vm492_vm4, %v9276_v14, 0.0 }
0x1f49   :  { %v3715_v6 = vadd.f32 %v3714_v29, %v3713_v15 }
0x1f4a   :  { %v9278_v35 = vpop.eup %9277 }
0x1f4b   :  { %v9280_v36 = vpop.eup %9279  ;;  %v3716_v39 = vrot.slane %v3715_v6, 4  ;;  %v3704_v22 = vsel %vm492_vm4, %v9278_v35, 0.0 }
0x1f4c   :  { %v3705_v30 = vsel %vm492_vm4, %v9280_v36, 0.0 }
0x1f4d   :  { %v3717_v62 = vadd.f32 %v3716_v39, %v3715_v6  ;;  %v3706_v3 = vadd.f32 %v3705_v30, %v3704_v22 }
0x1f4f   :  { %v3718_v24 = vrot.slane %v3717_v62, 2  ;;  %v3707_v34 = vrot.slane %v3706_v3, 4 }
0x1f51   :  { %v3719_v26 = vadd.f32 %v3718_v24, %v3717_v62  ;;  %v3708_v0 = vadd.f32 %v3707_v34, %v3706_v3 }
0x1f53   :  { %v3720_v19 = vrot.slane %v3719_v26, 1  ;;  %v3709_v33 = vrot.slane %v3708_v0, 2 }
0x1f55   :  { %v3721_v58 = vadd.f32 %v3720_v19, %v3719_v26  ;;  %v3710_v10 = vadd.f32 %v3709_v33, %v3708_v0 }
0x1f57   :  { %9281 = vlog2.f32 %v3721_v58  ;;  %v3711_v21 = vrot.slane %v3710_v10, 1 }
0x1f59   :  { %v3712_v12 = vadd.f32 %v3711_v21, %v3710_v10 }
0x1f5b   :  { %9283 = vlog2.f32 %v3712_v12 }
0x1f64   :  { %v9282_v25 = vpop.eup %9281 }
0x1f65   :  { %v3725_v42 = vmul.f32 0.6931472, %v9282_v25 }
0x1f67   :  { %v3727_v57 = vadd.f32 %v3725_v42, %v3691_v5 }
0x1f68   :  { %v9284_v61 = vpop.eup %9283 }
0x1f69   :  { %v3731_v27 = vsub.f32 %v10720_v18, %v3727_v57  ;;  %v3730_v7 = vsub.f32 %v10718_v8, %v3727_v57  ;;  %v3723_v59 = vmul.f32 0.6931472, %v9284_v61 }
0x1f6b   :  { %v3741_v40 = vsel %vm492_vm4, %v3731_v27, -inf  ;;  %v3738_v56 = vsel %vm492_vm4, %v3730_v7, -inf  ;;  %v3726_v31 = vadd.f32 %v3723_v59, %v3682_v23 }
0x1f6c   :  { %3742 = vmax.xlane.f32.xlu0 %v3741_v40  ;;  %3739 = vmax.xlane.f32.xlu1 %v3738_v56 }
0x1f6d   :  { %v3729_v44 = vsub.f32 %v10728_v55, %v3726_v31  ;;  %v3728_v52 = vsub.f32 %v10726_v41, %v3726_v31 }
0x1f6f   :  { %v3735_v63 = vsel %vm492_vm4, %v3729_v44, -inf  ;;  %v3732_v5 = vsel %vm492_vm4, %v3728_v52, -inf }
0x1f70   :  { %3736 = vmax.xlane.f32.xlu0 %v3735_v63  ;;  %3733 = vmax.xlane.f32.xlu1 %v3732_v5 }
0x1ff5   :  { %v3740_v18 = vpop.xlane.xlu1 %3739  ;;  %v3743_v8 = vpop.xlane.xlu0 %3742 }
0x1ff6   :  { %v3746_v60 = vsub.f32 %v3730_v7, %v3740_v18  ;;  %v3747_v9 = vsub.f32 %v3731_v27, %v3743_v8 }
0x1ff8   :  { %v3752_v45 = vmul.f32 1.442695, %v3746_v60  ;;  %v3754_v46 = vmul.f32 1.442695, %v3747_v9 }
0x1ff9   :  { %v3734_v50 = vpop.xlane.xlu1 %3733  ;;  %v3737_v23 = vpop.xlane.xlu0 %3736 }
0x1ffa   :  { %9285 = vpow2.f32 %v3752_v45  ;;  %v3744_v48 = vsub.f32 %v3728_v52, %v3734_v50  ;;  %v3745_v28 = vsub.f32 %v3729_v44, %v3737_v23 }
0x1ffb   :  { %9287 = vpow2.f32 %v3754_v46 }
0x1ffc   :  { %v3748_v55 = vmul.f32 1.442695, %v3744_v48  ;;  %v3750_v41 = vmul.f32 1.442695, %v3745_v28 }
0x1ffe   :  { %9289 = vpow2.f32 %v3748_v55 }
0x1fff   :  { %9291 = vpow2.f32 %v3750_v41 }
0x2007   :  { %v9286_v16 = vpop.eup %9285 }
0x2008   :  { %v9288_v51 = vpop.eup %9287  ;;  %v3762_v13 = vsel %vm492_vm4, %v9286_v16, 0.0 }
0x2009   :  { %3763 = vadd.xlane.f32.xlu1 %v3762_v13  ;;  %v3765_v14 = vsel %vm492_vm4, %v9288_v51, 0.0 }
0x200a   :  { %3766 = vadd.xlane.f32.xlu0 %v3765_v14 }
0x200b   :  { %v9290_v15 = vpop.eup %9289 }
0x200c   :  { %v9292_v29 = vpop.eup %9291  ;;  %v3756_v6 = vsel %vm492_vm4, %v9290_v15, 0.0 }
0x200d   :  { %3757 = vadd.xlane.f32.xlu1 %v3756_v6  ;;  %v3759_v35 = vsel %vm492_vm4, %v9292_v29, 0.0 }
0x200e   :  { %3760 = vadd.xlane.f32.xlu0 %v3759_v35 }
0x2092   :  { %v3764_v36 = vpop.xlane.xlu1 %3763 }
0x2093   :  { %9293 = vlog2.f32 %v3764_v36  ;;  %v3767_v39 = vpop.xlane.xlu0 %3766 }
0x2094   :  { %9295 = vlog2.f32 %v3767_v39 }
0x2096   :  { %v3758_v22 = vpop.xlane.xlu1 %3757 }
0x2097   :  { %9297 = vlog2.f32 %v3758_v22  ;;  %v3761_v30 = vpop.xlane.xlu0 %3760 }
0x2098   :  { %9299 = vlog2.f32 %v3761_v30 }
0x20a0   :  { %v9294_v62 = vpop.eup %9293 }
0x20a1   :  { %v9296_v3 = vpop.eup %9295  ;;  %v3773_v24 = vmul.f32 0.6931472, %v9294_v62 }
0x20a2   :  { %v3775_v34 = vmul.f32 0.6931472, %v9296_v3 }
0x20a3   :  { %v3778_v26 = vadd.f32 %v3773_v24, %v3740_v18 }
0x20a4   :  { %v9298_v0 = vpop.eup %9297  ;;  %v3779_v19 = vadd.f32 %v3775_v34, %v3743_v8 }
0x20a5   :  { %v9300_v33 = vpop.eup %9299  ;;  %v10754_v58 = vsub.f32 %v3730_v7, %v3778_v26  ;;  %v3769_v10 = vmul.f32 0.6931472, %v9298_v0 }
0x20a6   :  { %v10756_v21 = vsub.f32 %v3731_v27, %v3779_v19  ;;  %v3771_v12 = vmul.f32 0.6931472, %v9300_v33 }
0x20a7   :  { %v3793_v25 = vsel %vm492_vm4, %v10754_v58, -inf  ;;  %v3776_v42 = vadd.f32 %v3769_v10, %v3734_v50 }
0x20a8   :  { %v3794_v57 = vsel %vm492_vm4, %v10756_v21, -inf  ;;  %v3777_v61 = vadd.f32 %v3771_v12, %v3737_v23 }
0x20a9   :  { %v3795_v59 = vmax.f32 %v3793_v25, %v3794_v57  ;;  %v10762_v40 = vsub.f32 %v3728_v52, %v3776_v42 }
0x20aa   :  { %v10764_v56 = vsub.f32 %v3729_v44, %v3777_v61 }
0x20ab   :  { %v3796_v31 = vrot.slane %v3795_v59, 4  ;;  %v3784_v7 = vsel %vm492_vm4, %v10762_v40, -inf }
0x20ac   :  { %v3785_v27 = vsel %vm492_vm4, %v10764_v56, -inf }
0x20ad   :  { %v3786_v63 = vmax.f32 %v3784_v7, %v3785_v27  ;;  %v3797_v5 = vmax.f32 %v3795_v59, %v3796_v31 }
0x20af   :  { %v3787_v18 = vrot.slane %v3786_v63, 4  ;;  %v3798_v8 = vrot.slane %v3797_v5, 2 }
0x20b1   :  { %v3799_v60 = vmax.f32 %v3797_v5, %v3798_v8  ;;  %v3788_v9 = vmax.f32 %v3786_v63, %v3787_v18 }
0x20b3   :  { %v3800_v45 = vrot.slane %v3799_v60, 1  ;;  %v3789_v46 = vrot.slane %v3788_v9, 2 }
0x20b5   :  { %v3801_v50 = vmax.f32 %v3799_v60, %v3800_v45  ;;  %v3790_v52 = vmax.f32 %v3788_v9, %v3789_v46 }
0x20b7   :  { %v3804_v44 = vsub.f32 %v10754_v58, %v3801_v50  ;;  %v3805_v23 = vsub.f32 %v10756_v21, %v3801_v50  ;;  %v3791_v48 = vrot.slane %v3790_v52, 1 }
0x20b9   :  { %v3810_v28 = vmul.f32 1.442695, %v3804_v44  ;;  %v3812_v55 = vmul.f32 1.442695, %v3805_v23  ;;  %v3792_v41 = vmax.f32 %v3790_v52, %v3791_v48 }
0x20bb   :  { %9301 = vpow2.f32 %v3810_v28  ;;  %v3802_v16 = vsub.f32 %v10762_v40, %v3792_v41  ;;  %v3803_v51 = vsub.f32 %v10764_v56, %v3792_v41 }
0x20bc   :  { %9303 = vpow2.f32 %v3812_v55 }
0x20bd   :  { %v3806_v13 = vmul.f32 1.442695, %v3802_v16  ;;  %v3808_v14 = vmul.f32 1.442695, %v3803_v51 }
0x20bf   :  { %9305 = vpow2.f32 %v3806_v13 }
0x20c0   :  { %9307 = vpow2.f32 %v3808_v14 }
0x20c8   :  { %v9302_v15 = vpop.eup %9301 }
0x20c9   :  { %v9304_v29 = vpop.eup %9303  ;;  %v3823_v6 = vsel %vm492_vm4, %v9302_v15, 0.0 }
0x20ca   :  { %v3824_v35 = vsel %vm492_vm4, %v9304_v29, 0.0 }
0x20cb   :  { %v3825_v36 = vadd.f32 %v3824_v35, %v3823_v6 }
0x20cc   :  { %v9306_v39 = vpop.eup %9305 }
0x20cd   :  { %v9308_v22 = vpop.eup %9307  ;;  %v3826_v30 = vrot.slane %v3825_v36, 4  ;;  %v3814_v62 = vsel %vm492_vm4, %v9306_v39, 0.0 }
0x20ce   :  { %v3815_v3 = vsel %vm492_vm4, %v9308_v22, 0.0 }
0x20cf   :  { %v3827_v24 = vadd.f32 %v3826_v30, %v3825_v36  ;;  %v3816_v34 = vadd.f32 %v3815_v3, %v3814_v62 }
0x20d1   :  { %v3828_v26 = vrot.slane %v3827_v24, 2  ;;  %v3817_v0 = vrot.slane %v3816_v34, 4 }
0x20d3   :  { %v3829_v19 = vadd.f32 %v3828_v26, %v3827_v24  ;;  %v3818_v33 = vadd.f32 %v3817_v0, %v3816_v34 }
0x20d5   :  { %v3830_v10 = vrot.slane %v3829_v19, 1  ;;  %v3819_v12 = vrot.slane %v3818_v33, 2 }
0x20d7   :  { %v3831_v25 = vadd.f32 %v3830_v10, %v3829_v19  ;;  %v3820_v42 = vadd.f32 %v3819_v12, %v3818_v33 }
0x20d9   :  { %9309 = vlog2.f32 %v3831_v25  ;;  %v3821_v57 = vrot.slane %v3820_v42, 1 }
0x20db   :  { %v3822_v61 = vadd.f32 %v3821_v57, %v3820_v42 }
0x20dd   :  { %9311 = vlog2.f32 %v3822_v61 }
0x20e6   :  { %v9310_v59 = vpop.eup %9309 }
0x20e7   :  { %v3835_v31 = vmul.f32 0.6931472, %v9310_v59 }
0x20e9   :  { %v3837_v7 = vadd.f32 %v3835_v31, %v3801_v50 }
0x20ea   :  { %v9312_v27 = vpop.eup %9311 }
0x20eb   :  { %v3841_v63 = vsub.f32 %v10756_v21, %v3837_v7  ;;  %v3840_v5 = vsub.f32 %v10754_v58, %v3837_v7  ;;  %v3833_v18 = vmul.f32 0.6931472, %v9312_v27 }
0x20ed   :  { %v3851_v8 = vsel %vm492_vm4, %v3841_v63, -inf  ;;  %v3848_v60 = vsel %vm492_vm4, %v3840_v5, -inf  ;;  %v3836_v9 = vadd.f32 %v3833_v18, %v3792_v41 }
0x20ee   :  { %3852 = vmax.xlane.f32.xlu0 %v3851_v8  ;;  %3849 = vmax.xlane.f32.xlu1 %v3848_v60 }
0x20ef   :  { %v3839_v45 = vsub.f32 %v10764_v56, %v3836_v9  ;;  %v3838_v46 = vsub.f32 %v10762_v40, %v3836_v9 }
0x20f1   :  { %v3845_v52 = vsel %vm492_vm4, %v3839_v45, -inf  ;;  %v3842_v50 = vsel %vm492_vm4, %v3838_v46, -inf }
0x20f2   :  { %3846 = vmax.xlane.f32.xlu0 %v3845_v52  ;;  %3843 = vmax.xlane.f32.xlu1 %v3842_v50 }
0x2177   :  { %v3850_v21 = vpop.xlane.xlu1 %3849  ;;  %v3853_v58 = vpop.xlane.xlu0 %3852 }
0x2178   :  { %v3856_v44 = vsub.f32 %v3840_v5, %v3850_v21  ;;  %v3857_v23 = vsub.f32 %v3841_v63, %v3853_v58 }
0x217a   :  { %v3862_v48 = vmul.f32 1.442695, %v3856_v44  ;;  %v3864_v28 = vmul.f32 1.442695, %v3857_v23 }
0x217b   :  { %v3844_v55 = vpop.xlane.xlu1 %3843  ;;  %v3847_v41 = vpop.xlane.xlu0 %3846 }
0x217c   :  { %9313 = vpow2.f32 %v3862_v48  ;;  %v3854_v16 = vsub.f32 %v3838_v46, %v3844_v55  ;;  %v3855_v51 = vsub.f32 %v3839_v45, %v3847_v41 }
0x217d   :  { %9315 = vpow2.f32 %v3864_v28 }
0x217e   :  { %v3858_v56 = vmul.f32 1.442695, %v3854_v16  ;;  %v3860_v40 = vmul.f32 1.442695, %v3855_v51 }
0x2180   :  { %9317 = vpow2.f32 %v3858_v56 }
0x2181   :  { %9319 = vpow2.f32 %v3860_v40 }
0x2189   :  { %v9314_v13 = vpop.eup %9313 }
0x218a   :  { %v9316_v14 = vpop.eup %9315  ;;  %v3872_v15 = vsel %vm492_vm4, %v9314_v13, 0.0 }
0x218b   :  { %3873 = vadd.xlane.f32.xlu1 %v3872_v15  ;;  %v3875_v29 = vsel %vm492_vm4, %v9316_v14, 0.0 }
0x218c   :  { %3876 = vadd.xlane.f32.xlu0 %v3875_v29 }
0x218d   :  { %v9318_v6 = vpop.eup %9317 }
0x218e   :  { %v9320_v35 = vpop.eup %9319  ;;  %v3866_v36 = vsel %vm492_vm4, %v9318_v6, 0.0 }
0x218f   :  { %3867 = vadd.xlane.f32.xlu1 %v3866_v36  ;;  %v3869_v39 = vsel %vm492_vm4, %v9320_v35, 0.0 }
0x2190   :  { %3870 = vadd.xlane.f32.xlu0 %v3869_v39 }
0x2214   :  { %v3874_v22 = vpop.xlane.xlu1 %3873 }
0x2215   :  { %9321 = vlog2.f32 %v3874_v22  ;;  %v3877_v30 = vpop.xlane.xlu0 %3876 }
0x2216   :  { %9323 = vlog2.f32 %v3877_v30 }
0x2218   :  { %v3868_v62 = vpop.xlane.xlu1 %3867 }
0x2219   :  { %9325 = vlog2.f32 %v3868_v62  ;;  %v3871_v3 = vpop.xlane.xlu0 %3870 }
0x221a   :  { %9327 = vlog2.f32 %v3871_v3 }
0x2222   :  { %v9322_v24 = vpop.eup %9321 }
0x2223   :  { %v9324_v34 = vpop.eup %9323  ;;  %v3883_v26 = vmul.f32 0.6931472, %v9322_v24 }
0x2224   :  { %v3885_v0 = vmul.f32 0.6931472, %v9324_v34 }
0x2225   :  { %v3888_v19 = vadd.f32 %v3883_v26, %v3850_v21 }
0x2226   :  { %v9326_v33 = vpop.eup %9325  ;;  %v3889_v10 = vadd.f32 %v3885_v0, %v3853_v58 }
0x2227   :  { %v9328_v12 = vpop.eup %9327  ;;  %v10790_v25 = vsub.f32 %v3840_v5, %v3888_v19  ;;  %v3879_v42 = vmul.f32 0.6931472, %v9326_v33 }
0x2228   :  { %v10792_v57 = vsub.f32 %v3841_v63, %v3889_v10  ;;  %v3881_v61 = vmul.f32 0.6931472, %v9328_v12 }
0x2229   :  { %v3903_v59 = vsel %vm492_vm4, %v10790_v25, -inf  ;;  %v3886_v31 = vadd.f32 %v3879_v42, %v3844_v55 }
0x222a   :  { %v3904_v7 = vsel %vm492_vm4, %v10792_v57, -inf  ;;  %v3887_v27 = vadd.f32 %v3881_v61, %v3847_v41 }
0x222b   :  { %v3905_v18 = vmax.f32 %v3903_v59, %v3904_v7  ;;  %v10798_v8 = vsub.f32 %v3838_v46, %v3886_v31 }
0x222c   :  { %v10800_v60 = vsub.f32 %v3839_v45, %v3887_v27 }
0x222d   :  { %v3906_v9 = vrot.slane %v3905_v18, 4  ;;  %v3894_v5 = vsel %vm492_vm4, %v10798_v8, -inf }
0x222e   :  { %v3895_v63 = vsel %vm492_vm4, %v10800_v60, -inf }
0x222f   :  { %v3896_v52 = vmax.f32 %v3894_v5, %v3895_v63  ;;  %v3907_v50 = vmax.f32 %v3905_v18, %v3906_v9 }
0x2231   :  { %v3897_v21 = vrot.slane %v3896_v52, 4  ;;  %v3908_v58 = vrot.slane %v3907_v50, 2 }
0x2233   :  { %v3909_v44 = vmax.f32 %v3907_v50, %v3908_v58  ;;  %v3898_v23 = vmax.f32 %v3896_v52, %v3897_v21 }
0x2235   :  { %v3910_v48 = vrot.slane %v3909_v44, 1  ;;  %v3899_v28 = vrot.slane %v3898_v23, 2 }
0x2237   :  { %v3911_v55 = vmax.f32 %v3909_v44, %v3910_v48  ;;  %v3900_v46 = vmax.f32 %v3898_v23, %v3899_v28 }
0x2239   :  { %v3914_v45 = vsub.f32 %v10790_v25, %v3911_v55  ;;  %v3915_v41 = vsub.f32 %v10792_v57, %v3911_v55  ;;  %v3901_v16 = vrot.slane %v3900_v46, 1 }
0x223b   :  { %v3920_v51 = vmul.f32 1.442695, %v3914_v45  ;;  %v3922_v56 = vmul.f32 1.442695, %v3915_v41  ;;  %v3902_v40 = vmax.f32 %v3900_v46, %v3901_v16 }
0x223d   :  { %9329 = vpow2.f32 %v3920_v51  ;;  %v3912_v13 = vsub.f32 %v10798_v8, %v3902_v40  ;;  %v3913_v14 = vsub.f32 %v10800_v60, %v3902_v40 }
0x223e   :  { %9331 = vpow2.f32 %v3922_v56 }
0x223f   :  { %v3916_v15 = vmul.f32 1.442695, %v3912_v13  ;;  %v3918_v29 = vmul.f32 1.442695, %v3913_v14 }
0x2241   :  { %9333 = vpow2.f32 %v3916_v15 }
0x2242   :  { %9335 = vpow2.f32 %v3918_v29 }
0x224a   :  { %v9330_v6 = vpop.eup %9329 }
0x224b   :  { %v9332_v35 = vpop.eup %9331  ;;  %v3933_v36 = vsel %vm492_vm4, %v9330_v6, 0.0 }
0x224c   :  { %v3934_v39 = vsel %vm492_vm4, %v9332_v35, 0.0 }
0x224d   :  { %v3935_v22 = vadd.f32 %v3934_v39, %v3933_v36 }
0x224e   :  { %v9334_v30 = vpop.eup %9333 }
0x224f   :  { %v9336_v62 = vpop.eup %9335  ;;  %v3936_v3 = vrot.slane %v3935_v22, 4  ;;  %v3924_v24 = vsel %vm492_vm4, %v9334_v30, 0.0 }
0x2250   :  { %v3925_v34 = vsel %vm492_vm4, %v9336_v62, 0.0 }
0x2251   :  { %v3937_v26 = vadd.f32 %v3936_v3, %v3935_v22  ;;  %v3926_v0 = vadd.f32 %v3925_v34, %v3924_v24 }
0x2253   :  { %v3938_v19 = vrot.slane %v3937_v26, 2  ;;  %v3927_v33 = vrot.slane %v3926_v0, 4 }
0x2255   :  { %v3939_v10 = vadd.f32 %v3938_v19, %v3937_v26  ;;  %v3928_v12 = vadd.f32 %v3927_v33, %v3926_v0 }
0x2257   :  { %v3940_v42 = vrot.slane %v3939_v10, 1  ;;  %v3929_v61 = vrot.slane %v3928_v12, 2 }
0x2259   :  { %v3941_v59 = vadd.f32 %v3940_v42, %v3939_v10  ;;  %v3930_v31 = vadd.f32 %v3929_v61, %v3928_v12 }
0x225b   :  { %9337 = vlog2.f32 %v3941_v59  ;;  %v3931_v7 = vrot.slane %v3930_v31, 1 }
0x225d   :  { %v3932_v27 = vadd.f32 %v3931_v7, %v3930_v31 }
0x225f   :  { %9339 = vlog2.f32 %v3932_v27 }
0x2268   :  { %v9338_v18 = vpop.eup %9337 }
0x2269   :  { %v3945_v9 = vmul.f32 0.6931472, %v9338_v18 }
0x226b   :  { %v3947_v5 = vadd.f32 %v3945_v9, %v3911_v55 }
0x226c   :  { %v9340_v63 = vpop.eup %9339 }
0x226d   :  { %v3951_v52 = vsub.f32 %v10792_v57, %v3947_v5  ;;  %v3950_v50 = vsub.f32 %v10790_v25, %v3947_v5  ;;  %v3943_v21 = vmul.f32 0.6931472, %v9340_v63 }
0x226f   :  { %v3961_v58 = vsel %vm492_vm4, %v3951_v52, -inf  ;;  %v3958_v44 = vsel %vm492_vm4, %v3950_v50, -inf  ;;  %v3946_v23 = vadd.f32 %v3943_v21, %v3902_v40 }
0x2270   :  { %3962 = vmax.xlane.f32.xlu0 %v3961_v58  ;;  %3959 = vmax.xlane.f32.xlu1 %v3958_v44 }
0x2271   :  { %v3949_v48 = vsub.f32 %v10800_v60, %v3946_v23  ;;  %v3948_v28 = vsub.f32 %v10798_v8, %v3946_v23 }
0x2273   :  { %v3955_v46 = vsel %vm492_vm4, %v3949_v48, -inf  ;;  %v3952_v55 = vsel %vm492_vm4, %v3948_v28, -inf }
0x2274   :  { %3956 = vmax.xlane.f32.xlu0 %v3955_v46  ;;  %3953 = vmax.xlane.f32.xlu1 %v3952_v55 }
0x22f9   :  { %v3960_v57 = vpop.xlane.xlu1 %3959  ;;  %v3963_v25 = vpop.xlane.xlu0 %3962 }
0x22fa   :  { %v3966_v45 = vsub.f32 %v3950_v50, %v3960_v57  ;;  %v3967_v41 = vsub.f32 %v3951_v52, %v3963_v25 }
0x22fc   :  { %v3972_v16 = vmul.f32 1.442695, %v3966_v45  ;;  %v3974_v51 = vmul.f32 1.442695, %v3967_v41 }
0x22fd   :  { %v3954_v56 = vpop.xlane.xlu1 %3953  ;;  %v3957_v40 = vpop.xlane.xlu0 %3956 }
0x22fe   :  { %9341 = vpow2.f32 %v3972_v16  ;;  %v3964_v13 = vsub.f32 %v3948_v28, %v3954_v56  ;;  %v3965_v14 = vsub.f32 %v3949_v48, %v3957_v40 }
0x22ff   :  { %9343 = vpow2.f32 %v3974_v51 }
0x2300   :  { %v3968_v60 = vmul.f32 1.442695, %v3964_v13  ;;  %v3970_v8 = vmul.f32 1.442695, %v3965_v14 }
0x2302   :  { %9345 = vpow2.f32 %v3968_v60 }
0x2303   :  { %9347 = vpow2.f32 %v3970_v8 }
0x230b   :  { %v9342_v15 = vpop.eup %9341 }
0x230c   :  { %v9344_v29 = vpop.eup %9343  ;;  %v3982_v6 = vsel %vm492_vm4, %v9342_v15, 0.0 }
0x230d   :  { %3983 = vadd.xlane.f32.xlu1 %v3982_v6  ;;  %v3985_v35 = vsel %vm492_vm4, %v9344_v29, 0.0 }
0x230e   :  { %3986 = vadd.xlane.f32.xlu0 %v3985_v35 }
0x230f   :  { %v9346_v36 = vpop.eup %9345 }
0x2310   :  { %v9348_v39 = vpop.eup %9347  ;;  %v3976_v22 = vsel %vm492_vm4, %v9346_v36, 0.0 }
0x2311   :  { %3977 = vadd.xlane.f32.xlu1 %v3976_v22  ;;  %v3979_v30 = vsel %vm492_vm4, %v9348_v39, 0.0 }
0x2312   :  { %3980 = vadd.xlane.f32.xlu0 %v3979_v30 }
0x2396   :  { %v3984_v62 = vpop.xlane.xlu1 %3983 }
0x2397   :  { %9349 = vlog2.f32 %v3984_v62  ;;  %v3987_v3 = vpop.xlane.xlu0 %3986 }
0x2398   :  { %9351 = vlog2.f32 %v3987_v3 }
0x239a   :  { %v3978_v24 = vpop.xlane.xlu1 %3977 }
0x239b   :  { %9353 = vlog2.f32 %v3978_v24  ;;  %v3981_v34 = vpop.xlane.xlu0 %3980 }
0x239c   :  { %9355 = vlog2.f32 %v3981_v34 }
0x23a4   :  { %v9350_v26 = vpop.eup %9349 }
0x23a5   :  { %v9352_v0 = vpop.eup %9351  ;;  %v3993_v19 = vmul.f32 0.6931472, %v9350_v26 }
0x23a6   :  { %v3995_v33 = vmul.f32 0.6931472, %v9352_v0 }
0x23a7   :  { %v3998_v10 = vadd.f32 %v3993_v19, %v3960_v57 }
0x23a8   :  { %v9354_v12 = vpop.eup %9353  ;;  %v3999_v42 = vadd.f32 %v3995_v33, %v3963_v25 }
0x23a9   :  { %v9356_v61 = vpop.eup %9355  ;;  %v10826_v59 = vsub.f32 %v3950_v50, %v3998_v10  ;;  %v3989_v31 = vmul.f32 0.6931472, %v9354_v12 }
0x23aa   :  { %v10828_v7 = vsub.f32 %v3951_v52, %v3999_v42  ;;  %v3991_v27 = vmul.f32 0.6931472, %v9356_v61 }
0x23ab   :  { %v4013_v18 = vsel %vm492_vm4, %v10826_v59, -inf  ;;  %v3996_v9 = vadd.f32 %v3989_v31, %v3954_v56 }
0x23ac   :  { %v4014_v5 = vsel %vm492_vm4, %v10828_v7, -inf  ;;  %v3997_v63 = vadd.f32 %v3991_v27, %v3957_v40 }
0x23ad   :  { %v4015_v21 = vmax.f32 %v4013_v18, %v4014_v5  ;;  %v10834_v58 = vsub.f32 %v3948_v28, %v3996_v9 }
0x23ae   :  { %v10836_v44 = vsub.f32 %v3949_v48, %v3997_v63 }
0x23af   :  { %v4016_v23 = vrot.slane %v4015_v21, 4  ;;  %v4004_v50 = vsel %vm492_vm4, %v10834_v58, -inf }
0x23b0   :  { %v4005_v52 = vsel %vm492_vm4, %v10836_v44, -inf }
0x23b1   :  { %v4006_v46 = vmax.f32 %v4004_v50, %v4005_v52  ;;  %v4017_v55 = vmax.f32 %v4015_v21, %v4016_v23 }
0x23b3   :  { %v4007_v57 = vrot.slane %v4006_v46, 4  ;;  %v4018_v25 = vrot.slane %v4017_v55, 2 }
0x23b5   :  { %v4019_v45 = vmax.f32 %v4017_v55, %v4018_v25  ;;  %v4008_v41 = vmax.f32 %v4006_v46, %v4007_v57 }
0x23b7   :  { %v4020_v16 = vrot.slane %v4019_v45, 1  ;;  %v4009_v51 = vrot.slane %v4008_v41, 2 }
0x23b9   :  { %v4021_v56 = vmax.f32 %v4019_v45, %v4020_v16  ;;  %v4010_v28 = vmax.f32 %v4008_v41, %v4009_v51 }
0x23bb   :  { %v4024_v48 = vsub.f32 %v10826_v59, %v4021_v56  ;;  %v4025_v40 = vsub.f32 %v10828_v7, %v4021_v56  ;;  %v4011_v13 = vrot.slane %v4010_v28, 1 }
0x23bd   :  { %v4030_v14 = vmul.f32 1.442695, %v4024_v48  ;;  %v4032_v60 = vmul.f32 1.442695, %v4025_v40  ;;  %v4012_v8 = vmax.f32 %v4010_v28, %v4011_v13 }
0x23bf   :  { %9357 = vpow2.f32 %v4030_v14  ;;  %v4022_v15 = vsub.f32 %v10834_v58, %v4012_v8  ;;  %v4023_v29 = vsub.f32 %v10836_v44, %v4012_v8 }
0x23c0   :  { %9359 = vpow2.f32 %v4032_v60 }
0x23c1   :  { %v4026_v6 = vmul.f32 1.442695, %v4022_v15  ;;  %v4028_v35 = vmul.f32 1.442695, %v4023_v29 }
0x23c3   :  { %9361 = vpow2.f32 %v4026_v6 }
0x23c4   :  { %9363 = vpow2.f32 %v4028_v35 }
0x23cc   :  { %v9358_v36 = vpop.eup %9357 }
0x23cd   :  { %v9360_v39 = vpop.eup %9359  ;;  %v4043_v22 = vsel %vm492_vm4, %v9358_v36, 0.0 }
0x23ce   :  { %v4044_v30 = vsel %vm492_vm4, %v9360_v39, 0.0 }
0x23cf   :  { %v4045_v62 = vadd.f32 %v4044_v30, %v4043_v22 }
0x23d0   :  { %v9362_v3 = vpop.eup %9361 }
0x23d1   :  { %v9364_v24 = vpop.eup %9363  ;;  %v4046_v34 = vrot.slane %v4045_v62, 4  ;;  %v4034_v26 = vsel %vm492_vm4, %v9362_v3, 0.0 }
0x23d2   :  { %v4035_v0 = vsel %vm492_vm4, %v9364_v24, 0.0 }
0x23d3   :  { %v4047_v19 = vadd.f32 %v4046_v34, %v4045_v62  ;;  %v4036_v33 = vadd.f32 %v4035_v0, %v4034_v26 }
0x23d5   :  { %v4048_v10 = vrot.slane %v4047_v19, 2  ;;  %v4037_v12 = vrot.slane %v4036_v33, 4 }
0x23d7   :  { %v4049_v42 = vadd.f32 %v4048_v10, %v4047_v19  ;;  %v4038_v61 = vadd.f32 %v4037_v12, %v4036_v33 }
0x23d9   :  { %v4050_v31 = vrot.slane %v4049_v42, 1  ;;  %v4039_v27 = vrot.slane %v4038_v61, 2 }
0x23db   :  { %v4051_v18 = vadd.f32 %v4050_v31, %v4049_v42  ;;  %v4040_v9 = vadd.f32 %v4039_v27, %v4038_v61 }
0x23dd   :  { %9365 = vlog2.f32 %v4051_v18  ;;  %v4041_v5 = vrot.slane %v4040_v9, 1 }
0x23df   :  { %v4042_v63 = vadd.f32 %v4041_v5, %v4040_v9 }
0x23e1   :  { %9367 = vlog2.f32 %v4042_v63 }
0x23ea   :  { %v9366_v21 = vpop.eup %9365 }
0x23eb   :  { %v4055_v23 = vmul.f32 0.6931472, %v9366_v21 }
0x23ed   :  { %v4057_v50 = vadd.f32 %v4055_v23, %v4021_v56 }
0x23ee   :  { %v9368_v52 = vpop.eup %9367 }
0x23ef   :  { %v4061_v46 = vsub.f32 %v10828_v7, %v4057_v50  ;;  %v4060_v55 = vsub.f32 %v10826_v59, %v4057_v50  ;;  %v4053_v57 = vmul.f32 0.6931472, %v9368_v52 }
0x23f1   :  { %v4071_v25 = vsel %vm492_vm4, %v4061_v46, -inf  ;;  %v4068_v45 = vsel %vm492_vm4, %v4060_v55, -inf  ;;  %v4056_v41 = vadd.f32 %v4053_v57, %v4012_v8 }
0x23f2   :  { %4072 = vmax.xlane.f32.xlu0 %v4071_v25  ;;  %4069 = vmax.xlane.f32.xlu1 %v4068_v45 }
0x23f3   :  { %v4059_v16 = vsub.f32 %v10836_v44, %v4056_v41  ;;  %v4058_v51 = vsub.f32 %v10834_v58, %v4056_v41 }
0x23f5   :  { %v4065_v28 = vsel %vm492_vm4, %v4059_v16, -inf  ;;  %v4062_v56 = vsel %vm492_vm4, %v4058_v51, -inf }
0x23f6   :  { %4066 = vmax.xlane.f32.xlu0 %v4065_v28  ;;  %4063 = vmax.xlane.f32.xlu1 %v4062_v56 }
0x247b   :  { %v4070_v7 = vpop.xlane.xlu1 %4069  ;;  %v4073_v59 = vpop.xlane.xlu0 %4072 }
0x247c   :  { %v4076_v48 = vsub.f32 %v4060_v55, %v4070_v7  ;;  %v4077_v40 = vsub.f32 %v4061_v46, %v4073_v59 }
0x247e   :  { %v4082_v13 = vmul.f32 1.442695, %v4076_v48  ;;  %v4084_v14 = vmul.f32 1.442695, %v4077_v40 }
0x247f   :  { %v4064_v60 = vpop.xlane.xlu1 %4063  ;;  %v4067_v8 = vpop.xlane.xlu0 %4066 }
0x2480   :  { %9369 = vpow2.f32 %v4082_v13  ;;  %v4074_v15 = vsub.f32 %v4058_v51, %v4064_v60  ;;  %v4075_v29 = vsub.f32 %v4059_v16, %v4067_v8 }
0x2481   :  { %9371 = vpow2.f32 %v4084_v14 }
0x2482   :  { %v4078_v44 = vmul.f32 1.442695, %v4074_v15  ;;  %v4080_v58 = vmul.f32 1.442695, %v4075_v29 }
0x2484   :  { %9373 = vpow2.f32 %v4078_v44 }
0x2485   :  { %9375 = vpow2.f32 %v4080_v58 }
0x248d   :  { %v9370_v6 = vpop.eup %9369 }
0x248e   :  { %v9372_v35 = vpop.eup %9371  ;;  %v4092_v36 = vsel %vm492_vm4, %v9370_v6, 0.0 }
0x248f   :  { %4093 = vadd.xlane.f32.xlu1 %v4092_v36  ;;  %v4095_v39 = vsel %vm492_vm4, %v9372_v35, 0.0 }
0x2490   :  { %4096 = vadd.xlane.f32.xlu0 %v4095_v39 }
0x2491   :  { %v9374_v22 = vpop.eup %9373 }
0x2492   :  { %v9376_v30 = vpop.eup %9375  ;;  %v4086_v62 = vsel %vm492_vm4, %v9374_v22, 0.0 }
0x2493   :  { %4087 = vadd.xlane.f32.xlu1 %v4086_v62  ;;  %v4089_v3 = vsel %vm492_vm4, %v9376_v30, 0.0 }
0x2494   :  { %4090 = vadd.xlane.f32.xlu0 %v4089_v3 }
0x2518   :  { %v4094_v24 = vpop.xlane.xlu1 %4093 }
0x2519   :  { %9377 = vlog2.f32 %v4094_v24  ;;  %v4097_v34 = vpop.xlane.xlu0 %4096 }
0x251a   :  { %9379 = vlog2.f32 %v4097_v34 }
0x251c   :  { %v4088_v26 = vpop.xlane.xlu1 %4087 }
0x251d   :  { %9381 = vlog2.f32 %v4088_v26  ;;  %v4091_v0 = vpop.xlane.xlu0 %4090 }
0x251e   :  { %9383 = vlog2.f32 %v4091_v0 }
0x2526   :  { %v9378_v19 = vpop.eup %9377 }
0x2527   :  { %v9380_v33 = vpop.eup %9379  ;;  %v4103_v10 = vmul.f32 0.6931472, %v9378_v19 }
0x2528   :  { %v4105_v12 = vmul.f32 0.6931472, %v9380_v33 }
0x2529   :  { %v4108_v42 = vadd.f32 %v4103_v10, %v4070_v7 }
0x252a   :  { %v9382_v61 = vpop.eup %9381  ;;  %v4109_v31 = vadd.f32 %v4105_v12, %v4073_v59 }
0x252b   :  { %v9384_v27 = vpop.eup %9383  ;;  %v10862_v18 = vsub.f32 %v4060_v55, %v4108_v42  ;;  %v4099_v9 = vmul.f32 0.6931472, %v9382_v61 }
0x252c   :  { %v10864_v5 = vsub.f32 %v4061_v46, %v4109_v31  ;;  %v4101_v63 = vmul.f32 0.6931472, %v9384_v27 }
0x252d   :  { %v4123_v21 = vsel %vm492_vm4, %v10862_v18, -inf  ;;  %v4106_v23 = vadd.f32 %v4099_v9, %v4064_v60 }
0x252e   :  { %v4124_v50 = vsel %vm492_vm4, %v10864_v5, -inf  ;;  %v4107_v52 = vadd.f32 %v4101_v63, %v4067_v8 }
0x252f   :  { %v4125_v57 = vmax.f32 %v4123_v21, %v4124_v50  ;;  %v10870_v25 = vsub.f32 %v4058_v51, %v4106_v23 }
0x2530   :  { %v10872_v45 = vsub.f32 %v4059_v16, %v4107_v52 }
0x2531   :  { %v4126_v41 = vrot.slane %v4125_v57, 4  ;;  %v4114_v55 = vsel %vm492_vm4, %v10870_v25, -inf }
0x2532   :  { %v4115_v46 = vsel %vm492_vm4, %v10872_v45, -inf }
0x2533   :  { %v4116_v28 = vmax.f32 %v4114_v55, %v4115_v46  ;;  %v4127_v56 = vmax.f32 %v4125_v57, %v4126_v41 }
0x2535   :  { %v4117_v7 = vrot.slane %v4116_v28, 4  ;;  %v4128_v59 = vrot.slane %v4127_v56, 2 }
0x2537   :  { %v4129_v48 = vmax.f32 %v4127_v56, %v4128_v59  ;;  %v4118_v40 = vmax.f32 %v4116_v28, %v4117_v7 }
0x2539   :  { %v4130_v13 = vrot.slane %v4129_v48, 1  ;;  %v4119_v14 = vrot.slane %v4118_v40, 2 }
0x253b   :  { %v4131_v60 = vmax.f32 %v4129_v48, %v4130_v13  ;;  %v4120_v51 = vmax.f32 %v4118_v40, %v4119_v14 }
0x253d   :  { %v4134_v16 = vsub.f32 %v10862_v18, %v4131_v60  ;;  %v4135_v8 = vsub.f32 %v10864_v5, %v4131_v60  ;;  %v4121_v15 = vrot.slane %v4120_v51, 1 }
0x253f   :  { %v4140_v29 = vmul.f32 1.442695, %v4134_v16  ;;  %v4142_v44 = vmul.f32 1.442695, %v4135_v8  ;;  %v4122_v58 = vmax.f32 %v4120_v51, %v4121_v15 }
0x2541   :  { %9385 = vpow2.f32 %v4140_v29  ;;  %v4132_v6 = vsub.f32 %v10870_v25, %v4122_v58  ;;  %v4133_v35 = vsub.f32 %v10872_v45, %v4122_v58 }
0x2542   :  { %9387 = vpow2.f32 %v4142_v44 }
0x2543   :  { %v4136_v36 = vmul.f32 1.442695, %v4132_v6  ;;  %v4138_v39 = vmul.f32 1.442695, %v4133_v35 }
0x2545   :  { %9389 = vpow2.f32 %v4136_v36 }
0x2546   :  { %9391 = vpow2.f32 %v4138_v39 }
0x254e   :  { %v9386_v22 = vpop.eup %9385 }
0x254f   :  { %v9388_v30 = vpop.eup %9387  ;;  %v4153_v62 = vsel %vm492_vm4, %v9386_v22, 0.0 }
0x2550   :  { %v4154_v3 = vsel %vm492_vm4, %v9388_v30, 0.0 }
0x2551   :  { %v4155_v24 = vadd.f32 %v4154_v3, %v4153_v62 }
0x2552   :  { %v9390_v34 = vpop.eup %9389 }
0x2553   :  { %v9392_v26 = vpop.eup %9391  ;;  %v4156_v0 = vrot.slane %v4155_v24, 4  ;;  %v4144_v19 = vsel %vm492_vm4, %v9390_v34, 0.0 }
0x2554   :  { %v4145_v33 = vsel %vm492_vm4, %v9392_v26, 0.0 }
0x2555   :  { %v4157_v10 = vadd.f32 %v4156_v0, %v4155_v24  ;;  %v4146_v12 = vadd.f32 %v4145_v33, %v4144_v19 }
0x2557   :  { %v4158_v42 = vrot.slane %v4157_v10, 2  ;;  %v4147_v61 = vrot.slane %v4146_v12, 4 }
0x2559   :  { %v4159_v31 = vadd.f32 %v4158_v42, %v4157_v10  ;;  %v4148_v27 = vadd.f32 %v4147_v61, %v4146_v12 }
0x255b   :  { %v4160_v9 = vrot.slane %v4159_v31, 1  ;;  %v4149_v63 = vrot.slane %v4148_v27, 2 }
0x255d   :  { %v4161_v21 = vadd.f32 %v4160_v9, %v4159_v31  ;;  %v4150_v23 = vadd.f32 %v4149_v63, %v4148_v27 }
0x255f   :  { %9393 = vlog2.f32 %v4161_v21  ;;  %v4151_v50 = vrot.slane %v4150_v23, 1 }
0x2561   :  { %v4152_v52 = vadd.f32 %v4151_v50, %v4150_v23 }
0x2563   :  { %9395 = vlog2.f32 %v4152_v52 }
0x256c   :  { %v9394_v57 = vpop.eup %9393 }
0x256d   :  { %v4165_v41 = vmul.f32 0.6931472, %v9394_v57 }
0x256f   :  { %v4167_v55 = vadd.f32 %v4165_v41, %v4131_v60 }
0x2570   :  { %v9396_v46 = vpop.eup %9395 }
0x2571   :  { %v4171_v28 = vsub.f32 %v10864_v5, %v4167_v55  ;;  %v4170_v56 = vsub.f32 %v10862_v18, %v4167_v55  ;;  %v4163_v7 = vmul.f32 0.6931472, %v9396_v46 }
0x2573   :  { %v4181_v59 = vsel %vm492_vm4, %v4171_v28, -inf  ;;  %v4178_v48 = vsel %vm492_vm4, %v4170_v56, -inf  ;;  %v4166_v40 = vadd.f32 %v4163_v7, %v4122_v58 }
0x2574   :  { %4182 = vmax.xlane.f32.xlu0 %v4181_v59  ;;  %4179 = vmax.xlane.f32.xlu1 %v4178_v48 }
0x2575   :  { %v4169_v13 = vsub.f32 %v10872_v45, %v4166_v40  ;;  %v4168_v14 = vsub.f32 %v10870_v25, %v4166_v40 }
0x2577   :  { %v4175_v51 = vsel %vm492_vm4, %v4169_v13, -inf  ;;  %v4172_v60 = vsel %vm492_vm4, %v4168_v14, -inf }
0x2578   :  { %4176 = vmax.xlane.f32.xlu0 %v4175_v51  ;;  %4173 = vmax.xlane.f32.xlu1 %v4172_v60 }
0x25fd   :  { %v4180_v5 = vpop.xlane.xlu1 %4179  ;;  %v4183_v18 = vpop.xlane.xlu0 %4182 }
0x25fe   :  { %v4186_v16 = vsub.f32 %v4170_v56, %v4180_v5  ;;  %v4187_v8 = vsub.f32 %v4171_v28, %v4183_v18 }
0x2600   :  { %v4192_v15 = vmul.f32 1.442695, %v4186_v16  ;;  %v4194_v29 = vmul.f32 1.442695, %v4187_v8 }
0x2601   :  { %v4174_v44 = vpop.xlane.xlu1 %4173  ;;  %v4177_v58 = vpop.xlane.xlu0 %4176 }
0x2602   :  { %9397 = vpow2.f32 %v4192_v15  ;;  %v4184_v6 = vsub.f32 %v4168_v14, %v4174_v44  ;;  %v4185_v35 = vsub.f32 %v4169_v13, %v4177_v58 }
0x2603   :  { %9399 = vpow2.f32 %v4194_v29 }
0x2604   :  { %v4188_v45 = vmul.f32 1.442695, %v4184_v6  ;;  %v4190_v25 = vmul.f32 1.442695, %v4185_v35 }
0x2606   :  { %9401 = vpow2.f32 %v4188_v45 }
0x2607   :  { %9403 = vpow2.f32 %v4190_v25 }
0x260f   :  { %v9398_v36 = vpop.eup %9397 }
0x2610   :  { %v9400_v39 = vpop.eup %9399  ;;  %v4202_v22 = vsel %vm492_vm4, %v9398_v36, 0.0 }
0x2611   :  { %4203 = vadd.xlane.f32.xlu1 %v4202_v22  ;;  %v4205_v30 = vsel %vm492_vm4, %v9400_v39, 0.0 }
0x2612   :  { %4206 = vadd.xlane.f32.xlu0 %v4205_v30 }
0x2613   :  { %v9402_v62 = vpop.eup %9401 }
0x2614   :  { %v9404_v3 = vpop.eup %9403  ;;  %v4196_v24 = vsel %vm492_vm4, %v9402_v62, 0.0 }
0x2615   :  { %4197 = vadd.xlane.f32.xlu1 %v4196_v24  ;;  %v4199_v34 = vsel %vm492_vm4, %v9404_v3, 0.0 }
0x2616   :  { %4200 = vadd.xlane.f32.xlu0 %v4199_v34 }
0x269a   :  { %v4204_v26 = vpop.xlane.xlu1 %4203 }
0x269b   :  { %9405 = vlog2.f32 %v4204_v26  ;;  %v4207_v0 = vpop.xlane.xlu0 %4206 }
0x269c   :  { %9407 = vlog2.f32 %v4207_v0 }
0x269e   :  { %v4198_v19 = vpop.xlane.xlu1 %4197 }
0x269f   :  { %9409 = vlog2.f32 %v4198_v19  ;;  %v4201_v33 = vpop.xlane.xlu0 %4200 }
0x26a0   :  { %9411 = vlog2.f32 %v4201_v33 }
0x26a8   :  { %v9406_v10 = vpop.eup %9405 }
0x26a9   :  { %v9408_v12 = vpop.eup %9407  ;;  %v4213_v42 = vmul.f32 0.6931472, %v9406_v10 }
0x26aa   :  { %v4215_v61 = vmul.f32 0.6931472, %v9408_v12 }
0x26ab   :  { %v4218_v31 = vadd.f32 %v4213_v42, %v4180_v5 }
0x26ac   :  { %v9410_v27 = vpop.eup %9409  ;;  %v4219_v9 = vadd.f32 %v4215_v61, %v4183_v18 }
0x26ad   :  { %v9412_v63 = vpop.eup %9411  ;;  %v10898_v21 = vsub.f32 %v4170_v56, %v4218_v31  ;;  %v4209_v23 = vmul.f32 0.6931472, %v9410_v27 }
0x26ae   :  { %v10900_v50 = vsub.f32 %v4171_v28, %v4219_v9  ;;  %v4211_v52 = vmul.f32 0.6931472, %v9412_v63 }
0x26af   :  { %v4233_v57 = vsel %vm492_vm4, %v10898_v21, -inf  ;;  %v4216_v41 = vadd.f32 %v4209_v23, %v4174_v44 }
0x26b0   :  { %v4234_v55 = vsel %vm492_vm4, %v10900_v50, -inf  ;;  %v4217_v46 = vadd.f32 %v4211_v52, %v4177_v58 }
0x26b1   :  { %v4235_v7 = vmax.f32 %v4233_v57, %v4234_v55  ;;  %v10906_v59 = vsub.f32 %v4168_v14, %v4216_v41 }
0x26b2   :  { %v10908_v48 = vsub.f32 %v4169_v13, %v4217_v46 }
0x26b3   :  { %v4236_v40 = vrot.slane %v4235_v7, 4  ;;  %v4224_v56 = vsel %vm492_vm4, %v10906_v59, -inf }
0x26b4   :  { %v4225_v28 = vsel %vm492_vm4, %v10908_v48, -inf }
0x26b5   :  { %v4226_v51 = vmax.f32 %v4224_v56, %v4225_v28  ;;  %v4237_v60 = vmax.f32 %v4235_v7, %v4236_v40 }
0x26b7   :  { %v4227_v5 = vrot.slane %v4226_v51, 4  ;;  %v4238_v18 = vrot.slane %v4237_v60, 2 }
0x26b9   :  { %v4239_v16 = vmax.f32 %v4237_v60, %v4238_v18  ;;  %v4228_v8 = vmax.f32 %v4226_v51, %v4227_v5 }
0x26bb   :  { %v4240_v15 = vrot.slane %v4239_v16, 1  ;;  %v4229_v29 = vrot.slane %v4228_v8, 2 }
0x26bd   :  { %v4241_v44 = vmax.f32 %v4239_v16, %v4240_v15  ;;  %v4230_v14 = vmax.f32 %v4228_v8, %v4229_v29 }
0x26bf   :  { %v4244_v13 = vsub.f32 %v10898_v21, %v4241_v44  ;;  %v4245_v58 = vsub.f32 %v10900_v50, %v4241_v44  ;;  %v4231_v6 = vrot.slane %v4230_v14, 1 }
0x26c1   :  { %v4250_v35 = vmul.f32 1.442695, %v4244_v13  ;;  %v4252_v45 = vmul.f32 1.442695, %v4245_v58  ;;  %v4232_v25 = vmax.f32 %v4230_v14, %v4231_v6 }
0x26c3   :  { %9413 = vpow2.f32 %v4250_v35  ;;  %v4242_v36 = vsub.f32 %v10906_v59, %v4232_v25  ;;  %v4243_v39 = vsub.f32 %v10908_v48, %v4232_v25 }
0x26c4   :  { %9415 = vpow2.f32 %v4252_v45 }
0x26c5   :  { %v4246_v22 = vmul.f32 1.442695, %v4242_v36  ;;  %v4248_v30 = vmul.f32 1.442695, %v4243_v39 }
0x26c7   :  { %9417 = vpow2.f32 %v4246_v22 }
0x26c8   :  { %9419 = vpow2.f32 %v4248_v30 }
0x26d0   :  { %v9414_v62 = vpop.eup %9413 }
0x26d1   :  { %v9416_v3 = vpop.eup %9415  ;;  %v4263_v24 = vsel %vm492_vm4, %v9414_v62, 0.0 }
0x26d2   :  { %v4264_v34 = vsel %vm492_vm4, %v9416_v3, 0.0 }
0x26d3   :  { %v4265_v26 = vadd.f32 %v4264_v34, %v4263_v24 }
0x26d4   :  { %v9418_v0 = vpop.eup %9417 }
0x26d5   :  { %v9420_v19 = vpop.eup %9419  ;;  %v4266_v33 = vrot.slane %v4265_v26, 4  ;;  %v4254_v10 = vsel %vm492_vm4, %v9418_v0, 0.0 }
0x26d6   :  { %v4255_v12 = vsel %vm492_vm4, %v9420_v19, 0.0 }
0x26d7   :  { %v4267_v42 = vadd.f32 %v4266_v33, %v4265_v26  ;;  %v4256_v61 = vadd.f32 %v4255_v12, %v4254_v10 }
0x26d9   :  { %v4268_v31 = vrot.slane %v4267_v42, 2  ;;  %v4257_v27 = vrot.slane %v4256_v61, 4 }
0x26db   :  { %v4269_v9 = vadd.f32 %v4268_v31, %v4267_v42  ;;  %v4258_v63 = vadd.f32 %v4257_v27, %v4256_v61 }
0x26dd   :  { %v4270_v23 = vrot.slane %v4269_v9, 1  ;;  %v4259_v52 = vrot.slane %v4258_v63, 2 }
0x26df   :  { %v4271_v57 = vadd.f32 %v4270_v23, %v4269_v9  ;;  %v4260_v41 = vadd.f32 %v4259_v52, %v4258_v63 }
0x26e1   :  { %9421 = vlog2.f32 %v4271_v57  ;;  %v4261_v55 = vrot.slane %v4260_v41, 1 }
0x26e3   :  { %v4262_v46 = vadd.f32 %v4261_v55, %v4260_v41 }
0x26e5   :  { %9423 = vlog2.f32 %v4262_v46 }
0x26ee   :  { %v9422_v7 = vpop.eup %9421 }
0x26ef   :  { %v4275_v40 = vmul.f32 0.6931472, %v9422_v7 }
0x26f1   :  { %v4277_v56 = vadd.f32 %v4275_v40, %v4241_v44 }
0x26f2   :  { %v9424_v28 = vpop.eup %9423 }
0x26f3   :  { %v4281_v51 = vsub.f32 %v10900_v50, %v4277_v56  ;;  %v4280_v60 = vsub.f32 %v10898_v21, %v4277_v56  ;;  %v4273_v5 = vmul.f32 0.6931472, %v9424_v28 }
0x26f5   :  { %v4291_v18 = vsel %vm492_vm4, %v4281_v51, -inf  ;;  %v4288_v16 = vsel %vm492_vm4, %v4280_v60, -inf  ;;  %v4276_v8 = vadd.f32 %v4273_v5, %v4232_v25 }
0x26f6   :  { %4292 = vmax.xlane.f32.xlu0 %v4291_v18  ;;  %4289 = vmax.xlane.f32.xlu1 %v4288_v16 }
0x26f7   :  { %v4279_v15 = vsub.f32 %v10908_v48, %v4276_v8  ;;  %v4278_v29 = vsub.f32 %v10906_v59, %v4276_v8 }
0x26f9   :  { %v4285_v14 = vsel %vm492_vm4, %v4279_v15, -inf  ;;  %v4282_v44 = vsel %vm492_vm4, %v4278_v29, -inf }
0x26fa   :  { %4286 = vmax.xlane.f32.xlu0 %v4285_v14  ;;  %4283 = vmax.xlane.f32.xlu1 %v4282_v44 }
0x277f   :  { %v4290_v50 = vpop.xlane.xlu1 %4289  ;;  %v4293_v21 = vpop.xlane.xlu0 %4292 }
0x2780   :  { %v4296_v13 = vsub.f32 %v4280_v60, %v4290_v50  ;;  %v4297_v58 = vsub.f32 %v4281_v51, %v4293_v21 }
0x2782   :  { %v4302_v6 = vmul.f32 1.442695, %v4296_v13  ;;  %v4304_v35 = vmul.f32 1.442695, %v4297_v58 }
0x2783   :  { %v4284_v45 = vpop.xlane.xlu1 %4283  ;;  %v4287_v25 = vpop.xlane.xlu0 %4286 }
0x2784   :  { %9425 = vpow2.f32 %v4302_v6  ;;  %v4294_v36 = vsub.f32 %v4278_v29, %v4284_v45  ;;  %v4295_v39 = vsub.f32 %v4279_v15, %v4287_v25 }
0x2785   :  { %9427 = vpow2.f32 %v4304_v35 }
0x2786   :  { %v4298_v48 = vmul.f32 1.442695, %v4294_v36  ;;  %v4300_v59 = vmul.f32 1.442695, %v4295_v39 }
0x2788   :  { %9429 = vpow2.f32 %v4298_v48 }
0x2789   :  { %9431 = vpow2.f32 %v4300_v59 }
0x2791   :  { %v9426_v22 = vpop.eup %9425 }
0x2792   :  { %v9428_v30 = vpop.eup %9427  ;;  %v4312_v62 = vsel %vm492_vm4, %v9426_v22, 0.0 }
0x2793   :  { %4313 = vadd.xlane.f32.xlu1 %v4312_v62  ;;  %v4315_v3 = vsel %vm492_vm4, %v9428_v30, 0.0 }
0x2794   :  { %4316 = vadd.xlane.f32.xlu0 %v4315_v3 }
0x2795   :  { %v9430_v24 = vpop.eup %9429 }
0x2796   :  { %v9432_v34 = vpop.eup %9431  ;;  %v4306_v26 = vsel %vm492_vm4, %v9430_v24, 0.0 }
0x2797   :  { %4307 = vadd.xlane.f32.xlu1 %v4306_v26  ;;  %v4309_v0 = vsel %vm492_vm4, %v9432_v34, 0.0 }
0x2798   :  { %4310 = vadd.xlane.f32.xlu0 %v4309_v0 }
0x281c   :  { %v4314_v19 = vpop.xlane.xlu1 %4313 }
0x281d   :  { %9433 = vlog2.f32 %v4314_v19  ;;  %v4317_v33 = vpop.xlane.xlu0 %4316 }
0x281e   :  { %9435 = vlog2.f32 %v4317_v33 }
0x2820   :  { %v4308_v10 = vpop.xlane.xlu1 %4307 }
0x2821   :  { %9437 = vlog2.f32 %v4308_v10  ;;  %v4311_v12 = vpop.xlane.xlu0 %4310 }
0x2822   :  { %9439 = vlog2.f32 %v4311_v12 }
0x282a   :  { %v9434_v42 = vpop.eup %9433 }
0x282b   :  { %v9436_v61 = vpop.eup %9435  ;;  %v4323_v31 = vmul.f32 0.6931472, %v9434_v42 }
0x282c   :  { %v4325_v27 = vmul.f32 0.6931472, %v9436_v61 }
0x282d   :  { %v4328_v9 = vadd.f32 %v4323_v31, %v4290_v50 }
0x282e   :  { %v9438_v63 = vpop.eup %9437  ;;  %v4329_v23 = vadd.f32 %v4325_v27, %v4293_v21 }
0x282f   :  { %v9440_v52 = vpop.eup %9439  ;;  %v10934_v57 = vsub.f32 %v4280_v60, %v4328_v9  ;;  %v4319_v41 = vmul.f32 0.6931472, %v9438_v63 }
0x2830   :  { %v10936_v55 = vsub.f32 %v4281_v51, %v4329_v23  ;;  %v4321_v46 = vmul.f32 0.6931472, %v9440_v52 }
0x2831   :  { %v4343_v7 = vsel %vm492_vm4, %v10934_v57, -inf  ;;  %v4326_v40 = vadd.f32 %v4319_v41, %v4284_v45 }
0x2832   :  { %v4344_v56 = vsel %vm492_vm4, %v10936_v55, -inf  ;;  %v4327_v28 = vadd.f32 %v4321_v46, %v4287_v25 }
0x2833   :  { %v4345_v5 = vmax.f32 %v4343_v7, %v4344_v56  ;;  %v10942_v18 = vsub.f32 %v4278_v29, %v4326_v40 }
0x2834   :  { %v10944_v16 = vsub.f32 %v4279_v15, %v4327_v28 }
0x2835   :  { %v4346_v8 = vrot.slane %v4345_v5, 4  ;;  %v4334_v60 = vsel %vm492_vm4, %v10942_v18, -inf }
0x2836   :  { %v4335_v51 = vsel %vm492_vm4, %v10944_v16, -inf }
0x2837   :  { %v4347_v14 = vmax.f32 %v4345_v5, %v4346_v8  ;;  %v4336_v44 = vmax.f32 %v4334_v60, %v4335_v51 }
0x2839   :  { %v4348_v50 = vrot.slane %v4347_v14, 2  ;;  %v4337_v21 = vrot.slane %v4336_v44, 4 }
0x283b   :  { %v4349_v13 = vmax.f32 %v4347_v14, %v4348_v50  ;;  %v4338_v58 = vmax.f32 %v4336_v44, %v4337_v21 }
0x283d   :  { %v4350_v6 = vrot.slane %v4349_v13, 1  ;;  %v4339_v35 = vrot.slane %v4338_v58, 2 }
0x283f   :  { %v4351_v45 = vmax.f32 %v4349_v13, %v4350_v6  ;;  %v4340_v29 = vmax.f32 %v4338_v58, %v4339_v35 }
0x2841   :  { %v4354_v15 = vsub.f32 %v10934_v57, %v4351_v45  ;;  %v4355_v25 = vsub.f32 %v10936_v55, %v4351_v45  ;;  %v4341_v36 = vrot.slane %v4340_v29, 1 }
0x2843   :  { %v4360_v39 = vmul.f32 1.442695, %v4354_v15  ;;  %v4362_v48 = vmul.f32 1.442695, %v4355_v25  ;;  %v4342_v59 = vmax.f32 %v4340_v29, %v4341_v36 }
0x2845   :  { %9441 = vpow2.f32 %v4360_v39  ;;  %v4352_v22 = vsub.f32 %v10942_v18, %v4342_v59  ;;  %v4353_v30 = vsub.f32 %v10944_v16, %v4342_v59 }
0x2846   :  { %9443 = vpow2.f32 %v4362_v48 }
0x2847   :  { %v4356_v62 = vmul.f32 1.442695, %v4352_v22  ;;  %v4358_v3 = vmul.f32 1.442695, %v4353_v30 }
0x2849   :  { %9445 = vpow2.f32 %v4356_v62 }
0x284a   :  { %9447 = vpow2.f32 %v4358_v3 }
0x2852   :  { %v9442_v24 = vpop.eup %9441 }
0x2853   :  { %v9444_v34 = vpop.eup %9443  ;;  %v4373_v26 = vsel %vm492_vm4, %v9442_v24, 0.0  ;;  %v9169_v24 = vld [vmem:[%s7865_s25 + $0x8] sm:$0x1f]  }
0x2854   :  { %v4374_v0 = vsel %vm492_vm4, %v9444_v34, 0.0  ;;  %v10988_v34 = vld [vmem:[%s9879_s7 + $0x8] sm:$0xff]  }
0x2855   :  { %v4375_v19 = vadd.f32 %v4374_v0, %v4373_v26  ;;  %v10994_v26 = vld [vmem:[%s9879_s7] sm:$0xff]   ;;  %s11771_s7 = smov 96  }
0x2856   :  { %v9446_v33 = vpop.eup %9445 }
0x2857   :  { %v9448_v10 = vpop.eup %9447  ;;  %v4376_v12 = vrot.slane %v4375_v19, 4  ;;  %v4364_v42 = vsel %vm492_vm4, %v9446_v33, 0.0 }
0x2858   :  { %v4365_v61 = vsel %vm492_vm4, %v9448_v10, 0.0 }
0x2859   :  { %v4377_v31 = vadd.f32 %v4376_v12, %v4375_v19  ;;  %v4366_v27 = vadd.f32 %v4365_v61, %v4364_v42 }
0x285b   :  { %v4378_v9 = vrot.slane %v4377_v31, 2  ;;  %v4367_v63 = vrot.slane %v4366_v27, 4 }
0x285d   :  { %v4379_v23 = vadd.f32 %v4378_v9, %v4377_v31  ;;  %v4368_v52 = vadd.f32 %v4367_v63, %v4366_v27  ;;  %v9171_v63 = vld [vmem:[%s10982_s27 + $0x8] sm:$0x1f]  }
0x285f   :  { %v4380_v41 = vrot.slane %v4379_v23, 1  ;;  %v4369_v46 = vrot.slane %v4368_v52, 2 }
0x2861   :  { %v4381_v7 = vadd.f32 %v4380_v41, %v4379_v23  ;;  %v4370_v40 = vadd.f32 %v4369_v46, %v4368_v52  ;;  %v11001_v23 = vld [vmem:[%s10417_s14] sm:$0xff]  }
0x2863   :  { %9449 = vlog2.f32 %v4381_v7  ;;  %v4371_v56 = vrot.slane %v4370_v40, 1 }
0x2865   :  { %v4372_v28 = vadd.f32 %v4371_v56, %v4370_v40 }
0x2867   :  { %9451 = vlog2.f32 %v4372_v28 }
0x2870   :  { %v9450_v5 = vpop.eup %9449 }
0x2871   :  { %v4385_v8 = vmul.f32 0.6931472, %v9450_v5 }
0x2873   :  { %v4387_v60 = vadd.f32 %v4385_v8, %v4351_v45 }
0x2874   :  { %v9452_v51 = vpop.eup %9451 }
0x2875   :  { %v4391_v14 = vsub.f32 %v10936_v55, %v4387_v60  ;;  %v4383_v44 = vmul.f32 0.6931472, %v9452_v51  ;;  %v4390_v50 = vsub.f32 %v10934_v57, %v4387_v60 }
0x2877   :  { %v4398_v21 = vmul.f32 1.442695, %v4391_v14  ;;  %v4386_v13 = vadd.f32 %v4383_v44, %v4342_v59  ;;  %v4396_v58 = vmul.f32 1.442695, %v4390_v50 }
0x2879   :  { %9453 = vpow2.f32 %v4398_v21  ;;  %v4389_v6 = vsub.f32 %v10944_v16, %v4386_v13  ;;  %v4388_v35 = vsub.f32 %v10942_v18, %v4386_v13  ;;  %v11014_v21 = vld [vmem:[%s9908_s15] sm:$0xff]  }
0x287a   :  { %9455 = vpow2.f32 %v4396_v58 }
0x287b   :  { %v4394_v29 = vmul.f32 1.442695, %v4389_v6  ;;  %v4392_v15 = vmul.f32 1.442695, %v4388_v35 }
0x287d   :  { %9457 = vpow2.f32 %v4394_v29 }
0x287e   :  { %9459 = vpow2.f32 %v4392_v15 }
0x2886   :  { %v9454_v45 = vpop.eup %9453 }
0x2887   :  { %v9456_v25 = vpop.eup %9455 }
0x2888   :  { %v4401_v36 = vpack.c.bf16 %v9454_v45, %v9456_v25  ;;  %v11770_v25 = vld [vmem:[#allocation2_spill] sm:$0xff] }
0x288a   :  { %v9458_v55 = vpop.eup %9457  ;;  %4554 = vxpose.xlu1.c.b16.start.end [1/1] (short) (narrow) %v4401_v36, 16  ;;  %8775 = vmatmul.mubr.msk.bf16.vlgmr.msra.gmra.mxu1 %vm492_vm4, %v4401_v36 }
0x288b   :  { %v9460_v57 = vpop.eup %9459  ;;  %8785 = vmatpush3.bf16.msra.mxu1 %v4553_v1  ;;  %8786 = vmatprep.mubr.msk.bf16.mxu1 %vm9823_vm9, %v9822_v2 }
0x288c   :  { %v4400_v18 = vpack.c.bf16 %v9458_v55, %v9460_v57 }
0x288e   :  { %4493 = vxpose.xlu0.c.b16.start.end [1/1] (short) (narrow) %v4400_v18, 16  ;;  %8769 = vmatmul.mubr.msk.bf16.vlgmr.msra.gmra.mxu0 %vm492_vm4, %v4400_v18 }
0x288f   :  { %8779 = vmatpush3.bf16.msra.mxu0 %v4492_v53  ;;  %8780 = vmatprep.mubr.msk.bf16.mxu0 %vm9823_vm9, %v9822_v2 }
0x28ec   :  { %v4562_v16 = vpop.trf.xlu1 }
0x28ed   :  { %8787 = vmatmul.mubr.msk.bf16.vlgmr.msra.gmra.mxu1 %vm492_vm4, %v4562_v16 }
0x28ee   :  { %8802 = vmatprep.mubr.msk.bf16.mxu1 %vm566_vm5, %v9168_v32 }
0x28f0   :  { %v4501_v39 = vpop.trf.xlu0 }
0x28f1   :  { %8781 = vmatmul.mubr.msk.bf16.vlgmr.msra.gmra.mxu0 %vm492_vm4, %v4501_v39 }
0x28f2   :  { %8794 = vmatprep.mubr.msk.bf16.mxu0 %vm566_vm5, %v9170_v20  ;;  %v11025_v20 = vld [vmem:[%s9913_s19] sm:$0xff]  }
0x294a   :  { %v4485_v54 = vpop.f32.mrf.mxu1 }
0x294c   :  { %v8776_v1 = vpop.f32.mrf.mxu1 }
0x294e   :  { %v4441_v47 = vpop.f32.mrf.mxu0  ;;  %v4488_v53 = vpop.f32.mrf.mxu1 }
0x294f   :  { %v4615_v48 = vpack.c.bf16 %v4488_v53, %v4485_v54  ;;  %v11030_v54 = vld [vmem:[%s9934_s24] ss:$0 sm:$0xff]  ;;  %s9829_s24 = smov 35  }
0x2950   :  { %v8770_v59 = vpop.f32.mrf.mxu0  ;;  %v8777_v22 = vpop.f32.mrf.mxu1 }
0x2951   :  { %8798 = vmatprep.subr.bf16.mxu1 %v4615_v48 }
0x2952   :  { %v4444_v30 = vpop.f32.mrf.mxu0  ;;  %8799 = vmatpush3.bf16.msra.mxu1 %v4615_v48 }
0x2953   :  { %v4614_v62 = vpack.c.bf16 %v4444_v30, %v4441_v47 }
0x2954   :  { %v8771_v3 = vpop.f32.mrf.mxu0 }
0x2955   :  { %8800 = vmatprep.subr.bf16.mxu1 %v4614_v62  ;;  %v11063_v3 = vld [vmem:[%s9984_s28] sm:$0xff]  }
0x2956   :  { %8801 = vmatpush3.bf16.msra.mxu1 %v4614_v62 }
0x2957   :  { %8812 = vmatprep.subr.bf16.mxu1 %v10988_v34 }
0x2959   :  { %8803 = vmatmul.mubr.msk.bf16.vlgmr.msra.gmra.mxu1 %vm566_vm5, %v9169_v24  ;;  %v11067_v24 = vld [vmem:[%s9989_s2] sm:$0xff]  }
0x295a   :  { %8813 = vmatpush3.bf16.msra.mxu1 %v10988_v34 }
0x295b   :  { %8814 = vmatprep.subr.bf16.mxu1 %v10994_v26 }
0x295e   :  { %8815 = vmatpush3.bf16.msra.mxu1 %v10994_v26 }
0x29ad   :  { %v4607_v0 = vpop.f32.mrf.mxu1 }
0x29af   :  { %v8788_v19 = vpop.f32.mrf.mxu1 }
0x29b0   :  { %v11076_v19 = vld [vmem:[%s9913_s19 + $0x8] sm:$0x1f]   ;;  %s11774_s19 = sld [smem:[#allocation5_spill]] }
0x29b1   :  { %v4546_v33 = vpop.f32.mrf.mxu0  ;;  %v4610_v10 = vpop.f32.mrf.mxu1 }
0x29b2   :  { %v4617_v12 = vpack.c.bf16 %v4610_v10, %v4607_v0  ;;  %v11071_v0 = vld [vmem:[%s9908_s15 + $0x8] sm:$0x1f]   ;;  %s9828_s15 = smov 112  }
0x29b3   :  { %v8782_v42 = vpop.f32.mrf.mxu0  ;;  %v8789_v61 = vpop.f32.mrf.mxu1 }
0x29b4   :  { %8790 = vmatprep.subr.bf16.mxu0 %v4617_v12 }
0x29b5   :  { %v4549_v31 = vpop.f32.mrf.mxu0  ;;  %8791 = vmatpush3.bf16.msra.mxu0 %v4617_v12 }
0x29b6   :  { %v4616_v27 = vpack.c.bf16 %v4549_v31, %v4546_v33  ;;  %v11083_v33 = vld [vmem:[%s10008_s6 + $0x18] sm:$0xff]  }
0x29b7   :  { %v8783_v9 = vpop.f32.mrf.mxu0 }
0x29b8   :  { %8792 = vmatprep.subr.bf16.mxu0 %v4616_v27 }
0x29b9   :  { %8793 = vmatpush3.bf16.msra.mxu0 %v4616_v27 }
0x29ba   :  { %8806 = vmatprep.subr.bf16.mxu0 %v11001_v23 }
0x29bc   :  { %8795 = vmatmul.mubr.msk.bf16.vlgmr.msra.gmra.mxu0 %vm566_vm5, %v9171_v63 }
0x29bd   :  { %8807 = vmatpush3.bf16.msra.mxu0 %v11001_v23 }
0x2a19   :  { %v8804_v52 = vpop.f32.mrf.mxu1 }
0x2a1b   :  { %v4733_v41 = vpop.f32.mrf.mxu1 }
0x2a1d   :  { %v8805_v7 = vpop.f32.mrf.mxu1 }
0x2a1f   :  { %v4736_v28 = vpop.f32.mrf.mxu1 }
0x2a7c   :  { %v8796_v46 = vpop.f32.mrf.mxu0 }
0x2a7d   :  { %v4742_v14 = vadd.f32 %v8804_v52, %v8796_v46 }
0x2a7e   :  { %v4668_v40 = vpop.f32.mrf.mxu0 }
0x2a7f   :  { %v4734_v60 = vadd.f32 %v4733_v41, %v4668_v40  ;;  %v11092_v40 = vld [vmem:[%s10073_s29] sm:$0xff]  }
0x2a80   :  { %v8797_v56 = vpop.f32.mrf.mxu0 }
0x2a81   :  { %v4745_v5 = vadd.f32 %v8805_v7, %v8797_v56  ;;  %v11097_v56 = vld [vmem:[%s10008_s6 + $0x10] sm:$0xff]  }
0x2a82   :  { %v4671_v8 = vpop.f32.mrf.mxu0 }
0x2a83   :  { %v4737_v51 = vadd.f32 %v4736_v28, %v4671_v8  ;;  %v11007_v50 = vpack.c.bf16 %v4745_v5, %v4742_v14  ;;  %v11102_v28 = vld [vmem:[%s10008_s6 + $0x8] sm:$0xff]   ;;  %v11107_v5 = vld [vmem:[%s10008_s6] sm:$0xff]   ;;  %s7892_s6 = sld [smem:[%s11758_s0 + %s9829_s24]]  }
0x2a84   :  { %v11112_v8 = vld [vmem:[%s10032_s12] sm:$0xff]  }
0x2a85   :  { %v11005_v44 = vpack.c.bf16 %v4737_v51, %v4734_v60 }
0x2a87   :  { %8808 = vmatprep.mubr.msk.bf16.mxu0 %vm492_vm4, %v11005_v44 }
0x2a88   :  { %8809 = vmatmul.mubr.msk.bf16.vlgmr.msra.gmra.mxu0 %vm492_vm4, %v11007_v50 }
0x2a89   :  { %8824 = vmatprep.mubr.msk.bf16.mxu0 %vm634_vm6, %v11014_v21 }
0x2b48   :  { %v8810_v13 = vpop.f32.mrf.mxu0 }
0x2b49   :  { %v4813_v15 = vadd.f32 %v8810_v13, %v10199_v17 }
0x2b4a   :  { %v4796_v58 = vpop.f32.mrf.mxu0 }
0x2b4b   :  { %v4811_v35 = vadd.f32 %v4796_v58, %v10193_v11  ;;  %v4817_v16 = vmax.f32 %v4813_v15, 0.0 }
0x2b4c   :  { %v8811_v6 = vpop.f32.mrf.mxu0 }
0x2b4d   :  { %v4814_v29 = vadd.f32 %v8811_v6, %v10196_v4  ;;  %v4815_v57 = vmax.f32 %v4811_v35, 0.0 }
0x2b4e   :  { %v4799_v45 = vpop.f32.mrf.mxu0 }
0x2b4f   :  { %v4812_v36 = vadd.f32 %v4799_v45, %v11770_v25  ;;  %v4818_v55 = vmax.f32 %v4814_v29, 0.0 }
0x2b51   :  { %v4816_v18 = vmax.f32 %v4812_v36, 0.0  ;;  %v4820_v32 = vpack.c.bf16 %v4818_v55, %v4817_v16 }
0x2b53   :  { %v4819_v39 = vpack.c.bf16 %v4816_v18, %v4815_v57 }
0x2b55   :  { %8816 = vmatprep.mubr.msk.bf16.mxu1 %vm566_vm5, %v4819_v39 }
0x2b56   :  { %8817 = vmatmul.mubr.msk.bf16.vlgmr.msra.gmra.mxu1 %vm566_vm5, %v4820_v32 }
0x2b57   :  { %8832 = vmatprep.mubr.msk.bf16.mxu1 %vm634_vm6, %v11025_v20 }
0x2c16   :  { %v8818_v11 = vpop.f32.mrf.mxu1 }
0x2c17   :  { %v11033_v1 = vadd.f32 %v11030_v54, %v8818_v11 }
0x2c18   :  { %v4861_v4 = vpop.f32.mrf.mxu1 }
0x2c19   :  { %v11039_v48 = vadd.f32 %v11030_v54, %v4861_v4 }
0x2c1a   :  { %v8819_v17 = vpop.f32.mrf.mxu1 }
0x2c1b   :  { %v11036_v47 = vadd.f32 %v11030_v54, %v8819_v17 }
0x2c1c   :  { %v4864_v53 = vpop.f32.mrf.mxu1 }
0x2c1d   :  { %v11043_v59 = vpack.c.bf16 %v11036_v47, %v11033_v1  ;;  %v11046_v22 = vadd.f32 %v11030_v54, %v4864_v53 }
0x2c1f   :  { %v11050_v30 = vpack.c.bf16 %v11046_v22, %v11039_v48  ;;  %9071 = vmatprep.subr.msk.bf16.mxu0 %vm641_vm7, %v11043_v59  ;;  %9072 = vmatprep.subr.msk.bf16.mxu1 %vm641_vm7, %v11043_v59  ;;  %v4879_v62 = vsel %vm641_vm7, %v11043_v59, 0 }
0x2c20   :  { %8821 = vmatpush3.bf16.msra.mxu0 %v4879_v62  ;;  %8829 = vmatpush3.bf16.msra.mxu1 %v4879_v62  ;;  %v11125_v62 = vld [vmem:[%s10135_s18] sm:$0xff]  }
0x2c21   :  { %8822 = vmatprep.subr.bf16.mxu0 %v11050_v30  ;;  %8830 = vmatprep.subr.bf16.mxu1 %v11050_v30 }
0x2c24   :  { %8823 = vmatpush3.bf16.msra.mxu0 %v11050_v30  ;;  %8831 = vmatpush3.bf16.msra.mxu1 %v11050_v30 }
0x2c25   :  { %8836 = vmatprep.subr.bf16.mxu0 %v11063_v3  ;;  %8842 = vmatprep.subr.bf16.mxu1 %v11067_v24 }
0x2c27   :  { %8825 = vmatmul.mubr.msk.bf16.vlgmr.msra.gmra.mxu0 %vm634_vm6, %v11071_v0  ;;  %8833 = vmatmul.mubr.msk.bf16.vlgmr.msra.gmra.mxu1 %vm634_vm6, %v11076_v19 }
0x2c28   :  { %8837 = vmatpush3.bf16.msra.mxu0 %v11063_v3  ;;  %8843 = vmatpush3.bf16.msra.mxu1 %v11067_v24 }
0x2c29   :  { %8848 = vmatprep.subr.bf16.mxu0 %v11083_v33 }
0x2ce7   :  { %v8826_v10 = vpop.f32.mrf.mxu0  ;;  %v8834_v12 = vpop.f32.mrf.mxu1 }
0x2ce9   :  { %v4915_v42 = vpop.f32.mrf.mxu0  ;;  %v4964_v61 = vpop.f32.mrf.mxu1 }
0x2ceb   :  { %v8827_v31 = vpop.f32.mrf.mxu0  ;;  %v8835_v27 = vpop.f32.mrf.mxu1 }
0x2cec   :  { %v4980_v46 = vpack.c.bf16 %v8827_v31, %v8826_v10  ;;  %v5041_v7 = vpack.c.bf16 %v8835_v27, %v8834_v12 }
0x2ced   :  { %v4918_v9 = vpop.f32.mrf.mxu0  ;;  %v4967_v63 = vpop.f32.mrf.mxu1 }
0x2cee   :  { %v4979_v52 = vpack.c.bf16 %v4918_v9, %v4915_v42  ;;  %v5040_v41 = vpack.c.bf16 %v4967_v63, %v4964_v61  ;;  %v11133_v61 = vld [vmem:[%s10068_s23] ss:$0 sm:$0xff] }
0x2cf0   :  { %8838 = vmatprep.mubr.msk.bf16.mxu0 %vm492_vm4, %v4979_v52  ;;  %8844 = vmatprep.mubr.msk.bf16.mxu1 %vm492_vm4, %v5040_v41 }
0x2cf1   :  { %8839 = vmatmul.mubr.msk.bf16.vlgmr.msra.gmra.mxu0 %vm492_vm4, %v4980_v46  ;;  %8845 = vmatmul.mubr.msk.bf16.vlgmr.msra.gmra.mxu1 %vm492_vm4, %v5041_v7 }
0x2cf2   :  { %8849 = vmatpush3.bf16.msra.mxu0 %v11083_v33  ;;  %8864 = vmatprep.mubr.msk.bf16.mxu1 %vm634_vm6, %v11092_v40 }
0x2cf3   :  { %8850 = vmatprep.subr.bf16.mxu0 %v11097_v56 }
0x2cf6   :  { %8851 = vmatpush3.bf16.msra.mxu0 %v11097_v56 }
0x2cf7   :  { %8852 = vmatprep.subr.bf16.mxu0 %v11102_v28 }
0x2cfa   :  { %8853 = vmatpush3.bf16.msra.mxu0 %v11102_v28 }
0x2cfb   :  { %8854 = vmatprep.subr.bf16.mxu0 %v11107_v5 }
0x2cfe   :  { %8855 = vmatpush3.bf16.msra.mxu0 %v11107_v5 }
0x2cff   :  { %8876 = vmatprep.subr.bf16.mxu0 %v11112_v8 }
0x2db1   :  { %v8840_v60 = vpop.f32.mrf.mxu0  ;;  %v8846_v51 = vpop.f32.mrf.mxu1 }
0x2db2   :  { %v5038_v6 = vadd.f32 %v8840_v60, %v10046_v38  ;;  %v11147_v60 = vld [vmem:[%s10073_s29 + $0x8] sm:$0x1f]  }
0x2db3   :  { %v5021_v14 = vpop.f32.mrf.mxu0  ;;  %v5082_v13 = vpop.f32.mrf.mxu1 }
0x2db4   :  { %v5036_v58 = vadd.f32 %v5021_v14, %v10043_v37  ;;  %v5099_v57 = vadd.f32 %v8846_v51, %v5038_v6  ;;  %v11158_v51 = vld [vmem:[%s10116_s13 + $0x8] sm:$0xff]  }
0x2db5   :  { %v8841_v35 = vpop.f32.mrf.mxu0  ;;  %v8847_v29 = vpop.f32.mrf.mxu1  ;;  %v11162_v14 = vld [vmem:[%s10086_s4 + $0x8] sm:$0x1f]  }
0x2db6   :  { %v5039_v15 = vadd.f32 %v8841_v35, %v10049_v43  ;;  %v5097_v25 = vadd.f32 %v5082_v13, %v5036_v58  ;;  %v5103_v4 = vmax.f32 %v5099_v57, 0.0  ;;  %v11168_v13 = vld [vmem:[%s10116_s13] sm:$0xff]  }
0x2db7   :  { %v5024_v45 = vpop.f32.mrf.mxu0  ;;  %v5085_v18 = vpop.f32.mrf.mxu1  ;;  %v9771_v58 = vld [vmem:[%s9854_s21] sm:$0xff]   ;;  %s11772_s21 = sld [smem:[#allocation3_spill]] }
0x2db8   :  { %v5100_v36 = vadd.f32 %v8847_v29, %v5039_v15  ;;  %v5037_v55 = vadd.f32 %v5024_v45, %v10054_v49  ;;  %v5101_v32 = vmax.f32 %v5097_v25, 0.0 }
0x2dba   :  { %v5098_v16 = vadd.f32 %v5085_v18, %v5037_v55  ;;  %v5104_v39 = vmax.f32 %v5100_v36, 0.0 }
0x2dbc   :  { %v5102_v11 = vmax.f32 %v5098_v16, 0.0  ;;  %v5106_v53 = vpack.c.bf16 %v5104_v39, %v5103_v4 }
0x2dbe   :  { %v5105_v17 = vpack.c.bf16 %v5102_v11, %v5101_v32 }
0x2dc0   :  { %8856 = vmatprep.mubr.msk.bf16.mxu0 %vm923_vm8, %v5105_v17 }
0x2dc1   :  { %8857 = vmatmul.mubr.msk.bf16.vlgmr.msra.gmra.mxu0 %vm923_vm8, %v5106_v53 }
0x2dc2   :  { %8878 = vmatprep.mubr.msk.bf16.mxu0 %vm492_vm4, %v11050_v30  ;;  %8877 = vmatpush3.bf16.msra.mxu0 %v11112_v8 }
0x2dc3   :  { %8890 = vmatprep.subr.bf16.mxu0 %v11125_v62 }
0x2dc9   :  { %8879 = vmatmul.mubr.msk.bf16.vlgmr.msra.gmra.mxu0 %vm492_vm4, %v11043_v59 }
0x2dca   :  { %8891 = vmatpush3.bf16.msra.mxu0 %v11125_v62 }
0x2dcb   :  { %8902 = vmatprep.subr.bf16.mxu0 %v11001_v23 }
0x2e81   :  { %v8858_v10 = vpop.f32.mrf.mxu0 }
0x2e82   :  { %v5156_v30 = vadd.f32 %v11133_v61, %v8858_v10 }
0x2e83   :  { %v5147_v12 = vpop.f32.mrf.mxu0 }
0x2e84   :  { %v5148_v9 = vadd.f32 %v11133_v61, %v5147_v12 }
0x2e85   :  { %v8859_v42 = vpop.f32.mrf.mxu0 }
0x2e86   :  { %v5159_v31 = vadd.f32 %v11133_v61, %v8859_v42 }
0x2e87   :  { %v5150_v27 = vpop.f32.mrf.mxu0 }
0x2e88   :  { %v5163_v63 = vpack.c.bf16 %v5159_v31, %v5156_v30  ;;  %v5151_v59 = vadd.f32 %v11133_v61, %v5150_v27 }
0x2e89   :  { %v8880_v4 = vpop.f32.mrf.mxu0 }
0x2e8a   :  { %v5162_v52 = vpack.c.bf16 %v5151_v59, %v5148_v9  ;;  %5168 = vrot.lane.b32.xlu1 %v5163_v63, %s11771_s7  ;;  %v11177_v59 = vld [vmem:[%s10146_s26] ss:$0 sm:$0xff] }
0x2e8b   :  { %v5316_v17 = vpop.f32.mrf.mxu0 }
0x2e8c   :  { %5166 = vrot.lane.b32.xlu0 %v5162_v52, %s11771_s7 }
0x2e8d   :  { %v8881_v10 = vpop.f32.mrf.mxu0 }
0x2e8e   :  { %5514 = vrot.lane.b32.xlu1 %v11005_v44, %s9828_s15  ;;  %v5224_v44 = vsel %vm641_vm7, %v5163_v63, 0 }
0x2e8f   :  { %v5319_v9 = vpop.f32.mrf.mxu0 }
0x2e92   :  { %5516 = vrot.lane.b32.xlu1 %v11007_v50, %s9828_s15  ;;  %v11153_v50 = vld [vmem:[%s10086_s4] sm:$0xff]  }
0x2efc   :  { %v5169_v41 = vpop.permute.xlu1 %5168 }
0x2efd   :  { %v5172_v46 = vsel %vm641_vm7, %v5169_v41, 0  ;;  %9073 = vmatprep.subr.msk.bf16.mxu1 %vm641_vm7, %v5169_v41 }
0x2efe   :  { %8861 = vmatpush3.bf16.msra.mxu1 %v5172_v46  ;;  %v5167_v7 = vpop.permute.xlu0 %5166 }
0x2eff   :  { %8862 = vmatprep.subr.bf16.mxu1 %v5167_v7 }
0x2f02   :  { %8863 = vmatpush3.bf16.msra.mxu1 %v5167_v7 }
0x2f03   :  { %9074 = vmatprep.subr.msk.bf16.mxu1 %vm641_vm7, %v5163_v63 }
0x2f05   :  { %8865 = vmatmul.mubr.msk.bf16.vlgmr.msra.gmra.mxu1 %vm634_vm6, %v11147_v60 }
0x2f06   :  { %8869 = vmatpush3.bf16.msra.mxu1 %v5224_v44  ;;  %8872 = vmatprep.mubr.msk.bf16.mxu1 %vm634_vm6, %v11153_v50 }
0x2f07   :  { %8870 = vmatprep.subr.bf16.mxu1 %v5162_v52 }
0x2f0a   :  { %8871 = vmatpush3.bf16.msra.mxu1 %v5162_v52 }
0x2f0b   :  { %8882 = vmatprep.subr.bf16.mxu1 %v11158_v51 }
0x2f0d   :  { %8873 = vmatmul.mubr.msk.bf16.vlgmr.msra.gmra.mxu1 %vm634_vm6, %v11162_v14 }
0x2f0e   :  { %8883 = vmatpush3.bf16.msra.mxu1 %v11158_v51 }
0x2f0f   :  { %8884 = vmatprep.subr.bf16.mxu1 %v11168_v13 }
0x2f12   :  { %8885 = vmatpush3.bf16.msra.mxu1 %v11168_v13 }
0x2f13   :  { %8896 = vmatprep.subr.bf16.mxu1 %v9771_v58 }
0x2fc5   :  { %v8866_v6 = vpop.f32.mrf.mxu1 }
0x2fc7   :  { %v5208_v35 = vpop.f32.mrf.mxu1 }
0x2fc9   :  { %v8867_v29 = vpop.f32.mrf.mxu1 }
0x2fcb   :  { %v5211_v15 = vpop.f32.mrf.mxu1 }
0x2fcd   :  { %v8874_v45 = vpop.f32.mrf.mxu1 }
0x2fce   :  { %v5269_v39 = vadd.f32 %v8874_v45, %v8866_v6 }
0x2fcf   :  { %v5260_v25 = vpop.f32.mrf.mxu1 }
0x2fd0   :  { %v5261_v18 = vadd.f32 %v5260_v25, %v5208_v35  ;;  %v5515_v25 = vpop.permute.xlu1 %5514 }
0x2fd1   :  { %v8875_v36 = vpop.f32.mrf.mxu1 }
0x2fd2   :  { %v5272_v55 = vadd.f32 %v8875_v36, %v8867_v29 }
0x2fd3   :  { %v5263_v57 = vpop.f32.mrf.mxu1 }
0x2fd4   :  { %v5264_v16 = vadd.f32 %v5263_v57, %v5211_v15  ;;  %v5276_v11 = vpack.c.bf16 %v5272_v55, %v5269_v39  ;;  %v5517_v36 = vpop.permute.xlu1 %5516 }
0x2fd6   :  { %v5275_v32 = vpack.c.bf16 %v5264_v16, %v5261_v18  ;;  %v11191_v16 = vld [vmem:[%s10163_s3] ss:$0 sm:$0xff] }
0x2fd8   :  { %8886 = vmatprep.mubr.msk.bf16.mxu1 %vm566_vm5, %v5275_v32 }
0x2fd9   :  { %8887 = vmatmul.mubr.msk.bf16.vlgmr.msra.gmra.mxu1 %vm566_vm5, %v5276_v11 }
0x2fda   :  { %8897 = vmatpush3.bf16.msra.mxu1 %v9771_v58 }
0x2fdb   :  { %8908 = vmatprep.subr.bf16.mxu1 %v10988_v34 }
0x3099   :  { %v8888_v53 = vpop.f32.mrf.mxu1 }
0x309a   :  { %v5380_v30 = vadd.f32 %v8888_v53, %v8880_v4 }
0x309b   :  { %v5371_v12 = vpop.f32.mrf.mxu1 }
0x309c   :  { %v5372_v42 = vadd.f32 %v5371_v12, %v5316_v17  ;;  %v5388_v7 = vadd.f32 %v11177_v59, %v5380_v30 }
0x309d   :  { %v8889_v31 = vpop.f32.mrf.mxu1 }
0x309e   :  { %v5383_v27 = vadd.f32 %v8889_v31, %v8881_v10  ;;  %v5386_v52 = vadd.f32 %v11177_v59, %v5372_v42  ;;  %v5392_v29 = vmax.f32 %v5388_v7, 0.0 }
0x309f   :  { %v5374_v63 = vpop.f32.mrf.mxu1 }
0x30a0   :  { %v5389_v41 = vadd.f32 %v11177_v59, %v5383_v27  ;;  %v5375_v46 = vadd.f32 %v5374_v63, %v5319_v9  ;;  %v5390_v6 = vmax.f32 %v5386_v52, 0.0  ;;  %v9774_v27 = vld [vmem:[%s9894_s11] ss:$0 sm:$0xff]  ;;  %s11773_s11 = sld [smem:[#allocation4_spill]] }
0x30a2   :  { %v5387_v44 = vadd.f32 %v11177_v59, %v5375_v46  ;;  %v5393_v58 = vmax.f32 %v5389_v41, 0.0 }
0x30a4   :  { %v5391_v35 = vmax.f32 %v5387_v44, 0.0  ;;  %v5395_v45 = vpack.c.bf16 %v5393_v58, %v5392_v29 }
0x30a6   :  { %v5394_v15 = vpack.c.bf16 %v5391_v35, %v5390_v6 }
0x30a8   :  { %8892 = vmatprep.mubr.msk.bf16.mxu0 %vm492_vm4, %v5394_v15 }
0x30a9   :  { %8893 = vmatmul.mubr.msk.bf16.vlgmr.msra.gmra.mxu0 %vm492_vm4, %v5395_v45 }
0x30aa   :  { %8904 = vmatprep.mubr.msk.bf16.mxu0 %vm492_vm4, %v5515_v25  ;;  %8903 = vmatpush3.bf16.msra.mxu0 %v11001_v23 }
0x30b1   :  { %8905 = vmatmul.mubr.msk.bf16.vlgmr.msra.gmra.mxu0 %vm492_vm4, %v5517_v36 }
0x30b2   :  { %8920 = vmatprep.mubr.msk.bf16.mxu0 %vm634_vm6, %v11014_v21 }
0x3169   :  { %v8894_v55 = vpop.f32.mrf.mxu0 }
0x316a   :  { %v5445_v11 = vadd.f32 %v11191_v16, %v8894_v55 }
0x316b   :  { %v5436_v57 = vpop.f32.mrf.mxu0 }
0x316c   :  { %v5437_v39 = vadd.f32 %v11191_v16, %v5436_v57  ;;  %v5453_v10 = vadd.f32 %v5445_v11, %v11033_v1 }
0x316d   :  { %v8895_v18 = vpop.f32.mrf.mxu0 }
0x316e   :  { %v5448_v32 = vadd.f32 %v11191_v16, %v8895_v18  ;;  %v5451_v53 = vadd.f32 %v5437_v39, %v11039_v48 }
0x316f   :  { %v5439_v4 = vpop.f32.mrf.mxu0 }
0x3170   :  { %v5440_v23 = vadd.f32 %v11191_v16, %v5439_v4  ;;  %v5454_v17 = vadd.f32 %v5448_v32, %v11036_v47 }
0x3171   :  { %v8906_v30 = vpop.f32.mrf.mxu0 }
0x3172   :  { %v5452_v21 = vadd.f32 %v5440_v23, %v11046_v22  ;;  %v5456_v42 = vpack.c.bf16 %v5454_v17, %v5453_v10 }
0x3173   :  { %v5558_v47 = vpop.f32.mrf.mxu0 }
0x3174   :  { %v5455_v12 = vpack.c.bf16 %v5452_v21, %v5451_v53 }
0x3175   :  { %v8907_v9 = vpop.f32.mrf.mxu0 }
0x3176   :  { %8898 = vmatprep.mubr.msk.bf16.mxu1 %vm492_vm4, %v5455_v12 }
0x3177   :  { %8899 = vmatmul.mubr.msk.bf16.vlgmr.msra.gmra.mxu1 %vm492_vm4, %v5456_v42  ;;  %v5561_v58 = vpop.f32.mrf.mxu0 }
0x3178   :  { %8909 = vmatpush3.bf16.msra.mxu1 %v10988_v34 }
0x3179   :  { %8910 = vmatprep.subr.bf16.mxu1 %v10994_v26 }
0x317c   :  { %8911 = vmatpush3.bf16.msra.mxu1 %v10994_v26 }
0x3237   :  { %v8900_v31 = vpop.f32.mrf.mxu1 }
0x3238   :  { %v5506_v1 = vadd.f32 %v9774_v27, %v8900_v31 }
0x3239   :  { %v5497_v48 = vpop.f32.mrf.mxu1 }
0x323a   :  { %v5498_v22 = vadd.f32 %v9774_v27, %v5497_v48  ;;  %v5575_v34 = vadd.f32 %v8906_v30, %v5506_v1 }
0x323b   :  { %v8901_v63 = vpop.f32.mrf.mxu1 }
0x323c   :  { %v5509_v52 = vadd.f32 %v9774_v27, %v8901_v63  ;;  %v5573_v46 = vadd.f32 %v5558_v47, %v5498_v22  ;;  %v5579_v15 = vmax.f32 %v5575_v34, 0.0 }
0x323d   :  { %v5500_v41 = vpop.f32.mrf.mxu1 }
0x323e   :  { %v5576_v7 = vadd.f32 %v8907_v9, %v5509_v52  ;;  %v5501_v44 = vadd.f32 %v9774_v27, %v5500_v41  ;;  %v5577_v29 = vmax.f32 %v5573_v46, 0.0 }
0x3240   :  { %v5574_v6 = vadd.f32 %v5561_v58, %v5501_v44  ;;  %v5580_v35 = vmax.f32 %v5576_v7, 0.0 }
0x3242   :  { %v5578_v26 = vmax.f32 %v5574_v6, 0.0  ;;  %v5582_v25 = vpack.c.bf16 %v5580_v35, %v5579_v15 }
0x3244   :  { %v5581_v45 = vpack.c.bf16 %v5578_v26, %v5577_v29 }
0x3246   :  { %8912 = vmatprep.mubr.msk.bf16.mxu1 %vm566_vm5, %v5581_v45 }
0x3247   :  { %8913 = vmatmul.mubr.msk.bf16.vlgmr.msra.gmra.mxu1 %vm566_vm5, %v5582_v25 }
0x3248   :  { %8928 = vmatprep.mubr.msk.bf16.mxu1 %vm634_vm6, %v11025_v20 }
0x3307   :  { %v8914_v36 = vpop.f32.mrf.mxu1 }
0x3308   :  { %v11212_v18 = vadd.f32 %v11030_v54, %v8914_v36 }
0x3309   :  { %v5623_v55 = vpop.f32.mrf.mxu1 }
0x330a   :  { %v11218_v11 = vadd.f32 %v11030_v54, %v5623_v55 }
0x330b   :  { %v8915_v57 = vpop.f32.mrf.mxu1 }
0x330c   :  { %v11215_v39 = vadd.f32 %v11030_v54, %v8915_v57 }
0x330d   :  { %v5626_v32 = vpop.f32.mrf.mxu1 }
0x330e   :  { %v11222_v4 = vpack.c.bf16 %v11215_v39, %v11212_v18  ;;  %v11225_v23 = vadd.f32 %v11030_v54, %v5626_v32 }
0x3310   :  { %v11229_v20 = vpack.c.bf16 %v11225_v23, %v11218_v11  ;;  %9075 = vmatprep.subr.msk.bf16.mxu0 %vm641_vm7, %v11222_v4  ;;  %9076 = vmatprep.subr.msk.bf16.mxu1 %vm641_vm7, %v11222_v4  ;;  %v5641_v17 = vsel %vm641_vm7, %v11222_v4, 0 }
0x3311   :  { %8917 = vmatpush3.bf16.msra.mxu0 %v5641_v17  ;;  %8925 = vmatpush3.bf16.msra.mxu1 %v5641_v17 }
0x3312   :  { %8918 = vmatprep.subr.bf16.mxu0 %v11229_v20  ;;  %8926 = vmatprep.subr.bf16.mxu1 %v11229_v20 }
0x3315   :  { %8919 = vmatpush3.bf16.msra.mxu0 %v11229_v20  ;;  %8927 = vmatpush3.bf16.msra.mxu1 %v11229_v20 }
0x3316   :  { %8932 = vmatprep.subr.bf16.mxu0 %v11063_v3  ;;  %8938 = vmatprep.subr.bf16.mxu1 %v11067_v24 }
0x3318   :  { %8921 = vmatmul.mubr.msk.bf16.vlgmr.msra.gmra.mxu0 %vm634_vm6, %v11071_v0  ;;  %8929 = vmatmul.mubr.msk.bf16.vlgmr.msra.gmra.mxu1 %vm634_vm6, %v11076_v19 }
0x3319   :  { %8933 = vmatpush3.bf16.msra.mxu0 %v11063_v3  ;;  %8939 = vmatpush3.bf16.msra.mxu1 %v11067_v24 }
0x331a   :  { %8944 = vmatprep.subr.bf16.mxu0 %v11083_v33 }
0x33d8   :  { %v8922_v54 = vpop.f32.mrf.mxu0  ;;  %v8930_v53 = vpop.f32.mrf.mxu1 }
0x33da   :  { %v5677_v21 = vpop.f32.mrf.mxu0  ;;  %v5726_v10 = vpop.f32.mrf.mxu1 }
0x33dc   :  { %v8923_v12 = vpop.f32.mrf.mxu0  ;;  %v8931_v42 = vpop.f32.mrf.mxu1 }
0x33dd   :  { %v5742_v0 = vpack.c.bf16 %v8923_v12, %v8922_v54  ;;  %v5803_v27 = vpack.c.bf16 %v8931_v42, %v8930_v53 }
0x33de   :  { %v5680_v30 = vpop.f32.mrf.mxu0  ;;  %v5729_v47 = vpop.f32.mrf.mxu1 }
0x33df   :  { %v5741_v31 = vpack.c.bf16 %v5680_v30, %v5677_v21  ;;  %v5802_v48 = vpack.c.bf16 %v5729_v47, %v5726_v10 }
0x33e1   :  { %8934 = vmatprep.mubr.msk.bf16.mxu0 %vm492_vm4, %v5741_v31  ;;  %8940 = vmatprep.mubr.msk.bf16.mxu1 %vm492_vm4, %v5802_v48 }
0x33e2   :  { %8935 = vmatmul.mubr.msk.bf16.vlgmr.msra.gmra.mxu0 %vm492_vm4, %v5742_v0  ;;  %8941 = vmatmul.mubr.msk.bf16.vlgmr.msra.gmra.mxu1 %vm492_vm4, %v5803_v27 }
0x33e3   :  { %8945 = vmatpush3.bf16.msra.mxu0 %v11083_v33  ;;  %8960 = vmatprep.mubr.msk.bf16.mxu1 %vm634_vm6, %v11092_v40 }
0x33e4   :  { %8946 = vmatprep.subr.bf16.mxu0 %v11097_v56 }
0x33e7   :  { %8947 = vmatpush3.bf16.msra.mxu0 %v11097_v56 }
0x33e8   :  { %8948 = vmatprep.subr.bf16.mxu0 %v11102_v28 }
0x33eb   :  { %8949 = vmatpush3.bf16.msra.mxu0 %v11102_v28 }
0x33ec   :  { %8950 = vmatprep.subr.bf16.mxu0 %v11107_v5 }
0x33ef   :  { %8951 = vmatpush3.bf16.msra.mxu0 %v11107_v5 }
0x33f0   :  { %8972 = vmatprep.subr.bf16.mxu0 %v11112_v8 }
0x34a2   :  { %v8936_v3 = vpop.f32.mrf.mxu0  ;;  %v8942_v24 = vpop.f32.mrf.mxu1 }
0x34a3   :  { %v5800_v22 = vadd.f32 %v8936_v3, %v10046_v38 }
0x34a4   :  { %v5783_v19 = vpop.f32.mrf.mxu0  ;;  %v5844_v33 = vpop.f32.mrf.mxu1 }
0x34a5   :  { %v5798_v40 = vadd.f32 %v5783_v19, %v10043_v37  ;;  %v5861_v5 = vadd.f32 %v8942_v24, %v5800_v22 }
0x34a6   :  { %v8937_v9 = vpop.f32.mrf.mxu0  ;;  %v8943_v56 = vpop.f32.mrf.mxu1 }
0x34a7   :  { %v5801_v1 = vadd.f32 %v8937_v9, %v10049_v43  ;;  %v5859_v28 = vadd.f32 %v5844_v33, %v5798_v40  ;;  %v5865_v6 = vmax.f32 %v5861_v5, 0.0 }
0x34a8   :  { %v5786_v63 = vpop.f32.mrf.mxu0  ;;  %v5847_v46 = vpop.f32.mrf.mxu1 }
0x34a9   :  { %v5862_v52 = vadd.f32 %v8943_v56, %v5801_v1  ;;  %v5799_v41 = vadd.f32 %v5786_v63, %v10054_v49  ;;  %v5863_v58 = vmax.f32 %v5859_v28, 0.0 }
0x34ab   :  { %v5860_v7 = vadd.f32 %v5847_v46, %v5799_v41  ;;  %v5866_v44 = vmax.f32 %v5862_v52, 0.0 }
0x34ad   :  { %v5864_v34 = vmax.f32 %v5860_v7, 0.0  ;;  %v5868_v37 = vpack.c.bf16 %v5866_v44, %v5865_v6  ;;  %v9776_v44 = vld [vmem:[%s10462_s1] sm:$0xff]  }
0x34af   :  { %v5867_v35 = vpack.c.bf16 %v5864_v34, %v5863_v58 }
0x34b1   :  { %8952 = vmatprep.mubr.msk.bf16.mxu0 %vm923_vm8, %v5867_v35 }
0x34b2   :  { %8953 = vmatmul.mubr.msk.bf16.vlgmr.msra.gmra.mxu0 %vm923_vm8, %v5868_v37 }
0x34b3   :  { %8974 = vmatprep.mubr.msk.bf16.mxu0 %vm492_vm4, %v11229_v20  ;;  %8973 = vmatpush3.bf16.msra.mxu0 %v11112_v8 }
0x34b4   :  { %8986 = vmatprep.subr.bf16.mxu0 %v11125_v62 }
0x34ba   :  { %8975 = vmatmul.mubr.msk.bf16.vlgmr.msra.gmra.mxu0 %vm492_vm4, %v11222_v4 }
0x34bb   :  { %8987 = vmatpush3.bf16.msra.mxu0 %v11125_v62 }
0x3572   :  { %v8954_v38 = vpop.f32.mrf.mxu0 }
0x3573   :  { %v5918_v29 = vadd.f32 %v11133_v61, %v8954_v38 }
0x3574   :  { %v5909_v43 = vpop.f32.mrf.mxu0 }
0x3575   :  { %v5910_v45 = vadd.f32 %v11133_v61, %v5909_v43 }
0x3576   :  { %v8955_v49 = vpop.f32.mrf.mxu0 }
0x3577   :  { %v5921_v26 = vadd.f32 %v11133_v61, %v8955_v49 }
0x3578   :  { %v5912_v15 = vpop.f32.mrf.mxu0 }
0x3579   :  { %v5925_v25 = vpack.c.bf16 %v5921_v26, %v5918_v29  ;;  %v5913_v8 = vadd.f32 %v11133_v61, %v5912_v15 }
0x357b   :  { %v5924_v36 = vpack.c.bf16 %v5913_v8, %v5910_v45  ;;  %5930 = vrot.lane.b32.xlu0 %v5925_v25, %s11771_s7  ;;  %v5986_v61 = vsel %vm641_vm7, %v5925_v25, 0 }
0x357d   :  { %5928 = vrot.lane.b32.xlu1 %v5924_v36, %s11771_s7 }
0x35ed   :  { %v5931_v55 = vpop.permute.xlu0 %5930 }
0x35ee   :  { %v5934_v62 = vsel %vm641_vm7, %v5931_v55, 0  ;;  %9077 = vmatprep.subr.msk.bf16.mxu1 %vm641_vm7, %v5931_v55 }
0x35ef   :  { %8957 = vmatpush3.bf16.msra.mxu1 %v5934_v62  ;;  %v5929_v57 = vpop.permute.xlu1 %5928 }
0x35f0   :  { %8958 = vmatprep.subr.bf16.mxu1 %v5929_v57 }
0x35f3   :  { %8959 = vmatpush3.bf16.msra.mxu1 %v5929_v57 }
0x35f4   :  { %9078 = vmatprep.subr.msk.bf16.mxu1 %vm641_vm7, %v5925_v25 }
0x35f6   :  { %8961 = vmatmul.mubr.msk.bf16.vlgmr.msra.gmra.mxu1 %vm634_vm6, %v11147_v60 }
0x35f7   :  { %8965 = vmatpush3.bf16.msra.mxu1 %v5986_v61  ;;  %8968 = vmatprep.mubr.msk.bf16.mxu1 %vm634_vm6, %v11153_v50 }
0x35f8   :  { %8966 = vmatprep.subr.bf16.mxu1 %v5924_v36 }
0x35fb   :  { %8967 = vmatpush3.bf16.msra.mxu1 %v5924_v36 }
0x35fc   :  { %8978 = vmatprep.subr.bf16.mxu1 %v11158_v51 }
0x35fe   :  { %8969 = vmatmul.mubr.msk.bf16.vlgmr.msra.gmra.mxu1 %vm634_vm6, %v11162_v14 }
0x35ff   :  { %8979 = vmatpush3.bf16.msra.mxu1 %v11158_v51  ;;  %v9775_v51 = vld [vmem:[%s10456_s22] sm:$0xff]  }
0x3600   :  { %8980 = vmatprep.subr.bf16.mxu1 %v11168_v13 }
0x3603   :  { %8981 = vmatpush3.bf16.msra.mxu1 %v11168_v13  ;;  %v8976_v13 = vpop.f32.mrf.mxu0 }
0x3605   :  { %v6078_v47 = vpop.f32.mrf.mxu0 }
0x3607   :  { %v8977_v48 = vpop.f32.mrf.mxu0 }
0x3609   :  { %v6081_v33 = vpop.f32.mrf.mxu0 }
0x36b6   :  { %v8962_v60 = vpop.f32.mrf.mxu1 }
0x36b8   :  { %v5970_v32 = vpop.f32.mrf.mxu1 }
0x36ba   :  { %v8963_v4 = vpop.f32.mrf.mxu1 }
0x36bc   :  { %v5973_v20 = vpop.f32.mrf.mxu1 }
0x36be   :  { %v8970_v17 = vpop.f32.mrf.mxu1 }
0x36bf   :  { %v6031_v42 = vadd.f32 %v8970_v17, %v8962_v60 }
0x36c0   :  { %v6022_v50 = vpop.f32.mrf.mxu1 }
0x36c1   :  { %v6023_v10 = vadd.f32 %v6022_v50, %v5970_v32 }
0x36c2   :  { %v8971_v54 = vpop.f32.mrf.mxu1 }
0x36c3   :  { %v6034_v53 = vadd.f32 %v8971_v54, %v8963_v4 }
0x36c4   :  { %v6025_v21 = vpop.f32.mrf.mxu1 }
0x36c5   :  { %v6026_v12 = vadd.f32 %v6025_v21, %v5973_v20  ;;  %v6038_v30 = vpack.c.bf16 %v6034_v53, %v6031_v42 }
0x36c7   :  { %v6037_v14 = vpack.c.bf16 %v6026_v12, %v6023_v10  ;;  %v9781_v10 = vld [vmem:[%s11772_s21] ss:$0 sm:$0xff] }
0x36c9   :  { %8982 = vmatprep.mubr.msk.bf16.mxu1 %vm566_vm5, %v6037_v14 }
0x36ca   :  { %8983 = vmatmul.mubr.msk.bf16.vlgmr.msra.gmra.mxu1 %vm566_vm5, %v6038_v30 }
0x36cb   :  { %8996 = vmatprep.mubr.msk.bf16.mxu1 %vm634_vm6, %v9775_v51 }
0x378a   :  { %v8984_v31 = vpop.f32.mrf.mxu1 }
0x378b   :  { %v6142_v3 = vadd.f32 %v8984_v31, %v8976_v13 }
0x378c   :  { %v6133_v0 = vpop.f32.mrf.mxu1 }
0x378d   :  { %v6134_v27 = vadd.f32 %v6133_v0, %v6078_v47  ;;  %v6150_v1 = vadd.f32 %v11177_v59, %v6142_v3 }
0x378e   :  { %v8985_v24 = vpop.f32.mrf.mxu1 }
0x378f   :  { %v6145_v19 = vadd.f32 %v8985_v24, %v8977_v48  ;;  %v6148_v22 = vadd.f32 %v11177_v59, %v6134_v27  ;;  %v6154_v5 = vmax.f32 %v6150_v1, 0.0 }
0x3790   :  { %v6136_v40 = vpop.f32.mrf.mxu1 }
0x3791   :  { %v6151_v9 = vadd.f32 %v11177_v59, %v6145_v19  ;;  %v6137_v56 = vadd.f32 %v6136_v40, %v6081_v33  ;;  %v6152_v52 = vmax.f32 %v6148_v22, 0.0 }
0x3793   :  { %v6149_v63 = vadd.f32 %v11177_v59, %v6137_v56  ;;  %v6155_v28 = vmax.f32 %v6151_v9, 0.0 }
0x3795   :  { %v6153_v41 = vmax.f32 %v6149_v63, 0.0  ;;  %v6157_v7 = vpack.c.bf16 %v6155_v28, %v6154_v5 }
0x3797   :  { %v6156_v46 = vpack.c.bf16 %v6153_v41, %v6152_v52 }
0x3799   :  { %8988 = vmatprep.mubr.msk.bf16.mxu0 %vm492_vm4, %v6156_v46 }
0x379a   :  { %8989 = vmatmul.mubr.msk.bf16.vlgmr.msra.gmra.mxu0 %vm492_vm4, %v6157_v7 }
0x379b   :  { %9004 = vmatprep.mubr.msk.bf16.mxu0 %vm634_vm6, %v9776_v44 }
0x385a   :  { %v8990_v58 = vpop.f32.mrf.mxu0 }
0x385b   :  { %v6207_v6 = vadd.f32 %v11191_v16, %v8990_v58 }
0x385c   :  { %v6198_v34 = vpop.f32.mrf.mxu0 }
0x385d   :  { %v6199_v59 = vadd.f32 %v11191_v16, %v6198_v34  ;;  %v6215_v43 = vadd.f32 %v6207_v6, %v11212_v18 }
0x385e   :  { %v8991_v35 = vpop.f32.mrf.mxu0 }
0x385f   :  { %v6210_v37 = vadd.f32 %v11191_v16, %v8991_v35  ;;  %v6213_v26 = vadd.f32 %v6199_v59, %v11218_v11  ;;  %v9779_v11 = vld [vmem:[%s10456_s22 + $0x8] sm:$0xff]   ;;  %v9782_v35 = vld [vmem:[%s11773_s11] ss:$0 sm:$0xff] }
0x3860   :  { %v6201_v38 = vpop.f32.mrf.mxu0 }
0x3861   :  { %v6216_v49 = vadd.f32 %v6210_v37, %v11215_v39  ;;  %v6202_v29 = vadd.f32 %v11191_v16, %v6201_v38  ;;  %v9777_v16 = vld [vmem:[%s10506_s17] sm:$0xff]  }
0x3862   :  { %v9778_v39 = vld [vmem:[%s10540_s30] sm:$0xff]  }
0x3863   :  { %v6218_v15 = vpack.c.bf16 %v6216_v49, %v6215_v43  ;;  %v6214_v45 = vadd.f32 %v6202_v29, %v11225_v23  ;;  %v9780_v23 = vld [vmem:[%s10462_s1 + $0x8] sm:$0xff]   ;;  %v9783_v29 = vld [vmem:[%s11774_s19 + $0x30] sm:$0xff] }
0x3865   :  { %v6217_v25 = vpack.c.bf16 %v6214_v45, %v6213_v26  ;;  %9079 = vmatprep.subr.msk.bf16.mxu1 %vm641_vm7, %v6218_v15  ;;  %9080 = vmatprep.subr.msk.bf16.mxu0 %vm641_vm7, %v6218_v15  ;;  %v6220_v18 = vsel %vm641_vm7, %v6218_v15, 0  ;;  %v9784_v15 = vld [vmem:[%s11774_s19 + $0x38] sm:$0xff] }
0x3866   :  { %8993 = vmatpush3.bf16.msra.mxu1 %v6220_v18  ;;  %9001 = vmatpush3.bf16.msra.mxu0 %v6220_v18 }
0x3867   :  { %8994 = vmatprep.subr.bf16.mxu1 %v6217_v25  ;;  %9002 = vmatprep.subr.bf16.mxu0 %v6217_v25 }
0x386a   :  { %8995 = vmatpush3.bf16.msra.mxu1 %v6217_v25  ;;  %9003 = vmatpush3.bf16.msra.mxu0 %v6217_v25 }
0x386b   :  { %9008 = vmatprep.subr.bf16.mxu1 %v9777_v16  ;;  %9018 = vmatprep.subr.bf16.mxu0 %v9778_v39 }
0x386d   :  { %8997 = vmatmul.mubr.msk.bf16.vlgmr.msra.gmra.mxu1 %vm634_vm6, %v9779_v11  ;;  %9005 = vmatmul.mubr.msk.bf16.vlgmr.msra.gmra.mxu0 %vm634_vm6, %v9780_v23  ;;  %v9786_v23 = vld [vmem:[%s11774_s19 + $0x28] sm:$0xff] }
0x386e   :  { %9009 = vmatpush3.bf16.msra.mxu1 %v9777_v16  ;;  %9019 = vmatpush3.bf16.msra.mxu0 %v9778_v39  ;;  %v9785_v16 = vld [vmem:[%s11774_s19 + $0x20] sm:$0xff] }
0x386f   :  { %9034 = vmatprep.subr.bf16.mxu0 %v9822_v2  ;;  %9028 = vmatprep.subr.bf16.mxu1 %v9822_v2 }
0x392d   :  { %v11328_v8 = vpop.f32.mrf.mxu1  ;;  %v9006_v36 = vpop.f32.mrf.mxu0 }
0x392f   :  { %v11330_v55 = vpop.f32.mrf.mxu1  ;;  %v6305_v62 = vpop.f32.mrf.mxu0 }
0x3931   :  { %v11332_v57 = vpop.f32.mrf.mxu1  ;;  %v9007_v61 = vpop.f32.mrf.mxu0 }
0x3932   :  { %v6321_v17 = vpack.c.bf16 %v11332_v57, %v11328_v8  ;;  %v11346_v50 = vpack.c.bf16 %v9007_v61, %v9006_v36 }
0x3933   :  { %v11334_v60 = vpop.f32.mrf.mxu1  ;;  %v6308_v32 = vpop.f32.mrf.mxu0 }
0x3934   :  { %v6320_v4 = vpack.c.bf16 %v11334_v60, %v11330_v55  ;;  %v11338_v20 = vpack.c.bf16 %v6308_v32, %v6305_v62 }
0x3936   :  { %9010 = vmatprep.mubr.msk.bf16.mxu1 %vm492_vm4, %v6320_v4 }
0x3937   :  { %9011 = vmatmul.mubr.msk.bf16.vlgmr.msra.gmra.mxu1 %vm492_vm4, %v6321_v17 }
0x3938   :  { %9014 = vmatprep.mubr.msk.bf16.mxu1 %vm492_vm4, %v11338_v20 }
0x393f   :  { %9015 = vmatmul.mubr.msk.bf16.gmra.mxu1 %vm492_vm4, %v11346_v50 }
0x3940   :  { %9030 = vmatprep.mubr.msk.bf16.mxu1 %vm9823_vm9, %v9822_v2 }
0x39f7   :  { %v9012_v54 = vpop.f32.mrf.mxu1 }
0x39f8   :  { %v6379_v14 = vadd.f32 %v9781_v10, %v9012_v54  ;;  %v9787_v54 = vld [vmem:[%s11774_s19 + $0x18] sm:$0xff] }
0x39f9   :  { %v6370_v53 = vpop.f32.mrf.mxu1 }
0x39fa   :  { %v6371_v12 = vadd.f32 %v9781_v10, %v6370_v53  ;;  %v6403_v0 = vmax.f32 %v6379_v14, 0.0 }
0x39fb   :  { %v9013_v21 = vpop.f32.mrf.mxu1 }
0x39fc   :  { %v6382_v42 = vadd.f32 %v9781_v10, %v9013_v21  ;;  %v6401_v31 = vmax.f32 %v6371_v12, 0.0 }
0x39fd   :  { %v6373_v30 = vpop.f32.mrf.mxu1 }
0x39fe   :  { %v6374_v51 = vadd.f32 %v9781_v10, %v6373_v30  ;;  %v6404_v13 = vmax.f32 %v6382_v42, 0.0  ;;  %v9789_v42 = vld [vmem:[%s11774_s19 + $0x8] sm:$0xff]  ;;  %v9790_v30 = vld [vmem:[%s11774_s19] sm:$0xff] }
0x39ff   :  { %v9016_v47 = vpop.f32.mrf.mxu1 }
0x3a00   :  { %v6402_v48 = vmax.f32 %v6374_v51, 0.0  ;;  %v6410_v24 = vpack.c.bf16 %v6404_v13, %v6403_v0  ;;  %v6395_v22 = vadd.f32 %v9781_v10, %v9016_v47 }
0x3a01   :  { %v6386_v27 = vpop.f32.mrf.mxu1 }
0x3a02   :  { %v6409_v3 = vpack.c.bf16 %v6402_v48, %v6401_v31  ;;  %v6387_v33 = vadd.f32 %v9781_v10, %v6386_v27  ;;  %v6407_v52 = vmax.f32 %v6395_v22, 0.0 }
0x3a03   :  { %v9017_v19 = vpop.f32.mrf.mxu1 }
0x3a04   :  { %v6398_v40 = vadd.f32 %v9781_v10, %v9017_v19  ;;  %9020 = vmatprep.mubr.msk.bf16.mxu0 %vm492_vm4, %v6409_v3  ;;  %v6405_v63 = vmax.f32 %v6387_v33, 0.0 }
0x3a05   :  { %v6389_v9 = vpop.f32.mrf.mxu1  ;;  %9021 = vmatmul.mubr.msk.bf16.vlgmr.msra.gmra.mxu0 %vm492_vm4, %v6410_v24 }
0x3a06   :  { %v6390_v56 = vadd.f32 %v9781_v10, %v6389_v9  ;;  %v6408_v1 = vmax.f32 %v6398_v40, 0.0  ;;  %v9788_v10 = vld [vmem:[%s11774_s19 + $0x10] sm:$0xff] }
0x3a08   :  { %v6406_v28 = vmax.f32 %v6390_v56, 0.0  ;;  %v6412_v5 = vpack.c.bf16 %v6408_v1, %v6407_v52 }
0x3a0a   :  { %v6411_v41 = vpack.c.bf16 %v6406_v28, %v6405_v63 }
0x3a0c   :  { %9024 = vmatprep.mubr.msk.bf16.mxu0 %vm492_vm4, %v6411_v41 }
0x3a0d   :  { %9025 = vmatmul.mubr.msk.bf16.gmra.mxu0 %vm492_vm4, %v6412_v5 }
0x3a0e   :  { %9036 = vmatprep.mubr.msk.bf16.mxu0 %vm9823_vm9, %v9822_v2 }
0x3ac5   :  { %v9022_v46 = vpop.f32.mrf.mxu0 }
0x3ac6   :  { %v6468_v62 = vadd.f32 %v9782_v35, %v9022_v46 }
0x3ac7   :  { %v6459_v7 = vpop.f32.mrf.mxu0 }
0x3ac8   :  { %v6460_v17 = vadd.f32 %v9782_v35, %v6459_v7  ;;  %v6492_v12 = vmul.f32 %v9788_v10, %v6468_v62 }
0x3ac9   :  { %v9023_v44 = vpop.f32.mrf.mxu0 }
0x3aca   :  { %v6471_v18 = vadd.f32 %v9782_v35, %v9023_v44  ;;  %v6490_v51 = vmul.f32 %v9790_v30, %v6460_v17 }
0x3acb   :  { %v6462_v58 = vpop.f32.mrf.mxu0 }
0x3acc   :  { %v6463_v61 = vadd.f32 %v9782_v35, %v6462_v58  ;;  %v6493_v53 = vmul.f32 %v9787_v54, %v6471_v18 }
0x3acd   :  { %v9026_v34 = vpop.f32.mrf.mxu0 }
0x3ace   :  { %v6484_v59 = vadd.f32 %v9782_v35, %v9026_v34  ;;  %v6491_v14 = vmul.f32 %v9789_v42, %v6463_v61  ;;  %v6499_v13 = vpack.c.bf16 %v6493_v53, %v6492_v12 }
0x3acf   :  { %v6475_v6 = vpop.f32.mrf.mxu0 }
0x3ad0   :  { %v6476_v38 = vadd.f32 %v9782_v35, %v6475_v6  ;;  %v6496_v26 = vmul.f32 %v9783_v29, %v6484_v59  ;;  %v6498_v47 = vpack.c.bf16 %v6491_v14, %v6490_v51 }
0x3ad1   :  { %v9027_v37 = vpop.f32.mrf.mxu0 }
0x3ad2   :  { %v6487_v43 = vadd.f32 %v9782_v35, %v9027_v37  ;;  %v6494_v39 = vmul.f32 %v9785_v16, %v6476_v38 }
0x3ad3   :  { %v6478_v49 = vpop.f32.mrf.mxu0 }
0x3ad4   :  { %v6497_v45 = vmul.f32 %v9784_v15, %v6487_v43  ;;  %v6479_v25 = vadd.f32 %v9782_v35, %v6478_v49 }
0x3ad6   :  { %v6501_v11 = vpack.c.bf16 %v6497_v45, %v6496_v26  ;;  %v6495_v36 = vmul.f32 %v9786_v23, %v6479_v25 }
0x3ad8   :  { %v6500_v32 = vpack.c.bf16 %v6495_v36, %v6494_v39  ;;  %v6553_v4 = vsel %vm492_vm4, %v6501_v11, 0 }
0x3ad9   :  { %9035 = vmatpush3.bf16.xpose.msra.mxu0 %v6553_v4 }
0x3ada   :  { %v6506_v21 = vsel %vm492_vm4, %v6500_v32, 0  ;;  %9046 = vmatprep.subr.bf16.mxu0 %v9822_v2 }
0x3adb   :  { %9029 = vmatpush3.bf16.xpose.msra.mxu1 %v6506_v21 }
0x3adc   :  { %9040 = vmatprep.subr.bf16.mxu1 %v9822_v2 }
0x3ae0   :  { %9037 = vmatmul.mubr.msk.bf16.vlgmr.msra.gmra.mxu0 %vm492_vm4, %v6499_v13 }
0x3ae1   :  { %9047 = vmatpush3.bf16.msra.mxu0 %v11346_v50  ;;  %9048 = vmatprep.mubr.msk.bf16.mxu0 %vm9823_vm9, %v9822_v2 }
0x3ae2   :  { %9031 = vmatmul.mubr.msk.bf16.vlgmr.msra.gmra.mxu1 %vm492_vm4, %v6498_v47 }
0x3ae3   :  { %9041 = vmatpush3.bf16.msra.mxu1 %v11338_v20  ;;  %9042 = vmatprep.mubr.msk.bf16.mxu1 %vm9823_vm9, %v9822_v2 }
0x3ba0   :  { %v6589_v31 = vpop.f32.mrf.mxu0 }
0x3ba1   :  { %v11380_v19 = vmul.f32 10.0, %v6589_v31 }
0x3ba2   :  { %v6542_v48 = vpop.f32.mrf.mxu1  ;;  %v9038_v0 = vpop.f32.mrf.mxu0 }
0x3ba3   :  { %v6596_v27 = vmul.f32 10.0, %v6542_v48  ;;  %v6606_v20 = vsel %vm492_vm4, %v11380_v19, -inf }
0x3ba4   :  { %v9032_v3 = vpop.f32.mrf.mxu1  ;;  %v6592_v24 = vpop.f32.mrf.mxu0 }
0x3ba5   :  { %v6600_v50 = vsel %vm492_vm4, %v6596_v27, -inf  ;;  %v6599_v56 = vmul.f32 10.0, %v6592_v24 }
0x3ba6   :  { %v9039_v33 = vpop.f32.mrf.mxu0  ;;  %6601 = vmax.xlane.f32.xlu0 %v6600_v50  ;;  %v6545_v40 = vpop.f32.mrf.mxu1 }
0x3ba7   :  { %v6597_v22 = vmul.f32 10.0, %v6545_v40  ;;  %v6609_v1 = vsel %vm492_vm4, %v6599_v56, -inf }
0x3ba8   :  { %v9033_v9 = vpop.f32.mrf.mxu1 }
0x3ba9   :  { %v6603_v2 = vsel %vm492_vm4, %v6597_v22, -inf }
0x3baa   :  { %6607 = vmax.xlane.f32.xlu0 %v6606_v20  ;;  %6604 = vmax.xlane.f32.xlu1 %v6603_v2 }
0x3bae   :  { %6610 = vmax.xlane.f32.xlu0 %v6609_v1 }
0x3c2f   :  { %v6602_v63 = vpop.xlane.xlu0 %6601 }
0x3c30   :  { %v6612_v28 = vsub.f32 %v6596_v27, %v6602_v63 }
0x3c32   :  { %v6616_v52 = vmul.f32 1.442695, %v6612_v28 }
0x3c33   :  { %v6608_v41 = vpop.xlane.xlu0 %6607  ;;  %v6605_v5 = vpop.xlane.xlu1 %6604 }
0x3c34   :  { %9461 = vpow2.f32 %v6616_v52  ;;  %v6614_v46 = vsub.f32 %v11380_v19, %v6608_v41  ;;  %v6613_v7 = vsub.f32 %v6597_v22, %v6605_v5 }
0x3c36   :  { %v6620_v44 = vmul.f32 1.442695, %v6614_v46  ;;  %v6618_v58 = vmul.f32 1.442695, %v6613_v7 }
0x3c37   :  { %v6611_v34 = vpop.xlane.xlu0 %6610 }
0x3c38   :  { %9463 = vpow2.f32 %v6620_v44  ;;  %v6615_v6 = vsub.f32 %v6599_v56, %v6611_v34 }
0x3c39   :  { %9465 = vpow2.f32 %v6618_v58 }
0x3c3a   :  { %v6622_v35 = vmul.f32 1.442695, %v6615_v6 }
0x3c3c   :  { %9467 = vpow2.f32 %v6622_v35 }
0x3c41   :  { %v9462_v59 = vpop.eup %9461 }
0x3c42   :  { %v6624_v37 = vsel %vm492_vm4, %v9462_v59, 0.0 }
0x3c43   :  { %6625 = vadd.xlane.f32.xlu1 %v6624_v37 }
0x3c45   :  { %v9464_v38 = vpop.eup %9463 }
0x3c46   :  { %v9466_v43 = vpop.eup %9465  ;;  %v6630_v49 = vsel %vm492_vm4, %v9464_v38, 0.0 }
0x3c47   :  { %6631 = vadd.xlane.f32.xlu1 %v6630_v49  ;;  %v6627_v29 = vsel %vm492_vm4, %v9466_v43, 0.0 }
0x3c48   :  { %6628 = vadd.xlane.f32.xlu0 %v6627_v29 }
0x3c49   :  { %v9468_v26 = vpop.eup %9467 }
0x3c4a   :  { %v6633_v15 = vsel %vm492_vm4, %v9468_v26, 0.0 }
0x3c4c   :  { %6634 = vadd.xlane.f32.xlu0 %v6633_v15 }
0x3ccc   :  { %v6626_v45 = vpop.xlane.xlu1 %6625 }
0x3ccd   :  { %9469 = vlog2.f32 %v6626_v45 }
0x3cd0   :  { %v6632_v25 = vpop.xlane.xlu1 %6631 }
0x3cd1   :  { %v6629_v18 = vpop.xlane.xlu0 %6628  ;;  %9471 = vlog2.f32 %v6632_v25 }
0x3cd2   :  { %9473 = vlog2.f32 %v6629_v18 }
0x3cd5   :  { %v6635_v16 = vpop.xlane.xlu0 %6634 }
0x3cd6   :  { %9475 = vlog2.f32 %v6635_v16 }
0x3cda   :  { %v9470_v39 = vpop.eup %9469 }
0x3cdb   :  { %v6637_v11 = vmul.f32 0.6931472, %v9470_v39 }
0x3cdd   :  { %v6644_v36 = vadd.f32 %v6637_v11, %v6602_v63 }
0x3cde   :  { %v9472_v23 = vpop.eup %9471 }
0x3cdf   :  { %v9474_v62 = vpop.eup %9473  ;;  %v6641_v61 = vmul.f32 0.6931472, %v9472_v23  ;;  %v11392_v4 = vsub.f32 %v6596_v27, %v6644_v36 }
0x3ce0   :  { %v6639_v32 = vmul.f32 0.6931472, %v9474_v62 }
0x3ce1   :  { %v6646_v54 = vadd.f32 %v6641_v61, %v6608_v41  ;;  %v6652_v12 = vsel %vm492_vm4, %v11392_v4, -inf }
0x3ce2   :  { %v6645_v17 = vadd.f32 %v6639_v32, %v6605_v5 }
0x3ce3   :  { %v9476_v53 = vpop.eup %9475  ;;  %v11401_v14 = vsub.f32 %v11380_v19, %v6646_v54 }
0x3ce4   :  { %v11394_v21 = vsub.f32 %v6597_v22, %v6645_v17  ;;  %v6643_v10 = vmul.f32 0.6931472, %v9476_v53 }
0x3ce5   :  { %v6661_v31 = vsel %vm492_vm4, %v11401_v14, -inf }
0x3ce6   :  { %v6653_v42 = vsel %vm492_vm4, %v11394_v21, -inf  ;;  %v6647_v30 = vadd.f32 %v6643_v10, %v6611_v34 }
0x3ce7   :  { %v6654_v51 = vmax.f32 %v6652_v12, %v6653_v42 }
0x3ce8   :  { %v11403_v13 = vsub.f32 %v6599_v56, %v6647_v30 }
0x3ce9   :  { %v6655_v47 = vrot.slane %v6654_v51, 4 }
0x3cea   :  { %v6662_v48 = vsel %vm492_vm4, %v11403_v13, -inf }
0x3ceb   :  { %v6656_v0 = vmax.f32 %v6654_v51, %v6655_v47  ;;  %v6663_v27 = vmax.f32 %v6661_v31, %v6662_v48 }
0x3ced   :  { %v6657_v3 = vrot.slane %v6656_v0, 2  ;;  %v6664_v24 = vrot.slane %v6663_v27, 4 }
0x3cef   :  { %v6658_v50 = vmax.f32 %v6656_v0, %v6657_v3  ;;  %v6665_v33 = vmax.f32 %v6663_v27, %v6664_v24 }
0x3cf1   :  { %v6659_v40 = vrot.slane %v6658_v50, 1  ;;  %v6666_v19 = vrot.slane %v6665_v33, 2 }
0x3cf3   :  { %v6660_v22 = vmax.f32 %v6658_v50, %v6659_v40  ;;  %v6667_v9 = vmax.f32 %v6665_v33, %v6666_v19 }
0x3cf5   :  { %v6670_v56 = vsub.f32 %v11392_v4, %v6660_v22  ;;  %v6671_v20 = vsub.f32 %v11394_v21, %v6660_v22  ;;  %v6668_v2 = vrot.slane %v6667_v9, 1 }
0x3cf7   :  { %v6674_v1 = vmul.f32 1.442695, %v6670_v56  ;;  %v6676_v63 = vmul.f32 1.442695, %v6671_v20  ;;  %v6669_v28 = vmax.f32 %v6667_v9, %v6668_v2 }
0x3cf9   :  { %9477 = vpow2.f32 %v6674_v1  ;;  %v6672_v52 = vsub.f32 %v11401_v14, %v6669_v28  ;;  %v6673_v41 = vsub.f32 %v11403_v13, %v6669_v28 }
0x3cfa   :  { %9479 = vpow2.f32 %v6676_v63 }
0x3cfb   :  { %v6678_v5 = vmul.f32 1.442695, %v6672_v52  ;;  %v6680_v46 = vmul.f32 1.442695, %v6673_v41 }
0x3cfd   :  { %9481 = vpow2.f32 %v6678_v5 }
0x3cfe   :  { %9483 = vpow2.f32 %v6680_v46 }
0x3d06   :  { %v9478_v7 = vpop.eup %9477 }
0x3d07   :  { %v9480_v44 = vpop.eup %9479  ;;  %v6682_v58 = vsel %vm492_vm4, %v9478_v7, 0.0 }
0x3d08   :  { %v6683_v34 = vsel %vm492_vm4, %v9480_v44, 0.0 }
0x3d09   :  { %v6684_v6 = vadd.f32 %v6683_v34, %v6682_v58 }
0x3d0a   :  { %v9482_v35 = vpop.eup %9481 }
0x3d0b   :  { %v9484_v59 = vpop.eup %9483  ;;  %v6685_v37 = vrot.slane %v6684_v6, 4  ;;  %v6691_v38 = vsel %vm492_vm4, %v9482_v35, 0.0 }
0x3d0c   :  { %v6692_v43 = vsel %vm492_vm4, %v9484_v59, 0.0 }
0x3d0d   :  { %v6686_v49 = vadd.f32 %v6685_v37, %v6684_v6  ;;  %v6693_v29 = vadd.f32 %v6692_v43, %v6691_v38 }
0x3d0f   :  { %v6687_v26 = vrot.slane %v6686_v49, 2  ;;  %v6694_v15 = vrot.slane %v6693_v29, 4 }
0x3d11   :  { %v6688_v45 = vadd.f32 %v6687_v26, %v6686_v49  ;;  %v6695_v25 = vadd.f32 %v6694_v15, %v6693_v29 }
0x3d13   :  { %v6689_v18 = vrot.slane %v6688_v45, 1  ;;  %v6696_v16 = vrot.slane %v6695_v25, 2 }
0x3d15   :  { %v6690_v39 = vadd.f32 %v6689_v18, %v6688_v45  ;;  %v6697_v11 = vadd.f32 %v6696_v16, %v6695_v25 }
0x3d17   :  { %9485 = vlog2.f32 %v6690_v39  ;;  %v6698_v23 = vrot.slane %v6697_v11, 1 }
0x3d19   :  { %v6699_v36 = vadd.f32 %v6698_v23, %v6697_v11 }
0x3d1b   :  { %9487 = vlog2.f32 %v6699_v36 }
0x3d24   :  { %v9486_v62 = vpop.eup %9485 }
0x3d25   :  { %v6701_v61 = vmul.f32 0.6931472, %v9486_v62 }
0x3d27   :  { %v6704_v32 = vadd.f32 %v6701_v61, %v6660_v22 }
0x3d28   :  { %v9488_v17 = vpop.eup %9487 }
0x3d29   :  { %v6707_v54 = vsub.f32 %v11394_v21, %v6704_v32  ;;  %v6706_v53 = vsub.f32 %v11392_v4, %v6704_v32  ;;  %v6703_v10 = vmul.f32 0.6931472, %v9488_v17 }
0x3d2b   :  { %v6713_v12 = vsel %vm492_vm4, %v6707_v54, -inf  ;;  %v6710_v42 = vsel %vm492_vm4, %v6706_v53, -inf  ;;  %v6705_v30 = vadd.f32 %v6703_v10, %v6669_v28 }
0x3d2c   :  { %6714 = vmax.xlane.f32.xlu0 %v6713_v12  ;;  %6711 = vmax.xlane.f32.xlu1 %v6710_v42 }
0x3d2d   :  { %v6709_v51 = vsub.f32 %v11403_v13, %v6705_v30  ;;  %v6708_v47 = vsub.f32 %v11401_v14, %v6705_v30 }
0x3d2f   :  { %v6719_v31 = vsel %vm492_vm4, %v6709_v51, -inf  ;;  %v6716_v48 = vsel %vm492_vm4, %v6708_v47, -inf }
0x3d30   :  { %6720 = vmax.xlane.f32.xlu0 %v6719_v31  ;;  %6717 = vmax.xlane.f32.xlu1 %v6716_v48 }
0x3db5   :  { %v6715_v21 = vpop.xlane.xlu0 %6714  ;;  %v6712_v4 = vpop.xlane.xlu1 %6711 }
0x3db6   :  { %v6723_v0 = vsub.f32 %v6707_v54, %v6715_v21  ;;  %v6722_v27 = vsub.f32 %v6706_v53, %v6712_v4 }
0x3db8   :  { %v6728_v3 = vmul.f32 1.442695, %v6723_v0  ;;  %v6726_v24 = vmul.f32 1.442695, %v6722_v27 }
0x3db9   :  { %v6721_v50 = vpop.xlane.xlu0 %6720  ;;  %v6718_v33 = vpop.xlane.xlu1 %6717 }
0x3dba   :  { %9489 = vpow2.f32 %v6728_v3  ;;  %v6725_v40 = vsub.f32 %v6709_v51, %v6721_v50  ;;  %v6724_v19 = vsub.f32 %v6708_v47, %v6718_v33 }
0x3dbb   :  { %9491 = vpow2.f32 %v6726_v24 }
0x3dbc   :  { %v6732_v13 = vmul.f32 1.442695, %v6725_v40  ;;  %v6730_v14 = vmul.f32 1.442695, %v6724_v19 }
0x3dbe   :  { %9493 = vpow2.f32 %v6732_v13 }
0x3dbf   :  { %9495 = vpow2.f32 %v6730_v14 }
0x3dc7   :  { %v9490_v22 = vpop.eup %9489 }
0x3dc8   :  { %v9492_v9 = vpop.eup %9491  ;;  %v6737_v56 = vsel %vm492_vm4, %v9490_v22, 0.0 }
0x3dc9   :  { %6738 = vadd.xlane.f32.xlu0 %v6737_v56  ;;  %v6734_v20 = vsel %vm492_vm4, %v9492_v9, 0.0 }
0x3dca   :  { %6735 = vadd.xlane.f32.xlu1 %v6734_v20 }
0x3dcb   :  { %v9494_v2 = vpop.eup %9493 }
0x3dcc   :  { %v9496_v1 = vpop.eup %9495  ;;  %v6743_v63 = vsel %vm492_vm4, %v9494_v2, 0.0 }
0x3dcd   :  { %6744 = vadd.xlane.f32.xlu0 %v6743_v63  ;;  %v6740_v28 = vsel %vm492_vm4, %v9496_v1, 0.0 }
0x3dce   :  { %6741 = vadd.xlane.f32.xlu1 %v6740_v28 }
0x3e52   :  { %v6739_v52 = vpop.xlane.xlu0 %6738 }
0x3e53   :  { %9497 = vlog2.f32 %v6739_v52  ;;  %v6736_v41 = vpop.xlane.xlu1 %6735 }
0x3e54   :  { %9499 = vlog2.f32 %v6736_v41 }
0x3e56   :  { %v6745_v5 = vpop.xlane.xlu0 %6744 }
0x3e57   :  { %9501 = vlog2.f32 %v6745_v5  ;;  %v6742_v46 = vpop.xlane.xlu1 %6741 }
0x3e58   :  { %9503 = vlog2.f32 %v6742_v46 }
0x3e60   :  { %v9498_v7 = vpop.eup %9497 }
0x3e61   :  { %v9500_v44 = vpop.eup %9499  ;;  %v6749_v58 = vmul.f32 0.6931472, %v9498_v7 }
0x3e62   :  { %v6747_v34 = vmul.f32 0.6931472, %v9500_v44 }
0x3e63   :  { %v6755_v6 = vadd.f32 %v6749_v58, %v6715_v21 }
0x3e64   :  { %v9502_v35 = vpop.eup %9501  ;;  %v6754_v59 = vadd.f32 %v6747_v34, %v6712_v4 }
0x3e65   :  { %v9504_v37 = vpop.eup %9503  ;;  %v11429_v38 = vsub.f32 %v6707_v54, %v6755_v6  ;;  %v6753_v43 = vmul.f32 0.6931472, %v9502_v35 }
0x3e66   :  { %v11431_v49 = vsub.f32 %v6706_v53, %v6754_v59  ;;  %v6751_v29 = vmul.f32 0.6931472, %v9504_v37 }
0x3e67   :  { %v6763_v26 = vsel %vm492_vm4, %v11429_v38, -inf  ;;  %v6757_v15 = vadd.f32 %v6753_v43, %v6721_v50 }
0x3e68   :  { %v6762_v45 = vsel %vm492_vm4, %v11431_v49, -inf  ;;  %v6756_v25 = vadd.f32 %v6751_v29, %v6718_v33 }
0x3e69   :  { %v6764_v18 = vmax.f32 %v6762_v45, %v6763_v26  ;;  %v11437_v16 = vsub.f32 %v6709_v51, %v6757_v15 }
0x3e6a   :  { %v11439_v39 = vsub.f32 %v6708_v47, %v6756_v25 }
0x3e6b   :  { %v6765_v11 = vrot.slane %v6764_v18, 4  ;;  %v6772_v23 = vsel %vm492_vm4, %v11437_v16, -inf }
0x3e6c   :  { %v6771_v36 = vsel %vm492_vm4, %v11439_v39, -inf }
0x3e6d   :  { %v6766_v62 = vmax.f32 %v6764_v18, %v6765_v11  ;;  %v6773_v61 = vmax.f32 %v6771_v36, %v6772_v23 }
0x3e6f   :  { %v6767_v32 = vrot.slane %v6766_v62, 2  ;;  %v6774_v17 = vrot.slane %v6773_v61, 4 }
0x3e71   :  { %v6768_v54 = vmax.f32 %v6766_v62, %v6767_v32  ;;  %v6775_v53 = vmax.f32 %v6773_v61, %v6774_v17 }
0x3e73   :  { %v6769_v10 = vrot.slane %v6768_v54, 1  ;;  %v6776_v12 = vrot.slane %v6775_v53, 2 }
0x3e75   :  { %v6770_v42 = vmax.f32 %v6768_v54, %v6769_v10  ;;  %v6777_v30 = vmax.f32 %v6775_v53, %v6776_v12 }
0x3e77   :  { %v6780_v51 = vsub.f32 %v11431_v49, %v6770_v42  ;;  %v6781_v47 = vsub.f32 %v11429_v38, %v6770_v42  ;;  %v6778_v31 = vrot.slane %v6777_v30, 1 }
0x3e79   :  { %v6784_v48 = vmul.f32 1.442695, %v6780_v51  ;;  %v6786_v21 = vmul.f32 1.442695, %v6781_v47  ;;  %v6779_v4 = vmax.f32 %v6777_v30, %v6778_v31 }
0x3e7b   :  { %9505 = vpow2.f32 %v6784_v48  ;;  %v6782_v0 = vsub.f32 %v11439_v39, %v6779_v4  ;;  %v6783_v27 = vsub.f32 %v11437_v16, %v6779_v4 }
0x3e7c   :  { %9507 = vpow2.f32 %v6786_v21 }
0x3e7d   :  { %v6788_v3 = vmul.f32 1.442695, %v6782_v0  ;;  %v6790_v24 = vmul.f32 1.442695, %v6783_v27 }
0x3e7f   :  { %9509 = vpow2.f32 %v6788_v3 }
0x3e80   :  { %9511 = vpow2.f32 %v6790_v24 }
0x3e88   :  { %v9506_v50 = vpop.eup %9505 }
0x3e89   :  { %v9508_v33 = vpop.eup %9507  ;;  %v6792_v40 = vsel %vm492_vm4, %v9506_v50, 0.0 }
0x3e8a   :  { %v6793_v19 = vsel %vm492_vm4, %v9508_v33, 0.0 }
0x3e8b   :  { %v6794_v13 = vadd.f32 %v6793_v19, %v6792_v40 }
0x3e8c   :  { %v9510_v14 = vpop.eup %9509 }
0x3e8d   :  { %v9512_v22 = vpop.eup %9511  ;;  %v6795_v9 = vrot.slane %v6794_v13, 4  ;;  %v6801_v56 = vsel %vm492_vm4, %v9510_v14, 0.0 }
0x3e8e   :  { %v6802_v20 = vsel %vm492_vm4, %v9512_v22, 0.0 }
0x3e8f   :  { %v6796_v2 = vadd.f32 %v6795_v9, %v6794_v13  ;;  %v6803_v1 = vadd.f32 %v6802_v20, %v6801_v56 }
0x3e91   :  { %v6797_v63 = vrot.slane %v6796_v2, 2  ;;  %v6804_v28 = vrot.slane %v6803_v1, 4 }
0x3e93   :  { %v6798_v52 = vadd.f32 %v6797_v63, %v6796_v2  ;;  %v6805_v41 = vadd.f32 %v6804_v28, %v6803_v1 }
0x3e95   :  { %v6799_v5 = vrot.slane %v6798_v52, 1  ;;  %v6806_v46 = vrot.slane %v6805_v41, 2 }
0x3e97   :  { %v6800_v7 = vadd.f32 %v6799_v5, %v6798_v52  ;;  %v6807_v44 = vadd.f32 %v6806_v46, %v6805_v41 }
0x3e99   :  { %9513 = vlog2.f32 %v6800_v7  ;;  %v6808_v58 = vrot.slane %v6807_v44, 1 }
0x3e9b   :  { %v6809_v34 = vadd.f32 %v6808_v58, %v6807_v44 }
0x3e9d   :  { %9515 = vlog2.f32 %v6809_v34 }
0x3ea6   :  { %v9514_v6 = vpop.eup %9513 }
0x3ea7   :  { %v6811_v35 = vmul.f32 0.6931472, %v9514_v6 }
0x3ea9   :  { %v6814_v59 = vadd.f32 %v6811_v35, %v6770_v42 }
0x3eaa   :  { %v9516_v37 = vpop.eup %9515 }
0x3eab   :  { %v6817_v43 = vsub.f32 %v11429_v38, %v6814_v59  ;;  %v6816_v29 = vsub.f32 %v11431_v49, %v6814_v59  ;;  %v6813_v26 = vmul.f32 0.6931472, %v9516_v37 }
0x3ead   :  { %v6823_v15 = vsel %vm492_vm4, %v6817_v43, -inf  ;;  %v6820_v45 = vsel %vm492_vm4, %v6816_v29, -inf  ;;  %v6815_v25 = vadd.f32 %v6813_v26, %v6779_v4 }
0x3eae   :  { %6824 = vmax.xlane.f32.xlu0 %v6823_v15  ;;  %6821 = vmax.xlane.f32.xlu1 %v6820_v45 }
0x3eaf   :  { %v6819_v18 = vsub.f32 %v11437_v16, %v6815_v25  ;;  %v6818_v11 = vsub.f32 %v11439_v39, %v6815_v25 }
0x3eb1   :  { %v6829_v23 = vsel %vm492_vm4, %v6819_v18, -inf  ;;  %v6826_v36 = vsel %vm492_vm4, %v6818_v11, -inf }
0x3eb2   :  { %6830 = vmax.xlane.f32.xlu0 %v6829_v23  ;;  %6827 = vmax.xlane.f32.xlu1 %v6826_v36 }
0x3f37   :  { %v6825_v38 = vpop.xlane.xlu0 %6824  ;;  %v6822_v49 = vpop.xlane.xlu1 %6821 }
0x3f38   :  { %v6833_v62 = vsub.f32 %v6817_v43, %v6825_v38  ;;  %v6832_v61 = vsub.f32 %v6816_v29, %v6822_v49 }
0x3f3a   :  { %v6838_v32 = vmul.f32 1.442695, %v6833_v62  ;;  %v6836_v17 = vmul.f32 1.442695, %v6832_v61 }
0x3f3b   :  { %v6831_v54 = vpop.xlane.xlu0 %6830  ;;  %v6828_v53 = vpop.xlane.xlu1 %6827 }
0x3f3c   :  { %9517 = vpow2.f32 %v6838_v32  ;;  %v6835_v10 = vsub.f32 %v6819_v18, %v6831_v54  ;;  %v6834_v12 = vsub.f32 %v6818_v11, %v6828_v53 }
0x3f3d   :  { %9519 = vpow2.f32 %v6836_v17 }
0x3f3e   :  { %v6842_v16 = vmul.f32 1.442695, %v6835_v10  ;;  %v6840_v39 = vmul.f32 1.442695, %v6834_v12 }
0x3f40   :  { %9521 = vpow2.f32 %v6842_v16 }
0x3f41   :  { %9523 = vpow2.f32 %v6840_v39 }
0x3f49   :  { %v9518_v42 = vpop.eup %9517 }
0x3f4a   :  { %v9520_v30 = vpop.eup %9519  ;;  %v6847_v51 = vsel %vm492_vm4, %v9518_v42, 0.0 }
0x3f4b   :  { %6848 = vadd.xlane.f32.xlu0 %v6847_v51  ;;  %v6844_v47 = vsel %vm492_vm4, %v9520_v30, 0.0 }
0x3f4c   :  { %6845 = vadd.xlane.f32.xlu1 %v6844_v47 }
0x3f4d   :  { %v9522_v31 = vpop.eup %9521 }
0x3f4e   :  { %v9524_v48 = vpop.eup %9523  ;;  %v6853_v21 = vsel %vm492_vm4, %v9522_v31, 0.0 }
0x3f4f   :  { %6854 = vadd.xlane.f32.xlu0 %v6853_v21  ;;  %v6850_v4 = vsel %vm492_vm4, %v9524_v48, 0.0 }
0x3f50   :  { %6851 = vadd.xlane.f32.xlu1 %v6850_v4 }
0x3fd4   :  { %v6849_v0 = vpop.xlane.xlu0 %6848 }
0x3fd5   :  { %9525 = vlog2.f32 %v6849_v0  ;;  %v6846_v27 = vpop.xlane.xlu1 %6845 }
0x3fd6   :  { %9527 = vlog2.f32 %v6846_v27 }
0x3fd8   :  { %v6855_v3 = vpop.xlane.xlu0 %6854 }
0x3fd9   :  { %9529 = vlog2.f32 %v6855_v3  ;;  %v6852_v24 = vpop.xlane.xlu1 %6851 }
0x3fda   :  { %9531 = vlog2.f32 %v6852_v24 }
0x3fe2   :  { %v9526_v50 = vpop.eup %9525 }
0x3fe3   :  { %v9528_v33 = vpop.eup %9527  ;;  %v6859_v40 = vmul.f32 0.6931472, %v9526_v50 }
0x3fe4   :  { %v6857_v19 = vmul.f32 0.6931472, %v9528_v33 }
0x3fe5   :  { %v6865_v13 = vadd.f32 %v6859_v40, %v6825_v38 }
0x3fe6   :  { %v9530_v14 = vpop.eup %9529  ;;  %v6864_v22 = vadd.f32 %v6857_v19, %v6822_v49 }
0x3fe7   :  { %v9532_v9 = vpop.eup %9531  ;;  %v11465_v56 = vsub.f32 %v6817_v43, %v6865_v13  ;;  %v6863_v20 = vmul.f32 0.6931472, %v9530_v14 }
0x3fe8   :  { %v11467_v2 = vsub.f32 %v6816_v29, %v6864_v22  ;;  %v6861_v1 = vmul.f32 0.6931472, %v9532_v9 }
0x3fe9   :  { %v6873_v63 = vsel %vm492_vm4, %v11465_v56, -inf  ;;  %v6867_v28 = vadd.f32 %v6863_v20, %v6831_v54 }
0x3fea   :  { %v6872_v52 = vsel %vm492_vm4, %v11467_v2, -inf  ;;  %v6866_v41 = vadd.f32 %v6861_v1, %v6828_v53 }
0x3feb   :  { %v6874_v5 = vmax.f32 %v6872_v52, %v6873_v63  ;;  %v11473_v46 = vsub.f32 %v6819_v18, %v6867_v28 }
0x3fec   :  { %v11475_v7 = vsub.f32 %v6818_v11, %v6866_v41 }
0x3fed   :  { %v6875_v44 = vrot.slane %v6874_v5, 4  ;;  %v6882_v58 = vsel %vm492_vm4, %v11473_v46, -inf }
0x3fee   :  { %v6881_v34 = vsel %vm492_vm4, %v11475_v7, -inf }
0x3fef   :  { %v6876_v6 = vmax.f32 %v6874_v5, %v6875_v44  ;;  %v6883_v35 = vmax.f32 %v6881_v34, %v6882_v58 }
0x3ff1   :  { %v6877_v59 = vrot.slane %v6876_v6, 2  ;;  %v6884_v37 = vrot.slane %v6883_v35, 4 }
0x3ff3   :  { %v6878_v43 = vmax.f32 %v6876_v6, %v6877_v59  ;;  %v6885_v29 = vmax.f32 %v6883_v35, %v6884_v37 }
0x3ff5   :  { %v6879_v26 = vrot.slane %v6878_v43, 1  ;;  %v6886_v15 = vrot.slane %v6885_v29, 2 }
0x3ff7   :  { %v6880_v45 = vmax.f32 %v6878_v43, %v6879_v26  ;;  %v6887_v25 = vmax.f32 %v6885_v29, %v6886_v15 }
0x3ff9   :  { %v6890_v18 = vsub.f32 %v11467_v2, %v6880_v45  ;;  %v6891_v11 = vsub.f32 %v11465_v56, %v6880_v45  ;;  %v6888_v23 = vrot.slane %v6887_v25, 1 }
0x3ffb   :  { %v6894_v36 = vmul.f32 1.442695, %v6890_v18  ;;  %v6896_v38 = vmul.f32 1.442695, %v6891_v11  ;;  %v6889_v49 = vmax.f32 %v6887_v25, %v6888_v23 }
0x3ffd   :  { %9533 = vpow2.f32 %v6894_v36  ;;  %v6892_v62 = vsub.f32 %v11475_v7, %v6889_v49  ;;  %v6893_v61 = vsub.f32 %v11473_v46, %v6889_v49 }
0x3ffe   :  { %9535 = vpow2.f32 %v6896_v38 }
0x3fff   :  { %v6898_v32 = vmul.f32 1.442695, %v6892_v62  ;;  %v6900_v17 = vmul.f32 1.442695, %v6893_v61 }
0x4001   :  { %9537 = vpow2.f32 %v6898_v32 }
0x4002   :  { %9539 = vpow2.f32 %v6900_v17 }
0x400a   :  { %v9534_v54 = vpop.eup %9533 }
0x400b   :  { %v9536_v53 = vpop.eup %9535  ;;  %v6902_v10 = vsel %vm492_vm4, %v9534_v54, 0.0 }
0x400c   :  { %v6903_v12 = vsel %vm492_vm4, %v9536_v53, 0.0 }
0x400d   :  { %v6904_v16 = vadd.f32 %v6903_v12, %v6902_v10 }
0x400e   :  { %v9538_v39 = vpop.eup %9537 }
0x400f   :  { %v9540_v42 = vpop.eup %9539  ;;  %v6905_v30 = vrot.slane %v6904_v16, 4  ;;  %v6911_v51 = vsel %vm492_vm4, %v9538_v39, 0.0 }
0x4010   :  { %v6912_v47 = vsel %vm492_vm4, %v9540_v42, 0.0 }
0x4011   :  { %v6906_v31 = vadd.f32 %v6905_v30, %v6904_v16  ;;  %v6913_v48 = vadd.f32 %v6912_v47, %v6911_v51 }
0x4013   :  { %v6907_v21 = vrot.slane %v6906_v31, 2  ;;  %v6914_v4 = vrot.slane %v6913_v48, 4 }
0x4015   :  { %v6908_v0 = vadd.f32 %v6907_v21, %v6906_v31  ;;  %v6915_v27 = vadd.f32 %v6914_v4, %v6913_v48 }
0x4017   :  { %v6909_v3 = vrot.slane %v6908_v0, 1  ;;  %v6916_v24 = vrot.slane %v6915_v27, 2 }
0x4019   :  { %v6910_v50 = vadd.f32 %v6909_v3, %v6908_v0  ;;  %v6917_v33 = vadd.f32 %v6916_v24, %v6915_v27 }
0x401b   :  { %9541 = vlog2.f32 %v6910_v50  ;;  %v6918_v40 = vrot.slane %v6917_v33, 1 }
0x401d   :  { %v6919_v19 = vadd.f32 %v6918_v40, %v6917_v33 }
0x401f   :  { %9543 = vlog2.f32 %v6919_v19 }
0x4028   :  { %v9542_v13 = vpop.eup %9541 }
0x4029   :  { %v6921_v14 = vmul.f32 0.6931472, %v9542_v13 }
0x402b   :  { %v6924_v22 = vadd.f32 %v6921_v14, %v6880_v45 }
0x402c   :  { %v9544_v9 = vpop.eup %9543 }
0x402d   :  { %v6927_v20 = vsub.f32 %v11465_v56, %v6924_v22  ;;  %v6926_v1 = vsub.f32 %v11467_v2, %v6924_v22  ;;  %v6923_v63 = vmul.f32 0.6931472, %v9544_v9 }
0x402f   :  { %v6933_v28 = vsel %vm492_vm4, %v6927_v20, -inf  ;;  %v6930_v52 = vsel %vm492_vm4, %v6926_v1, -inf  ;;  %v6925_v41 = vadd.f32 %v6923_v63, %v6889_v49 }
0x4030   :  { %6934 = vmax.xlane.f32.xlu0 %v6933_v28  ;;  %6931 = vmax.xlane.f32.xlu1 %v6930_v52 }
0x4031   :  { %v6929_v5 = vsub.f32 %v11473_v46, %v6925_v41  ;;  %v6928_v44 = vsub.f32 %v11475_v7, %v6925_v41 }
0x4033   :  { %v6939_v58 = vsel %vm492_vm4, %v6929_v5, -inf  ;;  %v6936_v34 = vsel %vm492_vm4, %v6928_v44, -inf }
0x4034   :  { %6940 = vmax.xlane.f32.xlu0 %v6939_v58  ;;  %6937 = vmax.xlane.f32.xlu1 %v6936_v34 }
0x40b9   :  { %v6935_v56 = vpop.xlane.xlu0 %6934  ;;  %v6932_v2 = vpop.xlane.xlu1 %6931 }
0x40ba   :  { %v6943_v6 = vsub.f32 %v6927_v20, %v6935_v56  ;;  %v6942_v35 = vsub.f32 %v6926_v1, %v6932_v2 }
0x40bc   :  { %v6948_v59 = vmul.f32 1.442695, %v6943_v6  ;;  %v6946_v37 = vmul.f32 1.442695, %v6942_v35 }
0x40bd   :  { %v6941_v43 = vpop.xlane.xlu0 %6940  ;;  %v6938_v29 = vpop.xlane.xlu1 %6937 }
0x40be   :  { %9545 = vpow2.f32 %v6948_v59  ;;  %v6945_v26 = vsub.f32 %v6929_v5, %v6941_v43  ;;  %v6944_v15 = vsub.f32 %v6928_v44, %v6938_v29 }
0x40bf   :  { %9547 = vpow2.f32 %v6946_v37 }
0x40c0   :  { %v6952_v46 = vmul.f32 1.442695, %v6945_v26  ;;  %v6950_v7 = vmul.f32 1.442695, %v6944_v15 }
0x40c2   :  { %9549 = vpow2.f32 %v6952_v46 }
0x40c3   :  { %9551 = vpow2.f32 %v6950_v7 }
0x40cb   :  { %v9546_v45 = vpop.eup %9545 }
0x40cc   :  { %v9548_v25 = vpop.eup %9547  ;;  %v6957_v18 = vsel %vm492_vm4, %v9546_v45, 0.0 }
0x40cd   :  { %6958 = vadd.xlane.f32.xlu0 %v6957_v18  ;;  %v6954_v11 = vsel %vm492_vm4, %v9548_v25, 0.0 }
0x40ce   :  { %6955 = vadd.xlane.f32.xlu1 %v6954_v11 }
0x40cf   :  { %v9550_v23 = vpop.eup %9549 }
0x40d0   :  { %v9552_v36 = vpop.eup %9551  ;;  %v6963_v38 = vsel %vm492_vm4, %v9550_v23, 0.0 }
0x40d1   :  { %6964 = vadd.xlane.f32.xlu0 %v6963_v38  ;;  %v6960_v49 = vsel %vm492_vm4, %v9552_v36, 0.0 }
0x40d2   :  { %6961 = vadd.xlane.f32.xlu1 %v6960_v49 }
0x4156   :  { %v6959_v62 = vpop.xlane.xlu0 %6958 }
0x4157   :  { %9553 = vlog2.f32 %v6959_v62  ;;  %v6956_v61 = vpop.xlane.xlu1 %6955 }
0x4158   :  { %9555 = vlog2.f32 %v6956_v61 }
0x415a   :  { %v6965_v32 = vpop.xlane.xlu0 %6964 }
0x415b   :  { %9557 = vlog2.f32 %v6965_v32  ;;  %v6962_v17 = vpop.xlane.xlu1 %6961 }
0x415c   :  { %9559 = vlog2.f32 %v6962_v17 }
0x4164   :  { %v9554_v54 = vpop.eup %9553 }
0x4165   :  { %v9556_v53 = vpop.eup %9555  ;;  %v6969_v10 = vmul.f32 0.6931472, %v9554_v54 }
0x4166   :  { %v6967_v12 = vmul.f32 0.6931472, %v9556_v53 }
0x4167   :  { %v6975_v16 = vadd.f32 %v6969_v10, %v6935_v56 }
0x4168   :  { %v9558_v39 = vpop.eup %9557  ;;  %v6974_v42 = vadd.f32 %v6967_v12, %v6932_v2 }
0x4169   :  { %v9560_v30 = vpop.eup %9559  ;;  %v11501_v51 = vsub.f32 %v6927_v20, %v6975_v16  ;;  %v6973_v47 = vmul.f32 0.6931472, %v9558_v39 }
0x416a   :  { %v11503_v31 = vsub.f32 %v6926_v1, %v6974_v42  ;;  %v6971_v48 = vmul.f32 0.6931472, %v9560_v30 }
0x416b   :  { %v6983_v21 = vsel %vm492_vm4, %v11501_v51, -inf  ;;  %v6977_v4 = vadd.f32 %v6973_v47, %v6941_v43 }
0x416c   :  { %v6982_v0 = vsel %vm492_vm4, %v11503_v31, -inf  ;;  %v6976_v27 = vadd.f32 %v6971_v48, %v6938_v29 }
0x416d   :  { %v6984_v3 = vmax.f32 %v6982_v0, %v6983_v21  ;;  %v11509_v24 = vsub.f32 %v6929_v5, %v6977_v4 }
0x416e   :  { %v11511_v50 = vsub.f32 %v6928_v44, %v6976_v27 }
0x416f   :  { %v6985_v33 = vrot.slane %v6984_v3, 4  ;;  %v6992_v40 = vsel %vm492_vm4, %v11509_v24, -inf }
0x4170   :  { %v6991_v19 = vsel %vm492_vm4, %v11511_v50, -inf }
0x4171   :  { %v6986_v13 = vmax.f32 %v6984_v3, %v6985_v33  ;;  %v6993_v14 = vmax.f32 %v6991_v19, %v6992_v40 }
0x4173   :  { %v6987_v22 = vrot.slane %v6986_v13, 2  ;;  %v6994_v9 = vrot.slane %v6993_v14, 4 }
0x4175   :  { %v6988_v20 = vmax.f32 %v6986_v13, %v6987_v22  ;;  %v6995_v1 = vmax.f32 %v6993_v14, %v6994_v9 }
0x4177   :  { %v6989_v63 = vrot.slane %v6988_v20, 1  ;;  %v6996_v28 = vrot.slane %v6995_v1, 2 }
0x4179   :  { %v6990_v52 = vmax.f32 %v6988_v20, %v6989_v63  ;;  %v6997_v41 = vmax.f32 %v6995_v1, %v6996_v28 }
0x417b   :  { %v7000_v5 = vsub.f32 %v11503_v31, %v6990_v52  ;;  %v7001_v44 = vsub.f32 %v11501_v51, %v6990_v52  ;;  %v6998_v58 = vrot.slane %v6997_v41, 1 }
0x417d   :  { %v7004_v34 = vmul.f32 1.442695, %v7000_v5  ;;  %v7006_v56 = vmul.f32 1.442695, %v7001_v44  ;;  %v6999_v2 = vmax.f32 %v6997_v41, %v6998_v58 }
0x417f   :  { %9561 = vpow2.f32 %v7004_v34  ;;  %v7002_v6 = vsub.f32 %v11511_v50, %v6999_v2  ;;  %v7003_v35 = vsub.f32 %v11509_v24, %v6999_v2 }
0x4180   :  { %9563 = vpow2.f32 %v7006_v56 }
0x4181   :  { %v7008_v59 = vmul.f32 1.442695, %v7002_v6  ;;  %v7010_v37 = vmul.f32 1.442695, %v7003_v35 }
0x4183   :  { %9565 = vpow2.f32 %v7008_v59 }
0x4184   :  { %9567 = vpow2.f32 %v7010_v37 }
0x418c   :  { %v9562_v43 = vpop.eup %9561 }
0x418d   :  { %v9564_v29 = vpop.eup %9563  ;;  %v7012_v26 = vsel %vm492_vm4, %v9562_v43, 0.0 }
0x418e   :  { %v7013_v15 = vsel %vm492_vm4, %v9564_v29, 0.0 }
0x418f   :  { %v7014_v46 = vadd.f32 %v7013_v15, %v7012_v26 }
0x4190   :  { %v9566_v7 = vpop.eup %9565 }
0x4191   :  { %v9568_v45 = vpop.eup %9567  ;;  %v7015_v25 = vrot.slane %v7014_v46, 4  ;;  %v7021_v18 = vsel %vm492_vm4, %v9566_v7, 0.0 }
0x4192   :  { %v7022_v11 = vsel %vm492_vm4, %v9568_v45, 0.0 }
0x4193   :  { %v7016_v23 = vadd.f32 %v7015_v25, %v7014_v46  ;;  %v7023_v36 = vadd.f32 %v7022_v11, %v7021_v18 }
0x4195   :  { %v7017_v38 = vrot.slane %v7016_v23, 2  ;;  %v7024_v49 = vrot.slane %v7023_v36, 4 }
0x4197   :  { %v7018_v62 = vadd.f32 %v7017_v38, %v7016_v23  ;;  %v7025_v61 = vadd.f32 %v7024_v49, %v7023_v36 }
0x4199   :  { %v7019_v32 = vrot.slane %v7018_v62, 1  ;;  %v7026_v17 = vrot.slane %v7025_v61, 2 }
0x419b   :  { %v7020_v54 = vadd.f32 %v7019_v32, %v7018_v62  ;;  %v7027_v53 = vadd.f32 %v7026_v17, %v7025_v61 }
0x419d   :  { %9569 = vlog2.f32 %v7020_v54  ;;  %v7028_v10 = vrot.slane %v7027_v53, 1 }
0x419f   :  { %v7029_v12 = vadd.f32 %v7028_v10, %v7027_v53 }
0x41a1   :  { %9571 = vlog2.f32 %v7029_v12 }
0x41aa   :  { %v9570_v16 = vpop.eup %9569 }
0x41ab   :  { %v7031_v39 = vmul.f32 0.6931472, %v9570_v16 }
0x41ad   :  { %v7034_v42 = vadd.f32 %v7031_v39, %v6990_v52 }
0x41ae   :  { %v9572_v30 = vpop.eup %9571 }
0x41af   :  { %v7037_v47 = vsub.f32 %v11501_v51, %v7034_v42  ;;  %v7036_v48 = vsub.f32 %v11503_v31, %v7034_v42  ;;  %v7033_v21 = vmul.f32 0.6931472, %v9572_v30 }
0x41b1   :  { %v7043_v4 = vsel %vm492_vm4, %v7037_v47, -inf  ;;  %v7040_v0 = vsel %vm492_vm4, %v7036_v48, -inf  ;;  %v7035_v27 = vadd.f32 %v7033_v21, %v6999_v2 }
0x41b2   :  { %7044 = vmax.xlane.f32.xlu0 %v7043_v4  ;;  %7041 = vmax.xlane.f32.xlu1 %v7040_v0 }
0x41b3   :  { %v7039_v3 = vsub.f32 %v11509_v24, %v7035_v27  ;;  %v7038_v33 = vsub.f32 %v11511_v50, %v7035_v27 }
0x41b5   :  { %v7049_v40 = vsel %vm492_vm4, %v7039_v3, -inf  ;;  %v7046_v19 = vsel %vm492_vm4, %v7038_v33, -inf }
0x41b6   :  { %7050 = vmax.xlane.f32.xlu0 %v7049_v40  ;;  %7047 = vmax.xlane.f32.xlu1 %v7046_v19 }
0x423b   :  { %v7045_v51 = vpop.xlane.xlu0 %7044  ;;  %v7042_v31 = vpop.xlane.xlu1 %7041 }
0x423c   :  { %v7053_v13 = vsub.f32 %v7037_v47, %v7045_v51  ;;  %v7052_v14 = vsub.f32 %v7036_v48, %v7042_v31 }
0x423e   :  { %v7058_v22 = vmul.f32 1.442695, %v7053_v13  ;;  %v7056_v9 = vmul.f32 1.442695, %v7052_v14 }
0x423f   :  { %v7051_v20 = vpop.xlane.xlu0 %7050  ;;  %v7048_v1 = vpop.xlane.xlu1 %7047 }
0x4240   :  { %9573 = vpow2.f32 %v7058_v22  ;;  %v7055_v63 = vsub.f32 %v7039_v3, %v7051_v20  ;;  %v7054_v28 = vsub.f32 %v7038_v33, %v7048_v1 }
0x4241   :  { %9575 = vpow2.f32 %v7056_v9 }
0x4242   :  { %v7062_v24 = vmul.f32 1.442695, %v7055_v63  ;;  %v7060_v50 = vmul.f32 1.442695, %v7054_v28 }
0x4244   :  { %9577 = vpow2.f32 %v7062_v24 }
0x4245   :  { %9579 = vpow2.f32 %v7060_v50 }
0x424d   :  { %v9574_v52 = vpop.eup %9573 }
0x424e   :  { %v9576_v41 = vpop.eup %9575  ;;  %v7067_v5 = vsel %vm492_vm4, %v9574_v52, 0.0 }
0x424f   :  { %7068 = vadd.xlane.f32.xlu0 %v7067_v5  ;;  %v7064_v44 = vsel %vm492_vm4, %v9576_v41, 0.0 }
0x4250   :  { %7065 = vadd.xlane.f32.xlu1 %v7064_v44 }
0x4251   :  { %v9578_v58 = vpop.eup %9577 }
0x4252   :  { %v9580_v34 = vpop.eup %9579  ;;  %v7073_v56 = vsel %vm492_vm4, %v9578_v58, 0.0 }
0x4253   :  { %7074 = vadd.xlane.f32.xlu0 %v7073_v56  ;;  %v7070_v2 = vsel %vm492_vm4, %v9580_v34, 0.0 }
0x4254   :  { %7071 = vadd.xlane.f32.xlu1 %v7070_v2 }
0x42d8   :  { %v7069_v6 = vpop.xlane.xlu0 %7068 }
0x42d9   :  { %9581 = vlog2.f32 %v7069_v6  ;;  %v7066_v35 = vpop.xlane.xlu1 %7065 }
0x42da   :  { %9583 = vlog2.f32 %v7066_v35 }
0x42dc   :  { %v7075_v59 = vpop.xlane.xlu0 %7074 }
0x42dd   :  { %9585 = vlog2.f32 %v7075_v59  ;;  %v7072_v37 = vpop.xlane.xlu1 %7071 }
0x42de   :  { %9587 = vlog2.f32 %v7072_v37 }
0x42e6   :  { %v9582_v43 = vpop.eup %9581 }
0x42e7   :  { %v9584_v29 = vpop.eup %9583  ;;  %v7079_v26 = vmul.f32 0.6931472, %v9582_v43 }
0x42e8   :  { %v7077_v15 = vmul.f32 0.6931472, %v9584_v29 }
0x42e9   :  { %v7085_v46 = vadd.f32 %v7079_v26, %v7045_v51 }
0x42ea   :  { %v9586_v7 = vpop.eup %9585  ;;  %v7084_v45 = vadd.f32 %v7077_v15, %v7042_v31 }
0x42eb   :  { %v9588_v25 = vpop.eup %9587  ;;  %v11537_v18 = vsub.f32 %v7037_v47, %v7085_v46  ;;  %v7083_v11 = vmul.f32 0.6931472, %v9586_v7 }
0x42ec   :  { %v11539_v23 = vsub.f32 %v7036_v48, %v7084_v45  ;;  %v7081_v36 = vmul.f32 0.6931472, %v9588_v25 }
0x42ed   :  { %v7093_v38 = vsel %vm492_vm4, %v11537_v18, -inf  ;;  %v7087_v49 = vadd.f32 %v7083_v11, %v7051_v20 }
0x42ee   :  { %v7092_v62 = vsel %vm492_vm4, %v11539_v23, -inf  ;;  %v7086_v61 = vadd.f32 %v7081_v36, %v7048_v1 }
0x42ef   :  { %v7094_v32 = vmax.f32 %v7092_v62, %v7093_v38  ;;  %v11545_v17 = vsub.f32 %v7039_v3, %v7087_v49 }
0x42f0   :  { %v11547_v54 = vsub.f32 %v7038_v33, %v7086_v61 }
0x42f1   :  { %v7095_v53 = vrot.slane %v7094_v32, 4  ;;  %v7102_v10 = vsel %vm492_vm4, %v11545_v17, -inf }
0x42f2   :  { %v7101_v12 = vsel %vm492_vm4, %v11547_v54, -inf }
0x42f3   :  { %v7096_v16 = vmax.f32 %v7094_v32, %v7095_v53  ;;  %v7103_v39 = vmax.f32 %v7101_v12, %v7102_v10 }
0x42f5   :  { %v7097_v42 = vrot.slane %v7096_v16, 2  ;;  %v7104_v30 = vrot.slane %v7103_v39, 4 }
0x42f7   :  { %v7098_v47 = vmax.f32 %v7096_v16, %v7097_v42  ;;  %v7105_v48 = vmax.f32 %v7103_v39, %v7104_v30 }
0x42f9   :  { %v7099_v21 = vrot.slane %v7098_v47, 1  ;;  %v7106_v4 = vrot.slane %v7105_v48, 2 }
0x42fb   :  { %v7100_v0 = vmax.f32 %v7098_v47, %v7099_v21  ;;  %v7107_v27 = vmax.f32 %v7105_v48, %v7106_v4 }
0x42fd   :  { %v7110_v3 = vsub.f32 %v11539_v23, %v7100_v0  ;;  %v7111_v33 = vsub.f32 %v11537_v18, %v7100_v0  ;;  %v7108_v40 = vrot.slane %v7107_v27, 1 }
0x42ff   :  { %v7114_v19 = vmul.f32 1.442695, %v7110_v3  ;;  %v7116_v51 = vmul.f32 1.442695, %v7111_v33  ;;  %v7109_v31 = vmax.f32 %v7107_v27, %v7108_v40 }
0x4301   :  { %9589 = vpow2.f32 %v7114_v19  ;;  %v7112_v13 = vsub.f32 %v11547_v54, %v7109_v31  ;;  %v7113_v14 = vsub.f32 %v11545_v17, %v7109_v31 }
0x4302   :  { %9591 = vpow2.f32 %v7116_v51 }
0x4303   :  { %v7118_v22 = vmul.f32 1.442695, %v7112_v13  ;;  %v7120_v9 = vmul.f32 1.442695, %v7113_v14 }
0x4305   :  { %9593 = vpow2.f32 %v7118_v22 }
0x4306   :  { %9595 = vpow2.f32 %v7120_v9 }
0x430e   :  { %v9590_v20 = vpop.eup %9589 }
0x430f   :  { %v9592_v1 = vpop.eup %9591  ;;  %v7122_v63 = vsel %vm492_vm4, %v9590_v20, 0.0 }
0x4310   :  { %v7123_v28 = vsel %vm492_vm4, %v9592_v1, 0.0 }
0x4311   :  { %v7124_v24 = vadd.f32 %v7123_v28, %v7122_v63 }
0x4312   :  { %v9594_v50 = vpop.eup %9593 }
0x4313   :  { %v9596_v52 = vpop.eup %9595  ;;  %v7125_v41 = vrot.slane %v7124_v24, 4  ;;  %v7131_v5 = vsel %vm492_vm4, %v9594_v50, 0.0 }
0x4314   :  { %v7132_v44 = vsel %vm492_vm4, %v9596_v52, 0.0 }
0x4315   :  { %v7126_v58 = vadd.f32 %v7125_v41, %v7124_v24  ;;  %v7133_v34 = vadd.f32 %v7132_v44, %v7131_v5 }
0x4317   :  { %v7127_v56 = vrot.slane %v7126_v58, 2  ;;  %v7134_v2 = vrot.slane %v7133_v34, 4 }
0x4319   :  { %v7128_v6 = vadd.f32 %v7127_v56, %v7126_v58  ;;  %v7135_v35 = vadd.f32 %v7134_v2, %v7133_v34 }
0x431b   :  { %v7129_v59 = vrot.slane %v7128_v6, 1  ;;  %v7136_v37 = vrot.slane %v7135_v35, 2 }
0x431d   :  { %v7130_v43 = vadd.f32 %v7129_v59, %v7128_v6  ;;  %v7137_v29 = vadd.f32 %v7136_v37, %v7135_v35 }
0x431f   :  { %9597 = vlog2.f32 %v7130_v43  ;;  %v7138_v26 = vrot.slane %v7137_v29, 1 }
0x4321   :  { %v7139_v15 = vadd.f32 %v7138_v26, %v7137_v29 }
0x4323   :  { %9599 = vlog2.f32 %v7139_v15 }
0x432c   :  { %v9598_v46 = vpop.eup %9597 }
0x432d   :  { %v7141_v7 = vmul.f32 0.6931472, %v9598_v46 }
0x432f   :  { %v7144_v45 = vadd.f32 %v7141_v7, %v7100_v0 }
0x4330   :  { %v9600_v25 = vpop.eup %9599 }
0x4331   :  { %v7147_v11 = vsub.f32 %v11537_v18, %v7144_v45  ;;  %v7146_v36 = vsub.f32 %v11539_v23, %v7144_v45  ;;  %v7143_v38 = vmul.f32 0.6931472, %v9600_v25 }
0x4333   :  { %v7153_v49 = vsel %vm492_vm4, %v7147_v11, -inf  ;;  %v7150_v62 = vsel %vm492_vm4, %v7146_v36, -inf  ;;  %v7145_v61 = vadd.f32 %v7143_v38, %v7109_v31 }
0x4334   :  { %7154 = vmax.xlane.f32.xlu0 %v7153_v49  ;;  %7151 = vmax.xlane.f32.xlu1 %v7150_v62 }
0x4335   :  { %v7149_v32 = vsub.f32 %v11545_v17, %v7145_v61  ;;  %v7148_v53 = vsub.f32 %v11547_v54, %v7145_v61 }
0x4337   :  { %v7159_v10 = vsel %vm492_vm4, %v7149_v32, -inf  ;;  %v7156_v12 = vsel %vm492_vm4, %v7148_v53, -inf }
0x4338   :  { %7160 = vmax.xlane.f32.xlu0 %v7159_v10  ;;  %7157 = vmax.xlane.f32.xlu1 %v7156_v12 }
0x43bd   :  { %v7155_v18 = vpop.xlane.xlu0 %7154  ;;  %v7152_v23 = vpop.xlane.xlu1 %7151 }
0x43be   :  { %v7163_v16 = vsub.f32 %v7147_v11, %v7155_v18  ;;  %v7162_v39 = vsub.f32 %v7146_v36, %v7152_v23 }
0x43c0   :  { %v7168_v42 = vmul.f32 1.442695, %v7163_v16  ;;  %v7166_v30 = vmul.f32 1.442695, %v7162_v39 }
0x43c1   :  { %v7161_v47 = vpop.xlane.xlu0 %7160  ;;  %v7158_v48 = vpop.xlane.xlu1 %7157 }
0x43c2   :  { %9601 = vpow2.f32 %v7168_v42  ;;  %v7165_v21 = vsub.f32 %v7149_v32, %v7161_v47  ;;  %v7164_v4 = vsub.f32 %v7148_v53, %v7158_v48 }
0x43c3   :  { %9603 = vpow2.f32 %v7166_v30 }
0x43c4   :  { %v7172_v17 = vmul.f32 1.442695, %v7165_v21  ;;  %v7170_v54 = vmul.f32 1.442695, %v7164_v4 }
0x43c6   :  { %9605 = vpow2.f32 %v7172_v17 }
0x43c7   :  { %9607 = vpow2.f32 %v7170_v54 }
0x43cf   :  { %v9602_v0 = vpop.eup %9601 }
0x43d0   :  { %v9604_v27 = vpop.eup %9603  ;;  %v7177_v3 = vsel %vm492_vm4, %v9602_v0, 0.0 }
0x43d1   :  { %7178 = vadd.xlane.f32.xlu0 %v7177_v3  ;;  %v7174_v33 = vsel %vm492_vm4, %v9604_v27, 0.0 }
0x43d2   :  { %7175 = vadd.xlane.f32.xlu1 %v7174_v33 }
0x43d3   :  { %v9606_v40 = vpop.eup %9605 }
0x43d4   :  { %v9608_v19 = vpop.eup %9607  ;;  %v7183_v51 = vsel %vm492_vm4, %v9606_v40, 0.0 }
0x43d5   :  { %7184 = vadd.xlane.f32.xlu0 %v7183_v51  ;;  %v7180_v31 = vsel %vm492_vm4, %v9608_v19, 0.0 }
0x43d6   :  { %7181 = vadd.xlane.f32.xlu1 %v7180_v31 }
0x445a   :  { %v7179_v13 = vpop.xlane.xlu0 %7178 }
0x445b   :  { %9609 = vlog2.f32 %v7179_v13  ;;  %v7176_v14 = vpop.xlane.xlu1 %7175 }
0x445c   :  { %9611 = vlog2.f32 %v7176_v14 }
0x445e   :  { %v7185_v22 = vpop.xlane.xlu0 %7184 }
0x445f   :  { %9613 = vlog2.f32 %v7185_v22  ;;  %v7182_v9 = vpop.xlane.xlu1 %7181 }
0x4460   :  { %9615 = vlog2.f32 %v7182_v9 }
0x4468   :  { %v9610_v20 = vpop.eup %9609 }
0x4469   :  { %v9612_v1 = vpop.eup %9611  ;;  %v7189_v63 = vmul.f32 0.6931472, %v9610_v20 }
0x446a   :  { %v7187_v28 = vmul.f32 0.6931472, %v9612_v1 }
0x446b   :  { %v7195_v24 = vadd.f32 %v7189_v63, %v7155_v18 }
0x446c   :  { %v9614_v50 = vpop.eup %9613  ;;  %v7194_v52 = vadd.f32 %v7187_v28, %v7152_v23 }
0x446d   :  { %v9616_v41 = vpop.eup %9615  ;;  %v11573_v5 = vsub.f32 %v7147_v11, %v7195_v24  ;;  %v7193_v44 = vmul.f32 0.6931472, %v9614_v50 }
0x446e   :  { %v11575_v58 = vsub.f32 %v7146_v36, %v7194_v52  ;;  %v7191_v34 = vmul.f32 0.6931472, %v9616_v41 }
0x446f   :  { %v7203_v56 = vsel %vm492_vm4, %v11573_v5, -inf  ;;  %v7197_v2 = vadd.f32 %v7193_v44, %v7161_v47 }
0x4470   :  { %v7202_v6 = vsel %vm492_vm4, %v11575_v58, -inf  ;;  %v7196_v35 = vadd.f32 %v7191_v34, %v7158_v48 }
0x4471   :  { %v7204_v59 = vmax.f32 %v7202_v6, %v7203_v56  ;;  %v11581_v37 = vsub.f32 %v7149_v32, %v7197_v2 }
0x4472   :  { %v11583_v43 = vsub.f32 %v7148_v53, %v7196_v35 }
0x4473   :  { %v7205_v29 = vrot.slane %v7204_v59, 4  ;;  %v7212_v26 = vsel %vm492_vm4, %v11581_v37, -inf }
0x4474   :  { %v7211_v15 = vsel %vm492_vm4, %v11583_v43, -inf }
0x4475   :  { %v7206_v46 = vmax.f32 %v7204_v59, %v7205_v29  ;;  %v7213_v7 = vmax.f32 %v7211_v15, %v7212_v26 }
0x4477   :  { %v7207_v45 = vrot.slane %v7206_v46, 2  ;;  %v7214_v25 = vrot.slane %v7213_v7, 4 }
0x4479   :  { %v7208_v11 = vmax.f32 %v7206_v46, %v7207_v45  ;;  %v7215_v36 = vmax.f32 %v7213_v7, %v7214_v25 }
0x447b   :  { %v7209_v38 = vrot.slane %v7208_v11, 1  ;;  %v7216_v49 = vrot.slane %v7215_v36, 2 }
0x447d   :  { %v7210_v62 = vmax.f32 %v7208_v11, %v7209_v38  ;;  %v7217_v61 = vmax.f32 %v7215_v36, %v7216_v49 }
0x447f   :  { %v7220_v32 = vsub.f32 %v11575_v58, %v7210_v62  ;;  %v7221_v53 = vsub.f32 %v11573_v5, %v7210_v62  ;;  %v7218_v10 = vrot.slane %v7217_v61, 1 }
0x4481   :  { %v7224_v12 = vmul.f32 1.442695, %v7220_v32  ;;  %v7226_v18 = vmul.f32 1.442695, %v7221_v53  ;;  %v7219_v23 = vmax.f32 %v7217_v61, %v7218_v10 }
0x4483   :  { %9617 = vpow2.f32 %v7224_v12  ;;  %v7222_v16 = vsub.f32 %v11583_v43, %v7219_v23  ;;  %v7223_v39 = vsub.f32 %v11581_v37, %v7219_v23 }
0x4484   :  { %9619 = vpow2.f32 %v7226_v18 }
0x4485   :  { %v7228_v42 = vmul.f32 1.442695, %v7222_v16  ;;  %v7230_v30 = vmul.f32 1.442695, %v7223_v39 }
0x4487   :  { %9621 = vpow2.f32 %v7228_v42 }
0x4488   :  { %9623 = vpow2.f32 %v7230_v30 }
0x4490   :  { %v9618_v47 = vpop.eup %9617 }
0x4491   :  { %v9620_v48 = vpop.eup %9619  ;;  %v7232_v21 = vsel %vm492_vm4, %v9618_v47, 0.0 }
0x4492   :  { %v7233_v4 = vsel %vm492_vm4, %v9620_v48, 0.0 }
0x4493   :  { %v7234_v17 = vadd.f32 %v7233_v4, %v7232_v21 }
0x4494   :  { %v9622_v54 = vpop.eup %9621 }
0x4495   :  { %v9624_v0 = vpop.eup %9623  ;;  %v7235_v27 = vrot.slane %v7234_v17, 4  ;;  %v7241_v3 = vsel %vm492_vm4, %v9622_v54, 0.0 }
0x4496   :  { %v7242_v33 = vsel %vm492_vm4, %v9624_v0, 0.0 }
0x4497   :  { %v7236_v40 = vadd.f32 %v7235_v27, %v7234_v17  ;;  %v7243_v19 = vadd.f32 %v7242_v33, %v7241_v3 }
0x4499   :  { %v7237_v51 = vrot.slane %v7236_v40, 2  ;;  %v7244_v31 = vrot.slane %v7243_v19, 4 }
0x449b   :  { %v7238_v13 = vadd.f32 %v7237_v51, %v7236_v40  ;;  %v7245_v14 = vadd.f32 %v7244_v31, %v7243_v19 }
0x449d   :  { %v7239_v22 = vrot.slane %v7238_v13, 1  ;;  %v7246_v9 = vrot.slane %v7245_v14, 2 }
0x449f   :  { %v7240_v20 = vadd.f32 %v7239_v22, %v7238_v13  ;;  %v7247_v1 = vadd.f32 %v7246_v9, %v7245_v14 }
0x44a1   :  { %9625 = vlog2.f32 %v7240_v20  ;;  %v7248_v63 = vrot.slane %v7247_v1, 1 }
0x44a3   :  { %v7249_v28 = vadd.f32 %v7248_v63, %v7247_v1 }
0x44a5   :  { %9627 = vlog2.f32 %v7249_v28 }
0x44ae   :  { %v9626_v24 = vpop.eup %9625 }
0x44af   :  { %v7251_v50 = vmul.f32 0.6931472, %v9626_v24 }
0x44b1   :  { %v7254_v52 = vadd.f32 %v7251_v50, %v7210_v62 }
0x44b2   :  { %v9628_v41 = vpop.eup %9627 }
0x44b3   :  { %v7257_v44 = vsub.f32 %v11573_v5, %v7254_v52  ;;  %v7256_v34 = vsub.f32 %v11575_v58, %v7254_v52  ;;  %v7253_v56 = vmul.f32 0.6931472, %v9628_v41 }
0x44b5   :  { %v7263_v2 = vsel %vm492_vm4, %v7257_v44, -inf  ;;  %v7260_v6 = vsel %vm492_vm4, %v7256_v34, -inf  ;;  %v7255_v35 = vadd.f32 %v7253_v56, %v7219_v23 }
0x44b6   :  { %7264 = vmax.xlane.f32.xlu0 %v7263_v2  ;;  %7261 = vmax.xlane.f32.xlu1 %v7260_v6 }
0x44b7   :  { %v7259_v59 = vsub.f32 %v11581_v37, %v7255_v35  ;;  %v7258_v29 = vsub.f32 %v11583_v43, %v7255_v35 }
0x44b9   :  { %v7269_v26 = vsel %vm492_vm4, %v7259_v59, -inf  ;;  %v7266_v15 = vsel %vm492_vm4, %v7258_v29, -inf }
0x44ba   :  { %7270 = vmax.xlane.f32.xlu0 %v7269_v26  ;;  %7267 = vmax.xlane.f32.xlu1 %v7266_v15 }
0x453f   :  { %v7265_v5 = vpop.xlane.xlu0 %7264  ;;  %v7262_v58 = vpop.xlane.xlu1 %7261 }
0x4540   :  { %v7273_v46 = vsub.f32 %v7257_v44, %v7265_v5  ;;  %v7272_v7 = vsub.f32 %v7256_v34, %v7262_v58 }
0x4542   :  { %v7278_v45 = vmul.f32 1.442695, %v7273_v46  ;;  %v7276_v25 = vmul.f32 1.442695, %v7272_v7 }
0x4543   :  { %v7271_v11 = vpop.xlane.xlu0 %7270  ;;  %v7268_v36 = vpop.xlane.xlu1 %7267 }
0x4544   :  { %9629 = vpow2.f32 %v7278_v45  ;;  %v7275_v38 = vsub.f32 %v7259_v59, %v7271_v11  ;;  %v7274_v49 = vsub.f32 %v7258_v29, %v7268_v36 }
0x4545   :  { %9631 = vpow2.f32 %v7276_v25 }
0x4546   :  { %v7282_v37 = vmul.f32 1.442695, %v7275_v38  ;;  %v7280_v43 = vmul.f32 1.442695, %v7274_v49 }
0x4548   :  { %9633 = vpow2.f32 %v7282_v37 }
0x4549   :  { %9635 = vpow2.f32 %v7280_v43 }
0x4551   :  { %v9630_v62 = vpop.eup %9629 }
0x4552   :  { %v9632_v61 = vpop.eup %9631  ;;  %v7287_v32 = vsel %vm492_vm4, %v9630_v62, 0.0 }
0x4553   :  { %7288 = vadd.xlane.f32.xlu0 %v7287_v32  ;;  %v7284_v53 = vsel %vm492_vm4, %v9632_v61, 0.0 }
0x4554   :  { %7285 = vadd.xlane.f32.xlu1 %v7284_v53 }
0x4555   :  { %v9634_v10 = vpop.eup %9633 }
0x4556   :  { %v9636_v12 = vpop.eup %9635  ;;  %v7293_v18 = vsel %vm492_vm4, %v9634_v10, 0.0 }
0x4557   :  { %7294 = vadd.xlane.f32.xlu0 %v7293_v18  ;;  %v7290_v23 = vsel %vm492_vm4, %v9636_v12, 0.0 }
0x4558   :  { %7291 = vadd.xlane.f32.xlu1 %v7290_v23 }
0x45dc   :  { %v7289_v16 = vpop.xlane.xlu0 %7288 }
0x45dd   :  { %9637 = vlog2.f32 %v7289_v16  ;;  %v7286_v39 = vpop.xlane.xlu1 %7285 }
0x45de   :  { %9639 = vlog2.f32 %v7286_v39 }
0x45e0   :  { %v7295_v42 = vpop.xlane.xlu0 %7294 }
0x45e1   :  { %9641 = vlog2.f32 %v7295_v42  ;;  %v7292_v30 = vpop.xlane.xlu1 %7291 }
0x45e2   :  { %9643 = vlog2.f32 %v7292_v30 }
0x45ea   :  { %v9638_v47 = vpop.eup %9637 }
0x45eb   :  { %v9640_v48 = vpop.eup %9639  ;;  %v7299_v21 = vmul.f32 0.6931472, %v9638_v47 }
0x45ec   :  { %v7297_v4 = vmul.f32 0.6931472, %v9640_v48 }
0x45ed   :  { %v7305_v17 = vadd.f32 %v7299_v21, %v7265_v5 }
0x45ee   :  { %v9642_v54 = vpop.eup %9641  ;;  %v7304_v0 = vadd.f32 %v7297_v4, %v7262_v58 }
0x45ef   :  { %v9644_v27 = vpop.eup %9643  ;;  %v11609_v3 = vsub.f32 %v7257_v44, %v7305_v17  ;;  %v7303_v33 = vmul.f32 0.6931472, %v9642_v54 }
0x45f0   :  { %v11611_v40 = vsub.f32 %v7256_v34, %v7304_v0  ;;  %v7301_v19 = vmul.f32 0.6931472, %v9644_v27 }
0x45f1   :  { %v7313_v51 = vsel %vm492_vm4, %v11609_v3, -inf  ;;  %v7307_v31 = vadd.f32 %v7303_v33, %v7271_v11 }
0x45f2   :  { %v7312_v13 = vsel %vm492_vm4, %v11611_v40, -inf  ;;  %v7306_v14 = vadd.f32 %v7301_v19, %v7268_v36 }
0x45f3   :  { %v7314_v22 = vmax.f32 %v7312_v13, %v7313_v51  ;;  %v11617_v9 = vsub.f32 %v7259_v59, %v7307_v31 }
0x45f4   :  { %v11619_v20 = vsub.f32 %v7258_v29, %v7306_v14 }
0x45f5   :  { %v7315_v1 = vrot.slane %v7314_v22, 4  ;;  %v7322_v63 = vsel %vm492_vm4, %v11617_v9, -inf }
0x45f6   :  { %v7321_v28 = vsel %vm492_vm4, %v11619_v20, -inf }
0x45f7   :  { %v7316_v24 = vmax.f32 %v7314_v22, %v7315_v1  ;;  %v7323_v50 = vmax.f32 %v7321_v28, %v7322_v63 }
0x45f9   :  { %v7317_v52 = vrot.slane %v7316_v24, 2  ;;  %v7324_v41 = vrot.slane %v7323_v50, 4 }
0x45fb   :  { %v7318_v44 = vmax.f32 %v7316_v24, %v7317_v52  ;;  %v7325_v34 = vmax.f32 %v7323_v50, %v7324_v41 }
0x45fd   :  { %v7319_v56 = vrot.slane %v7318_v44, 1  ;;  %v7326_v2 = vrot.slane %v7325_v34, 2 }
0x45ff   :  { %v7320_v6 = vmax.f32 %v7318_v44, %v7319_v56  ;;  %v7327_v35 = vmax.f32 %v7325_v34, %v7326_v2 }
0x4601   :  { %v7330_v59 = vsub.f32 %v11611_v40, %v7320_v6  ;;  %v7331_v29 = vsub.f32 %v11609_v3, %v7320_v6  ;;  %v7328_v26 = vrot.slane %v7327_v35, 1 }
0x4603   :  { %v7334_v15 = vmul.f32 1.442695, %v7330_v59  ;;  %v7336_v5 = vmul.f32 1.442695, %v7331_v29  ;;  %v7329_v58 = vmax.f32 %v7327_v35, %v7328_v26 }
0x4605   :  { %9645 = vpow2.f32 %v7334_v15  ;;  %v7332_v46 = vsub.f32 %v11619_v20, %v7329_v58  ;;  %v7333_v7 = vsub.f32 %v11617_v9, %v7329_v58 }
0x4606   :  { %9647 = vpow2.f32 %v7336_v5 }
0x4607   :  { %v7338_v45 = vmul.f32 1.442695, %v7332_v46  ;;  %v7340_v25 = vmul.f32 1.442695, %v7333_v7 }
0x4609   :  { %9649 = vpow2.f32 %v7338_v45 }
0x460a   :  { %9651 = vpow2.f32 %v7340_v25 }
0x4612   :  { %v9646_v11 = vpop.eup %9645 }
0x4613   :  { %v9648_v36 = vpop.eup %9647  ;;  %v7342_v38 = vsel %vm492_vm4, %v9646_v11, 0.0 }
0x4614   :  { %v7343_v49 = vsel %vm492_vm4, %v9648_v36, 0.0 }
0x4615   :  { %v7344_v37 = vadd.f32 %v7343_v49, %v7342_v38 }
0x4616   :  { %v9650_v43 = vpop.eup %9649 }
0x4617   :  { %v9652_v62 = vpop.eup %9651  ;;  %v7345_v61 = vrot.slane %v7344_v37, 4  ;;  %v7351_v32 = vsel %vm492_vm4, %v9650_v43, 0.0 }
0x4618   :  { %v7352_v53 = vsel %vm492_vm4, %v9652_v62, 0.0 }
0x4619   :  { %v7346_v10 = vadd.f32 %v7345_v61, %v7344_v37  ;;  %v7353_v12 = vadd.f32 %v7352_v53, %v7351_v32 }
0x461b   :  { %v7347_v18 = vrot.slane %v7346_v10, 2  ;;  %v7354_v23 = vrot.slane %v7353_v12, 4 }
0x461d   :  { %v7348_v16 = vadd.f32 %v7347_v18, %v7346_v10  ;;  %v7355_v39 = vadd.f32 %v7354_v23, %v7353_v12 }
0x461f   :  { %v7349_v42 = vrot.slane %v7348_v16, 1  ;;  %v7356_v30 = vrot.slane %v7355_v39, 2 }
0x4621   :  { %v7350_v47 = vadd.f32 %v7349_v42, %v7348_v16  ;;  %v7357_v48 = vadd.f32 %v7356_v30, %v7355_v39 }
0x4623   :  { %9653 = vlog2.f32 %v7350_v47  ;;  %v7358_v21 = vrot.slane %v7357_v48, 1 }
0x4625   :  { %v7359_v4 = vadd.f32 %v7358_v21, %v7357_v48 }
0x4627   :  { %9655 = vlog2.f32 %v7359_v4 }
0x4630   :  { %v9654_v17 = vpop.eup %9653 }
0x4631   :  { %v7361_v54 = vmul.f32 0.6931472, %v9654_v17 }
0x4633   :  { %v7364_v0 = vadd.f32 %v7361_v54, %v7320_v6 }
0x4634   :  { %v9656_v27 = vpop.eup %9655 }
0x4635   :  { %v7367_v33 = vsub.f32 %v11609_v3, %v7364_v0  ;;  %v7366_v19 = vsub.f32 %v11611_v40, %v7364_v0  ;;  %v7363_v51 = vmul.f32 0.6931472, %v9656_v27 }
0x4637   :  { %v7373_v31 = vsel %vm492_vm4, %v7367_v33, -inf  ;;  %v7370_v13 = vsel %vm492_vm4, %v7366_v19, -inf  ;;  %v7365_v14 = vadd.f32 %v7363_v51, %v7329_v58 }
0x4638   :  { %7374 = vmax.xlane.f32.xlu0 %v7373_v31  ;;  %7371 = vmax.xlane.f32.xlu1 %v7370_v13 }
0x4639   :  { %v7369_v22 = vsub.f32 %v11617_v9, %v7365_v14  ;;  %v7368_v1 = vsub.f32 %v11619_v20, %v7365_v14 }
0x463b   :  { %v7379_v63 = vsel %vm492_vm4, %v7369_v22, -inf  ;;  %v7376_v28 = vsel %vm492_vm4, %v7368_v1, -inf }
0x463c   :  { %7380 = vmax.xlane.f32.xlu0 %v7379_v63  ;;  %7377 = vmax.xlane.f32.xlu1 %v7376_v28 }
0x46c1   :  { %v7375_v3 = vpop.xlane.xlu0 %7374  ;;  %v7372_v40 = vpop.xlane.xlu1 %7371 }
0x46c2   :  { %v7383_v24 = vsub.f32 %v7367_v33, %v7375_v3  ;;  %v7382_v50 = vsub.f32 %v7366_v19, %v7372_v40 }
0x46c4   :  { %v7388_v52 = vmul.f32 1.442695, %v7383_v24  ;;  %v7386_v41 = vmul.f32 1.442695, %v7382_v50 }
0x46c5   :  { %v7381_v44 = vpop.xlane.xlu0 %7380  ;;  %v7378_v34 = vpop.xlane.xlu1 %7377 }
0x46c6   :  { %9657 = vpow2.f32 %v7388_v52  ;;  %v7385_v56 = vsub.f32 %v7369_v22, %v7381_v44  ;;  %v7384_v2 = vsub.f32 %v7368_v1, %v7378_v34 }
0x46c7   :  { %9659 = vpow2.f32 %v7386_v41 }
0x46c8   :  { %v7392_v9 = vmul.f32 1.442695, %v7385_v56  ;;  %v7390_v20 = vmul.f32 1.442695, %v7384_v2 }
0x46ca   :  { %9661 = vpow2.f32 %v7392_v9 }
0x46cb   :  { %9663 = vpow2.f32 %v7390_v20 }
0x46d3   :  { %v9658_v6 = vpop.eup %9657 }
0x46d4   :  { %v9660_v35 = vpop.eup %9659  ;;  %v7397_v59 = vsel %vm492_vm4, %v9658_v6, 0.0 }
0x46d5   :  { %7398 = vadd.xlane.f32.xlu0 %v7397_v59  ;;  %v7394_v29 = vsel %vm492_vm4, %v9660_v35, 0.0 }
0x46d6   :  { %7395 = vadd.xlane.f32.xlu1 %v7394_v29 }
0x46d7   :  { %v9662_v26 = vpop.eup %9661 }
0x46d8   :  { %v9664_v15 = vpop.eup %9663  ;;  %v7403_v5 = vsel %vm492_vm4, %v9662_v26, 0.0 }
0x46d9   :  { %7404 = vadd.xlane.f32.xlu0 %v7403_v5  ;;  %v7400_v58 = vsel %vm492_vm4, %v9664_v15, 0.0 }
0x46da   :  { %7401 = vadd.xlane.f32.xlu1 %v7400_v58 }
0x475e   :  { %v7399_v46 = vpop.xlane.xlu0 %7398 }
0x475f   :  { %9665 = vlog2.f32 %v7399_v46  ;;  %v7396_v7 = vpop.xlane.xlu1 %7395 }
0x4760   :  { %9667 = vlog2.f32 %v7396_v7 }
0x4762   :  { %v7405_v45 = vpop.xlane.xlu0 %7404 }
0x4763   :  { %9669 = vlog2.f32 %v7405_v45  ;;  %v7402_v25 = vpop.xlane.xlu1 %7401 }
0x4764   :  { %9671 = vlog2.f32 %v7402_v25 }
0x476c   :  { %v9666_v11 = vpop.eup %9665 }
0x476d   :  { %v9668_v36 = vpop.eup %9667  ;;  %v7409_v38 = vmul.f32 0.6931472, %v9666_v11 }
0x476e   :  { %v7407_v49 = vmul.f32 0.6931472, %v9668_v36 }
0x476f   :  { %v7415_v37 = vadd.f32 %v7409_v38, %v7375_v3 }
0x4770   :  { %v9670_v43 = vpop.eup %9669  ;;  %v7414_v62 = vadd.f32 %v7407_v49, %v7372_v40 }
0x4771   :  { %v9672_v61 = vpop.eup %9671  ;;  %v11645_v32 = vsub.f32 %v7367_v33, %v7415_v37  ;;  %v7413_v53 = vmul.f32 0.6931472, %v9670_v43 }
0x4772   :  { %v11647_v10 = vsub.f32 %v7366_v19, %v7414_v62  ;;  %v7411_v12 = vmul.f32 0.6931472, %v9672_v61 }
0x4773   :  { %v7423_v18 = vsel %vm492_vm4, %v11645_v32, -inf  ;;  %v7417_v23 = vadd.f32 %v7413_v53, %v7381_v44 }
0x4774   :  { %v7422_v16 = vsel %vm492_vm4, %v11647_v10, -inf  ;;  %v7416_v39 = vadd.f32 %v7411_v12, %v7378_v34 }
0x4775   :  { %v7424_v42 = vmax.f32 %v7422_v16, %v7423_v18  ;;  %v11653_v30 = vsub.f32 %v7369_v22, %v7417_v23 }
0x4776   :  { %v11655_v47 = vsub.f32 %v7368_v1, %v7416_v39 }
0x4777   :  { %v7425_v48 = vrot.slane %v7424_v42, 4  ;;  %v7432_v21 = vsel %vm492_vm4, %v11653_v30, -inf }
0x4778   :  { %v7431_v4 = vsel %vm492_vm4, %v11655_v47, -inf }
0x4779   :  { %v7426_v17 = vmax.f32 %v7424_v42, %v7425_v48  ;;  %v7433_v54 = vmax.f32 %v7431_v4, %v7432_v21 }
0x477b   :  { %v7427_v0 = vrot.slane %v7426_v17, 2  ;;  %v7434_v27 = vrot.slane %v7433_v54, 4 }
0x477d   :  { %v7428_v33 = vmax.f32 %v7426_v17, %v7427_v0  ;;  %v7435_v19 = vmax.f32 %v7433_v54, %v7434_v27 }
0x477f   :  { %v7429_v51 = vrot.slane %v7428_v33, 1  ;;  %v7436_v31 = vrot.slane %v7435_v19, 2 }
0x4781   :  { %v7430_v13 = vmax.f32 %v7428_v33, %v7429_v51  ;;  %v7437_v14 = vmax.f32 %v7435_v19, %v7436_v31 }
0x4783   :  { %v7440_v22 = vsub.f32 %v11647_v10, %v7430_v13  ;;  %v7441_v1 = vsub.f32 %v11645_v32, %v7430_v13  ;;  %v7438_v63 = vrot.slane %v7437_v14, 1 }
0x4785   :  { %v7444_v28 = vmul.f32 1.442695, %v7440_v22  ;;  %v7446_v3 = vmul.f32 1.442695, %v7441_v1  ;;  %v7439_v40 = vmax.f32 %v7437_v14, %v7438_v63 }
0x4787   :  { %9673 = vpow2.f32 %v7444_v28  ;;  %v7442_v24 = vsub.f32 %v11655_v47, %v7439_v40  ;;  %v7443_v50 = vsub.f32 %v11653_v30, %v7439_v40 }
0x4788   :  { %9675 = vpow2.f32 %v7446_v3 }
0x4789   :  { %v7448_v52 = vmul.f32 1.442695, %v7442_v24  ;;  %v7450_v41 = vmul.f32 1.442695, %v7443_v50 }
0x478b   :  { %9677 = vpow2.f32 %v7448_v52 }
0x478c   :  { %9679 = vpow2.f32 %v7450_v41 }
0x4794   :  { %v9674_v44 = vpop.eup %9673 }
0x4795   :  { %v9676_v34 = vpop.eup %9675  ;;  %v7452_v56 = vsel %vm492_vm4, %v9674_v44, 0.0 }
0x4796   :  { %v7453_v2 = vsel %vm492_vm4, %v9676_v34, 0.0 }
0x4797   :  { %v7454_v9 = vadd.f32 %v7453_v2, %v7452_v56 }
0x4798   :  { %v9678_v20 = vpop.eup %9677 }
0x4799   :  { %v9680_v6 = vpop.eup %9679  ;;  %v7455_v35 = vrot.slane %v7454_v9, 4  ;;  %v7461_v59 = vsel %vm492_vm4, %v9678_v20, 0.0 }
0x479a   :  { %v7462_v29 = vsel %vm492_vm4, %v9680_v6, 0.0 }
0x479b   :  { %v7456_v26 = vadd.f32 %v7455_v35, %v7454_v9  ;;  %v7463_v15 = vadd.f32 %v7462_v29, %v7461_v59 }
0x479d   :  { %v7457_v5 = vrot.slane %v7456_v26, 2  ;;  %v7464_v58 = vrot.slane %v7463_v15, 4 }
0x479f   :  { %v7458_v46 = vadd.f32 %v7457_v5, %v7456_v26  ;;  %v7465_v7 = vadd.f32 %v7464_v58, %v7463_v15 }
0x47a1   :  { %v7459_v45 = vrot.slane %v7458_v46, 1  ;;  %v7466_v25 = vrot.slane %v7465_v7, 2 }
0x47a3   :  { %v7460_v11 = vadd.f32 %v7459_v45, %v7458_v46  ;;  %v7467_v36 = vadd.f32 %v7466_v25, %v7465_v7 }
0x47a5   :  { %9681 = vlog2.f32 %v7460_v11  ;;  %v7468_v38 = vrot.slane %v7467_v36, 1 }
0x47a7   :  { %v7469_v49 = vadd.f32 %v7468_v38, %v7467_v36 }
0x47a9   :  { %9683 = vlog2.f32 %v7469_v49 }
0x47b2   :  { %v9682_v37 = vpop.eup %9681 }
0x47b3   :  { %v7471_v43 = vmul.f32 0.6931472, %v9682_v37 }
0x47b5   :  { %v7474_v62 = vadd.f32 %v7471_v43, %v7430_v13 }
0x47b6   :  { %v9684_v61 = vpop.eup %9683 }
0x47b7   :  { %v7477_v53 = vsub.f32 %v11645_v32, %v7474_v62  ;;  %v7476_v12 = vsub.f32 %v11647_v10, %v7474_v62  ;;  %v7473_v18 = vmul.f32 0.6931472, %v9684_v61 }
0x47b9   :  { %v7483_v23 = vsel %vm492_vm4, %v7477_v53, -inf  ;;  %v7480_v16 = vsel %vm492_vm4, %v7476_v12, -inf  ;;  %v7475_v39 = vadd.f32 %v7473_v18, %v7439_v40 }
0x47ba   :  { %7484 = vmax.xlane.f32.xlu0 %v7483_v23  ;;  %7481 = vmax.xlane.f32.xlu1 %v7480_v16 }
0x47bb   :  { %v7479_v42 = vsub.f32 %v11653_v30, %v7475_v39  ;;  %v7478_v48 = vsub.f32 %v11655_v47, %v7475_v39 }
0x47bd   :  { %v7489_v21 = vsel %vm492_vm4, %v7479_v42, -inf  ;;  %v7486_v4 = vsel %vm492_vm4, %v7478_v48, -inf }
0x47be   :  { %7490 = vmax.xlane.f32.xlu0 %v7489_v21  ;;  %7487 = vmax.xlane.f32.xlu1 %v7486_v4 }
0x4843   :  { %v7485_v32 = vpop.xlane.xlu0 %7484  ;;  %v7482_v10 = vpop.xlane.xlu1 %7481 }
0x4844   :  { %v7493_v17 = vsub.f32 %v7477_v53, %v7485_v32  ;;  %v7492_v54 = vsub.f32 %v7476_v12, %v7482_v10 }
0x4846   :  { %v7498_v0 = vmul.f32 1.442695, %v7493_v17  ;;  %v7496_v27 = vmul.f32 1.442695, %v7492_v54 }
0x4847   :  { %v7491_v33 = vpop.xlane.xlu0 %7490  ;;  %v7488_v19 = vpop.xlane.xlu1 %7487 }
0x4848   :  { %9685 = vpow2.f32 %v7498_v0  ;;  %v7495_v51 = vsub.f32 %v7479_v42, %v7491_v33  ;;  %v7494_v31 = vsub.f32 %v7478_v48, %v7488_v19 }
0x4849   :  { %9687 = vpow2.f32 %v7496_v27 }
0x484a   :  { %v7502_v30 = vmul.f32 1.442695, %v7495_v51  ;;  %v7500_v47 = vmul.f32 1.442695, %v7494_v31 }
0x484c   :  { %9689 = vpow2.f32 %v7502_v30 }
0x484d   :  { %9691 = vpow2.f32 %v7500_v47 }
0x4855   :  { %v9686_v13 = vpop.eup %9685 }
0x4856   :  { %v9688_v14 = vpop.eup %9687  ;;  %v7507_v22 = vsel %vm492_vm4, %v9686_v13, 0.0 }
0x4857   :  { %7508 = vadd.xlane.f32.xlu0 %v7507_v22  ;;  %v7504_v1 = vsel %vm492_vm4, %v9688_v14, 0.0 }
0x4858   :  { %7505 = vadd.xlane.f32.xlu1 %v7504_v1 }
0x4859   :  { %v9690_v63 = vpop.eup %9689 }
0x485a   :  { %v9692_v28 = vpop.eup %9691  ;;  %v7513_v3 = vsel %vm492_vm4, %v9690_v63, 0.0 }
0x485b   :  { %7514 = vadd.xlane.f32.xlu0 %v7513_v3  ;;  %v7510_v40 = vsel %vm492_vm4, %v9692_v28, 0.0 }
0x485c   :  { %7511 = vadd.xlane.f32.xlu1 %v7510_v40 }
0x48e0   :  { %v7509_v24 = vpop.xlane.xlu0 %7508 }
0x48e1   :  { %9693 = vlog2.f32 %v7509_v24  ;;  %v7506_v50 = vpop.xlane.xlu1 %7505 }
0x48e2   :  { %9695 = vlog2.f32 %v7506_v50 }
0x48e4   :  { %v7515_v52 = vpop.xlane.xlu0 %7514 }
0x48e5   :  { %9697 = vlog2.f32 %v7515_v52  ;;  %v7512_v41 = vpop.xlane.xlu1 %7511 }
0x48e6   :  { %9699 = vlog2.f32 %v7512_v41 }
0x48ee   :  { %v9694_v44 = vpop.eup %9693 }
0x48ef   :  { %v9696_v34 = vpop.eup %9695  ;;  %v7519_v56 = vmul.f32 0.6931472, %v9694_v44 }
0x48f0   :  { %v7517_v2 = vmul.f32 0.6931472, %v9696_v34 }
0x48f1   :  { %v7525_v9 = vadd.f32 %v7519_v56, %v7485_v32 }
0x48f2   :  { %v9698_v20 = vpop.eup %9697  ;;  %v7524_v6 = vadd.f32 %v7517_v2, %v7482_v10 }
0x48f3   :  { %v9700_v35 = vpop.eup %9699  ;;  %v11681_v59 = vsub.f32 %v7477_v53, %v7525_v9  ;;  %v7523_v29 = vmul.f32 0.6931472, %v9698_v20 }
0x48f4   :  { %v11683_v26 = vsub.f32 %v7476_v12, %v7524_v6  ;;  %v7521_v15 = vmul.f32 0.6931472, %v9700_v35 }
0x48f5   :  { %v7533_v5 = vsel %vm492_vm4, %v11681_v59, -inf  ;;  %v7527_v58 = vadd.f32 %v7523_v29, %v7491_v33 }
0x48f6   :  { %v7532_v46 = vsel %vm492_vm4, %v11683_v26, -inf  ;;  %v7526_v7 = vadd.f32 %v7521_v15, %v7488_v19 }
0x48f7   :  { %v7534_v45 = vmax.f32 %v7532_v46, %v7533_v5  ;;  %v11689_v25 = vsub.f32 %v7479_v42, %v7527_v58 }
0x48f8   :  { %v11691_v11 = vsub.f32 %v7478_v48, %v7526_v7 }
0x48f9   :  { %v7535_v36 = vrot.slane %v7534_v45, 4  ;;  %v7542_v38 = vsel %vm492_vm4, %v11689_v25, -inf }
0x48fa   :  { %v7541_v49 = vsel %vm492_vm4, %v11691_v11, -inf }
0x48fb   :  { %v7536_v37 = vmax.f32 %v7534_v45, %v7535_v36  ;;  %v7543_v43 = vmax.f32 %v7541_v49, %v7542_v38 }
0x48fd   :  { %v7537_v62 = vrot.slane %v7536_v37, 2  ;;  %v7544_v61 = vrot.slane %v7543_v43, 4 }
0x48ff   :  { %v7538_v53 = vmax.f32 %v7536_v37, %v7537_v62  ;;  %v7545_v12 = vmax.f32 %v7543_v43, %v7544_v61 }
0x4901   :  { %v7539_v18 = vrot.slane %v7538_v53, 1  ;;  %v7546_v23 = vrot.slane %v7545_v12, 2 }
0x4903   :  { %v7540_v16 = vmax.f32 %v7538_v53, %v7539_v18  ;;  %v7547_v39 = vmax.f32 %v7545_v12, %v7546_v23 }
0x4905   :  { %v7550_v42 = vsub.f32 %v11683_v26, %v7540_v16  ;;  %v7551_v48 = vsub.f32 %v11681_v59, %v7540_v16  ;;  %v7548_v21 = vrot.slane %v7547_v39, 1 }
0x4907   :  { %v7554_v4 = vmul.f32 1.442695, %v7550_v42  ;;  %v7556_v32 = vmul.f32 1.442695, %v7551_v48  ;;  %v7549_v10 = vmax.f32 %v7547_v39, %v7548_v21 }
0x4909   :  { %9701 = vpow2.f32 %v7554_v4  ;;  %v7552_v17 = vsub.f32 %v11691_v11, %v7549_v10  ;;  %v7553_v54 = vsub.f32 %v11689_v25, %v7549_v10 }
0x490a   :  { %9703 = vpow2.f32 %v7556_v32 }
0x490b   :  { %v7558_v0 = vmul.f32 1.442695, %v7552_v17  ;;  %v7560_v27 = vmul.f32 1.442695, %v7553_v54 }
0x490d   :  { %9705 = vpow2.f32 %v7558_v0 }
0x490e   :  { %9707 = vpow2.f32 %v7560_v27 }
0x4916   :  { %v9702_v33 = vpop.eup %9701 }
0x4917   :  { %v9704_v19 = vpop.eup %9703  ;;  %v7562_v51 = vsel %vm492_vm4, %v9702_v33, 0.0 }
0x4918   :  { %v7563_v31 = vsel %vm492_vm4, %v9704_v19, 0.0 }
0x4919   :  { %v7564_v30 = vadd.f32 %v7563_v31, %v7562_v51 }
0x491a   :  { %v9706_v47 = vpop.eup %9705 }
0x491b   :  { %v9708_v13 = vpop.eup %9707  ;;  %v7565_v14 = vrot.slane %v7564_v30, 4  ;;  %v7571_v22 = vsel %vm492_vm4, %v9706_v47, 0.0 }
0x491c   :  { %v7572_v1 = vsel %vm492_vm4, %v9708_v13, 0.0 }
0x491d   :  { %v7566_v63 = vadd.f32 %v7565_v14, %v7564_v30  ;;  %v7573_v28 = vadd.f32 %v7572_v1, %v7571_v22 }
0x491f   :  { %v7567_v3 = vrot.slane %v7566_v63, 2  ;;  %v7574_v40 = vrot.slane %v7573_v28, 4 }
0x4921   :  { %v7568_v24 = vadd.f32 %v7567_v3, %v7566_v63  ;;  %v7575_v50 = vadd.f32 %v7574_v40, %v7573_v28 }
0x4923   :  { %v7569_v52 = vrot.slane %v7568_v24, 1  ;;  %v7576_v41 = vrot.slane %v7575_v50, 2 }
0x4925   :  { %v7570_v44 = vadd.f32 %v7569_v52, %v7568_v24  ;;  %v7577_v34 = vadd.f32 %v7576_v41, %v7575_v50 }
0x4927   :  { %9709 = vlog2.f32 %v7570_v44  ;;  %v7578_v56 = vrot.slane %v7577_v34, 1 }
0x4929   :  { %v7579_v2 = vadd.f32 %v7578_v56, %v7577_v34 }
0x492b   :  { %9711 = vlog2.f32 %v7579_v2 }
0x4934   :  { %v9710_v9 = vpop.eup %9709 }
0x4935   :  { %v7581_v20 = vmul.f32 0.6931472, %v9710_v9 }
0x4937   :  { %v7584_v6 = vadd.f32 %v7581_v20, %v7540_v16 }
0x4938   :  { %v9712_v35 = vpop.eup %9711 }
0x4939   :  { %v7587_v29 = vsub.f32 %v11681_v59, %v7584_v6  ;;  %v7586_v15 = vsub.f32 %v11683_v26, %v7584_v6  ;;  %v7583_v5 = vmul.f32 0.6931472, %v9712_v35 }
0x493b   :  { %v7593_v58 = vsel %vm492_vm4, %v7587_v29, -inf  ;;  %v7590_v46 = vsel %vm492_vm4, %v7586_v15, -inf  ;;  %v7585_v7 = vadd.f32 %v7583_v5, %v7549_v10 }
0x493c   :  { %7594 = vmax.xlane.f32.xlu0 %v7593_v58  ;;  %7591 = vmax.xlane.f32.xlu1 %v7590_v46 }
0x493d   :  { %v7589_v45 = vsub.f32 %v11689_v25, %v7585_v7  ;;  %v7588_v36 = vsub.f32 %v11691_v11, %v7585_v7 }
0x493f   :  { %v7599_v38 = vsel %vm492_vm4, %v7589_v45, -inf  ;;  %v7596_v49 = vsel %vm492_vm4, %v7588_v36, -inf }
0x4940   :  { %7600 = vmax.xlane.f32.xlu0 %v7599_v38  ;;  %7597 = vmax.xlane.f32.xlu1 %v7596_v49 }
0x49c5   :  { %v7595_v59 = vpop.xlane.xlu0 %7594  ;;  %v7592_v26 = vpop.xlane.xlu1 %7591 }
0x49c6   :  { %v7603_v37 = vsub.f32 %v7587_v29, %v7595_v59  ;;  %v7602_v43 = vsub.f32 %v7586_v15, %v7592_v26 }
0x49c8   :  { %v7608_v62 = vmul.f32 1.442695, %v7603_v37  ;;  %v7606_v61 = vmul.f32 1.442695, %v7602_v43 }
0x49c9   :  { %v7601_v53 = vpop.xlane.xlu0 %7600  ;;  %v7598_v12 = vpop.xlane.xlu1 %7597 }
0x49ca   :  { %9713 = vpow2.f32 %v7608_v62  ;;  %v7605_v18 = vsub.f32 %v7589_v45, %v7601_v53  ;;  %v7604_v23 = vsub.f32 %v7588_v36, %v7598_v12 }
0x49cb   :  { %9715 = vpow2.f32 %v7606_v61 }
0x49cc   :  { %v7612_v25 = vmul.f32 1.442695, %v7605_v18  ;;  %v7610_v11 = vmul.f32 1.442695, %v7604_v23 }
0x49ce   :  { %9717 = vpow2.f32 %v7612_v25 }
0x49cf   :  { %9719 = vpow2.f32 %v7610_v11 }
0x49d7   :  { %v9714_v16 = vpop.eup %9713 }
0x49d8   :  { %v9716_v39 = vpop.eup %9715  ;;  %v7617_v42 = vsel %vm492_vm4, %v9714_v16, 0.0 }
0x49d9   :  { %7618 = vadd.xlane.f32.xlu0 %v7617_v42  ;;  %v7614_v48 = vsel %vm492_vm4, %v9716_v39, 0.0 }
0x49da   :  { %7615 = vadd.xlane.f32.xlu1 %v7614_v48 }
0x49db   :  { %v9718_v21 = vpop.eup %9717 }
0x49dc   :  { %v9720_v4 = vpop.eup %9719  ;;  %v7623_v32 = vsel %vm492_vm4, %v9718_v21, 0.0 }
0x49dd   :  { %7624 = vadd.xlane.f32.xlu0 %v7623_v32  ;;  %v7620_v10 = vsel %vm492_vm4, %v9720_v4, 0.0 }
0x49de   :  { %7621 = vadd.xlane.f32.xlu1 %v7620_v10 }
0x4a62   :  { %v7619_v17 = vpop.xlane.xlu0 %7618 }
0x4a63   :  { %9721 = vlog2.f32 %v7619_v17  ;;  %v7616_v54 = vpop.xlane.xlu1 %7615 }
0x4a64   :  { %9723 = vlog2.f32 %v7616_v54 }
0x4a66   :  { %v7625_v0 = vpop.xlane.xlu0 %7624 }
0x4a67   :  { %9725 = vlog2.f32 %v7625_v0  ;;  %v7622_v27 = vpop.xlane.xlu1 %7621 }
0x4a68   :  { %9727 = vlog2.f32 %v7622_v27 }
0x4a70   :  { %v9722_v33 = vpop.eup %9721 }
0x4a71   :  { %v9724_v19 = vpop.eup %9723  ;;  %v7629_v51 = vmul.f32 0.6931472, %v9722_v33 }
0x4a72   :  { %v7627_v31 = vmul.f32 0.6931472, %v9724_v19 }
0x4a73   :  { %v7635_v30 = vadd.f32 %v7629_v51, %v7595_v59 }
0x4a74   :  { %v9726_v47 = vpop.eup %9725  ;;  %v7634_v13 = vadd.f32 %v7627_v31, %v7592_v26 }
0x4a75   :  { %v9728_v14 = vpop.eup %9727  ;;  %v11717_v22 = vsub.f32 %v7587_v29, %v7635_v30  ;;  %v7633_v1 = vmul.f32 0.6931472, %v9726_v47 }
0x4a76   :  { %v11719_v63 = vsub.f32 %v7586_v15, %v7634_v13  ;;  %v7631_v28 = vmul.f32 0.6931472, %v9728_v14 }
0x4a77   :  { %v7643_v3 = vsel %vm492_vm4, %v11717_v22, -inf  ;;  %v7637_v40 = vadd.f32 %v7633_v1, %v7601_v53 }
0x4a78   :  { %v7642_v24 = vsel %vm492_vm4, %v11719_v63, -inf  ;;  %v7636_v50 = vadd.f32 %v7631_v28, %v7598_v12 }
0x4a79   :  { %v7644_v52 = vmax.f32 %v7642_v24, %v7643_v3  ;;  %v11725_v41 = vsub.f32 %v7589_v45, %v7637_v40 }
0x4a7a   :  { %v11727_v44 = vsub.f32 %v7588_v36, %v7636_v50 }
0x4a7b   :  { %v7645_v34 = vrot.slane %v7644_v52, 4  ;;  %v7652_v56 = vsel %vm492_vm4, %v11725_v41, -inf }
0x4a7c   :  { %v7651_v2 = vsel %vm492_vm4, %v11727_v44, -inf }
0x4a7d   :  { %v7646_v9 = vmax.f32 %v7644_v52, %v7645_v34  ;;  %v7653_v20 = vmax.f32 %v7651_v2, %v7652_v56 }
0x4a7f   :  { %v7647_v6 = vrot.slane %v7646_v9, 2  ;;  %v7654_v35 = vrot.slane %v7653_v20, 4 }
0x4a81   :  { %v7648_v29 = vmax.f32 %v7646_v9, %v7647_v6  ;;  %v7655_v15 = vmax.f32 %v7653_v20, %v7654_v35 }
0x4a83   :  { %v7649_v5 = vrot.slane %v7648_v29, 1  ;;  %v7656_v58 = vrot.slane %v7655_v15, 2 }
0x4a85   :  { %v7650_v46 = vmax.f32 %v7648_v29, %v7649_v5  ;;  %v7657_v7 = vmax.f32 %v7655_v15, %v7656_v58 }
0x4a87   :  { %v7660_v45 = vsub.f32 %v11719_v63, %v7650_v46  ;;  %v7661_v36 = vsub.f32 %v11717_v22, %v7650_v46  ;;  %v7658_v38 = vrot.slane %v7657_v7, 1 }
0x4a89   :  { %v7664_v49 = vmul.f32 1.442695, %v7660_v45  ;;  %v7666_v59 = vmul.f32 1.442695, %v7661_v36  ;;  %v7659_v26 = vmax.f32 %v7657_v7, %v7658_v38 }
0x4a8b   :  { %9729 = vpow2.f32 %v7664_v49  ;;  %v7662_v37 = vsub.f32 %v11727_v44, %v7659_v26  ;;  %v7663_v43 = vsub.f32 %v11725_v41, %v7659_v26 }
0x4a8c   :  { %9731 = vpow2.f32 %v7666_v59 }
0x4a8d   :  { %v7668_v62 = vmul.f32 1.442695, %v7662_v37  ;;  %v7670_v61 = vmul.f32 1.442695, %v7663_v43 }
0x4a8f   :  { %9733 = vpow2.f32 %v7668_v62 }
0x4a90   :  { %9735 = vpow2.f32 %v7670_v61  ;;  %v7822_v61 = vlaneseq }
0x4a98   :  { %v9730_v53 = vpop.eup %9729 }
0x4a99   :  { %v9732_v12 = vpop.eup %9731  ;;  %v7672_v18 = vsel %vm492_vm4, %v9730_v53, 0.0  ;;  %v7823_v53 = vand.u32 127, %v7822_v61 }
0x4a9a   :  { %v7673_v23 = vsel %vm492_vm4, %v9732_v12, 0.0 }
0x4a9b   :  { %v7674_v25 = vadd.f32 %v7673_v23, %v7672_v18  ;;  %v7828_v12 = vadd.s32 4294967288, %v7823_v53  ;;  %v7825_v23 = vshrl.u32 %v7822_v61, 7 }
0x4a9c   :  { %v9734_v11 = vpop.eup %9733 }
0x4a9d   :  { %v9736_v16 = vpop.eup %9735  ;;  %v7675_v39 = vrot.slane %v7674_v25, 4  ;;  %v7681_v42 = vsel %vm492_vm4, %v9734_v11, 0.0 }
0x4a9e   :  { %v7682_v48 = vsel %vm492_vm4, %v9736_v16, 0.0  ;;  %v7826_v16 = vsub.s32 %v7823_v53, %v7825_v23 }
0x4a9f   :  { %v7676_v21 = vadd.f32 %v7675_v39, %v7674_v25  ;;  %v7683_v4 = vadd.f32 %v7682_v48, %v7681_v42  ;;  %v7831_v25 = vsub.s32 %v7828_v12, %v7825_v23 }
0x4aa1   :  { %v7677_v32 = vrot.slane %v7676_v21, 2  ;;  %v7684_v10 = vrot.slane %v7683_v4, 4 }
0x4aa3   :  { %v7678_v17 = vadd.f32 %v7677_v32, %v7676_v21  ;;  %v7685_v54 = vadd.f32 %v7684_v10, %v7683_v4 }
0x4aa5   :  { %v7679_v0 = vrot.slane %v7678_v17, 1  ;;  %v7686_v27 = vrot.slane %v7685_v54, 2 }
0x4aa7   :  { %v7680_v33 = vadd.f32 %v7679_v0, %v7678_v17  ;;  %v7687_v19 = vadd.f32 %v7686_v27, %v7685_v54 }
0x4aa9   :  { %9737 = vlog2.f32 %v7680_v33  ;;  %v7688_v51 = vrot.slane %v7687_v19, 1 }
0x4aab   :  { %v7689_v31 = vadd.f32 %v7688_v51, %v7687_v19 }
0x4aad   :  { %9739 = vlog2.f32 %v7689_v31 }
0x4ab6   :  { %v9738_v30 = vpop.eup %9737 }
0x4ab7   :  { %v7691_v47 = vmul.f32 0.6931472, %v9738_v30 }
0x4ab9   :  { %v7694_v13 = vadd.f32 %v7691_v47, %v7650_v46 }
0x4aba   :  { %v9740_v14 = vpop.eup %9739 }
0x4abb   :  { %v7696_v1 = vsub.f32 %v11719_v63, %v7694_v13  ;;  %v7697_v28 = vsub.f32 %v11717_v22, %v7694_v13  ;;  %v7693_v3 = vmul.f32 0.6931472, %v9740_v14 }
0x4abd   :  { %v7700_v40 = vmul.f32 1.442695, %v7696_v1  ;;  %v7702_v24 = vmul.f32 1.442695, %v7697_v28  ;;  %v7695_v50 = vadd.f32 %v7693_v3, %v7659_v26 }
0x4abf   :  { %9741 = vpow2.f32 %v7700_v40  ;;  %v7698_v52 = vsub.f32 %v11727_v44, %v7695_v50  ;;  %v7699_v34 = vsub.f32 %v11725_v41, %v7695_v50 }
0x4ac0   :  { %9743 = vpow2.f32 %v7702_v24 }
0x4ac1   :  { %v7704_v56 = vmul.f32 1.442695, %v7698_v52  ;;  %v7706_v2 = vmul.f32 1.442695, %v7699_v34 }
0x4ac3   :  { %9745 = vpow2.f32 %v7704_v56 }
0x4ac4   :  { %9747 = vpow2.f32 %v7706_v2 }
0x4acc   :  { %v9742_v9 = vpop.eup %9741 }
0x4acd   :  { %v9744_v20 = vpop.eup %9743 }
0x4ace   :  { %v7708_v6 = vpack.c.bf16 %v9744_v20, %v9742_v9 }
0x4ad0   :  { %v9746_v63 = vpop.eup %9745  ;;  %9043 = vmatmul.mubr.msk.bf16.vlgmr.msra.gmra.mxu1 %vm492_vm4, %v7708_v6 }
0x4ad1   :  { %v9748_v22 = vpop.eup %9747 }
0x4ad2   :  { %v7709_v35 = vpack.c.bf16 %v9748_v22, %v9746_v63 }
0x4ad4   :  { %9049 = vmatmul.mubr.msk.bf16.vlgmr.msra.gmra.mxu0 %vm492_vm4, %v7709_v35 }
0x4b90   :  { %v7747_v29 = vpop.f32.mrf.mxu1 }
0x4b91   :  { %v7798_v44 = vsub.f32 %v11330_v55, %v7747_v29 }
0x4b92   :  { %v9044_v15 = vpop.f32.mrf.mxu1 }
0x4b93   :  { %v7802_v41 = vmax.f32 %v7798_v44, 0.0 }
0x4b94   :  { %v7750_v5 = vpop.f32.mrf.mxu1  ;;  %v7791_v58 = vpop.f32.mrf.mxu0 }
0x4b95   :  { %v7799_v46 = vsub.f32 %v11334_v60, %v7750_v5  ;;  %v7800_v7 = vsub.f32 %v11328_v8, %v7791_v58  ;;  %v7806_v45 = vsel %vm492_vm4, %v7802_v41, 0.0 }
0x4b96   :  { %v9050_v36 = vpop.f32.mrf.mxu0  ;;  %7807 = vadd.xlane.f32.xlu1 %v7806_v45  ;;  %v9045_v38 = vpop.f32.mrf.mxu1 }
0x4b97   :  { %v7803_v49 = vmax.f32 %v7799_v46, 0.0  ;;  %v7804_v59 = vmax.f32 %v7800_v7, 0.0 }
0x4b98   :  { %v7794_v26 = vpop.f32.mrf.mxu0 }
0x4b99   :  { %v7801_v37 = vsub.f32 %v11332_v57, %v7794_v26  ;;  %v7812_v55 = vsel %vm492_vm4, %v7804_v59, 0.0  ;;  %v7809_v43 = vsel %vm492_vm4, %v7803_v49, 0.0 }
0x4b9a   :  { %v9051_v62 = vpop.f32.mrf.mxu0  ;;  %7813 = vadd.xlane.f32.xlu1 %v7812_v55  ;;  %7810 = vadd.xlane.f32.xlu0 %v7809_v43 }
0x4b9b   :  { %v7805_v60 = vmax.f32 %v7801_v37, 0.0 }
0x4b9d   :  { %v7815_v8 = vsel %vm492_vm4, %v7805_v60, 0.0 }
0x4b9e   :  { %7816 = vadd.xlane.f32.xlu0 %v7815_v8 }
0x4c1f   :  { %v7808_v18 = vpop.xlane.xlu1 %7807 }
0x4c20   :  { %v7827_v48 = vrot.slane %v7808_v18, %v7826_v16 }
0x4c23   :  { %v7811_v11 = vpop.xlane.xlu0 %7810  ;;  %v7814_v57 = vpop.xlane.xlu1 %7813 }
0x4c24   :  { %v7832_v39 = vrot.slane %v7811_v11, %v7831_v25  ;;  %v7838_v21 = vrot.slane %v7814_v57, %v7826_v16 }
0x4c26   :  { %v7834_v32 = vsel %vm7833_vm10, %v7832_v39, %v7827_v48 }
0x4c27   :  { %v7817_v42 = vpop.xlane.xlu0 %7816 }
0x4c28   :  { %v7842_v4 = vrot.slane %v7817_v42, %v7831_v25 }
0x4c2a   :  { %v7843_v10 = vsel %vm7833_vm10, %v7842_v4, %v7838_v21 }
0x4c2b   :  { %v7845_v17 = vsel %vm7844_vm11, %v7843_v10, %v7834_v32 }
0x4c2c   :  { %v7848_v54 = vsel %vm7847_vm12, %v7845_v17, 0.0 }
0x4c2d   :  { %7849 = vadd.xlane.f32.xlu1 %v7848_v54 }
0x4cb6   :  { %v7850_v0 = vpop.xlane.xlu1 %7849 }
0x4cb7   :  { %v7851_v27 = vsub.f32 0.0, %v7850_v0 }
0x4cb9   :  { %7853 = vst.msk [vmem:[%s7892_s6] sm:$0x3] %vm7852_vm13, %v7851_v27 }

</bundles_post_ra>
